<compile_context>
chip_gen: v6e
topology: v6e:2x2x1
jax: 0.10.0
libtpu: 0.0.40
codegen_flags: <defaults>
</compile_context>

<pallas_src>
import jax
import jax.numpy as jnp
from jax.experimental import pallas as pl
from jax.experimental.pallas import tpu as pltpu


def _round_up(x, m):
    return (x + m - 1) // m * m


# ---------------------------------------------------------------------------
# Fused conv-stage GEMM kernel:  y = relu(patches @ w + shift)
# (BN scale folded into w; shift = folded conv-bias / BN shift.)
# ---------------------------------------------------------------------------
def _conv_gemm_kernel(x_ref, w_ref, shift_ref, o_ref):
    acc = jnp.dot(x_ref[...], w_ref[...], preferred_element_type=jnp.float32)
    y = jnp.maximum(acc + shift_ref[...], 0.0)
    o_ref[...] = y.astype(o_ref.dtype)


def conv_gemm(x, w, shift, *, nsplit=1, out_dtype=jnp.bfloat16):
    """x: (M, K) bf16 patches, w: (K, N) bf16, shift: (1, N) f32.

    K and N stay at their natural (unpadded) sizes; the BlockSpec dims rely on
    the full-extent escape hatch of the (8, 128) rule.  The M axis is split
    into `nsplit` row blocks on a parallel grid axis (ragged tail masked by
    Pallas)."""
    M, K = x.shape
    _, N = w.shape
    tm = _round_up(pl.cdiv(M, nsplit), 8) if nsplit > 1 else M
    grid = pl.cdiv(M, tm)
    return pl.pallas_call(
        _conv_gemm_kernel,
        out_shape=jax.ShapeDtypeStruct((M, N), out_dtype),
        grid=(grid,),
        in_specs=[
            pl.BlockSpec((tm, K), lambda i: (i, 0)),
            pl.BlockSpec((K, N), lambda i: (0, 0)),
            pl.BlockSpec((1, N), lambda i: (0, 0)),
        ],
        out_specs=pl.BlockSpec((tm, N), lambda i: (i, 0)),
        compiler_params=pltpu.CompilerParams(dimension_semantics=("parallel",)),
    )(x, w, shift)


# ---------------------------------------------------------------------------
# Fused tail kernel:  q = relu(x @ W1 + b1) @ W2 + b2   (one launch, M = batch)
# ---------------------------------------------------------------------------
def _tail_kernel(x_ref, w1_ref, b1_ref, w2_ref, b2_ref, o_ref):
    h = jnp.dot(x_ref[...], w1_ref[...], preferred_element_type=jnp.float32)
    h = jnp.maximum(h + b1_ref[...], 0.0)
    q = jnp.dot(h.astype(w2_ref.dtype), w2_ref[...],
                preferred_element_type=jnp.float32)
    o_ref[...] = q + b2_ref[...]


def fused_tail(x, w1, b1, w2, b2):
    B, Kt = x.shape
    _, H = w1.shape
    _, Nq = w2.shape
    return pl.pallas_call(
        _tail_kernel,
        out_shape=jax.ShapeDtypeStruct((B, Nq), jnp.float32),
        grid=(1,),
        in_specs=[
            pl.BlockSpec((B, Kt), lambda i: (0, 0)),
            pl.BlockSpec((Kt, H), lambda i: (0, 0)),
            pl.BlockSpec((1, H), lambda i: (0, 0)),
            pl.BlockSpec((H, Nq), lambda i: (0, 0)),
            pl.BlockSpec((1, Nq), lambda i: (0, 0)),
        ],
        out_specs=pl.BlockSpec((B, Nq), lambda i: (0, 0)),
    )(x, w1, b1, w2, b2)


# ---------------------------------------------------------------------------
# Slim im2col glue (XLA): one concat of strided slices + one reshape.
# K ordering is (kh, kw, cin) to match the prepared weights.
# ---------------------------------------------------------------------------
def _im2col_nhwc(x, k, s):
    B, H, W, C = x.shape
    Ho = (H - k) // s + 1
    Wo = (W - k) // s + 1
    slabs = [x[:, kh:kh + s * (Ho - 1) + 1:s, kw:kw + s * (Wo - 1) + 1:s, :]
             for kh in range(k) for kw in range(k)]
    patches = jnp.concatenate(slabs, axis=-1)        # (B, Ho, Wo, k*k*C)
    return patches.reshape(B * Ho * Wo, k * k * C), Ho, Wo


# ---------------------------------------------------------------------------
# Parameters (PyTorch layout) + one-time preparation (fold / permute / cast)
# ---------------------------------------------------------------------------
def init_params(key, action_dim, hidden_dim=500):
    ks = iter(jax.random.split(key, 32))

    def conv_p(cin, cout, k, s):
        return dict(
            w=0.05 * jax.random.normal(next(ks), (cout, cin, k, k), jnp.float32),
            b=0.05 * jax.random.normal(next(ks), (cout,), jnp.float32),
            gamma=1.0 + 0.05 * jax.random.normal(next(ks), (cout,), jnp.float32),
            beta=0.05 * jax.random.normal(next(ks), (cout,), jnp.float32),
            mean=0.05 * jax.random.normal(next(ks), (cout,), jnp.float32),
            var=1.0 + 0.1 * jnp.abs(jax.random.normal(next(ks), (cout,), jnp.float32)),
            k=k, s=s,
        )

    convs = [
        conv_p(3, 16, 5, 2),
        conv_p(16, 32, 5, 2),
        conv_p(32, 16, 5, 2),
        conv_p(16, 8, 3, 2),
    ]
    lin1 = dict(
        w=0.05 * jax.random.normal(next(ks), (hidden_dim, 288 + action_dim), jnp.float32),
        b=0.05 * jax.random.normal(next(ks), (hidden_dim,), jnp.float32),
    )
    lin2 = dict(
        w=0.05 * jax.random.normal(next(ks), (1, hidden_dim), jnp.float32),
        b=0.05 * jax.random.normal(next(ks), (1,), jnp.float32),
    )
    return dict(convs=convs, lin1=lin1, lin2=lin2)


def prepare_params(params, action_dim):
    """One-time fold / permute / transpose / cast of the raw PyTorch params."""
    eps = 1e-5
    nsplits = [2, 2, 2, 1]      # 2-way row split for the bigger stages (v7x dual TC)
    convs = []
    for p, nsplit in zip(params["convs"], nsplits):
        k, s = p["k"], p["s"]
        cout, cin = p["w"].shape[0], p["w"].shape[1]
        # torch (Cout, Cin, kh, kw) -> (kh, kw, Cin, Cout) -> (K, Cout)
        wmat = jnp.transpose(p["w"], (2, 3, 1, 0)).reshape(k * k * cin, cout)
        scale = p["gamma"] / jnp.sqrt(p["var"] + eps)
        shift = p["b"] * scale + p["beta"] - p["mean"] * scale
        wmat = wmat * scale[None, :]                 # fold BN scale into W
        convs.append(dict(w=wmat.astype(jnp.bfloat16),
                          shift=shift.reshape(1, cout).astype(jnp.float32),
                          k=k, s=s, cout=cout, nsplit=nsplit))

    hidden = params["lin1"]["w"].shape[0]
    ho, wo, cc = 6, 6, 8                             # module spec: 288 features
    feat_dim = ho * wo * cc

    # Permute linear1 feature columns so the NHWC-flattened conv features
    # (index h*48 + w*8 + c) hit the torch NCHW-flatten (c*36 + h*6 + w) weights.
    hi, wi, ci = jnp.meshgrid(jnp.arange(ho), jnp.arange(wo), jnp.arange(cc),
                              indexing="ij")
    perm = (ci * (ho * wo) + hi * wo + wi).reshape(-1)

    w1 = params["lin1"]["w"]                         # (hidden, 288 + A)
    w1_feat = w1[:, :feat_dim][:, perm]              # columns in NHWC order
    w1_t = jnp.concatenate([w1_feat, w1[:, feat_dim:]], axis=1).T  # (288+A, hidden)
    b1 = params["lin1"]["b"].reshape(1, hidden).astype(jnp.float32)
    w2_t = params["lin2"]["w"].T                     # (hidden, 1)
    b2 = params["lin2"]["b"].reshape(1, 1).astype(jnp.float32)

    return dict(convs=convs,
                w1=w1_t.astype(jnp.bfloat16), b1=b1,
                w2=w2_t.astype(jnp.bfloat16), b2=b2)


# ---------------------------------------------------------------------------
# Forward pass
# ---------------------------------------------------------------------------
def soft_q_network_2d(prepped, state_nchw, action):
    # NCHW -> NHWC once (tiny) with the single bf16 cast of the whole network.
    x = jnp.transpose(state_nchw, (0, 2, 3, 1)).astype(jnp.bfloat16)
    B = x.shape[0]

    for cp in prepped["convs"]:
        patches, Ho, Wo = _im2col_nhwc(x, cp["k"], cp["s"])
        y = conv_gemm(patches, cp["w"], cp["shift"], nsplit=cp["nsplit"])
        x = y.reshape(B, Ho, Wo, cp["cout"])          # packed NHWC bf16 activation

    feat = x.reshape(B, -1)                           # NHWC flatten -> (B, 288)
    x_tail = jnp.concatenate([feat, action.astype(jnp.bfloat16)], axis=1)
    q = fused_tail(x_tail, prepped["w1"], prepped["b1"],
                   prepped["w2"], prepped["b2"])
    return q                                          # (B, 1) float32


if __name__ == "__main__":
    key = jax.random.PRNGKey(0)
    pkey, skey, akey = jax.random.split(key, 3)

    action_dim = 4
    raw_params = init_params(pkey, action_dim, hidden_dim=500)
    params = prepare_params(raw_params, action_dim)

    # 128x128 RGB input -> conv spatial chain 62 -> 29 -> 13 -> 6, 8*6*6 = 288 feats
    state = jax.random.normal(skey, (2, 3, 128, 128), jnp.float32)   # NCHW like PyTorch
    action = jax.random.normal(akey, (2, action_dim), jnp.float32)

    fwd = jax.jit(lambda s, a: soft_q_network_2d(params, s, a))
    q = fwd(state, action)
    jax.block_until_ready(q)
    assert q.shape == (2, 1) and q.dtype == jnp.float32
    print("KERNEL_OK")
</pallas_src>

<mosaic_0001>
module attributes {stable_mosaic.version = 11 : i64} {
  func.func @_conv_gemm_kernel(%arg0: i32, %arg1: memref<3848x75xbf16, #tpu.memory_space<vmem>>, %arg2: memref<75x16xbf16, #tpu.memory_space<vmem>>, %arg3: memref<1x16xf32, #tpu.memory_space<vmem>>, %arg4: memref<3848x16xbf16, #tpu.memory_space<vmem>>) attributes {dimension_semantics = [#tpu.dimension_semantics<parallel>], iteration_bounds = array<i64: 2>, scalar_prefetch = 0 : i64, scratch_operands = 0 : i64, tpu.core_type = #tpu.core_type<tc>, window_params = [{transform_indices = @transform_0, window_bounds = array<i64: 3848, 75>}, {pipeline_mode = #tpu.pipeline_mode<synchronous>, transform_indices = @transform_1, window_bounds = array<i64: 75, 16>}, {pipeline_mode = #tpu.pipeline_mode<synchronous>, transform_indices = @transform_2, window_bounds = array<i64: 1, 16>}, {transform_indices = @transform_3, window_bounds = array<i64: 3848, 16>}]} {
    %c0 = arith.constant 0 : index
    %c0_0 = arith.constant 0 : index
    %0 = vector.load %arg1[%c0, %c0_0] : memref<3848x75xbf16, #tpu.memory_space<vmem>>, vector<3848x75xbf16>
    %c0_1 = arith.constant 0 : index
    %c0_2 = arith.constant 0 : index
    %1 = vector.load %arg2[%c0_1, %c0_2] : memref<75x16xbf16, #tpu.memory_space<vmem>>, vector<75x16xbf16>
    %cst = arith.constant dense<0.000000e+00> : vector<3848x16xf32>
    %2 = tpu.matmul %0, %1, %cst {dimension_numbers = #tpu.dot_dimension_numbers<[1], [0], [0], [1], [0, 0, 1, 1], [], []>} : vector<3848x75xbf16>, vector<75x16xbf16>, vector<3848x16xf32> -> vector<3848x16xf32>
    %c0_3 = arith.constant 0 : index
    %c0_4 = arith.constant 0 : index
    %3 = vector.load %arg3[%c0_3, %c0_4] : memref<1x16xf32, #tpu.memory_space<vmem>>, vector<1x16xf32>
    %4 = vector.broadcast %3 : vector<1x16xf32> to vector<3848x16xf32>
    %5 = arith.addf %2, %4 : vector<3848x16xf32>
    %cst_5 = arith.constant 0.000000e+00 : f32
    %6 = vector.broadcast %cst_5 : f32 to vector<3848x16xf32>
    %7 = arith.maximumf %5, %6 : vector<3848x16xf32>
    %8 = arith.truncf %7 : vector<3848x16xf32> to vector<3848x16xbf16>
    %c0_6 = arith.constant 0 : index
    %c0_7 = arith.constant 0 : index
    %9 = vector.load %arg4[%c0_6, %c0_7] : memref<3848x16xbf16, #tpu.memory_space<vmem>>, vector<3848x16xbf16>
    tpu.vector_store %arg4[%c0_6, %c0_7], %8 {strides = array<i32>} : memref<3848x16xbf16, #tpu.memory_space<vmem>>, vector<3848x16xbf16>,
    return
  }
  func.func @transform_0(%arg0: i32) -> (i32, i32) {
    %c0_i32 = arith.constant 0 : i32
    %c0_i32_0 = arith.constant 0 : i32
    return %arg0, %c0_i32 : i32, i32
  }
  func.func @transform_1(%arg0: i32) -> (i32, i32) {
    %c0_i32 = arith.constant 0 : i32
    %c0_i32_0 = arith.constant 0 : i32
    %c0_i32_1 = arith.constant 0 : i32
    return %c0_i32, %c0_i32_0 : i32, i32
  }
  func.func @transform_2(%arg0: i32) -> (i32, i32) {
    %c0_i32 = arith.constant 0 : i32
    %c0_i32_0 = arith.constant 0 : i32
    %c0_i32_1 = arith.constant 0 : i32
    return %c0_i32, %c0_i32_0 : i32, i32
  }
  func.func @transform_3(%arg0: i32) -> (i32, i32) {
    %c0_i32 = arith.constant 0 : i32
    %c0_i32_0 = arith.constant 0 : i32
    return %arg0, %c0_i32 : i32, i32
  }
}

module attributes {stable_mosaic.version = 11 : i64} {
  func.func @_conv_gemm_kernel(%arg0: i32, %arg1: memref<848x400xbf16, #tpu.memory_space<vmem>>, %arg2: memref<400x32xbf16, #tpu.memory_space<vmem>>, %arg3: memref<1x32xf32, #tpu.memory_space<vmem>>, %arg4: memref<848x32xbf16, #tpu.memory_space<vmem>>) attributes {dimension_semantics = [#tpu.dimension_semantics<parallel>], iteration_bounds = array<i64: 2>, scalar_prefetch = 0 : i64, scratch_operands = 0 : i64, tpu.core_type = #tpu.core_type<tc>, window_params = [{transform_indices = @transform_0, window_bounds = array<i64: 848, 400>}, {pipeline_mode = #tpu.pipeline_mode<synchronous>, transform_indices = @transform_1, window_bounds = array<i64: 400, 32>}, {pipeline_mode = #tpu.pipeline_mode<synchronous>, transform_indices = @transform_2, window_bounds = array<i64: 1, 32>}, {transform_indices = @transform_3, window_bounds = array<i64: 848, 32>}]} {
    %c0 = arith.constant 0 : index
    %c0_0 = arith.constant 0 : index
    %0 = vector.load %arg1[%c0, %c0_0] : memref<848x400xbf16, #tpu.memory_space<vmem>>, vector<848x400xbf16>
    %c0_1 = arith.constant 0 : index
    %c0_2 = arith.constant 0 : index
    %1 = vector.load %arg2[%c0_1, %c0_2] : memref<400x32xbf16, #tpu.memory_space<vmem>>, vector<400x32xbf16>
    %cst = arith.constant dense<0.000000e+00> : vector<848x32xf32>
    %2 = tpu.matmul %0, %1, %cst {dimension_numbers = #tpu.dot_dimension_numbers<[1], [0], [0], [1], [0, 0, 1, 1], [], []>} : vector<848x400xbf16>, vector<400x32xbf16>, vector<848x32xf32> -> vector<848x32xf32>
    %c0_3 = arith.constant 0 : index
    %c0_4 = arith.constant 0 : index
    %3 = vector.load %arg3[%c0_3, %c0_4] : memref<1x32xf32, #tpu.memory_space<vmem>>, vector<1x32xf32>
    %4 = vector.broadcast %3 : vector<1x32xf32> to vector<848x32xf32>
    %5 = arith.addf %2, %4 : vector<848x32xf32>
    %cst_5 = arith.constant 0.000000e+00 : f32
    %6 = vector.broadcast %cst_5 : f32 to vector<848x32xf32>
    %7 = arith.maximumf %5, %6 : vector<848x32xf32>
    %8 = arith.truncf %7 : vector<848x32xf32> to vector<848x32xbf16>
    %c0_6 = arith.constant 0 : index
    %c0_7 = arith.constant 0 : index
    %9 = vector.load %arg4[%c0_6, %c0_7] : memref<848x32xbf16, #tpu.memory_space<vmem>>, vector<848x32xbf16>
    tpu.vector_store %arg4[%c0_6, %c0_7], %8 {strides = array<i32>} : memref<848x32xbf16, #tpu.memory_space<vmem>>, vector<848x32xbf16>,
    return
  }
  func.func @transform_0(%arg0: i32) -> (i32, i32) {
    %c0_i32 = arith.constant 0 : i32
    %c0_i32_0 = arith.constant 0 : i32
    return %arg0, %c0_i32 : i32, i32
  }
  func.func @transform_1(%arg0: i32) -> (i32, i32) {
    %c0_i32 = arith.constant 0 : i32
    %c0_i32_0 = arith.constant 0 : i32
    %c0_i32_1 = arith.constant 0 : i32
    return %c0_i32, %c0_i32_0 : i32, i32
  }
  func.func @transform_2(%arg0: i32) -> (i32, i32) {
    %c0_i32 = arith.constant 0 : i32
    %c0_i32_0 = arith.constant 0 : i32
    %c0_i32_1 = arith.constant 0 : i32
    return %c0_i32, %c0_i32_0 : i32, i32
  }
  func.func @transform_3(%arg0: i32) -> (i32, i32) {
    %c0_i32 = arith.constant 0 : i32
    %c0_i32_0 = arith.constant 0 : i32
    return %arg0, %c0_i32 : i32, i32
  }
}

module attributes {stable_mosaic.version = 11 : i64} {
  func.func @_conv_gemm_kernel(%arg0: i32, %arg1: memref<176x800xbf16, #tpu.memory_space<vmem>>, %arg2: memref<800x16xbf16, #tpu.memory_space<vmem>>, %arg3: memref<1x16xf32, #tpu.memory_space<vmem>>, %arg4: memref<176x16xbf16, #tpu.memory_space<vmem>>) attributes {dimension_semantics = [#tpu.dimension_semantics<parallel>], iteration_bounds = array<i64: 2>, scalar_prefetch = 0 : i64, scratch_operands = 0 : i64, tpu.core_type = #tpu.core_type<tc>, window_params = [{transform_indices = @transform_0, window_bounds = array<i64: 176, 800>}, {pipeline_mode = #tpu.pipeline_mode<synchronous>, transform_indices = @transform_1, window_bounds = array<i64: 800, 16>}, {pipeline_mode = #tpu.pipeline_mode<synchronous>, transform_indices = @transform_2, window_bounds = array<i64: 1, 16>}, {transform_indices = @transform_3, window_bounds = array<i64: 176, 16>}]} {
    %c0 = arith.constant 0 : index
    %c0_0 = arith.constant 0 : index
    %0 = vector.load %arg1[%c0, %c0_0] : memref<176x800xbf16, #tpu.memory_space<vmem>>, vector<176x800xbf16>
    %c0_1 = arith.constant 0 : index
    %c0_2 = arith.constant 0 : index
    %1 = vector.load %arg2[%c0_1, %c0_2] : memref<800x16xbf16, #tpu.memory_space<vmem>>, vector<800x16xbf16>
    %cst = arith.constant dense<0.000000e+00> : vector<176x16xf32>
    %2 = tpu.matmul %0, %1, %cst {dimension_numbers = #tpu.dot_dimension_numbers<[1], [0], [0], [1], [0, 0, 1, 1], [], []>} : vector<176x800xbf16>, vector<800x16xbf16>, vector<176x16xf32> -> vector<176x16xf32>
    %c0_3 = arith.constant 0 : index
    %c0_4 = arith.constant 0 : index
    %3 = vector.load %arg3[%c0_3, %c0_4] : memref<1x16xf32, #tpu.memory_space<vmem>>, vector<1x16xf32>
    %4 = vector.broadcast %3 : vector<1x16xf32> to vector<176x16xf32>
    %5 = arith.addf %2, %4 : vector<176x16xf32>
    %cst_5 = arith.constant 0.000000e+00 : f32
    %6 = vector.broadcast %cst_5 : f32 to vector<176x16xf32>
    %7 = arith.maximumf %5, %6 : vector<176x16xf32>
    %8 = arith.truncf %7 : vector<176x16xf32> to vector<176x16xbf16>
    %c0_6 = arith.constant 0 : index
    %c0_7 = arith.constant 0 : index
    %9 = vector.load %arg4[%c0_6, %c0_7] : memref<176x16xbf16, #tpu.memory_space<vmem>>, vector<176x16xbf16>
    tpu.vector_store %arg4[%c0_6, %c0_7], %8 {strides = array<i32>} : memref<176x16xbf16, #tpu.memory_space<vmem>>, vector<176x16xbf16>,
    return
  }
  func.func @transform_0(%arg0: i32) -> (i32, i32) {
    %c0_i32 = arith.constant 0 : i32
    %c0_i32_0 = arith.constant 0 : i32
    return %arg0, %c0_i32 : i32, i32
  }
  func.func @transform_1(%arg0: i32) -> (i32, i32) {
    %c0_i32 = arith.constant 0 : i32
    %c0_i32_0 = arith.constant 0 : i32
    %c0_i32_1 = arith.constant 0 : i32
    return %c0_i32, %c0_i32_0 : i32, i32
  }
  func.func @transform_2(%arg0: i32) -> (i32, i32) {
    %c0_i32 = arith.constant 0 : i32
    %c0_i32_0 = arith.constant 0 : i32
    %c0_i32_1 = arith.constant 0 : i32
    return %c0_i32, %c0_i32_0 : i32, i32
  }
  func.func @transform_3(%arg0: i32) -> (i32, i32) {
    %c0_i32 = arith.constant 0 : i32
    %c0_i32_0 = arith.constant 0 : i32
    return %arg0, %c0_i32 : i32, i32
  }
}

module attributes {stable_mosaic.version = 11 : i64} {
  func.func @_conv_gemm_kernel(%arg0: i32, %arg1: memref<72x144xbf16, #tpu.memory_space<vmem>>, %arg2: memref<144x8xbf16, #tpu.memory_space<vmem>>, %arg3: memref<1x8xf32, #tpu.memory_space<vmem>>, %arg4: memref<72x8xbf16, #tpu.memory_space<vmem>>) attributes {dimension_semantics = [#tpu.dimension_semantics<parallel>], iteration_bounds = array<i64: 1>, scalar_prefetch = 0 : i64, scratch_operands = 0 : i64, tpu.core_type = #tpu.core_type<tc>, window_params = [{transform_indices = @transform_0, window_bounds = array<i64: 72, 144>}, {pipeline_mode = #tpu.pipeline_mode<synchronous>, transform_indices = @transform_1, window_bounds = array<i64: 144, 8>}, {pipeline_mode = #tpu.pipeline_mode<synchronous>, transform_indices = @transform_2, window_bounds = array<i64: 1, 8>}, {transform_indices = @transform_3, window_bounds = array<i64: 72, 8>}]} {
    %c0 = arith.constant 0 : index
    %c0_0 = arith.constant 0 : index
    %0 = vector.load %arg1[%c0, %c0_0] : memref<72x144xbf16, #tpu.memory_space<vmem>>, vector<72x144xbf16>
    %c0_1 = arith.constant 0 : index
    %c0_2 = arith.constant 0 : index
    %1 = vector.load %arg2[%c0_1, %c0_2] : memref<144x8xbf16, #tpu.memory_space<vmem>>, vector<144x8xbf16>
    %cst = arith.constant dense<0.000000e+00> : vector<72x8xf32>
    %2 = tpu.matmul %0, %1, %cst {dimension_numbers = #tpu.dot_dimension_numbers<[1], [0], [0], [1], [0, 0, 1, 1], [], []>} : vector<72x144xbf16>, vector<144x8xbf16>, vector<72x8xf32> -> vector<72x8xf32>
    %c0_3 = arith.constant 0 : index
    %c0_4 = arith.constant 0 : index
    %3 = vector.load %arg3[%c0_3, %c0_4] : memref<1x8xf32, #tpu.memory_space<vmem>>, vector<1x8xf32>
    %4 = vector.broadcast %3 : vector<1x8xf32> to vector<72x8xf32>
    %5 = arith.addf %2, %4 : vector<72x8xf32>
    %cst_5 = arith.constant 0.000000e+00 : f32
    %6 = vector.broadcast %cst_5 : f32 to vector<72x8xf32>
    %7 = arith.maximumf %5, %6 : vector<72x8xf32>
    %8 = arith.truncf %7 : vector<72x8xf32> to vector<72x8xbf16>
    %c0_6 = arith.constant 0 : index
    %c0_7 = arith.constant 0 : index
    %9 = vector.load %arg4[%c0_6, %c0_7] : memref<72x8xbf16, #tpu.memory_space<vmem>>, vector<72x8xbf16>
    tpu.vector_store %arg4[%c0_6, %c0_7], %8 {strides = array<i32>} : memref<72x8xbf16, #tpu.memory_space<vmem>>, vector<72x8xbf16>,
    return
  }
  func.func @transform_0(%arg0: i32) -> (i32, i32) {
    %c0_i32 = arith.constant 0 : i32
    %c0_i32_0 = arith.constant 0 : i32
    return %arg0, %c0_i32 : i32, i32
  }
  func.func @transform_1(%arg0: i32) -> (i32, i32) {
    %c0_i32 = arith.constant 0 : i32
    %c0_i32_0 = arith.constant 0 : i32
    %c0_i32_1 = arith.constant 0 : i32
    return %c0_i32, %c0_i32_0 : i32, i32
  }
  func.func @transform_2(%arg0: i32) -> (i32, i32) {
    %c0_i32 = arith.constant 0 : i32
    %c0_i32_0 = arith.constant 0 : i32
    %c0_i32_1 = arith.constant 0 : i32
    return %c0_i32, %c0_i32_0 : i32, i32
  }
  func.func @transform_3(%arg0: i32) -> (i32, i32) {
    %c0_i32 = arith.constant 0 : i32
    %c0_i32_0 = arith.constant 0 : i32
    return %arg0, %c0_i32 : i32, i32
  }
}

module attributes {stable_mosaic.version = 11 : i64} {
  func.func @_tail_kernel(%arg0: i32, %arg1: memref<2x292xbf16, #tpu.memory_space<vmem>>, %arg2: memref<292x500xbf16, #tpu.memory_space<vmem>>, %arg3: memref<1x500xf32, #tpu.memory_space<vmem>>, %arg4: memref<500x1xbf16, #tpu.memory_space<vmem>>, %arg5: memref<1x1xf32, #tpu.memory_space<vmem>>, %arg6: memref<2x1xf32, #tpu.memory_space<vmem>>) attributes {dimension_semantics = [#tpu.dimension_semantics<arbitrary>], iteration_bounds = array<i64: 1>, scalar_prefetch = 0 : i64, scratch_operands = 0 : i64, tpu.core_type = #tpu.core_type<tc>, window_params = [{pipeline_mode = #tpu.pipeline_mode<synchronous>, transform_indices = @transform_0, window_bounds = array<i64: 2, 292>}, {pipeline_mode = #tpu.pipeline_mode<synchronous>, transform_indices = @transform_1, window_bounds = array<i64: 292, 500>}, {pipeline_mode = #tpu.pipeline_mode<synchronous>, transform_indices = @transform_2, window_bounds = array<i64: 1, 500>}, {pipeline_mode = #tpu.pipeline_mode<synchronous>, transform_indices = @transform_3, window_bounds = array<i64: 500, 1>}, {pipeline_mode = #tpu.pipeline_mode<synchronous>, transform_indices = @transform_4, window_bounds = array<i64: 1, 1>}, {pipeline_mode = #tpu.pipeline_mode<synchronous>, transform_indices = @transform_5, window_bounds = array<i64: 2, 1>}]} {
    %c0 = arith.constant 0 : index
    %c0_0 = arith.constant 0 : index
    %0 = vector.load %arg1[%c0, %c0_0] : memref<2x292xbf16, #tpu.memory_space<vmem>>, vector<2x292xbf16>
    %c0_1 = arith.constant 0 : index
    %c0_2 = arith.constant 0 : index
    %1 = vector.load %arg2[%c0_1, %c0_2] : memref<292x500xbf16, #tpu.memory_space<vmem>>, vector<292x500xbf16>
    %cst = arith.constant dense<0.000000e+00> : vector<2x500xf32>
    %2 = tpu.matmul %0, %1, %cst {dimension_numbers = #tpu.dot_dimension_numbers<[1], [0], [0], [1], [0, 0, 1, 1], [], []>} : vector<2x292xbf16>, vector<292x500xbf16>, vector<2x500xf32> -> vector<2x500xf32>
    %c0_3 = arith.constant 0 : index
    %c0_4 = arith.constant 0 : index
    %3 = vector.load %arg3[%c0_3, %c0_4] : memref<1x500xf32, #tpu.memory_space<vmem>>, vector<1x500xf32>
    %4 = vector.broadcast %3 : vector<1x500xf32> to vector<2x500xf32>
    %5 = arith.addf %2, %4 : vector<2x500xf32>
    %cst_5 = arith.constant 0.000000e+00 : f32
    %6 = vector.broadcast %cst_5 : f32 to vector<2x500xf32>
    %7 = arith.maximumf %5, %6 : vector<2x500xf32>
    %8 = arith.truncf %7 : vector<2x500xf32> to vector<2x500xbf16>
    %c0_6 = arith.constant 0 : index
    %c0_7 = arith.constant 0 : index
    %9 = vector.load %arg4[%c0_6, %c0_7] : memref<500x1xbf16, #tpu.memory_space<vmem>>, vector<500x1xbf16>
    %cst_8 = arith.constant dense<0.000000e+00> : vector<2x1xf32>
    %10 = tpu.matmul %8, %9, %cst_8 {dimension_numbers = #tpu.dot_dimension_numbers<[1], [0], [0], [1], [0, 0, 1, 1], [], []>} : vector<2x500xbf16>, vector<500x1xbf16>, vector<2x1xf32> -> vector<2x1xf32>
    %c0_9 = arith.constant 0 : index
    %c0_10 = arith.constant 0 : index
    %11 = vector.load %arg5[%c0_9, %c0_10] : memref<1x1xf32, #tpu.memory_space<vmem>>, vector<1x1xf32>
    %12 = vector.broadcast %11 : vector<1x1xf32> to vector<2x1xf32>
    %13 = arith.addf %10, %12 : vector<2x1xf32>
    %c0_11 = arith.constant 0 : index
    %c0_12 = arith.constant 0 : index
    %14 = vector.load %arg6[%c0_11, %c0_12] : memref<2x1xf32, #tpu.memory_space<vmem>>, vector<2x1xf32>
    tpu.vector_store %arg6[%c0_11, %c0_12], %13 {strides = array<i32>} : memref<2x1xf32, #tpu.memory_space<vmem>>, vector<2x1xf32>,
    return
  }
  func.func @transform_0(%arg0: i32) -> (i32, i32) {
    %c0_i32 = arith.constant 0 : i32
    %c0_i32_0 = arith.constant 0 : i32
    %c0_i32_1 = arith.constant 0 : i32
    return %c0_i32, %c0_i32_0 : i32, i32
  }
  func.func @transform_1(%arg0: i32) -> (i32, i32) {
    %c0_i32 = arith.constant 0 : i32
    %c0_i32_0 = arith.constant 0 : i32
    %c0_i32_1 = arith.constant 0 : i32
    return %c0_i32, %c0_i32_0 : i32, i32
  }
  func.func @transform_2(%arg0: i32) -> (i32, i32) {
    %c0_i32 = arith.constant 0 : i32
    %c0_i32_0 = arith.constant 0 : i32
    %c0_i32_1 = arith.constant 0 : i32
    return %c0_i32, %c0_i32_0 : i32, i32
  }
  func.func @transform_3(%arg0: i32) -> (i32, i32) {
    %c0_i32 = arith.constant 0 : i32
    %c0_i32_0 = arith.constant 0 : i32
    %c0_i32_1 = arith.constant 0 : i32
    return %c0_i32, %c0_i32_0 : i32, i32
  }
  func.func @transform_4(%arg0: i32) -> (i32, i32) {
    %c0_i32 = arith.constant 0 : i32
    %c0_i32_0 = arith.constant 0 : i32
    %c0_i32_1 = arith.constant 0 : i32
    return %c0_i32, %c0_i32_0 : i32, i32
  }
  func.func @transform_5(%arg0: i32) -> (i32, i32) {
    %c0_i32 = arith.constant 0 : i32
    %c0_i32_0 = arith.constant 0 : i32
    %c0_i32_1 = arith.constant 0 : i32
    return %c0_i32, %c0_i32_0 : i32, i32
  }
}

</mosaic_0001>

<bundles_post_ra>
// kernel: _lambda_.5
= control target key start
LH: loop header
LB: loop body
LE: loop exit
PB: predicated region body
PF: predicated region fallthrough
CT: control target
= control target key end

     0   :  { %s11128_s12 = smov 0   ;;  %s11130_s13 = smov 0   ;;  %s13836_s0 = inlined_call_operand.vmem [shape: bf16[7688,75], index: 0, kind: input, shape index: {}]   ;;  %s13837_s1 = inlined_call_operand.vmem [shape: bf16[75,16], index: 1, kind: input, shape index: {}]   ;;  %s13838_s2 = inlined_call_operand.vmem [shape: f32[1,16], index: 2, kind: input, shape index: {}]   ;;  %s13839_s3 = inlined_call_operand.vmem [shape: bf16[7688,16], index: 3, kind: output, shape index: {}]  }
   0x1   :  { %s11132_s14 = smov 0  }
   0x2 LB: > { %s11141_s15 = sadd.s32 4294967295, %s11071_s14   ;;  %s11143_s16 = sadd.s32 1, %s11071_s14   ;;  %s11071_s14 = sphi %s11132_s14, %s13846_s14   ;;  %s11067_s13 = sphi %s11130_s13, %s13845_s13   ;;  %s11063_s12 = sphi %s11128_s12, %s13844_s12  }
   0x3   : > { %s85_s17 = ssub.s32 %s11071_s14, %s11143_s16  ;;  %s88_s18 = sadd.s32 1, %s11067_s13 }
   0x4   : > { %p86_p0 = scmp.eq.s32.totalorder %s85_s17, 0  ;;  %p98_p1 = scmp.ne.s32.totalorder %s11067_s13, %s11063_s12 }
   0x5   : > { %p99_p2 = scmp.eq.s32.totalorder %s11141_s15, 1  ;;  %p7973_p3 = scmp.ge.s32.totalorder %s11071_s14, 1 }
   0x6   : > { %s11151_s19 = scalar_select %p86_p0, %s11067_s13, %s88_s18  }
   0x7   : > { %p11153_p4 = por %p99_p2, %p98_p1  ;;  %p146_p5 = scmp.lt.s32.totalorder %s11071_s14, 3 }
   0x9   : > { %p147_p6 = pnand %p7973_p3, %p146_p5 }
   0xa   : > { %s11165_s23 = smul.u32 (!%p147_p6), 481, %s11141_s15  ;;  %s170_s10 = sand.u32 (!%p147_p6), 1, %s11063_s12  }
   0xb   : > { %150 = sbr.rel (%p147_p6) target bundleno = 1285 (0x505), region = 32 }
   0xc   : > { %p178_p7 = scmp.lt.s32.totalorder (!%p147_p6), %s11165_s23, 960  ;;  %s10673_s17 = smul.u32 (!%p147_p6), 1924, %s170_s10 }
   0xe   : > { %s11408_s12 = scalar_lea.vmem (!%p147_p6), [#allocation2], %s10673_s17  }
  0x10   : > { %vm2647_vm0 = vcmask 1044480   ;;  %v11105_v0 = vmov 0.0   ;;  %v10765_v1 = vld [vmem:[%s13837_s1 + $0x20] sm:$0x3f]   ;;  %vm2648_vm1 = vcmask 1045504   ;;  %v11106_v2 = vmov 65535  }
  0x11   : > { %9689 = vmatprep.subr.bf16.mxu0 %v11105_v0  ;;  %10663 = vmatprep.subr.bf16.mxu1 %v11105_v0  ;;  %v2649_v3 = vsel %vm2647_vm0, 4294967295, %v11106_v2  ;;  %vm11107_vm2 = vmmov 0   ;;  %v10766_v6 = vld [vmem:[%s13837_s1 + $0x18] sm:$0xff]   ;;  %s179_s26 = scalar_select %p178_p7, %s11165_s23, 960  ;;  %v10767_v7 = vld [vmem:[%s13837_s1 + $0x10] sm:$0xff]   ;;  %v10768_v8 = vld [vmem:[%s13837_s1 + $0x8] sm:$0xff]  }
  0x12   : > { %v2650_v4 = vsel %vm2648_vm1, %v2649_v3, 0  ;;  %9699 = vmatprep.mubr.msk.bf16.mxu0 %vm11107_vm2, %v11105_v0  ;;  %10183 = vmatprep.mubr.msk.bf16.mxu1 %vm11107_vm2, %v11105_v0  ;;  %v10769_v9 = vld [vmem:[%s13837_s1] sm:$0xff]   ;;  %vm1923_vm3 = vcmask 613376   ;;  %vm7020_vm4 = vcmask 125952   ;;  %s7510_s6 = ssub.s32 (%p11153_p4), 961, %s11165_s23  ;;  %s9440_s7 = smul.u32 (%p11153_p4), 1924, %s11141_s15 }
  0x13   : > { %v2652_v5 = vand.u32 %v10765_v1, %v2650_v4  ;;  %s7974_s29 = sshll.u32 %s179_s26, 2  ;;  %v11394_v60 = vld [vmem:[%s13838_s2] ss:$0 sm:$0xff]  ;;  %p7511_p8 = scmp.lt.s32.totalorder (%p11153_p4), %s7510_s6, 481 }
  0x14   : > { %s11184_s5 = scalar_lea.vmem %s13836_s0, %s7974_s29  ;;  %s13644_s10 = scalar_lea.vmem (%p11153_p4), %s13839_s3, %s9440_s7  }
  0x15   : > { %9690 = vmatpush3.bf16.msra.mxu0 %v2652_v5  ;;  %10668 = vmatpush3.bf16.msra.mxu1 %v2652_v5  ;;  %v10770_v10 = vld [vmem:[%s11184_s5] sm:$0xff]   ;;  %v10771_v11 = vld [vmem:[%s11184_s5 + $0x3c8] sm:$0xff]   ;;  %v10773_v13 = vld [vmem:[%s11184_s5 + $0x3d0] sm:$0xff]  }
  0x16   : > { %9691 = vmatprep.subr.bf16.mxu0 %v11105_v0  ;;  %10664 = vmatprep.subr.bf16.mxu1 %v11105_v0  ;;  %v10772_v12 = vld [vmem:[%s11184_s5 + $0x8] sm:$0xff]   ;;  %v10774_v14 = vld [vmem:[%s11184_s5 + $0x10] sm:$0xff]   ;;  %v10775_v15 = vld [vmem:[%s11184_s5 + $0x3d8] sm:$0xff]  }
  0x17   : > { %v10776_v16 = vld [vmem:[%s11184_s5 + $0x18] sm:$0xff]   ;;  %v10777_v17 = vld [vmem:[%s11184_s5 + $0x3e0] sm:$0xff]   ;;  %v10779_v19 = vld [vmem:[%s11184_s5 + $0x3e8] sm:$0xff]  }
  0x18   : > { %v10778_v18 = vld [vmem:[%s11184_s5 + $0x20] sm:$0xff]   ;;  %v10780_v20 = vld [vmem:[%s11184_s5 + $0x28] sm:$0xff]   ;;  %v10781_v21 = vld [vmem:[%s11184_s5 + $0x3f0] sm:$0xff]  }
  0x19   : > { %9692 = vmatpush3.bf16.msra.mxu0 %v10766_v6  ;;  %10669 = vmatpush3.bf16.msra.mxu1 %v10766_v6  ;;  %v10782_v22 = vld [vmem:[%s11184_s5 + $0x30] sm:$0xff]   ;;  %v10783_v23 = vld [vmem:[%s11184_s5 + $0x3f8] sm:$0xff]   ;;  %v10785_v25 = vld [vmem:[%s11184_s5 + $0x400] sm:$0xff]  }
  0x1a   : > { %9693 = vmatprep.subr.bf16.mxu0 %v11105_v0  ;;  %10665 = vmatprep.subr.bf16.mxu1 %v11105_v0  ;;  %v10784_v24 = vld [vmem:[%s11184_s5 + $0x38] sm:$0xff]   ;;  %v10786_v26 = vld [vmem:[%s11184_s5 + $0x40] sm:$0xff]   ;;  %v10787_v27 = vld [vmem:[%s11184_s5 + $0x408] sm:$0xff]  }
  0x1b   : > { %v10788_v28 = vld [vmem:[%s11184_s5 + $0x48] sm:$0xff]   ;;  %v10789_v29 = vld [vmem:[%s11184_s5 + $0x410] sm:$0xff]   ;;  %v10791_v31 = vld [vmem:[%s11184_s5 + $0x418] sm:$0xff]  }
  0x1c   : > { %v10790_v30 = vld [vmem:[%s11184_s5 + $0x50] sm:$0xff]   ;;  %v10792_v32 = vld [vmem:[%s11184_s5 + $0x58] sm:$0xff]   ;;  %v10793_v33 = vld [vmem:[%s11184_s5 + $0x420] sm:$0xff]  }
  0x1d   : > { %9694 = vmatpush3.bf16.msra.mxu0 %v10767_v7  ;;  %10670 = vmatpush3.bf16.msra.mxu1 %v10767_v7  ;;  %v10794_v34 = vld [vmem:[%s11184_s5 + $0x60] sm:$0xff]   ;;  %v10795_v35 = vld [vmem:[%s11184_s5 + $0x428] sm:$0xff]   ;;  %v10797_v37 = vld [vmem:[%s11184_s5 + $0x430] sm:$0xff]  }
  0x1e   : > { %9695 = vmatprep.subr.bf16.mxu0 %v11105_v0  ;;  %10666 = vmatprep.subr.bf16.mxu1 %v11105_v0  ;;  %v10796_v36 = vld [vmem:[%s11184_s5 + $0x68] sm:$0xff]   ;;  %v10798_v38 = vld [vmem:[%s11184_s5 + $0x70] sm:$0xff]   ;;  %v10799_v39 = vld [vmem:[%s11184_s5 + $0x438] sm:$0xff]  }
  0x1f   : > { %v10800_v40 = vld [vmem:[%s11184_s5 + $0x78] sm:$0xff]   ;;  %v10801_v41 = vld [vmem:[%s11184_s5 + $0x440] sm:$0xff]   ;;  %v10803_v43 = vld [vmem:[%s11184_s5 + $0x448] sm:$0xff]  }
  0x20   : > { %v10802_v42 = vld [vmem:[%s11184_s5 + $0x80] sm:$0xff]   ;;  %v10804_v44 = vld [vmem:[%s11184_s5 + $0x88] sm:$0xff]   ;;  %v10805_v45 = vld [vmem:[%s11184_s5 + $0x450] sm:$0xff]  }
  0x21   : > { %9696 = vmatpush3.bf16.msra.mxu0 %v10768_v8  ;;  %10671 = vmatpush3.bf16.msra.mxu1 %v10768_v8  ;;  %v10806_v46 = vld [vmem:[%s11184_s5 + $0x90] sm:$0xff]   ;;  %v10807_v47 = vld [vmem:[%s11184_s5 + $0x458] sm:$0xff]   ;;  %v10809_v49 = vld [vmem:[%s11184_s5 + $0x460] sm:$0xff]  }
  0x22   : > { %9697 = vmatprep.subr.bf16.mxu0 %v11105_v0  ;;  %10667 = vmatprep.subr.bf16.mxu1 %v11105_v0  ;;  %v10808_v48 = vld [vmem:[%s11184_s5 + $0x98] sm:$0xff]   ;;  %v10810_v50 = vld [vmem:[%s11184_s5 + $0xa0] sm:$0xff]   ;;  %v10811_v51 = vld [vmem:[%s11184_s5 + $0x468] sm:$0xff]  }
  0x23   : > { %v10812_v52 = vld [vmem:[%s11184_s5 + $0xa8] sm:$0xff]   ;;  %v10813_v53 = vld [vmem:[%s11184_s5 + $0x470] sm:$0xff]   ;;  %v10815_v55 = vld [vmem:[%s11184_s5 + $0x478] sm:$0xff]  }
  0x24   : > { %v10814_v54 = vld [vmem:[%s11184_s5 + $0xb0] sm:$0xff]   ;;  %v10816_v56 = vld [vmem:[%s11184_s5 + $0xb8] sm:$0xff]   ;;  %v10817_v57 = vld [vmem:[%s11184_s5 + $0x480] sm:$0xff]  }
  0x25   : > { %9698 = vmatpush3.bf16.msra.mxu0 %v10769_v9  ;;  %10672 = vmatpush3.bf16.msra.mxu1 %v10769_v9  ;;  %v10818_v58 = vld [vmem:[%s11184_s5 + $0xc0] sm:$0xff]   ;;  %v10819_v59 = vld [vmem:[%s11184_s5 + $0x488] sm:$0xff]   ;;  %v10821_v9 = vld [vmem:[%s11184_s5 + $0x490] sm:$0xff]  }
  0x26   : > { %v10820_v7 = vld [vmem:[%s11184_s5 + $0xc8] sm:$0xff]  }
  0x28   : > { %9700 = vmatmul.mubr.msk.bf16.vlgmr.msra.gmra.mxu0 %vm1923_vm3, %v10770_v10  ;;  %10184 = vmatmul.mubr.msk.bf16.vlgmr.msra.gmra.mxu1 %vm1923_vm3, %v10771_v11 }
  0x29   : > { %9703 = vmatprep.mubr.msk.bf16.mxu0 %vm11107_vm2, %v11105_v0  ;;  %10187 = vmatprep.mubr.msk.bf16.mxu1 %vm11107_vm2, %v11105_v0 }
  0x30   : > { %9704 = vmatmul.mubr.msk.bf16.gmra.mxu0 %vm1923_vm3, %v10772_v12  ;;  %10188 = vmatmul.mubr.msk.bf16.gmra.mxu1 %vm1923_vm3, %v10773_v13 }
  0x31   : > { %9707 = vmatprep.mubr.msk.bf16.mxu0 %vm11107_vm2, %v11105_v0  ;;  %10191 = vmatprep.mubr.msk.bf16.mxu1 %vm11107_vm2, %v11105_v0 }
  0x38   : > { %9708 = vmatmul.mubr.msk.bf16.gmra.mxu0 %vm1923_vm3, %v10774_v14  ;;  %10192 = vmatmul.mubr.msk.bf16.gmra.mxu1 %vm1923_vm3, %v10775_v15 }
  0x39   : > { %9711 = vmatprep.mubr.msk.bf16.mxu0 %vm11107_vm2, %v11105_v0  ;;  %10195 = vmatprep.mubr.msk.bf16.mxu1 %vm11107_vm2, %v11105_v0 }
  0x40   : > { %9712 = vmatmul.mubr.msk.bf16.gmra.mxu0 %vm1923_vm3, %v10776_v16  ;;  %10196 = vmatmul.mubr.msk.bf16.gmra.mxu1 %vm1923_vm3, %v10777_v17 }
  0x41   : > { %9715 = vmatprep.mubr.msk.bf16.mxu0 %vm11107_vm2, %v11105_v0  ;;  %10199 = vmatprep.mubr.msk.bf16.mxu1 %vm11107_vm2, %v11105_v0 }
  0x48   : > { %9716 = vmatmul.mubr.msk.bf16.gmra.mxu0 %vm1923_vm3, %v10778_v18  ;;  %10200 = vmatmul.mubr.msk.bf16.gmra.mxu1 %vm1923_vm3, %v10779_v19 }
  0x49   : > { %9719 = vmatprep.mubr.msk.bf16.mxu0 %vm11107_vm2, %v11105_v0  ;;  %10203 = vmatprep.mubr.msk.bf16.mxu1 %vm11107_vm2, %v11105_v0 }
  0x50   : > { %9720 = vmatmul.mubr.msk.bf16.gmra.mxu0 %vm1923_vm3, %v10780_v20  ;;  %10204 = vmatmul.mubr.msk.bf16.gmra.mxu1 %vm1923_vm3, %v10781_v21 }
  0x51   : > { %9723 = vmatprep.mubr.msk.bf16.mxu0 %vm11107_vm2, %v11105_v0  ;;  %10207 = vmatprep.mubr.msk.bf16.mxu1 %vm11107_vm2, %v11105_v0 }
  0x58   : > { %9724 = vmatmul.mubr.msk.bf16.gmra.mxu0 %vm1923_vm3, %v10782_v22  ;;  %10208 = vmatmul.mubr.msk.bf16.gmra.mxu1 %vm1923_vm3, %v10783_v23 }
  0x59   : > { %9727 = vmatprep.mubr.msk.bf16.mxu0 %vm11107_vm2, %v11105_v0  ;;  %10211 = vmatprep.mubr.msk.bf16.mxu1 %vm11107_vm2, %v11105_v0 }
  0x60   : > { %9728 = vmatmul.mubr.msk.bf16.gmra.mxu0 %vm1923_vm3, %v10784_v24  ;;  %10212 = vmatmul.mubr.msk.bf16.gmra.mxu1 %vm1923_vm3, %v10785_v25 }
  0x61   : > { %9731 = vmatprep.mubr.msk.bf16.mxu0 %vm11107_vm2, %v11105_v0  ;;  %10215 = vmatprep.mubr.msk.bf16.mxu1 %vm11107_vm2, %v11105_v0 }
  0x68   : > { %9732 = vmatmul.mubr.msk.bf16.gmra.mxu0 %vm1923_vm3, %v10786_v26  ;;  %10216 = vmatmul.mubr.msk.bf16.gmra.mxu1 %vm1923_vm3, %v10787_v27 }
  0x69   : > { %9735 = vmatprep.mubr.msk.bf16.mxu0 %vm11107_vm2, %v11105_v0  ;;  %10219 = vmatprep.mubr.msk.bf16.mxu1 %vm11107_vm2, %v11105_v0 }
  0x70   : > { %9736 = vmatmul.mubr.msk.bf16.gmra.mxu0 %vm1923_vm3, %v10788_v28  ;;  %10220 = vmatmul.mubr.msk.bf16.gmra.mxu1 %vm1923_vm3, %v10789_v29  ;;  %v10822_v29 = vld [vmem:[%s11184_s5 + $0xd0] sm:$0xff]  }
  0x71   : > { %9739 = vmatprep.mubr.msk.bf16.mxu0 %vm11107_vm2, %v11105_v0  ;;  %10223 = vmatprep.mubr.msk.bf16.mxu1 %vm11107_vm2, %v11105_v0 }
  0x78   : > { %9740 = vmatmul.mubr.msk.bf16.gmra.mxu0 %vm1923_vm3, %v10790_v30  ;;  %10224 = vmatmul.mubr.msk.bf16.gmra.mxu1 %vm1923_vm3, %v10791_v31  ;;  %v10823_v31 = vld [vmem:[%s11184_s5 + $0x498] sm:$0xff]  }
  0x79   : > { %9743 = vmatprep.mubr.msk.bf16.mxu0 %vm11107_vm2, %v11105_v0  ;;  %10227 = vmatprep.mubr.msk.bf16.mxu1 %vm11107_vm2, %v11105_v0 }
  0x80   : > { %9744 = vmatmul.mubr.msk.bf16.gmra.mxu0 %vm1923_vm3, %v10792_v32  ;;  %10228 = vmatmul.mubr.msk.bf16.gmra.mxu1 %vm1923_vm3, %v10793_v33 }
  0x81   : > { %9747 = vmatprep.mubr.msk.bf16.mxu0 %vm11107_vm2, %v11105_v0  ;;  %10231 = vmatprep.mubr.msk.bf16.mxu1 %vm11107_vm2, %v11105_v0 }
  0x88   : > { %9748 = vmatmul.mubr.msk.bf16.gmra.mxu0 %vm1923_vm3, %v10794_v34  ;;  %10232 = vmatmul.mubr.msk.bf16.gmra.mxu1 %vm1923_vm3, %v10795_v35 }
  0x89   : > { %9751 = vmatprep.mubr.msk.bf16.mxu0 %vm11107_vm2, %v11105_v0  ;;  %10235 = vmatprep.mubr.msk.bf16.mxu1 %vm11107_vm2, %v11105_v0 }
  0x90   : > { %9752 = vmatmul.mubr.msk.bf16.gmra.mxu0 %vm1923_vm3, %v10796_v36  ;;  %10236 = vmatmul.mubr.msk.bf16.gmra.mxu1 %vm1923_vm3, %v10797_v37 }
  0x91   : > { %9755 = vmatprep.mubr.msk.bf16.mxu0 %vm11107_vm2, %v11105_v0  ;;  %10239 = vmatprep.mubr.msk.bf16.mxu1 %vm11107_vm2, %v11105_v0 }
  0x98   : > { %9756 = vmatmul.mubr.msk.bf16.gmra.mxu0 %vm1923_vm3, %v10798_v38  ;;  %10240 = vmatmul.mubr.msk.bf16.gmra.mxu1 %vm1923_vm3, %v10799_v39 }
  0x99   : > { %9759 = vmatprep.mubr.msk.bf16.mxu0 %vm11107_vm2, %v11105_v0  ;;  %10243 = vmatprep.mubr.msk.bf16.mxu1 %vm11107_vm2, %v11105_v0 }
  0xa0   : > { %9760 = vmatmul.mubr.msk.bf16.gmra.mxu0 %vm1923_vm3, %v10800_v40  ;;  %10244 = vmatmul.mubr.msk.bf16.gmra.mxu1 %vm1923_vm3, %v10801_v41 }
  0xa1   : > { %9763 = vmatprep.mubr.msk.bf16.mxu0 %vm11107_vm2, %v11105_v0  ;;  %10247 = vmatprep.mubr.msk.bf16.mxu1 %vm11107_vm2, %v11105_v0 }
  0xa8   : > { %9764 = vmatmul.mubr.msk.bf16.gmra.mxu0 %vm1923_vm3, %v10802_v42  ;;  %10248 = vmatmul.mubr.msk.bf16.gmra.mxu1 %vm1923_vm3, %v10803_v43 }
  0xa9   : > { %9767 = vmatprep.mubr.msk.bf16.mxu0 %vm11107_vm2, %v11105_v0  ;;  %10251 = vmatprep.mubr.msk.bf16.mxu1 %vm11107_vm2, %v11105_v0 }
  0xb0   : > { %9768 = vmatmul.mubr.msk.bf16.gmra.mxu0 %vm1923_vm3, %v10804_v44  ;;  %10252 = vmatmul.mubr.msk.bf16.gmra.mxu1 %vm1923_vm3, %v10805_v45 }
  0xb1   : > { %9771 = vmatprep.mubr.msk.bf16.mxu0 %vm11107_vm2, %v11105_v0  ;;  %10255 = vmatprep.mubr.msk.bf16.mxu1 %vm11107_vm2, %v11105_v0 }
  0xb8   : > { %9772 = vmatmul.mubr.msk.bf16.gmra.mxu0 %vm1923_vm3, %v10806_v46  ;;  %10256 = vmatmul.mubr.msk.bf16.gmra.mxu1 %vm1923_vm3, %v10807_v47 }
  0xb9   : > { %9775 = vmatprep.mubr.msk.bf16.mxu0 %vm11107_vm2, %v11105_v0  ;;  %10259 = vmatprep.mubr.msk.bf16.mxu1 %vm11107_vm2, %v11105_v0 }
  0xc0   : > { %9776 = vmatmul.mubr.msk.bf16.gmra.mxu0 %vm1923_vm3, %v10808_v48  ;;  %10260 = vmatmul.mubr.msk.bf16.gmra.mxu1 %vm1923_vm3, %v10809_v49 }
  0xc1   : > { %9779 = vmatprep.mubr.msk.bf16.mxu0 %vm11107_vm2, %v11105_v0  ;;  %10263 = vmatprep.mubr.msk.bf16.mxu1 %vm11107_vm2, %v11105_v0 }
  0xc8   : > { %9780 = vmatmul.mubr.msk.bf16.gmra.mxu0 %vm1923_vm3, %v10810_v50  ;;  %10264 = vmatmul.mubr.msk.bf16.gmra.mxu1 %vm1923_vm3, %v10811_v51  ;;  %v10824_v51 = vld [vmem:[%s11184_s5 + $0xd8] sm:$0xff]  }
  0xc9   : > { %9783 = vmatprep.mubr.msk.bf16.mxu0 %vm11107_vm2, %v11105_v0  ;;  %10267 = vmatprep.mubr.msk.bf16.mxu1 %vm11107_vm2, %v11105_v0 }
  0xd0   : > { %9784 = vmatmul.mubr.msk.bf16.gmra.mxu0 %vm1923_vm3, %v10812_v52  ;;  %10268 = vmatmul.mubr.msk.bf16.gmra.mxu1 %vm1923_vm3, %v10813_v53  ;;  %v10825_v53 = vld [vmem:[%s11184_s5 + $0x4a0] sm:$0xff]  }
  0xd1   : > { %9787 = vmatprep.mubr.msk.bf16.mxu0 %vm11107_vm2, %v11105_v0  ;;  %10271 = vmatprep.mubr.msk.bf16.mxu1 %vm11107_vm2, %v11105_v0 }
  0xd8   : > { %9788 = vmatmul.mubr.msk.bf16.gmra.mxu0 %vm1923_vm3, %v10814_v54  ;;  %10272 = vmatmul.mubr.msk.bf16.gmra.mxu1 %vm1923_vm3, %v10815_v55 }
  0xd9   : > { %9791 = vmatprep.mubr.msk.bf16.mxu0 %vm11107_vm2, %v11105_v0  ;;  %10275 = vmatprep.mubr.msk.bf16.mxu1 %vm11107_vm2, %v11105_v0 }
  0xe0   : > { %9792 = vmatmul.mubr.msk.bf16.gmra.mxu0 %vm1923_vm3, %v10816_v56  ;;  %10276 = vmatmul.mubr.msk.bf16.gmra.mxu1 %vm1923_vm3, %v10817_v57 }
  0xe1   : > { %9795 = vmatprep.mubr.msk.bf16.mxu0 %vm11107_vm2, %v11105_v0  ;;  %10279 = vmatprep.mubr.msk.bf16.mxu1 %vm11107_vm2, %v11105_v0 }
  0xe8   : > { %v2688_v61 = vpop.f32.mrf.mxu0  ;;  %9796 = vmatmul.mubr.msk.bf16.gmra.mxu0 %vm1923_vm3, %v10818_v58  ;;  %v3656_v62 = vpop.f32.mrf.mxu1  ;;  %10280 = vmatmul.mubr.msk.bf16.gmra.mxu1 %vm1923_vm3, %v10819_v59 }
  0xe9   : > { %v2689_v63 = vadd.f32 %v11394_v60, %v2688_v61  ;;  %v3657_v1 = vadd.f32 %v11394_v60, %v3656_v62  ;;  %9799 = vmatprep.mubr.msk.bf16.mxu0 %vm11107_vm2, %v11105_v0  ;;  %10283 = vmatprep.mubr.msk.bf16.mxu1 %vm11107_vm2, %v11105_v0 }
  0xea   : > { %v9701_v2 = vpop.f32.mrf.mxu0  ;;  %v10185_v3 = vpop.f32.mrf.mxu1 }
  0xeb   : > { %v4614_v4 = vmax.f32 %v2689_v63, 0.0  ;;  %v4856_v5 = vmax.f32 %v3657_v1, 0.0 }
  0xec   : > { %v2691_v6 = vpop.f32.mrf.mxu0  ;;  %v3659_v8 = vpop.f32.mrf.mxu1 }
  0xed   : > { %v8959_v10 = vpack.c.bf16 %v4614_v4, %v4614_v4  ;;  %v2692_v11 = vadd.f32 %v11394_v60, %v2691_v6  ;;  %v9201_v12 = vpack.c.bf16 %v4856_v5, %v4856_v5  ;;  %v3660_v13 = vadd.f32 %v11394_v60, %v3659_v8 }
  0xee   : > { %v9702_v14 = vpop.f32.mrf.mxu0  ;;  %v10186_v15 = vpop.f32.mrf.mxu1 }
  0xef   : > { %7021 = vst.msk [vmem:[%s11408_s12] sm:$0xf] %vm7020_vm4, %v8959_v10  ;;  %v4615_v16 = vmax.f32 %v2692_v11, 0.0  ;;  %7263 = vst.msk [vmem:[%s11408_s12 + $0x3c8] sm:$0xf] %vm7020_vm4, %v9201_v12  ;;  %v4857_v17 = vmax.f32 %v3660_v13, 0.0 }
  0xf0   : > { %v2696_v18 = vpop.f32.mrf.mxu0  ;;  %9800 = vmatmul.mubr.msk.bf16.gmra.mxu0 %vm1923_vm3, %v10820_v7  ;;  %v3664_v19 = vpop.f32.mrf.mxu1  ;;  %10284 = vmatmul.mubr.msk.bf16.gmra.mxu1 %vm1923_vm3, %v10821_v9  ;;  %v10826_v11 = vld [vmem:[%s11184_s5 + $0xe0] sm:$0xff]   ;;  %v10827_v13 = vld [vmem:[%s11184_s5 + $0x4a8] sm:$0xff]  }
  0xf1   : > { %v8960_v20 = vpack.c.bf16 %v4615_v16, %v4615_v16  ;;  %v2697_v21 = vadd.f32 %v11394_v60, %v2696_v18  ;;  %v9202_v22 = vpack.c.bf16 %v4857_v17, %v4857_v17  ;;  %v3665_v23 = vadd.f32 %v11394_v60, %v3664_v19  ;;  %9803 = vmatprep.mubr.msk.bf16.mxu0 %vm11107_vm2, %v11105_v0 }
  0xf2   : > { %v9705_v24 = vpop.f32.mrf.mxu0  ;;  %v10189_v25 = vpop.f32.mrf.mxu1  ;;  %10287 = vmatprep.mubr.msk.bf16.mxu1 %vm11107_vm2, %v11105_v0 }
  0xf3   : > { %7022 = vst.msk [vmem:[%s11408_s12 + $0x4] sm:$0xf] %vm7020_vm4, %v8960_v20  ;;  %v4616_v26 = vmax.f32 %v2697_v21, 0.0  ;;  %7264 = vst.msk [vmem:[%s11408_s12 + $0x3cc] sm:$0xf] %vm7020_vm4, %v9202_v22  ;;  %v4858_v27 = vmax.f32 %v3665_v23, 0.0 }
  0xf4   : > { %v2699_v28 = vpop.f32.mrf.mxu0  ;;  %v3667_v30 = vpop.f32.mrf.mxu1 }
  0xf5   : > { %v8961_v32 = vpack.c.bf16 %v4616_v26, %v4616_v26  ;;  %v2700_v33 = vadd.f32 %v11394_v60, %v2699_v28  ;;  %v9203_v34 = vpack.c.bf16 %v4858_v27, %v4858_v27  ;;  %v3668_v35 = vadd.f32 %v11394_v60, %v3667_v30 }
  0xf6   : > { %v9706_v36 = vpop.f32.mrf.mxu0  ;;  %v10190_v37 = vpop.f32.mrf.mxu1 }
  0xf7   : > { %7023 = vst.msk [vmem:[%s11408_s12 + $0x8] sm:$0xf] %vm7020_vm4, %v8961_v32  ;;  %v4617_v38 = vmax.f32 %v2700_v33, 0.0  ;;  %7265 = vst.msk [vmem:[%s11408_s12 + $0x3d0] sm:$0xf] %vm7020_vm4, %v9203_v34  ;;  %v4859_v39 = vmax.f32 %v3668_v35, 0.0 }
  0xf8   : > { %v2704_v40 = vpop.f32.mrf.mxu0  ;;  %9804 = vmatmul.mubr.msk.bf16.gmra.mxu0 %vm1923_vm3, %v10822_v29  ;;  %v3672_v41 = vpop.f32.mrf.mxu1  ;;  %10288 = vmatmul.mubr.msk.bf16.gmra.mxu1 %vm1923_vm3, %v10823_v31  ;;  %v10828_v33 = vld [vmem:[%s11184_s5 + $0xe8] sm:$0xff]   ;;  %v10829_v35 = vld [vmem:[%s11184_s5 + $0x4b0] sm:$0xff]  }
  0xf9   : > { %v8962_v42 = vpack.c.bf16 %v4617_v38, %v4617_v38  ;;  %v2705_v43 = vadd.f32 %v11394_v60, %v2704_v40  ;;  %v9204_v44 = vpack.c.bf16 %v4859_v39, %v4859_v39  ;;  %v3673_v45 = vadd.f32 %v11394_v60, %v3672_v41  ;;  %9807 = vmatprep.mubr.msk.bf16.mxu0 %vm11107_vm2, %v11105_v0 }
  0xfa   : > { %v9709_v46 = vpop.f32.mrf.mxu0  ;;  %v10193_v47 = vpop.f32.mrf.mxu1  ;;  %10291 = vmatprep.mubr.msk.bf16.mxu1 %vm11107_vm2, %v11105_v0 }
  0xfb   : > { %7024 = vst.msk [vmem:[%s11408_s12 + $0xc] sm:$0xf] %vm7020_vm4, %v8962_v42  ;;  %v4618_v48 = vmax.f32 %v2705_v43, 0.0  ;;  %7266 = vst.msk [vmem:[%s11408_s12 + $0x3d4] sm:$0xf] %vm7020_vm4, %v9204_v44  ;;  %v4860_v49 = vmax.f32 %v3673_v45, 0.0 }
  0xfc   : > { %v2707_v50 = vpop.f32.mrf.mxu0  ;;  %v3675_v52 = vpop.f32.mrf.mxu1 }
  0xfd   : > { %v8963_v54 = vpack.c.bf16 %v4618_v48, %v4618_v48  ;;  %v2708_v55 = vadd.f32 %v11394_v60, %v2707_v50  ;;  %v9205_v56 = vpack.c.bf16 %v4860_v49, %v4860_v49  ;;  %v3676_v57 = vadd.f32 %v11394_v60, %v3675_v52 }
  0xfe   : > { %v9710_v58 = vpop.f32.mrf.mxu0  ;;  %v10194_v59 = vpop.f32.mrf.mxu1 }
  0xff   : > { %7025 = vst.msk [vmem:[%s11408_s12 + $0x10] sm:$0xf] %vm7020_vm4, %v8963_v54  ;;  %v4619_v61 = vmax.f32 %v2708_v55, 0.0  ;;  %7267 = vst.msk [vmem:[%s11408_s12 + $0x3d8] sm:$0xf] %vm7020_vm4, %v9205_v56  ;;  %v4861_v62 = vmax.f32 %v3676_v57, 0.0 }
 0x100   : > { %v2712_v63 = vpop.f32.mrf.mxu0  ;;  %9808 = vmatmul.mubr.msk.bf16.gmra.mxu0 %vm1923_vm3, %v10824_v51  ;;  %v3680_v1 = vpop.f32.mrf.mxu1  ;;  %10292 = vmatmul.mubr.msk.bf16.gmra.mxu1 %vm1923_vm3, %v10825_v53  ;;  %v10830_v55 = vld [vmem:[%s11184_s5 + $0xf0] sm:$0xff]   ;;  %v10831_v57 = vld [vmem:[%s11184_s5 + $0x4b8] sm:$0xff]  }
 0x101   : > { %v8964_v2 = vpack.c.bf16 %v4619_v61, %v4619_v61  ;;  %v2713_v3 = vadd.f32 %v11394_v60, %v2712_v63  ;;  %v9206_v4 = vpack.c.bf16 %v4861_v62, %v4861_v62  ;;  %v3681_v5 = vadd.f32 %v11394_v60, %v3680_v1  ;;  %9811 = vmatprep.mubr.msk.bf16.mxu0 %vm11107_vm2, %v11105_v0 }
 0x102   : > { %v9713_v6 = vpop.f32.mrf.mxu0  ;;  %v10197_v7 = vpop.f32.mrf.mxu1  ;;  %10295 = vmatprep.mubr.msk.bf16.mxu1 %vm11107_vm2, %v11105_v0 }
 0x103   : > { %7026 = vst.msk [vmem:[%s11408_s12 + $0x14] sm:$0xf] %vm7020_vm4, %v8964_v2  ;;  %v4620_v8 = vmax.f32 %v2713_v3, 0.0  ;;  %7268 = vst.msk [vmem:[%s11408_s12 + $0x3dc] sm:$0xf] %vm7020_vm4, %v9206_v4  ;;  %v4862_v9 = vmax.f32 %v3681_v5, 0.0 }
 0x104   : > { %v2715_v10 = vpop.f32.mrf.mxu0  ;;  %v3683_v12 = vpop.f32.mrf.mxu1 }
 0x105   : > { %v8965_v14 = vpack.c.bf16 %v4620_v8, %v4620_v8  ;;  %v2716_v15 = vadd.f32 %v11394_v60, %v2715_v10  ;;  %v9207_v16 = vpack.c.bf16 %v4862_v9, %v4862_v9  ;;  %v3684_v17 = vadd.f32 %v11394_v60, %v3683_v12 }
 0x106   : > { %v9714_v18 = vpop.f32.mrf.mxu0  ;;  %v10198_v19 = vpop.f32.mrf.mxu1 }
 0x107   : > { %7027 = vst.msk [vmem:[%s11408_s12 + $0x18] sm:$0xf] %vm7020_vm4, %v8965_v14  ;;  %v4621_v20 = vmax.f32 %v2716_v15, 0.0  ;;  %7269 = vst.msk [vmem:[%s11408_s12 + $0x3e0] sm:$0xf] %vm7020_vm4, %v9207_v16  ;;  %v4863_v21 = vmax.f32 %v3684_v17, 0.0 }
 0x108   : > { %v2720_v22 = vpop.f32.mrf.mxu0  ;;  %9812 = vmatmul.mubr.msk.bf16.gmra.mxu0 %vm1923_vm3, %v10826_v11  ;;  %v3688_v23 = vpop.f32.mrf.mxu1  ;;  %10296 = vmatmul.mubr.msk.bf16.gmra.mxu1 %vm1923_vm3, %v10827_v13  ;;  %v10832_v15 = vld [vmem:[%s11184_s5 + $0xf8] sm:$0xff]   ;;  %v10833_v17 = vld [vmem:[%s11184_s5 + $0x4c0] sm:$0xff]  }
 0x109   : > { %v8966_v24 = vpack.c.bf16 %v4621_v20, %v4621_v20  ;;  %v2721_v25 = vadd.f32 %v11394_v60, %v2720_v22  ;;  %v9208_v26 = vpack.c.bf16 %v4863_v21, %v4863_v21  ;;  %v3689_v27 = vadd.f32 %v11394_v60, %v3688_v23  ;;  %9815 = vmatprep.mubr.msk.bf16.mxu0 %vm11107_vm2, %v11105_v0 }
 0x10a   : > { %v9717_v28 = vpop.f32.mrf.mxu0  ;;  %v10201_v29 = vpop.f32.mrf.mxu1  ;;  %10299 = vmatprep.mubr.msk.bf16.mxu1 %vm11107_vm2, %v11105_v0 }
 0x10b   : > { %7028 = vst.msk [vmem:[%s11408_s12 + $0x1c] sm:$0xf] %vm7020_vm4, %v8966_v24  ;;  %v4622_v30 = vmax.f32 %v2721_v25, 0.0  ;;  %7270 = vst.msk [vmem:[%s11408_s12 + $0x3e4] sm:$0xf] %vm7020_vm4, %v9208_v26  ;;  %v4864_v31 = vmax.f32 %v3689_v27, 0.0 }
 0x10c   : > { %v2723_v32 = vpop.f32.mrf.mxu0  ;;  %v3691_v34 = vpop.f32.mrf.mxu1 }
 0x10d   : > { %v8967_v36 = vpack.c.bf16 %v4622_v30, %v4622_v30  ;;  %v2724_v37 = vadd.f32 %v11394_v60, %v2723_v32  ;;  %v9209_v38 = vpack.c.bf16 %v4864_v31, %v4864_v31  ;;  %v3692_v39 = vadd.f32 %v11394_v60, %v3691_v34 }
 0x10e   : > { %v9718_v40 = vpop.f32.mrf.mxu0  ;;  %v10202_v41 = vpop.f32.mrf.mxu1 }
 0x10f   : > { %7029 = vst.msk [vmem:[%s11408_s12 + $0x20] sm:$0xf] %vm7020_vm4, %v8967_v36  ;;  %v4623_v42 = vmax.f32 %v2724_v37, 0.0  ;;  %7271 = vst.msk [vmem:[%s11408_s12 + $0x3e8] sm:$0xf] %vm7020_vm4, %v9209_v38  ;;  %v4865_v43 = vmax.f32 %v3692_v39, 0.0 }
 0x110   : > { %v2728_v44 = vpop.f32.mrf.mxu0  ;;  %9816 = vmatmul.mubr.msk.bf16.gmra.mxu0 %vm1923_vm3, %v10828_v33  ;;  %v3696_v45 = vpop.f32.mrf.mxu1  ;;  %10300 = vmatmul.mubr.msk.bf16.gmra.mxu1 %vm1923_vm3, %v10829_v35  ;;  %v10834_v37 = vld [vmem:[%s11184_s5 + $0x100] sm:$0xff]   ;;  %v10835_v39 = vld [vmem:[%s11184_s5 + $0x4c8] sm:$0xff]  }
 0x111   : > { %v8968_v46 = vpack.c.bf16 %v4623_v42, %v4623_v42  ;;  %v2729_v47 = vadd.f32 %v11394_v60, %v2728_v44  ;;  %v9210_v48 = vpack.c.bf16 %v4865_v43, %v4865_v43  ;;  %v3697_v49 = vadd.f32 %v11394_v60, %v3696_v45  ;;  %9819 = vmatprep.mubr.msk.bf16.mxu0 %vm11107_vm2, %v11105_v0 }
 0x112   : > { %v9721_v50 = vpop.f32.mrf.mxu0  ;;  %v10205_v51 = vpop.f32.mrf.mxu1  ;;  %10303 = vmatprep.mubr.msk.bf16.mxu1 %vm11107_vm2, %v11105_v0 }
 0x113   : > { %7030 = vst.msk [vmem:[%s11408_s12 + $0x24] sm:$0xf] %vm7020_vm4, %v8968_v46  ;;  %v4624_v52 = vmax.f32 %v2729_v47, 0.0  ;;  %7272 = vst.msk [vmem:[%s11408_s12 + $0x3ec] sm:$0xf] %vm7020_vm4, %v9210_v48  ;;  %v4866_v53 = vmax.f32 %v3697_v49, 0.0 }
 0x114   : > { %v2731_v54 = vpop.f32.mrf.mxu0  ;;  %v3699_v56 = vpop.f32.mrf.mxu1 }
 0x115   : > { %v8969_v58 = vpack.c.bf16 %v4624_v52, %v4624_v52  ;;  %v2732_v59 = vadd.f32 %v11394_v60, %v2731_v54  ;;  %v9211_v61 = vpack.c.bf16 %v4866_v53, %v4866_v53  ;;  %v3700_v62 = vadd.f32 %v11394_v60, %v3699_v56 }
 0x116   : > { %v9722_v63 = vpop.f32.mrf.mxu0  ;;  %v10206_v1 = vpop.f32.mrf.mxu1 }
 0x117   : > { %7031 = vst.msk [vmem:[%s11408_s12 + $0x28] sm:$0xf] %vm7020_vm4, %v8969_v58  ;;  %v4625_v2 = vmax.f32 %v2732_v59, 0.0  ;;  %7273 = vst.msk [vmem:[%s11408_s12 + $0x3f0] sm:$0xf] %vm7020_vm4, %v9211_v61  ;;  %v4867_v3 = vmax.f32 %v3700_v62, 0.0 }
 0x118   : > { %v2736_v4 = vpop.f32.mrf.mxu0  ;;  %9820 = vmatmul.mubr.msk.bf16.gmra.mxu0 %vm1923_vm3, %v10830_v55  ;;  %v3704_v5 = vpop.f32.mrf.mxu1  ;;  %10304 = vmatmul.mubr.msk.bf16.gmra.mxu1 %vm1923_vm3, %v10831_v57  ;;  %v10836_v59 = vld [vmem:[%s11184_s5 + $0x108] sm:$0xff]   ;;  %v10837_v62 = vld [vmem:[%s11184_s5 + $0x4d0] sm:$0xff]  }
 0x119   : > { %v8970_v6 = vpack.c.bf16 %v4625_v2, %v4625_v2  ;;  %v2737_v7 = vadd.f32 %v11394_v60, %v2736_v4  ;;  %v9212_v8 = vpack.c.bf16 %v4867_v3, %v4867_v3  ;;  %v3705_v9 = vadd.f32 %v11394_v60, %v3704_v5  ;;  %9823 = vmatprep.mubr.msk.bf16.mxu0 %vm11107_vm2, %v11105_v0 }
 0x11a   : > { %v9725_v10 = vpop.f32.mrf.mxu0  ;;  %v10209_v11 = vpop.f32.mrf.mxu1  ;;  %10307 = vmatprep.mubr.msk.bf16.mxu1 %vm11107_vm2, %v11105_v0 }
 0x11b   : > { %7032 = vst.msk [vmem:[%s11408_s12 + $0x2c] sm:$0xf] %vm7020_vm4, %v8970_v6  ;;  %v4626_v12 = vmax.f32 %v2737_v7, 0.0  ;;  %7274 = vst.msk [vmem:[%s11408_s12 + $0x3f4] sm:$0xf] %vm7020_vm4, %v9212_v8  ;;  %v4868_v13 = vmax.f32 %v3705_v9, 0.0 }
 0x11c   : > { %v2739_v14 = vpop.f32.mrf.mxu0  ;;  %v3707_v16 = vpop.f32.mrf.mxu1 }
 0x11d   : > { %v8971_v18 = vpack.c.bf16 %v4626_v12, %v4626_v12  ;;  %v2740_v19 = vadd.f32 %v11394_v60, %v2739_v14  ;;  %v9213_v20 = vpack.c.bf16 %v4868_v13, %v4868_v13  ;;  %v3708_v21 = vadd.f32 %v11394_v60, %v3707_v16 }
 0x11e   : > { %v9726_v22 = vpop.f32.mrf.mxu0  ;;  %v10210_v23 = vpop.f32.mrf.mxu1 }
 0x11f   : > { %7033 = vst.msk [vmem:[%s11408_s12 + $0x30] sm:$0xf] %vm7020_vm4, %v8971_v18  ;;  %v4627_v24 = vmax.f32 %v2740_v19, 0.0  ;;  %7275 = vst.msk [vmem:[%s11408_s12 + $0x3f8] sm:$0xf] %vm7020_vm4, %v9213_v20  ;;  %v4869_v25 = vmax.f32 %v3708_v21, 0.0 }
 0x120   : > { %v2744_v26 = vpop.f32.mrf.mxu0  ;;  %9824 = vmatmul.mubr.msk.bf16.gmra.mxu0 %vm1923_vm3, %v10832_v15  ;;  %v3712_v27 = vpop.f32.mrf.mxu1  ;;  %10308 = vmatmul.mubr.msk.bf16.gmra.mxu1 %vm1923_vm3, %v10833_v17  ;;  %v10838_v19 = vld [vmem:[%s11184_s5 + $0x110] sm:$0xff]   ;;  %v10839_v21 = vld [vmem:[%s11184_s5 + $0x4d8] sm:$0xff]  }
 0x121   : > { %v8972_v28 = vpack.c.bf16 %v4627_v24, %v4627_v24  ;;  %v2745_v29 = vadd.f32 %v11394_v60, %v2744_v26  ;;  %v9214_v30 = vpack.c.bf16 %v4869_v25, %v4869_v25  ;;  %v3713_v31 = vadd.f32 %v11394_v60, %v3712_v27  ;;  %9827 = vmatprep.mubr.msk.bf16.mxu0 %vm11107_vm2, %v11105_v0 }
 0x122   : > { %v9729_v32 = vpop.f32.mrf.mxu0  ;;  %v10213_v33 = vpop.f32.mrf.mxu1  ;;  %10311 = vmatprep.mubr.msk.bf16.mxu1 %vm11107_vm2, %v11105_v0 }
 0x123   : > { %7034 = vst.msk [vmem:[%s11408_s12 + $0x34] sm:$0xf] %vm7020_vm4, %v8972_v28  ;;  %v4628_v34 = vmax.f32 %v2745_v29, 0.0  ;;  %7276 = vst.msk [vmem:[%s11408_s12 + $0x3fc] sm:$0xf] %vm7020_vm4, %v9214_v30  ;;  %v4870_v35 = vmax.f32 %v3713_v31, 0.0 }
 0x124   : > { %v2747_v36 = vpop.f32.mrf.mxu0  ;;  %v3715_v38 = vpop.f32.mrf.mxu1 }
 0x125   : > { %v8973_v40 = vpack.c.bf16 %v4628_v34, %v4628_v34  ;;  %v2748_v41 = vadd.f32 %v11394_v60, %v2747_v36  ;;  %v9215_v42 = vpack.c.bf16 %v4870_v35, %v4870_v35  ;;  %v3716_v43 = vadd.f32 %v11394_v60, %v3715_v38 }
 0x126   : > { %v9730_v44 = vpop.f32.mrf.mxu0  ;;  %v10214_v45 = vpop.f32.mrf.mxu1 }
 0x127   : > { %7035 = vst.msk [vmem:[%s11408_s12 + $0x38] sm:$0xf] %vm7020_vm4, %v8973_v40  ;;  %v4629_v46 = vmax.f32 %v2748_v41, 0.0  ;;  %7277 = vst.msk [vmem:[%s11408_s12 + $0x400] sm:$0xf] %vm7020_vm4, %v9215_v42  ;;  %v4871_v47 = vmax.f32 %v3716_v43, 0.0 }
 0x128   : > { %v2752_v48 = vpop.f32.mrf.mxu0  ;;  %9828 = vmatmul.mubr.msk.bf16.gmra.mxu0 %vm1923_vm3, %v10834_v37  ;;  %v3720_v49 = vpop.f32.mrf.mxu1  ;;  %10312 = vmatmul.mubr.msk.bf16.gmra.mxu1 %vm1923_vm3, %v10835_v39  ;;  %v10840_v41 = vld [vmem:[%s11184_s5 + $0x118] sm:$0xff]   ;;  %v10841_v43 = vld [vmem:[%s11184_s5 + $0x4e0] sm:$0xff]  }
 0x129   : > { %v8974_v50 = vpack.c.bf16 %v4629_v46, %v4629_v46  ;;  %v2753_v51 = vadd.f32 %v11394_v60, %v2752_v48  ;;  %v9216_v52 = vpack.c.bf16 %v4871_v47, %v4871_v47  ;;  %v3721_v53 = vadd.f32 %v11394_v60, %v3720_v49  ;;  %9831 = vmatprep.mubr.msk.bf16.mxu0 %vm11107_vm2, %v11105_v0 }
 0x12a   : > { %v9733_v54 = vpop.f32.mrf.mxu0  ;;  %v10217_v55 = vpop.f32.mrf.mxu1  ;;  %10315 = vmatprep.mubr.msk.bf16.mxu1 %vm11107_vm2, %v11105_v0 }
 0x12b   : > { %7036 = vst.msk [vmem:[%s11408_s12 + $0x3c] sm:$0xf] %vm7020_vm4, %v8974_v50  ;;  %v4630_v56 = vmax.f32 %v2753_v51, 0.0  ;;  %7278 = vst.msk [vmem:[%s11408_s12 + $0x404] sm:$0xf] %vm7020_vm4, %v9216_v52  ;;  %v4872_v57 = vmax.f32 %v3721_v53, 0.0 }
 0x12c   : > { %v2755_v58 = vpop.f32.mrf.mxu0  ;;  %v3723_v61 = vpop.f32.mrf.mxu1 }
 0x12d   : > { %v8975_v63 = vpack.c.bf16 %v4630_v56, %v4630_v56  ;;  %v2756_v1 = vadd.f32 %v11394_v60, %v2755_v58  ;;  %v9217_v2 = vpack.c.bf16 %v4872_v57, %v4872_v57  ;;  %v3724_v3 = vadd.f32 %v11394_v60, %v3723_v61 }
 0x12e   : > { %v9734_v4 = vpop.f32.mrf.mxu0  ;;  %v10218_v5 = vpop.f32.mrf.mxu1 }
 0x12f   : > { %7037 = vst.msk [vmem:[%s11408_s12 + $0x40] sm:$0xf] %vm7020_vm4, %v8975_v63  ;;  %v4631_v6 = vmax.f32 %v2756_v1, 0.0  ;;  %7279 = vst.msk [vmem:[%s11408_s12 + $0x408] sm:$0xf] %vm7020_vm4, %v9217_v2  ;;  %v4873_v7 = vmax.f32 %v3724_v3, 0.0 }
 0x130   : > { %v2760_v8 = vpop.f32.mrf.mxu0  ;;  %9832 = vmatmul.mubr.msk.bf16.gmra.mxu0 %vm1923_vm3, %v10836_v59  ;;  %v3728_v9 = vpop.f32.mrf.mxu1  ;;  %10316 = vmatmul.mubr.msk.bf16.gmra.mxu1 %vm1923_vm3, %v10837_v62  ;;  %v10842_v1 = vld [vmem:[%s11184_s5 + $0x120] sm:$0xff]   ;;  %v10843_v3 = vld [vmem:[%s11184_s5 + $0x4e8] sm:$0xff]  }
 0x131   : > { %v8976_v10 = vpack.c.bf16 %v4631_v6, %v4631_v6  ;;  %v2761_v11 = vadd.f32 %v11394_v60, %v2760_v8  ;;  %v9218_v12 = vpack.c.bf16 %v4873_v7, %v4873_v7  ;;  %v3729_v13 = vadd.f32 %v11394_v60, %v3728_v9  ;;  %9835 = vmatprep.mubr.msk.bf16.mxu0 %vm11107_vm2, %v11105_v0 }
 0x132   : > { %v9737_v14 = vpop.f32.mrf.mxu0  ;;  %v10221_v15 = vpop.f32.mrf.mxu1  ;;  %10319 = vmatprep.mubr.msk.bf16.mxu1 %vm11107_vm2, %v11105_v0 }
 0x133   : > { %7038 = vst.msk [vmem:[%s11408_s12 + $0x44] sm:$0xf] %vm7020_vm4, %v8976_v10  ;;  %v4632_v16 = vmax.f32 %v2761_v11, 0.0  ;;  %7280 = vst.msk [vmem:[%s11408_s12 + $0x40c] sm:$0xf] %vm7020_vm4, %v9218_v12  ;;  %v4874_v17 = vmax.f32 %v3729_v13, 0.0 }
 0x134   : > { %v2763_v18 = vpop.f32.mrf.mxu0  ;;  %v3731_v20 = vpop.f32.mrf.mxu1 }
 0x135   : > { %v8977_v22 = vpack.c.bf16 %v4632_v16, %v4632_v16  ;;  %v2764_v23 = vadd.f32 %v11394_v60, %v2763_v18  ;;  %v9219_v24 = vpack.c.bf16 %v4874_v17, %v4874_v17  ;;  %v3732_v25 = vadd.f32 %v11394_v60, %v3731_v20 }
 0x136   : > { %v9738_v26 = vpop.f32.mrf.mxu0  ;;  %v10222_v27 = vpop.f32.mrf.mxu1 }
 0x137   : > { %7039 = vst.msk [vmem:[%s11408_s12 + $0x48] sm:$0xf] %vm7020_vm4, %v8977_v22  ;;  %v4633_v28 = vmax.f32 %v2764_v23, 0.0  ;;  %7281 = vst.msk [vmem:[%s11408_s12 + $0x410] sm:$0xf] %vm7020_vm4, %v9219_v24  ;;  %v4875_v29 = vmax.f32 %v3732_v25, 0.0 }
 0x138   : > { %v2768_v30 = vpop.f32.mrf.mxu0  ;;  %9836 = vmatmul.mubr.msk.bf16.gmra.mxu0 %vm1923_vm3, %v10838_v19  ;;  %v3736_v31 = vpop.f32.mrf.mxu1  ;;  %10320 = vmatmul.mubr.msk.bf16.gmra.mxu1 %vm1923_vm3, %v10839_v21  ;;  %v10844_v23 = vld [vmem:[%s11184_s5 + $0x128] sm:$0xff]   ;;  %v10845_v25 = vld [vmem:[%s11184_s5 + $0x4f0] sm:$0xff]  }
 0x139   : > { %v8978_v32 = vpack.c.bf16 %v4633_v28, %v4633_v28  ;;  %v2769_v33 = vadd.f32 %v11394_v60, %v2768_v30  ;;  %v9220_v34 = vpack.c.bf16 %v4875_v29, %v4875_v29  ;;  %v3737_v35 = vadd.f32 %v11394_v60, %v3736_v31  ;;  %9839 = vmatprep.mubr.msk.bf16.mxu0 %vm11107_vm2, %v11105_v0 }
 0x13a   : > { %v9741_v36 = vpop.f32.mrf.mxu0  ;;  %v10225_v37 = vpop.f32.mrf.mxu1  ;;  %10323 = vmatprep.mubr.msk.bf16.mxu1 %vm11107_vm2, %v11105_v0 }
 0x13b   : > { %7040 = vst.msk [vmem:[%s11408_s12 + $0x4c] sm:$0xf] %vm7020_vm4, %v8978_v32  ;;  %v4634_v38 = vmax.f32 %v2769_v33, 0.0  ;;  %7282 = vst.msk [vmem:[%s11408_s12 + $0x414] sm:$0xf] %vm7020_vm4, %v9220_v34  ;;  %v4876_v39 = vmax.f32 %v3737_v35, 0.0 }
 0x13c   : > { %v2771_v40 = vpop.f32.mrf.mxu0  ;;  %v3739_v42 = vpop.f32.mrf.mxu1 }
 0x13d   : > { %v8979_v44 = vpack.c.bf16 %v4634_v38, %v4634_v38  ;;  %v2772_v45 = vadd.f32 %v11394_v60, %v2771_v40  ;;  %v9221_v46 = vpack.c.bf16 %v4876_v39, %v4876_v39  ;;  %v3740_v47 = vadd.f32 %v11394_v60, %v3739_v42 }
 0x13e   : > { %v9742_v48 = vpop.f32.mrf.mxu0  ;;  %v10226_v49 = vpop.f32.mrf.mxu1 }
 0x13f   : > { %7041 = vst.msk [vmem:[%s11408_s12 + $0x50] sm:$0xf] %vm7020_vm4, %v8979_v44  ;;  %v4635_v50 = vmax.f32 %v2772_v45, 0.0  ;;  %7283 = vst.msk [vmem:[%s11408_s12 + $0x418] sm:$0xf] %vm7020_vm4, %v9221_v46  ;;  %v4877_v51 = vmax.f32 %v3740_v47, 0.0 }
 0x140   : > { %v2776_v52 = vpop.f32.mrf.mxu0  ;;  %9840 = vmatmul.mubr.msk.bf16.gmra.mxu0 %vm1923_vm3, %v10840_v41  ;;  %v3744_v53 = vpop.f32.mrf.mxu1  ;;  %10324 = vmatmul.mubr.msk.bf16.gmra.mxu1 %vm1923_vm3, %v10841_v43  ;;  %v10846_v45 = vld [vmem:[%s11184_s5 + $0x130] sm:$0xff]   ;;  %v10847_v47 = vld [vmem:[%s11184_s5 + $0x4f8] sm:$0xff]  }
 0x141   : > { %v8980_v54 = vpack.c.bf16 %v4635_v50, %v4635_v50  ;;  %v2777_v55 = vadd.f32 %v11394_v60, %v2776_v52  ;;  %v9222_v56 = vpack.c.bf16 %v4877_v51, %v4877_v51  ;;  %v3745_v57 = vadd.f32 %v11394_v60, %v3744_v53  ;;  %9843 = vmatprep.mubr.msk.bf16.mxu0 %vm11107_vm2, %v11105_v0 }
 0x142   : > { %v9745_v58 = vpop.f32.mrf.mxu0  ;;  %v10229_v59 = vpop.f32.mrf.mxu1  ;;  %10327 = vmatprep.mubr.msk.bf16.mxu1 %vm11107_vm2, %v11105_v0 }
 0x143   : > { %7042 = vst.msk [vmem:[%s11408_s12 + $0x54] sm:$0xf] %vm7020_vm4, %v8980_v54  ;;  %v4636_v61 = vmax.f32 %v2777_v55, 0.0  ;;  %7284 = vst.msk [vmem:[%s11408_s12 + $0x41c] sm:$0xf] %vm7020_vm4, %v9222_v56  ;;  %v4878_v62 = vmax.f32 %v3745_v57, 0.0 }
 0x144   : > { %v2779_v63 = vpop.f32.mrf.mxu0  ;;  %v3747_v2 = vpop.f32.mrf.mxu1 }
 0x145   : > { %v8981_v4 = vpack.c.bf16 %v4636_v61, %v4636_v61  ;;  %v2780_v5 = vadd.f32 %v11394_v60, %v2779_v63  ;;  %v9223_v6 = vpack.c.bf16 %v4878_v62, %v4878_v62  ;;  %v3748_v7 = vadd.f32 %v11394_v60, %v3747_v2 }
 0x146   : > { %v9746_v8 = vpop.f32.mrf.mxu0  ;;  %v10230_v9 = vpop.f32.mrf.mxu1 }
 0x147   : > { %7043 = vst.msk [vmem:[%s11408_s12 + $0x58] sm:$0xf] %vm7020_vm4, %v8981_v4  ;;  %v4637_v10 = vmax.f32 %v2780_v5, 0.0  ;;  %7285 = vst.msk [vmem:[%s11408_s12 + $0x420] sm:$0xf] %vm7020_vm4, %v9223_v6  ;;  %v4879_v11 = vmax.f32 %v3748_v7, 0.0 }
 0x148   : > { %v2784_v12 = vpop.f32.mrf.mxu0  ;;  %9844 = vmatmul.mubr.msk.bf16.gmra.mxu0 %vm1923_vm3, %v10842_v1  ;;  %v3752_v13 = vpop.f32.mrf.mxu1  ;;  %10328 = vmatmul.mubr.msk.bf16.gmra.mxu1 %vm1923_vm3, %v10843_v3  ;;  %v10848_v5 = vld [vmem:[%s11184_s5 + $0x138] sm:$0xff]   ;;  %v10849_v7 = vld [vmem:[%s11184_s5 + $0x500] sm:$0xff]  }
 0x149   : > { %v8982_v14 = vpack.c.bf16 %v4637_v10, %v4637_v10  ;;  %v2785_v15 = vadd.f32 %v11394_v60, %v2784_v12  ;;  %v9224_v16 = vpack.c.bf16 %v4879_v11, %v4879_v11  ;;  %v3753_v17 = vadd.f32 %v11394_v60, %v3752_v13  ;;  %9847 = vmatprep.mubr.msk.bf16.mxu0 %vm11107_vm2, %v11105_v0 }
 0x14a   : > { %v9749_v18 = vpop.f32.mrf.mxu0  ;;  %v10233_v19 = vpop.f32.mrf.mxu1  ;;  %10331 = vmatprep.mubr.msk.bf16.mxu1 %vm11107_vm2, %v11105_v0 }
 0x14b   : > { %7044 = vst.msk [vmem:[%s11408_s12 + $0x5c] sm:$0xf] %vm7020_vm4, %v8982_v14  ;;  %v4638_v20 = vmax.f32 %v2785_v15, 0.0  ;;  %7286 = vst.msk [vmem:[%s11408_s12 + $0x424] sm:$0xf] %vm7020_vm4, %v9224_v16  ;;  %v4880_v21 = vmax.f32 %v3753_v17, 0.0 }
 0x14c   : > { %v2787_v22 = vpop.f32.mrf.mxu0  ;;  %v3755_v24 = vpop.f32.mrf.mxu1 }
 0x14d   : > { %v8983_v26 = vpack.c.bf16 %v4638_v20, %v4638_v20  ;;  %v2788_v27 = vadd.f32 %v11394_v60, %v2787_v22  ;;  %v9225_v28 = vpack.c.bf16 %v4880_v21, %v4880_v21  ;;  %v3756_v29 = vadd.f32 %v11394_v60, %v3755_v24 }
 0x14e   : > { %v9750_v30 = vpop.f32.mrf.mxu0  ;;  %v10234_v31 = vpop.f32.mrf.mxu1 }
 0x14f   : > { %7045 = vst.msk [vmem:[%s11408_s12 + $0x60] sm:$0xf] %vm7020_vm4, %v8983_v26  ;;  %v4639_v32 = vmax.f32 %v2788_v27, 0.0  ;;  %7287 = vst.msk [vmem:[%s11408_s12 + $0x428] sm:$0xf] %vm7020_vm4, %v9225_v28  ;;  %v4881_v33 = vmax.f32 %v3756_v29, 0.0 }
 0x150   : > { %v2792_v34 = vpop.f32.mrf.mxu0  ;;  %9848 = vmatmul.mubr.msk.bf16.gmra.mxu0 %vm1923_vm3, %v10844_v23  ;;  %v3760_v35 = vpop.f32.mrf.mxu1  ;;  %10332 = vmatmul.mubr.msk.bf16.gmra.mxu1 %vm1923_vm3, %v10845_v25  ;;  %v10850_v27 = vld [vmem:[%s11184_s5 + $0x140] sm:$0xff]   ;;  %v10851_v29 = vld [vmem:[%s11184_s5 + $0x508] sm:$0xff]  }
 0x151   : > { %v8984_v36 = vpack.c.bf16 %v4639_v32, %v4639_v32  ;;  %v2793_v37 = vadd.f32 %v11394_v60, %v2792_v34  ;;  %v9226_v38 = vpack.c.bf16 %v4881_v33, %v4881_v33  ;;  %v3761_v39 = vadd.f32 %v11394_v60, %v3760_v35  ;;  %9851 = vmatprep.mubr.msk.bf16.mxu0 %vm11107_vm2, %v11105_v0 }
 0x152   : > { %v9753_v40 = vpop.f32.mrf.mxu0  ;;  %v10237_v41 = vpop.f32.mrf.mxu1  ;;  %10335 = vmatprep.mubr.msk.bf16.mxu1 %vm11107_vm2, %v11105_v0 }
 0x153   : > { %7046 = vst.msk [vmem:[%s11408_s12 + $0x64] sm:$0xf] %vm7020_vm4, %v8984_v36  ;;  %v4640_v42 = vmax.f32 %v2793_v37, 0.0  ;;  %7288 = vst.msk [vmem:[%s11408_s12 + $0x42c] sm:$0xf] %vm7020_vm4, %v9226_v38  ;;  %v4882_v43 = vmax.f32 %v3761_v39, 0.0 }
 0x154   : > { %v2795_v44 = vpop.f32.mrf.mxu0  ;;  %v3763_v46 = vpop.f32.mrf.mxu1 }
 0x155   : > { %v8985_v48 = vpack.c.bf16 %v4640_v42, %v4640_v42  ;;  %v2796_v49 = vadd.f32 %v11394_v60, %v2795_v44  ;;  %v9227_v50 = vpack.c.bf16 %v4882_v43, %v4882_v43  ;;  %v3764_v51 = vadd.f32 %v11394_v60, %v3763_v46 }
 0x156   : > { %v9754_v52 = vpop.f32.mrf.mxu0  ;;  %v10238_v53 = vpop.f32.mrf.mxu1 }
 0x157   : > { %7047 = vst.msk [vmem:[%s11408_s12 + $0x68] sm:$0xf] %vm7020_vm4, %v8985_v48  ;;  %v4641_v54 = vmax.f32 %v2796_v49, 0.0  ;;  %7289 = vst.msk [vmem:[%s11408_s12 + $0x430] sm:$0xf] %vm7020_vm4, %v9227_v50  ;;  %v4883_v55 = vmax.f32 %v3764_v51, 0.0 }
 0x158   : > { %v2800_v56 = vpop.f32.mrf.mxu0  ;;  %9852 = vmatmul.mubr.msk.bf16.gmra.mxu0 %vm1923_vm3, %v10846_v45  ;;  %v3768_v57 = vpop.f32.mrf.mxu1  ;;  %10336 = vmatmul.mubr.msk.bf16.gmra.mxu1 %vm1923_vm3, %v10847_v47  ;;  %v10852_v49 = vld [vmem:[%s11184_s5 + $0x148] sm:$0xff]   ;;  %v10853_v51 = vld [vmem:[%s11184_s5 + $0x510] sm:$0xff]  }
 0x159   : > { %v8986_v58 = vpack.c.bf16 %v4641_v54, %v4641_v54  ;;  %v2801_v59 = vadd.f32 %v11394_v60, %v2800_v56  ;;  %v9228_v61 = vpack.c.bf16 %v4883_v55, %v4883_v55  ;;  %v3769_v62 = vadd.f32 %v11394_v60, %v3768_v57  ;;  %9855 = vmatprep.mubr.msk.bf16.mxu0 %vm11107_vm2, %v11105_v0 }
 0x15a   : > { %v9757_v63 = vpop.f32.mrf.mxu0  ;;  %v10241_v1 = vpop.f32.mrf.mxu1  ;;  %10339 = vmatprep.mubr.msk.bf16.mxu1 %vm11107_vm2, %v11105_v0 }
 0x15b   : > { %7048 = vst.msk [vmem:[%s11408_s12 + $0x6c] sm:$0xf] %vm7020_vm4, %v8986_v58  ;;  %v4642_v2 = vmax.f32 %v2801_v59, 0.0  ;;  %7290 = vst.msk [vmem:[%s11408_s12 + $0x434] sm:$0xf] %vm7020_vm4, %v9228_v61  ;;  %v4884_v3 = vmax.f32 %v3769_v62, 0.0 }
 0x15c   : > { %v2803_v4 = vpop.f32.mrf.mxu0  ;;  %v3771_v6 = vpop.f32.mrf.mxu1 }
 0x15d   : > { %v8987_v8 = vpack.c.bf16 %v4642_v2, %v4642_v2  ;;  %v2804_v9 = vadd.f32 %v11394_v60, %v2803_v4  ;;  %v9229_v10 = vpack.c.bf16 %v4884_v3, %v4884_v3  ;;  %v3772_v11 = vadd.f32 %v11394_v60, %v3771_v6 }
 0x15e   : > { %v9758_v12 = vpop.f32.mrf.mxu0  ;;  %v10242_v13 = vpop.f32.mrf.mxu1 }
 0x15f   : > { %7049 = vst.msk [vmem:[%s11408_s12 + $0x70] sm:$0xf] %vm7020_vm4, %v8987_v8  ;;  %v4643_v14 = vmax.f32 %v2804_v9, 0.0  ;;  %7291 = vst.msk [vmem:[%s11408_s12 + $0x438] sm:$0xf] %vm7020_vm4, %v9229_v10  ;;  %v4885_v15 = vmax.f32 %v3772_v11, 0.0 }
 0x160   : > { %v2808_v16 = vpop.f32.mrf.mxu0  ;;  %9856 = vmatmul.mubr.msk.bf16.gmra.mxu0 %vm1923_vm3, %v10848_v5  ;;  %v3776_v17 = vpop.f32.mrf.mxu1  ;;  %10340 = vmatmul.mubr.msk.bf16.gmra.mxu1 %vm1923_vm3, %v10849_v7  ;;  %v10854_v9 = vld [vmem:[%s11184_s5 + $0x150] sm:$0xff]   ;;  %v10855_v11 = vld [vmem:[%s11184_s5 + $0x518] sm:$0xff]  }
 0x161   : > { %v8988_v18 = vpack.c.bf16 %v4643_v14, %v4643_v14  ;;  %v2809_v19 = vadd.f32 %v11394_v60, %v2808_v16  ;;  %v9230_v20 = vpack.c.bf16 %v4885_v15, %v4885_v15  ;;  %v3777_v21 = vadd.f32 %v11394_v60, %v3776_v17  ;;  %9859 = vmatprep.mubr.msk.bf16.mxu0 %vm11107_vm2, %v11105_v0 }
 0x162   : > { %v9761_v22 = vpop.f32.mrf.mxu0  ;;  %v10245_v23 = vpop.f32.mrf.mxu1  ;;  %10343 = vmatprep.mubr.msk.bf16.mxu1 %vm11107_vm2, %v11105_v0 }
 0x163   : > { %7050 = vst.msk [vmem:[%s11408_s12 + $0x74] sm:$0xf] %vm7020_vm4, %v8988_v18  ;;  %v4644_v24 = vmax.f32 %v2809_v19, 0.0  ;;  %7292 = vst.msk [vmem:[%s11408_s12 + $0x43c] sm:$0xf] %vm7020_vm4, %v9230_v20  ;;  %v4886_v25 = vmax.f32 %v3777_v21, 0.0 }
 0x164   : > { %v2811_v26 = vpop.f32.mrf.mxu0  ;;  %v3779_v28 = vpop.f32.mrf.mxu1 }
 0x165   : > { %v8989_v30 = vpack.c.bf16 %v4644_v24, %v4644_v24  ;;  %v2812_v31 = vadd.f32 %v11394_v60, %v2811_v26  ;;  %v9231_v32 = vpack.c.bf16 %v4886_v25, %v4886_v25  ;;  %v3780_v33 = vadd.f32 %v11394_v60, %v3779_v28 }
 0x166   : > { %v9762_v34 = vpop.f32.mrf.mxu0  ;;  %v10246_v35 = vpop.f32.mrf.mxu1 }
 0x167   : > { %7051 = vst.msk [vmem:[%s11408_s12 + $0x78] sm:$0xf] %vm7020_vm4, %v8989_v30  ;;  %v4645_v36 = vmax.f32 %v2812_v31, 0.0  ;;  %7293 = vst.msk [vmem:[%s11408_s12 + $0x440] sm:$0xf] %vm7020_vm4, %v9231_v32  ;;  %v4887_v37 = vmax.f32 %v3780_v33, 0.0 }
 0x168   : > { %v2816_v38 = vpop.f32.mrf.mxu0  ;;  %9860 = vmatmul.mubr.msk.bf16.gmra.mxu0 %vm1923_vm3, %v10850_v27  ;;  %v3784_v39 = vpop.f32.mrf.mxu1  ;;  %10344 = vmatmul.mubr.msk.bf16.gmra.mxu1 %vm1923_vm3, %v10851_v29  ;;  %v10856_v31 = vld [vmem:[%s11184_s5 + $0x158] sm:$0xff]   ;;  %v10857_v33 = vld [vmem:[%s11184_s5 + $0x520] sm:$0xff]  }
 0x169   : > { %v8990_v40 = vpack.c.bf16 %v4645_v36, %v4645_v36  ;;  %v2817_v41 = vadd.f32 %v11394_v60, %v2816_v38  ;;  %v9232_v42 = vpack.c.bf16 %v4887_v37, %v4887_v37  ;;  %v3785_v43 = vadd.f32 %v11394_v60, %v3784_v39  ;;  %9863 = vmatprep.mubr.msk.bf16.mxu0 %vm11107_vm2, %v11105_v0 }
 0x16a   : > { %v9765_v44 = vpop.f32.mrf.mxu0  ;;  %v10249_v45 = vpop.f32.mrf.mxu1  ;;  %10347 = vmatprep.mubr.msk.bf16.mxu1 %vm11107_vm2, %v11105_v0 }
 0x16b   : > { %7052 = vst.msk [vmem:[%s11408_s12 + $0x7c] sm:$0xf] %vm7020_vm4, %v8990_v40  ;;  %v4646_v46 = vmax.f32 %v2817_v41, 0.0  ;;  %7294 = vst.msk [vmem:[%s11408_s12 + $0x444] sm:$0xf] %vm7020_vm4, %v9232_v42  ;;  %v4888_v47 = vmax.f32 %v3785_v43, 0.0 }
 0x16c   : > { %v2819_v48 = vpop.f32.mrf.mxu0  ;;  %v3787_v50 = vpop.f32.mrf.mxu1 }
 0x16d   : > { %v8991_v52 = vpack.c.bf16 %v4646_v46, %v4646_v46  ;;  %v2820_v53 = vadd.f32 %v11394_v60, %v2819_v48  ;;  %v9233_v54 = vpack.c.bf16 %v4888_v47, %v4888_v47  ;;  %v3788_v55 = vadd.f32 %v11394_v60, %v3787_v50  ;;  %v11739_v60 = vld [vmem:[%s13838_s2] ss:$0 sm:$0xff] }
 0x16e   : > { %v9766_v56 = vpop.f32.mrf.mxu0  ;;  %v10250_v57 = vpop.f32.mrf.mxu1 }
 0x16f   : > { %7053 = vst.msk [vmem:[%s11408_s12 + $0x80] sm:$0xf] %vm7020_vm4, %v8991_v52  ;;  %v4647_v58 = vmax.f32 %v2820_v53, 0.0  ;;  %7295 = vst.msk [vmem:[%s11408_s12 + $0x448] sm:$0xf] %vm7020_vm4, %v9233_v54  ;;  %v4889_v59 = vmax.f32 %v3788_v55, 0.0 }
 0x170   : > { %v2824_v61 = vpop.f32.mrf.mxu0  ;;  %9864 = vmatmul.mubr.msk.bf16.gmra.mxu0 %vm1923_vm3, %v10852_v49  ;;  %v3792_v62 = vpop.f32.mrf.mxu1  ;;  %10348 = vmatmul.mubr.msk.bf16.gmra.mxu1 %vm1923_vm3, %v10853_v51  ;;  %v10858_v53 = vld [vmem:[%s11184_s5 + $0x160] sm:$0xff]   ;;  %v10859_v55 = vld [vmem:[%s11184_s5 + $0x528] sm:$0xff]  }
 0x171   : > { %v8992_v63 = vpack.c.bf16 %v4647_v58, %v4647_v58  ;;  %v2825_v1 = vadd.f32 %v11739_v60, %v2824_v61  ;;  %v9234_v2 = vpack.c.bf16 %v4889_v59, %v4889_v59  ;;  %v3793_v3 = vadd.f32 %v11739_v60, %v3792_v62  ;;  %9867 = vmatprep.mubr.msk.bf16.mxu0 %vm11107_vm2, %v11105_v0 }
 0x172   : > { %v9769_v4 = vpop.f32.mrf.mxu0  ;;  %v10253_v5 = vpop.f32.mrf.mxu1  ;;  %10351 = vmatprep.mubr.msk.bf16.mxu1 %vm11107_vm2, %v11105_v0 }
 0x173   : > { %7054 = vst.msk [vmem:[%s11408_s12 + $0x84] sm:$0xf] %vm7020_vm4, %v8992_v63  ;;  %v4648_v6 = vmax.f32 %v2825_v1, 0.0  ;;  %7296 = vst.msk [vmem:[%s11408_s12 + $0x44c] sm:$0xf] %vm7020_vm4, %v9234_v2  ;;  %v4890_v7 = vmax.f32 %v3793_v3, 0.0 }
 0x174   : > { %v2827_v8 = vpop.f32.mrf.mxu0  ;;  %v3795_v10 = vpop.f32.mrf.mxu1 }
 0x175   : > { %v8993_v12 = vpack.c.bf16 %v4648_v6, %v4648_v6  ;;  %v2828_v13 = vadd.f32 %v11739_v60, %v2827_v8  ;;  %v9235_v14 = vpack.c.bf16 %v4890_v7, %v4890_v7  ;;  %v3796_v15 = vadd.f32 %v11739_v60, %v3795_v10 }
 0x176   : > { %v9770_v16 = vpop.f32.mrf.mxu0  ;;  %v10254_v17 = vpop.f32.mrf.mxu1 }
 0x177   : > { %7055 = vst.msk [vmem:[%s11408_s12 + $0x88] sm:$0xf] %vm7020_vm4, %v8993_v12  ;;  %v4649_v18 = vmax.f32 %v2828_v13, 0.0  ;;  %7297 = vst.msk [vmem:[%s11408_s12 + $0x450] sm:$0xf] %vm7020_vm4, %v9235_v14  ;;  %v4891_v19 = vmax.f32 %v3796_v15, 0.0 }
 0x178   : > { %v2832_v20 = vpop.f32.mrf.mxu0  ;;  %9868 = vmatmul.mubr.msk.bf16.gmra.mxu0 %vm1923_vm3, %v10854_v9  ;;  %v3800_v21 = vpop.f32.mrf.mxu1  ;;  %10352 = vmatmul.mubr.msk.bf16.gmra.mxu1 %vm1923_vm3, %v10855_v11  ;;  %v10860_v13 = vld [vmem:[%s11184_s5 + $0x168] sm:$0xff]   ;;  %v10861_v15 = vld [vmem:[%s11184_s5 + $0x530] sm:$0xff]  }
 0x179   : > { %v8994_v22 = vpack.c.bf16 %v4649_v18, %v4649_v18  ;;  %v2833_v23 = vadd.f32 %v11739_v60, %v2832_v20  ;;  %v9236_v24 = vpack.c.bf16 %v4891_v19, %v4891_v19  ;;  %v3801_v25 = vadd.f32 %v11739_v60, %v3800_v21  ;;  %9871 = vmatprep.mubr.msk.bf16.mxu0 %vm11107_vm2, %v11105_v0 }
 0x17a   : > { %v9773_v26 = vpop.f32.mrf.mxu0  ;;  %v10257_v27 = vpop.f32.mrf.mxu1  ;;  %10355 = vmatprep.mubr.msk.bf16.mxu1 %vm11107_vm2, %v11105_v0 }
 0x17b   : > { %7056 = vst.msk [vmem:[%s11408_s12 + $0x8c] sm:$0xf] %vm7020_vm4, %v8994_v22  ;;  %v4650_v28 = vmax.f32 %v2833_v23, 0.0  ;;  %7298 = vst.msk [vmem:[%s11408_s12 + $0x454] sm:$0xf] %vm7020_vm4, %v9236_v24  ;;  %v4892_v29 = vmax.f32 %v3801_v25, 0.0 }
 0x17c   : > { %v2835_v30 = vpop.f32.mrf.mxu0  ;;  %v3803_v32 = vpop.f32.mrf.mxu1 }
 0x17d   : > { %v8995_v34 = vpack.c.bf16 %v4650_v28, %v4650_v28  ;;  %v2836_v35 = vadd.f32 %v11739_v60, %v2835_v30  ;;  %v9237_v36 = vpack.c.bf16 %v4892_v29, %v4892_v29  ;;  %v3804_v37 = vadd.f32 %v11739_v60, %v3803_v32 }
 0x17e   : > { %v9774_v38 = vpop.f32.mrf.mxu0  ;;  %v10258_v39 = vpop.f32.mrf.mxu1 }
 0x17f   : > { %7057 = vst.msk [vmem:[%s11408_s12 + $0x90] sm:$0xf] %vm7020_vm4, %v8995_v34  ;;  %v4651_v40 = vmax.f32 %v2836_v35, 0.0  ;;  %7299 = vst.msk [vmem:[%s11408_s12 + $0x458] sm:$0xf] %vm7020_vm4, %v9237_v36  ;;  %v4893_v41 = vmax.f32 %v3804_v37, 0.0 }
 0x180   : > { %v2840_v42 = vpop.f32.mrf.mxu0  ;;  %9872 = vmatmul.mubr.msk.bf16.gmra.mxu0 %vm1923_vm3, %v10856_v31  ;;  %v3808_v43 = vpop.f32.mrf.mxu1  ;;  %10356 = vmatmul.mubr.msk.bf16.gmra.mxu1 %vm1923_vm3, %v10857_v33  ;;  %v10862_v35 = vld [vmem:[%s11184_s5 + $0x170] sm:$0xff]   ;;  %v10863_v37 = vld [vmem:[%s11184_s5 + $0x538] sm:$0xff]  }
 0x181   : > { %v8996_v44 = vpack.c.bf16 %v4651_v40, %v4651_v40  ;;  %v2841_v45 = vadd.f32 %v11739_v60, %v2840_v42  ;;  %v9238_v46 = vpack.c.bf16 %v4893_v41, %v4893_v41  ;;  %v3809_v47 = vadd.f32 %v11739_v60, %v3808_v43  ;;  %9875 = vmatprep.mubr.msk.bf16.mxu0 %vm11107_vm2, %v11105_v0 }
 0x182   : > { %v9777_v48 = vpop.f32.mrf.mxu0  ;;  %v10261_v49 = vpop.f32.mrf.mxu1  ;;  %10359 = vmatprep.mubr.msk.bf16.mxu1 %vm11107_vm2, %v11105_v0 }
 0x183   : > { %7058 = vst.msk [vmem:[%s11408_s12 + $0x94] sm:$0xf] %vm7020_vm4, %v8996_v44  ;;  %v4652_v50 = vmax.f32 %v2841_v45, 0.0  ;;  %7300 = vst.msk [vmem:[%s11408_s12 + $0x45c] sm:$0xf] %vm7020_vm4, %v9238_v46  ;;  %v4894_v51 = vmax.f32 %v3809_v47, 0.0 }
 0x184   : > { %v2843_v52 = vpop.f32.mrf.mxu0  ;;  %v3811_v54 = vpop.f32.mrf.mxu1 }
 0x185   : > { %v8997_v56 = vpack.c.bf16 %v4652_v50, %v4652_v50  ;;  %v2844_v57 = vadd.f32 %v11739_v60, %v2843_v52  ;;  %v9239_v58 = vpack.c.bf16 %v4894_v51, %v4894_v51  ;;  %v3812_v59 = vadd.f32 %v11739_v60, %v3811_v54 }
 0x186   : > { %v9778_v61 = vpop.f32.mrf.mxu0  ;;  %v10262_v62 = vpop.f32.mrf.mxu1 }
 0x187   : > { %7059 = vst.msk [vmem:[%s11408_s12 + $0x98] sm:$0xf] %vm7020_vm4, %v8997_v56  ;;  %v4653_v63 = vmax.f32 %v2844_v57, 0.0  ;;  %7301 = vst.msk [vmem:[%s11408_s12 + $0x460] sm:$0xf] %vm7020_vm4, %v9239_v58  ;;  %v4895_v1 = vmax.f32 %v3812_v59, 0.0 }
 0x188   : > { %v2848_v2 = vpop.f32.mrf.mxu0  ;;  %9876 = vmatmul.mubr.msk.bf16.gmra.mxu0 %vm1923_vm3, %v10858_v53  ;;  %v3816_v3 = vpop.f32.mrf.mxu1  ;;  %10360 = vmatmul.mubr.msk.bf16.gmra.mxu1 %vm1923_vm3, %v10859_v55  ;;  %v10864_v57 = vld [vmem:[%s11184_s5 + $0x178] sm:$0xff]   ;;  %v10865_v59 = vld [vmem:[%s11184_s5 + $0x540] sm:$0xff]  }
 0x189   : > { %v8998_v4 = vpack.c.bf16 %v4653_v63, %v4653_v63  ;;  %v2849_v5 = vadd.f32 %v11739_v60, %v2848_v2  ;;  %v9240_v6 = vpack.c.bf16 %v4895_v1, %v4895_v1  ;;  %v3817_v7 = vadd.f32 %v11739_v60, %v3816_v3  ;;  %9879 = vmatprep.mubr.msk.bf16.mxu0 %vm11107_vm2, %v11105_v0 }
 0x18a   : > { %v9781_v8 = vpop.f32.mrf.mxu0  ;;  %v10265_v9 = vpop.f32.mrf.mxu1  ;;  %10363 = vmatprep.mubr.msk.bf16.mxu1 %vm11107_vm2, %v11105_v0 }
 0x18b   : > { %7060 = vst.msk [vmem:[%s11408_s12 + $0x9c] sm:$0xf] %vm7020_vm4, %v8998_v4  ;;  %v4654_v10 = vmax.f32 %v2849_v5, 0.0  ;;  %7302 = vst.msk [vmem:[%s11408_s12 + $0x464] sm:$0xf] %vm7020_vm4, %v9240_v6  ;;  %v4896_v11 = vmax.f32 %v3817_v7, 0.0 }
 0x18c   : > { %v2851_v12 = vpop.f32.mrf.mxu0  ;;  %v3819_v14 = vpop.f32.mrf.mxu1 }
 0x18d   : > { %v8999_v16 = vpack.c.bf16 %v4654_v10, %v4654_v10  ;;  %v2852_v17 = vadd.f32 %v11739_v60, %v2851_v12  ;;  %v9241_v18 = vpack.c.bf16 %v4896_v11, %v4896_v11  ;;  %v3820_v19 = vadd.f32 %v11739_v60, %v3819_v14 }
 0x18e   : > { %v9782_v20 = vpop.f32.mrf.mxu0  ;;  %v10266_v21 = vpop.f32.mrf.mxu1 }
 0x18f   : > { %7061 = vst.msk [vmem:[%s11408_s12 + $0xa0] sm:$0xf] %vm7020_vm4, %v8999_v16  ;;  %v4655_v22 = vmax.f32 %v2852_v17, 0.0  ;;  %7303 = vst.msk [vmem:[%s11408_s12 + $0x468] sm:$0xf] %vm7020_vm4, %v9241_v18  ;;  %v4897_v23 = vmax.f32 %v3820_v19, 0.0 }
 0x190   : > { %v2856_v24 = vpop.f32.mrf.mxu0  ;;  %9880 = vmatmul.mubr.msk.bf16.gmra.mxu0 %vm1923_vm3, %v10860_v13  ;;  %v3824_v25 = vpop.f32.mrf.mxu1  ;;  %10364 = vmatmul.mubr.msk.bf16.gmra.mxu1 %vm1923_vm3, %v10861_v15  ;;  %v10866_v17 = vld [vmem:[%s11184_s5 + $0x180] sm:$0xff]   ;;  %v10867_v19 = vld [vmem:[%s11184_s5 + $0x548] sm:$0xff]  }
 0x191   : > { %v9000_v26 = vpack.c.bf16 %v4655_v22, %v4655_v22  ;;  %v2857_v27 = vadd.f32 %v11739_v60, %v2856_v24  ;;  %v9242_v28 = vpack.c.bf16 %v4897_v23, %v4897_v23  ;;  %v3825_v29 = vadd.f32 %v11739_v60, %v3824_v25  ;;  %9883 = vmatprep.mubr.msk.bf16.mxu0 %vm11107_vm2, %v11105_v0 }
 0x192   : > { %v9785_v30 = vpop.f32.mrf.mxu0  ;;  %v10269_v31 = vpop.f32.mrf.mxu1  ;;  %10367 = vmatprep.mubr.msk.bf16.mxu1 %vm11107_vm2, %v11105_v0 }
 0x193   : > { %7062 = vst.msk [vmem:[%s11408_s12 + $0xa4] sm:$0xf] %vm7020_vm4, %v9000_v26  ;;  %v4656_v32 = vmax.f32 %v2857_v27, 0.0  ;;  %7304 = vst.msk [vmem:[%s11408_s12 + $0x46c] sm:$0xf] %vm7020_vm4, %v9242_v28  ;;  %v4898_v33 = vmax.f32 %v3825_v29, 0.0 }
 0x194   : > { %v2859_v34 = vpop.f32.mrf.mxu0  ;;  %v3827_v36 = vpop.f32.mrf.mxu1 }
 0x195   : > { %v9001_v38 = vpack.c.bf16 %v4656_v32, %v4656_v32  ;;  %v2860_v39 = vadd.f32 %v11739_v60, %v2859_v34  ;;  %v9243_v40 = vpack.c.bf16 %v4898_v33, %v4898_v33  ;;  %v3828_v41 = vadd.f32 %v11739_v60, %v3827_v36 }
 0x196   : > { %v9786_v42 = vpop.f32.mrf.mxu0  ;;  %v10270_v43 = vpop.f32.mrf.mxu1 }
 0x197   : > { %7063 = vst.msk [vmem:[%s11408_s12 + $0xa8] sm:$0xf] %vm7020_vm4, %v9001_v38  ;;  %v4657_v44 = vmax.f32 %v2860_v39, 0.0  ;;  %7305 = vst.msk [vmem:[%s11408_s12 + $0x470] sm:$0xf] %vm7020_vm4, %v9243_v40  ;;  %v4899_v45 = vmax.f32 %v3828_v41, 0.0 }
 0x198   : > { %v2864_v46 = vpop.f32.mrf.mxu0  ;;  %9884 = vmatmul.mubr.msk.bf16.gmra.mxu0 %vm1923_vm3, %v10862_v35  ;;  %v3832_v47 = vpop.f32.mrf.mxu1  ;;  %10368 = vmatmul.mubr.msk.bf16.gmra.mxu1 %vm1923_vm3, %v10863_v37  ;;  %v10868_v39 = vld [vmem:[%s11184_s5 + $0x188] sm:$0xff]   ;;  %v10869_v41 = vld [vmem:[%s11184_s5 + $0x550] sm:$0xff]  }
 0x199   : > { %v9002_v48 = vpack.c.bf16 %v4657_v44, %v4657_v44  ;;  %v2865_v49 = vadd.f32 %v11739_v60, %v2864_v46  ;;  %v9244_v50 = vpack.c.bf16 %v4899_v45, %v4899_v45  ;;  %v3833_v51 = vadd.f32 %v11739_v60, %v3832_v47  ;;  %9887 = vmatprep.mubr.msk.bf16.mxu0 %vm11107_vm2, %v11105_v0 }
 0x19a   : > { %v9789_v52 = vpop.f32.mrf.mxu0  ;;  %v10273_v53 = vpop.f32.mrf.mxu1  ;;  %10371 = vmatprep.mubr.msk.bf16.mxu1 %vm11107_vm2, %v11105_v0 }
 0x19b   : > { %7064 = vst.msk [vmem:[%s11408_s12 + $0xac] sm:$0xf] %vm7020_vm4, %v9002_v48  ;;  %v4658_v54 = vmax.f32 %v2865_v49, 0.0  ;;  %7306 = vst.msk [vmem:[%s11408_s12 + $0x474] sm:$0xf] %vm7020_vm4, %v9244_v50  ;;  %v4900_v55 = vmax.f32 %v3833_v51, 0.0 }
 0x19c   : > { %v2867_v56 = vpop.f32.mrf.mxu0  ;;  %v3835_v58 = vpop.f32.mrf.mxu1 }
 0x19d   : > { %v9003_v61 = vpack.c.bf16 %v4658_v54, %v4658_v54  ;;  %v2868_v62 = vadd.f32 %v11739_v60, %v2867_v56  ;;  %v9245_v63 = vpack.c.bf16 %v4900_v55, %v4900_v55  ;;  %v3836_v1 = vadd.f32 %v11739_v60, %v3835_v58 }
 0x19e   : > { %v9790_v2 = vpop.f32.mrf.mxu0  ;;  %v10274_v3 = vpop.f32.mrf.mxu1 }
 0x19f   : > { %7065 = vst.msk [vmem:[%s11408_s12 + $0xb0] sm:$0xf] %vm7020_vm4, %v9003_v61  ;;  %v4659_v4 = vmax.f32 %v2868_v62, 0.0  ;;  %7307 = vst.msk [vmem:[%s11408_s12 + $0x478] sm:$0xf] %vm7020_vm4, %v9245_v63  ;;  %v4901_v5 = vmax.f32 %v3836_v1, 0.0 }
 0x1a0   : > { %v2872_v6 = vpop.f32.mrf.mxu0  ;;  %9888 = vmatmul.mubr.msk.bf16.gmra.mxu0 %vm1923_vm3, %v10864_v57  ;;  %v3840_v7 = vpop.f32.mrf.mxu1  ;;  %10372 = vmatmul.mubr.msk.bf16.gmra.mxu1 %vm1923_vm3, %v10865_v59  ;;  %v10870_v62 = vld [vmem:[%s11184_s5 + $0x190] sm:$0xff]   ;;  %v10871_v1 = vld [vmem:[%s11184_s5 + $0x558] sm:$0xff]  }
 0x1a1   : > { %v9004_v8 = vpack.c.bf16 %v4659_v4, %v4659_v4  ;;  %v2873_v9 = vadd.f32 %v11739_v60, %v2872_v6  ;;  %v9246_v10 = vpack.c.bf16 %v4901_v5, %v4901_v5  ;;  %v3841_v11 = vadd.f32 %v11739_v60, %v3840_v7  ;;  %9891 = vmatprep.mubr.msk.bf16.mxu0 %vm11107_vm2, %v11105_v0 }
 0x1a2   : > { %v9793_v12 = vpop.f32.mrf.mxu0  ;;  %v10277_v13 = vpop.f32.mrf.mxu1  ;;  %10375 = vmatprep.mubr.msk.bf16.mxu1 %vm11107_vm2, %v11105_v0 }
 0x1a3   : > { %7066 = vst.msk [vmem:[%s11408_s12 + $0xb4] sm:$0xf] %vm7020_vm4, %v9004_v8  ;;  %v4660_v14 = vmax.f32 %v2873_v9, 0.0  ;;  %7308 = vst.msk [vmem:[%s11408_s12 + $0x47c] sm:$0xf] %vm7020_vm4, %v9246_v10  ;;  %v4902_v15 = vmax.f32 %v3841_v11, 0.0 }
 0x1a4   : > { %v2875_v16 = vpop.f32.mrf.mxu0  ;;  %v3843_v18 = vpop.f32.mrf.mxu1 }
 0x1a5   : > { %v9005_v20 = vpack.c.bf16 %v4660_v14, %v4660_v14  ;;  %v2876_v21 = vadd.f32 %v11739_v60, %v2875_v16  ;;  %v9247_v22 = vpack.c.bf16 %v4902_v15, %v4902_v15  ;;  %v3844_v23 = vadd.f32 %v11739_v60, %v3843_v18 }
 0x1a6   : > { %v9794_v24 = vpop.f32.mrf.mxu0  ;;  %v10278_v25 = vpop.f32.mrf.mxu1 }
 0x1a7   : > { %7067 = vst.msk [vmem:[%s11408_s12 + $0xb8] sm:$0xf] %vm7020_vm4, %v9005_v20  ;;  %v4661_v26 = vmax.f32 %v2876_v21, 0.0  ;;  %7309 = vst.msk [vmem:[%s11408_s12 + $0x480] sm:$0xf] %vm7020_vm4, %v9247_v22  ;;  %v4903_v27 = vmax.f32 %v3844_v23, 0.0 }
 0x1a8   : > { %v2880_v28 = vpop.f32.mrf.mxu0  ;;  %9892 = vmatmul.mubr.msk.bf16.gmra.mxu0 %vm1923_vm3, %v10866_v17  ;;  %v3848_v29 = vpop.f32.mrf.mxu1  ;;  %10376 = vmatmul.mubr.msk.bf16.gmra.mxu1 %vm1923_vm3, %v10867_v19  ;;  %v10872_v21 = vld [vmem:[%s11184_s5 + $0x198] sm:$0xff]   ;;  %v10873_v23 = vld [vmem:[%s11184_s5 + $0x560] sm:$0xff]  }
 0x1a9   : > { %v9006_v30 = vpack.c.bf16 %v4661_v26, %v4661_v26  ;;  %v2881_v31 = vadd.f32 %v11739_v60, %v2880_v28  ;;  %v9248_v32 = vpack.c.bf16 %v4903_v27, %v4903_v27  ;;  %v3849_v33 = vadd.f32 %v11739_v60, %v3848_v29  ;;  %9895 = vmatprep.mubr.msk.bf16.mxu0 %vm11107_vm2, %v11105_v0 }
 0x1aa   : > { %v9797_v34 = vpop.f32.mrf.mxu0  ;;  %v10281_v35 = vpop.f32.mrf.mxu1  ;;  %10379 = vmatprep.mubr.msk.bf16.mxu1 %vm11107_vm2, %v11105_v0 }
 0x1ab   : > { %7068 = vst.msk [vmem:[%s11408_s12 + $0xbc] sm:$0xf] %vm7020_vm4, %v9006_v30  ;;  %v4662_v36 = vmax.f32 %v2881_v31, 0.0  ;;  %7310 = vst.msk [vmem:[%s11408_s12 + $0x484] sm:$0xf] %vm7020_vm4, %v9248_v32  ;;  %v4904_v37 = vmax.f32 %v3849_v33, 0.0 }
 0x1ac   : > { %v2883_v38 = vpop.f32.mrf.mxu0  ;;  %v3851_v40 = vpop.f32.mrf.mxu1 }
 0x1ad   : > { %v9007_v42 = vpack.c.bf16 %v4662_v36, %v4662_v36  ;;  %v2884_v43 = vadd.f32 %v11739_v60, %v2883_v38  ;;  %v9249_v44 = vpack.c.bf16 %v4904_v37, %v4904_v37  ;;  %v3852_v45 = vadd.f32 %v11739_v60, %v3851_v40 }
 0x1ae   : > { %v9798_v46 = vpop.f32.mrf.mxu0  ;;  %v10282_v47 = vpop.f32.mrf.mxu1 }
 0x1af   : > { %7069 = vst.msk [vmem:[%s11408_s12 + $0xc0] sm:$0xf] %vm7020_vm4, %v9007_v42  ;;  %v4663_v48 = vmax.f32 %v2884_v43, 0.0  ;;  %7311 = vst.msk [vmem:[%s11408_s12 + $0x488] sm:$0xf] %vm7020_vm4, %v9249_v44  ;;  %v4905_v49 = vmax.f32 %v3852_v45, 0.0 }
 0x1b0   : > { %v2888_v50 = vpop.f32.mrf.mxu0  ;;  %9896 = vmatmul.mubr.msk.bf16.gmra.mxu0 %vm1923_vm3, %v10868_v39  ;;  %v3856_v51 = vpop.f32.mrf.mxu1  ;;  %10380 = vmatmul.mubr.msk.bf16.gmra.mxu1 %vm1923_vm3, %v10869_v41  ;;  %v10874_v43 = vld [vmem:[%s11184_s5 + $0x1a0] sm:$0xff]   ;;  %v10875_v45 = vld [vmem:[%s11184_s5 + $0x568] sm:$0xff]  }
 0x1b1   : > { %v9008_v52 = vpack.c.bf16 %v4663_v48, %v4663_v48  ;;  %v2889_v53 = vadd.f32 %v11739_v60, %v2888_v50  ;;  %v9250_v54 = vpack.c.bf16 %v4905_v49, %v4905_v49  ;;  %v3857_v55 = vadd.f32 %v11739_v60, %v3856_v51  ;;  %9899 = vmatprep.mubr.msk.bf16.mxu0 %vm11107_vm2, %v11105_v0 }
 0x1b2   : > { %v9801_v56 = vpop.f32.mrf.mxu0  ;;  %v10285_v57 = vpop.f32.mrf.mxu1  ;;  %10383 = vmatprep.mubr.msk.bf16.mxu1 %vm11107_vm2, %v11105_v0 }
 0x1b3   : > { %7070 = vst.msk [vmem:[%s11408_s12 + $0xc4] sm:$0xf] %vm7020_vm4, %v9008_v52  ;;  %v4664_v58 = vmax.f32 %v2889_v53, 0.0  ;;  %7312 = vst.msk [vmem:[%s11408_s12 + $0x48c] sm:$0xf] %vm7020_vm4, %v9250_v54  ;;  %v4906_v59 = vmax.f32 %v3857_v55, 0.0 }
 0x1b4   : > { %v2891_v61 = vpop.f32.mrf.mxu0  ;;  %v3859_v63 = vpop.f32.mrf.mxu1 }
 0x1b5   : > { %v9009_v2 = vpack.c.bf16 %v4664_v58, %v4664_v58  ;;  %v2892_v3 = vadd.f32 %v11739_v60, %v2891_v61  ;;  %v9251_v4 = vpack.c.bf16 %v4906_v59, %v4906_v59  ;;  %v3860_v5 = vadd.f32 %v11739_v60, %v3859_v63 }
 0x1b6   : > { %v9802_v6 = vpop.f32.mrf.mxu0  ;;  %v10286_v7 = vpop.f32.mrf.mxu1 }
 0x1b7   : > { %7071 = vst.msk [vmem:[%s11408_s12 + $0xc8] sm:$0xf] %vm7020_vm4, %v9009_v2  ;;  %v4665_v8 = vmax.f32 %v2892_v3, 0.0  ;;  %7313 = vst.msk [vmem:[%s11408_s12 + $0x490] sm:$0xf] %vm7020_vm4, %v9251_v4  ;;  %v4907_v9 = vmax.f32 %v3860_v5, 0.0 }
 0x1b8   : > { %v2896_v10 = vpop.f32.mrf.mxu0  ;;  %9900 = vmatmul.mubr.msk.bf16.gmra.mxu0 %vm1923_vm3, %v10870_v62  ;;  %v3864_v11 = vpop.f32.mrf.mxu1  ;;  %10384 = vmatmul.mubr.msk.bf16.gmra.mxu1 %vm1923_vm3, %v10871_v1  ;;  %v10876_v3 = vld [vmem:[%s11184_s5 + $0x1a8] sm:$0xff]   ;;  %v10877_v5 = vld [vmem:[%s11184_s5 + $0x570] sm:$0xff]  }
 0x1b9   : > { %v9010_v12 = vpack.c.bf16 %v4665_v8, %v4665_v8  ;;  %v2897_v13 = vadd.f32 %v11739_v60, %v2896_v10  ;;  %v9252_v14 = vpack.c.bf16 %v4907_v9, %v4907_v9  ;;  %v3865_v15 = vadd.f32 %v11739_v60, %v3864_v11  ;;  %9903 = vmatprep.mubr.msk.bf16.mxu0 %vm11107_vm2, %v11105_v0 }
 0x1ba   : > { %v9805_v16 = vpop.f32.mrf.mxu0  ;;  %v10289_v17 = vpop.f32.mrf.mxu1  ;;  %10387 = vmatprep.mubr.msk.bf16.mxu1 %vm11107_vm2, %v11105_v0 }
 0x1bb   : > { %7072 = vst.msk [vmem:[%s11408_s12 + $0xcc] sm:$0xf] %vm7020_vm4, %v9010_v12  ;;  %v4666_v18 = vmax.f32 %v2897_v13, 0.0  ;;  %7314 = vst.msk [vmem:[%s11408_s12 + $0x494] sm:$0xf] %vm7020_vm4, %v9252_v14  ;;  %v4908_v19 = vmax.f32 %v3865_v15, 0.0 }
 0x1bc   : > { %v2899_v20 = vpop.f32.mrf.mxu0  ;;  %v3867_v22 = vpop.f32.mrf.mxu1 }
 0x1bd   : > { %v9011_v24 = vpack.c.bf16 %v4666_v18, %v4666_v18  ;;  %v2900_v25 = vadd.f32 %v11739_v60, %v2899_v20  ;;  %v9253_v26 = vpack.c.bf16 %v4908_v19, %v4908_v19  ;;  %v3868_v27 = vadd.f32 %v11739_v60, %v3867_v22 }
 0x1be   : > { %v9806_v28 = vpop.f32.mrf.mxu0  ;;  %v10290_v29 = vpop.f32.mrf.mxu1 }
 0x1bf   : > { %7073 = vst.msk [vmem:[%s11408_s12 + $0xd0] sm:$0xf] %vm7020_vm4, %v9011_v24  ;;  %v4667_v30 = vmax.f32 %v2900_v25, 0.0  ;;  %7315 = vst.msk [vmem:[%s11408_s12 + $0x498] sm:$0xf] %vm7020_vm4, %v9253_v26  ;;  %v4909_v31 = vmax.f32 %v3868_v27, 0.0 }
 0x1c0   : > { %v2904_v32 = vpop.f32.mrf.mxu0  ;;  %9904 = vmatmul.mubr.msk.bf16.gmra.mxu0 %vm1923_vm3, %v10872_v21  ;;  %v3872_v33 = vpop.f32.mrf.mxu1  ;;  %10388 = vmatmul.mubr.msk.bf16.gmra.mxu1 %vm1923_vm3, %v10873_v23  ;;  %v10878_v25 = vld [vmem:[%s11184_s5 + $0x1b0] sm:$0xff]   ;;  %v10879_v27 = vld [vmem:[%s11184_s5 + $0x578] sm:$0xff]  }
 0x1c1   : > { %v9012_v34 = vpack.c.bf16 %v4667_v30, %v4667_v30  ;;  %v2905_v35 = vadd.f32 %v11739_v60, %v2904_v32  ;;  %v9254_v36 = vpack.c.bf16 %v4909_v31, %v4909_v31  ;;  %v3873_v37 = vadd.f32 %v11739_v60, %v3872_v33  ;;  %9907 = vmatprep.mubr.msk.bf16.mxu0 %vm11107_vm2, %v11105_v0 }
 0x1c2   : > { %v9809_v38 = vpop.f32.mrf.mxu0  ;;  %v10293_v39 = vpop.f32.mrf.mxu1  ;;  %10391 = vmatprep.mubr.msk.bf16.mxu1 %vm11107_vm2, %v11105_v0 }
 0x1c3   : > { %7074 = vst.msk [vmem:[%s11408_s12 + $0xd4] sm:$0xf] %vm7020_vm4, %v9012_v34  ;;  %v4668_v40 = vmax.f32 %v2905_v35, 0.0  ;;  %7316 = vst.msk [vmem:[%s11408_s12 + $0x49c] sm:$0xf] %vm7020_vm4, %v9254_v36  ;;  %v4910_v41 = vmax.f32 %v3873_v37, 0.0 }
 0x1c4   : > { %v2907_v42 = vpop.f32.mrf.mxu0  ;;  %v3875_v44 = vpop.f32.mrf.mxu1 }
 0x1c5   : > { %v9013_v46 = vpack.c.bf16 %v4668_v40, %v4668_v40  ;;  %v2908_v47 = vadd.f32 %v11739_v60, %v2907_v42  ;;  %v9255_v48 = vpack.c.bf16 %v4910_v41, %v4910_v41  ;;  %v3876_v49 = vadd.f32 %v11739_v60, %v3875_v44 }
 0x1c6   : > { %v9810_v50 = vpop.f32.mrf.mxu0  ;;  %v10294_v51 = vpop.f32.mrf.mxu1 }
 0x1c7   : > { %7075 = vst.msk [vmem:[%s11408_s12 + $0xd8] sm:$0xf] %vm7020_vm4, %v9013_v46  ;;  %v4669_v52 = vmax.f32 %v2908_v47, 0.0  ;;  %7317 = vst.msk [vmem:[%s11408_s12 + $0x4a0] sm:$0xf] %vm7020_vm4, %v9255_v48  ;;  %v4911_v53 = vmax.f32 %v3876_v49, 0.0 }
 0x1c8   : > { %v2912_v54 = vpop.f32.mrf.mxu0  ;;  %9908 = vmatmul.mubr.msk.bf16.gmra.mxu0 %vm1923_vm3, %v10874_v43  ;;  %v3880_v55 = vpop.f32.mrf.mxu1  ;;  %10392 = vmatmul.mubr.msk.bf16.gmra.mxu1 %vm1923_vm3, %v10875_v45  ;;  %v10880_v47 = vld [vmem:[%s11184_s5 + $0x1b8] sm:$0xff]   ;;  %v10881_v49 = vld [vmem:[%s11184_s5 + $0x580] sm:$0xff]  }
 0x1c9   : > { %v9014_v56 = vpack.c.bf16 %v4669_v52, %v4669_v52  ;;  %v2913_v57 = vadd.f32 %v11739_v60, %v2912_v54  ;;  %v9256_v58 = vpack.c.bf16 %v4911_v53, %v4911_v53  ;;  %v3881_v59 = vadd.f32 %v11739_v60, %v3880_v55  ;;  %9911 = vmatprep.mubr.msk.bf16.mxu0 %vm11107_vm2, %v11105_v0 }
 0x1ca   : > { %v9813_v61 = vpop.f32.mrf.mxu0  ;;  %v10297_v62 = vpop.f32.mrf.mxu1  ;;  %10395 = vmatprep.mubr.msk.bf16.mxu1 %vm11107_vm2, %v11105_v0 }
 0x1cb   : > { %7076 = vst.msk [vmem:[%s11408_s12 + $0xdc] sm:$0xf] %vm7020_vm4, %v9014_v56  ;;  %v4670_v63 = vmax.f32 %v2913_v57, 0.0  ;;  %7318 = vst.msk [vmem:[%s11408_s12 + $0x4a4] sm:$0xf] %vm7020_vm4, %v9256_v58  ;;  %v4912_v1 = vmax.f32 %v3881_v59, 0.0 }
 0x1cc   : > { %v2915_v2 = vpop.f32.mrf.mxu0  ;;  %v3883_v4 = vpop.f32.mrf.mxu1 }
 0x1cd   : > { %v9015_v6 = vpack.c.bf16 %v4670_v63, %v4670_v63  ;;  %v2916_v7 = vadd.f32 %v11739_v60, %v2915_v2  ;;  %v9257_v8 = vpack.c.bf16 %v4912_v1, %v4912_v1  ;;  %v3884_v9 = vadd.f32 %v11739_v60, %v3883_v4 }
 0x1ce   : > { %v9814_v10 = vpop.f32.mrf.mxu0  ;;  %v10298_v11 = vpop.f32.mrf.mxu1 }
 0x1cf   : > { %7077 = vst.msk [vmem:[%s11408_s12 + $0xe0] sm:$0xf] %vm7020_vm4, %v9015_v6  ;;  %v4671_v12 = vmax.f32 %v2916_v7, 0.0  ;;  %7319 = vst.msk [vmem:[%s11408_s12 + $0x4a8] sm:$0xf] %vm7020_vm4, %v9257_v8  ;;  %v4913_v13 = vmax.f32 %v3884_v9, 0.0 }
 0x1d0   : > { %v2920_v14 = vpop.f32.mrf.mxu0  ;;  %9912 = vmatmul.mubr.msk.bf16.gmra.mxu0 %vm1923_vm3, %v10876_v3  ;;  %v3888_v15 = vpop.f32.mrf.mxu1  ;;  %10396 = vmatmul.mubr.msk.bf16.gmra.mxu1 %vm1923_vm3, %v10877_v5  ;;  %v10882_v7 = vld [vmem:[%s11184_s5 + $0x1c0] sm:$0xff]   ;;  %v10883_v9 = vld [vmem:[%s11184_s5 + $0x588] sm:$0xff]  }
 0x1d1   : > { %v9016_v16 = vpack.c.bf16 %v4671_v12, %v4671_v12  ;;  %v2921_v17 = vadd.f32 %v11739_v60, %v2920_v14  ;;  %v9258_v18 = vpack.c.bf16 %v4913_v13, %v4913_v13  ;;  %v3889_v19 = vadd.f32 %v11739_v60, %v3888_v15  ;;  %9915 = vmatprep.mubr.msk.bf16.mxu0 %vm11107_vm2, %v11105_v0 }
 0x1d2   : > { %v9817_v20 = vpop.f32.mrf.mxu0  ;;  %v10301_v21 = vpop.f32.mrf.mxu1  ;;  %10399 = vmatprep.mubr.msk.bf16.mxu1 %vm11107_vm2, %v11105_v0 }
 0x1d3   : > { %7078 = vst.msk [vmem:[%s11408_s12 + $0xe4] sm:$0xf] %vm7020_vm4, %v9016_v16  ;;  %v4672_v22 = vmax.f32 %v2921_v17, 0.0  ;;  %7320 = vst.msk [vmem:[%s11408_s12 + $0x4ac] sm:$0xf] %vm7020_vm4, %v9258_v18  ;;  %v4914_v23 = vmax.f32 %v3889_v19, 0.0 }
 0x1d4   : > { %v2923_v24 = vpop.f32.mrf.mxu0  ;;  %v3891_v26 = vpop.f32.mrf.mxu1 }
 0x1d5   : > { %v9017_v28 = vpack.c.bf16 %v4672_v22, %v4672_v22  ;;  %v2924_v29 = vadd.f32 %v11739_v60, %v2923_v24  ;;  %v9259_v30 = vpack.c.bf16 %v4914_v23, %v4914_v23  ;;  %v3892_v31 = vadd.f32 %v11739_v60, %v3891_v26 }
 0x1d6   : > { %v9818_v32 = vpop.f32.mrf.mxu0  ;;  %v10302_v33 = vpop.f32.mrf.mxu1 }
 0x1d7   : > { %7079 = vst.msk [vmem:[%s11408_s12 + $0xe8] sm:$0xf] %vm7020_vm4, %v9017_v28  ;;  %v4673_v34 = vmax.f32 %v2924_v29, 0.0  ;;  %7321 = vst.msk [vmem:[%s11408_s12 + $0x4b0] sm:$0xf] %vm7020_vm4, %v9259_v30  ;;  %v4915_v35 = vmax.f32 %v3892_v31, 0.0 }
 0x1d8   : > { %v2928_v36 = vpop.f32.mrf.mxu0  ;;  %9916 = vmatmul.mubr.msk.bf16.gmra.mxu0 %vm1923_vm3, %v10878_v25  ;;  %v3896_v37 = vpop.f32.mrf.mxu1  ;;  %10400 = vmatmul.mubr.msk.bf16.gmra.mxu1 %vm1923_vm3, %v10879_v27  ;;  %v10884_v29 = vld [vmem:[%s11184_s5 + $0x1c8] sm:$0xff]   ;;  %v10885_v31 = vld [vmem:[%s11184_s5 + $0x590] sm:$0xff]  }
 0x1d9   : > { %v9018_v38 = vpack.c.bf16 %v4673_v34, %v4673_v34  ;;  %v2929_v39 = vadd.f32 %v11739_v60, %v2928_v36  ;;  %v9260_v40 = vpack.c.bf16 %v4915_v35, %v4915_v35  ;;  %v3897_v41 = vadd.f32 %v11739_v60, %v3896_v37  ;;  %9919 = vmatprep.mubr.msk.bf16.mxu0 %vm11107_vm2, %v11105_v0 }
 0x1da   : > { %v9821_v42 = vpop.f32.mrf.mxu0  ;;  %v10305_v43 = vpop.f32.mrf.mxu1  ;;  %10403 = vmatprep.mubr.msk.bf16.mxu1 %vm11107_vm2, %v11105_v0 }
 0x1db   : > { %7080 = vst.msk [vmem:[%s11408_s12 + $0xec] sm:$0xf] %vm7020_vm4, %v9018_v38  ;;  %v4674_v44 = vmax.f32 %v2929_v39, 0.0  ;;  %7322 = vst.msk [vmem:[%s11408_s12 + $0x4b4] sm:$0xf] %vm7020_vm4, %v9260_v40  ;;  %v4916_v45 = vmax.f32 %v3897_v41, 0.0 }
 0x1dc   : > { %v2931_v46 = vpop.f32.mrf.mxu0  ;;  %v3899_v48 = vpop.f32.mrf.mxu1 }
 0x1dd   : > { %v9019_v50 = vpack.c.bf16 %v4674_v44, %v4674_v44  ;;  %v2932_v51 = vadd.f32 %v11739_v60, %v2931_v46  ;;  %v9261_v52 = vpack.c.bf16 %v4916_v45, %v4916_v45  ;;  %v3900_v53 = vadd.f32 %v11739_v60, %v3899_v48 }
 0x1de   : > { %v9822_v54 = vpop.f32.mrf.mxu0  ;;  %v10306_v55 = vpop.f32.mrf.mxu1 }
 0x1df   : > { %7081 = vst.msk [vmem:[%s11408_s12 + $0xf0] sm:$0xf] %vm7020_vm4, %v9019_v50  ;;  %v4675_v56 = vmax.f32 %v2932_v51, 0.0  ;;  %7323 = vst.msk [vmem:[%s11408_s12 + $0x4b8] sm:$0xf] %vm7020_vm4, %v9261_v52  ;;  %v4917_v57 = vmax.f32 %v3900_v53, 0.0 }
 0x1e0   : > { %v2936_v58 = vpop.f32.mrf.mxu0  ;;  %9920 = vmatmul.mubr.msk.bf16.gmra.mxu0 %vm1923_vm3, %v10880_v47  ;;  %v3904_v59 = vpop.f32.mrf.mxu1  ;;  %10404 = vmatmul.mubr.msk.bf16.gmra.mxu1 %vm1923_vm3, %v10881_v49  ;;  %v10886_v51 = vld [vmem:[%s11184_s5 + $0x1d0] sm:$0xff]   ;;  %v10887_v53 = vld [vmem:[%s11184_s5 + $0x598] sm:$0xff]  }
 0x1e1   : > { %v9020_v61 = vpack.c.bf16 %v4675_v56, %v4675_v56  ;;  %v2937_v62 = vadd.f32 %v11739_v60, %v2936_v58  ;;  %v9262_v63 = vpack.c.bf16 %v4917_v57, %v4917_v57  ;;  %v3905_v1 = vadd.f32 %v11739_v60, %v3904_v59  ;;  %9923 = vmatprep.mubr.msk.bf16.mxu0 %vm11107_vm2, %v11105_v0 }
 0x1e2   : > { %v9825_v2 = vpop.f32.mrf.mxu0  ;;  %v10309_v3 = vpop.f32.mrf.mxu1  ;;  %10407 = vmatprep.mubr.msk.bf16.mxu1 %vm11107_vm2, %v11105_v0 }
 0x1e3   : > { %7082 = vst.msk [vmem:[%s11408_s12 + $0xf4] sm:$0xf] %vm7020_vm4, %v9020_v61  ;;  %v4676_v4 = vmax.f32 %v2937_v62, 0.0  ;;  %7324 = vst.msk [vmem:[%s11408_s12 + $0x4bc] sm:$0xf] %vm7020_vm4, %v9262_v63  ;;  %v4918_v5 = vmax.f32 %v3905_v1, 0.0 }
 0x1e4   : > { %v2939_v6 = vpop.f32.mrf.mxu0  ;;  %v3907_v8 = vpop.f32.mrf.mxu1 }
 0x1e5   : > { %v9021_v10 = vpack.c.bf16 %v4676_v4, %v4676_v4  ;;  %v2940_v11 = vadd.f32 %v11739_v60, %v2939_v6  ;;  %v9263_v12 = vpack.c.bf16 %v4918_v5, %v4918_v5  ;;  %v3908_v13 = vadd.f32 %v11739_v60, %v3907_v8  ;;  %v12085_v5 = vld [vmem:[%s13838_s2] ss:$0 sm:$0xff] }
 0x1e6   : > { %v9826_v14 = vpop.f32.mrf.mxu0  ;;  %v10310_v15 = vpop.f32.mrf.mxu1 }
 0x1e7   : > { %7083 = vst.msk [vmem:[%s11408_s12 + $0xf8] sm:$0xf] %vm7020_vm4, %v9021_v10  ;;  %v4677_v16 = vmax.f32 %v2940_v11, 0.0  ;;  %7325 = vst.msk [vmem:[%s11408_s12 + $0x4c0] sm:$0xf] %vm7020_vm4, %v9263_v12  ;;  %v4919_v17 = vmax.f32 %v3908_v13, 0.0 }
 0x1e8   : > { %v2944_v18 = vpop.f32.mrf.mxu0  ;;  %9924 = vmatmul.mubr.msk.bf16.gmra.mxu0 %vm1923_vm3, %v10882_v7  ;;  %v3912_v19 = vpop.f32.mrf.mxu1  ;;  %10408 = vmatmul.mubr.msk.bf16.gmra.mxu1 %vm1923_vm3, %v10883_v9  ;;  %v10888_v11 = vld [vmem:[%s11184_s5 + $0x1d8] sm:$0xff]   ;;  %v10889_v13 = vld [vmem:[%s11184_s5 + $0x5a0] sm:$0xff]  }
 0x1e9   : > { %v9022_v20 = vpack.c.bf16 %v4677_v16, %v4677_v16  ;;  %v2945_v21 = vadd.f32 %v11739_v60, %v2944_v18  ;;  %v9264_v22 = vpack.c.bf16 %v4919_v17, %v4919_v17  ;;  %v3913_v23 = vadd.f32 %v11739_v60, %v3912_v19  ;;  %9927 = vmatprep.mubr.msk.bf16.mxu0 %vm11107_vm2, %v11105_v0 }
 0x1ea   : > { %v9829_v24 = vpop.f32.mrf.mxu0  ;;  %v10313_v25 = vpop.f32.mrf.mxu1  ;;  %10411 = vmatprep.mubr.msk.bf16.mxu1 %vm11107_vm2, %v11105_v0 }
 0x1eb   : > { %7084 = vst.msk [vmem:[%s11408_s12 + $0xfc] sm:$0xf] %vm7020_vm4, %v9022_v20  ;;  %v4678_v26 = vmax.f32 %v2945_v21, 0.0  ;;  %7326 = vst.msk [vmem:[%s11408_s12 + $0x4c4] sm:$0xf] %vm7020_vm4, %v9264_v22  ;;  %v4920_v27 = vmax.f32 %v3913_v23, 0.0 }
 0x1ec   : > { %v2947_v28 = vpop.f32.mrf.mxu0  ;;  %v3915_v30 = vpop.f32.mrf.mxu1 }
 0x1ed   : > { %v9023_v32 = vpack.c.bf16 %v4678_v26, %v4678_v26  ;;  %v2948_v33 = vadd.f32 %v11739_v60, %v2947_v28  ;;  %v9265_v34 = vpack.c.bf16 %v4920_v27, %v4920_v27  ;;  %v3916_v35 = vadd.f32 %v11739_v60, %v3915_v30 }
 0x1ee   : > { %v9830_v36 = vpop.f32.mrf.mxu0  ;;  %v10314_v37 = vpop.f32.mrf.mxu1 }
 0x1ef   : > { %7085 = vst.msk [vmem:[%s11408_s12 + $0x100] sm:$0xf] %vm7020_vm4, %v9023_v32  ;;  %v4679_v38 = vmax.f32 %v2948_v33, 0.0  ;;  %7327 = vst.msk [vmem:[%s11408_s12 + $0x4c8] sm:$0xf] %vm7020_vm4, %v9265_v34  ;;  %v4921_v39 = vmax.f32 %v3916_v35, 0.0 }
 0x1f0   : > { %v2952_v40 = vpop.f32.mrf.mxu0  ;;  %9928 = vmatmul.mubr.msk.bf16.gmra.mxu0 %vm1923_vm3, %v10884_v29  ;;  %v3920_v41 = vpop.f32.mrf.mxu1  ;;  %10412 = vmatmul.mubr.msk.bf16.gmra.mxu1 %vm1923_vm3, %v10885_v31  ;;  %v10890_v33 = vld [vmem:[%s11184_s5 + $0x1e0] sm:$0xff]   ;;  %v10891_v35 = vld [vmem:[%s11184_s5 + $0x5a8] sm:$0xff]  }
 0x1f1   : > { %v9024_v42 = vpack.c.bf16 %v4679_v38, %v4679_v38  ;;  %v2953_v43 = vadd.f32 %v11739_v60, %v2952_v40  ;;  %v9266_v44 = vpack.c.bf16 %v4921_v39, %v4921_v39  ;;  %v3921_v45 = vadd.f32 %v11739_v60, %v3920_v41  ;;  %9931 = vmatprep.mubr.msk.bf16.mxu0 %vm11107_vm2, %v11105_v0 }
 0x1f2   : > { %v9833_v46 = vpop.f32.mrf.mxu0  ;;  %v10317_v47 = vpop.f32.mrf.mxu1  ;;  %10415 = vmatprep.mubr.msk.bf16.mxu1 %vm11107_vm2, %v11105_v0 }
 0x1f3   : > { %7086 = vst.msk [vmem:[%s11408_s12 + $0x104] sm:$0xf] %vm7020_vm4, %v9024_v42  ;;  %v4680_v48 = vmax.f32 %v2953_v43, 0.0  ;;  %7328 = vst.msk [vmem:[%s11408_s12 + $0x4cc] sm:$0xf] %vm7020_vm4, %v9266_v44  ;;  %v4922_v49 = vmax.f32 %v3921_v45, 0.0 }
 0x1f4   : > { %v2955_v50 = vpop.f32.mrf.mxu0  ;;  %v3923_v52 = vpop.f32.mrf.mxu1 }
 0x1f5   : > { %v9025_v54 = vpack.c.bf16 %v4680_v48, %v4680_v48  ;;  %v2956_v55 = vadd.f32 %v11739_v60, %v2955_v50  ;;  %v9267_v56 = vpack.c.bf16 %v4922_v49, %v4922_v49  ;;  %v3924_v57 = vadd.f32 %v11739_v60, %v3923_v52 }
 0x1f6   : > { %v9834_v58 = vpop.f32.mrf.mxu0  ;;  %v10318_v59 = vpop.f32.mrf.mxu1 }
 0x1f7   : > { %7087 = vst.msk [vmem:[%s11408_s12 + $0x108] sm:$0xf] %vm7020_vm4, %v9025_v54  ;;  %v4681_v61 = vmax.f32 %v2956_v55, 0.0  ;;  %7329 = vst.msk [vmem:[%s11408_s12 + $0x4d0] sm:$0xf] %vm7020_vm4, %v9267_v56  ;;  %v4923_v62 = vmax.f32 %v3924_v57, 0.0 }
 0x1f8   : > { %v2960_v63 = vpop.f32.mrf.mxu0  ;;  %9932 = vmatmul.mubr.msk.bf16.gmra.mxu0 %vm1923_vm3, %v10886_v51  ;;  %v3928_v1 = vpop.f32.mrf.mxu1  ;;  %10416 = vmatmul.mubr.msk.bf16.gmra.mxu1 %vm1923_vm3, %v10887_v53  ;;  %v10892_v55 = vld [vmem:[%s11184_s5 + $0x1e8] sm:$0xff]   ;;  %v10893_v57 = vld [vmem:[%s11184_s5 + $0x5b0] sm:$0xff]  }
 0x1f9   : > { %v9026_v2 = vpack.c.bf16 %v4681_v61, %v4681_v61  ;;  %v2961_v3 = vadd.f32 %v11739_v60, %v2960_v63  ;;  %v9268_v4 = vpack.c.bf16 %v4923_v62, %v4923_v62  ;;  %v3929_v6 = vadd.f32 %v12085_v5, %v3928_v1  ;;  %9935 = vmatprep.mubr.msk.bf16.mxu0 %vm11107_vm2, %v11105_v0 }
 0x1fa   : > { %v9837_v7 = vpop.f32.mrf.mxu0  ;;  %v10321_v8 = vpop.f32.mrf.mxu1  ;;  %10419 = vmatprep.mubr.msk.bf16.mxu1 %vm11107_vm2, %v11105_v0 }
 0x1fb   : > { %7088 = vst.msk [vmem:[%s11408_s12 + $0x10c] sm:$0xf] %vm7020_vm4, %v9026_v2  ;;  %v4682_v60 = vmax.f32 %v2961_v3, 0.0  ;;  %7330 = vst.msk [vmem:[%s11408_s12 + $0x4d4] sm:$0xf] %vm7020_vm4, %v9268_v4  ;;  %v4924_v9 = vmax.f32 %v3929_v6, 0.0 }
 0x1fc   : > { %v2963_v10 = vpop.f32.mrf.mxu0  ;;  %v3931_v12 = vpop.f32.mrf.mxu1 }
 0x1fd   : > { %v9027_v14 = vpack.c.bf16 %v4682_v60, %v4682_v60  ;;  %v2964_v15 = vadd.f32 %v12085_v5, %v2963_v10  ;;  %v9269_v16 = vpack.c.bf16 %v4924_v9, %v4924_v9  ;;  %v3932_v17 = vadd.f32 %v12085_v5, %v3931_v12 }
 0x1fe   : > { %v9838_v18 = vpop.f32.mrf.mxu0  ;;  %v10322_v19 = vpop.f32.mrf.mxu1 }
 0x1ff   : > { %7089 = vst.msk [vmem:[%s11408_s12 + $0x110] sm:$0xf] %vm7020_vm4, %v9027_v14  ;;  %v4683_v20 = vmax.f32 %v2964_v15, 0.0  ;;  %7331 = vst.msk [vmem:[%s11408_s12 + $0x4d8] sm:$0xf] %vm7020_vm4, %v9269_v16  ;;  %v4925_v21 = vmax.f32 %v3932_v17, 0.0 }
 0x200   : > { %v2968_v22 = vpop.f32.mrf.mxu0  ;;  %9936 = vmatmul.mubr.msk.bf16.gmra.mxu0 %vm1923_vm3, %v10888_v11  ;;  %v3936_v23 = vpop.f32.mrf.mxu1  ;;  %10420 = vmatmul.mubr.msk.bf16.gmra.mxu1 %vm1923_vm3, %v10889_v13  ;;  %v10894_v15 = vld [vmem:[%s11184_s5 + $0x1f0] sm:$0xff]   ;;  %v10895_v17 = vld [vmem:[%s11184_s5 + $0x5b8] sm:$0xff]  }
 0x201   : > { %v9028_v24 = vpack.c.bf16 %v4683_v20, %v4683_v20  ;;  %v2969_v25 = vadd.f32 %v12085_v5, %v2968_v22  ;;  %v9270_v26 = vpack.c.bf16 %v4925_v21, %v4925_v21  ;;  %v3937_v27 = vadd.f32 %v12085_v5, %v3936_v23  ;;  %9939 = vmatprep.mubr.msk.bf16.mxu0 %vm11107_vm2, %v11105_v0 }
 0x202   : > { %v9841_v28 = vpop.f32.mrf.mxu0  ;;  %v10325_v29 = vpop.f32.mrf.mxu1  ;;  %10423 = vmatprep.mubr.msk.bf16.mxu1 %vm11107_vm2, %v11105_v0 }
 0x203   : > { %7090 = vst.msk [vmem:[%s11408_s12 + $0x114] sm:$0xf] %vm7020_vm4, %v9028_v24  ;;  %v4684_v30 = vmax.f32 %v2969_v25, 0.0  ;;  %7332 = vst.msk [vmem:[%s11408_s12 + $0x4dc] sm:$0xf] %vm7020_vm4, %v9270_v26  ;;  %v4926_v31 = vmax.f32 %v3937_v27, 0.0 }
 0x204   : > { %v2971_v32 = vpop.f32.mrf.mxu0  ;;  %v3939_v34 = vpop.f32.mrf.mxu1 }
 0x205   : > { %v9029_v36 = vpack.c.bf16 %v4684_v30, %v4684_v30  ;;  %v2972_v37 = vadd.f32 %v12085_v5, %v2971_v32  ;;  %v9271_v38 = vpack.c.bf16 %v4926_v31, %v4926_v31  ;;  %v3940_v39 = vadd.f32 %v12085_v5, %v3939_v34 }
 0x206   : > { %v9842_v40 = vpop.f32.mrf.mxu0  ;;  %v10326_v41 = vpop.f32.mrf.mxu1 }
 0x207   : > { %7091 = vst.msk [vmem:[%s11408_s12 + $0x118] sm:$0xf] %vm7020_vm4, %v9029_v36  ;;  %v4685_v42 = vmax.f32 %v2972_v37, 0.0  ;;  %7333 = vst.msk [vmem:[%s11408_s12 + $0x4e0] sm:$0xf] %vm7020_vm4, %v9271_v38  ;;  %v4927_v43 = vmax.f32 %v3940_v39, 0.0 }
 0x208   : > { %v2976_v44 = vpop.f32.mrf.mxu0  ;;  %9940 = vmatmul.mubr.msk.bf16.gmra.mxu0 %vm1923_vm3, %v10890_v33  ;;  %v3944_v45 = vpop.f32.mrf.mxu1  ;;  %10424 = vmatmul.mubr.msk.bf16.gmra.mxu1 %vm1923_vm3, %v10891_v35  ;;  %v10896_v37 = vld [vmem:[%s11184_s5 + $0x1f8] sm:$0xff]   ;;  %v10897_v39 = vld [vmem:[%s11184_s5 + $0x5c0] sm:$0xff]  }
 0x209   : > { %v9030_v46 = vpack.c.bf16 %v4685_v42, %v4685_v42  ;;  %v2977_v47 = vadd.f32 %v12085_v5, %v2976_v44  ;;  %v9272_v48 = vpack.c.bf16 %v4927_v43, %v4927_v43  ;;  %v3945_v49 = vadd.f32 %v12085_v5, %v3944_v45  ;;  %9943 = vmatprep.mubr.msk.bf16.mxu0 %vm11107_vm2, %v11105_v0 }
 0x20a   : > { %v9845_v50 = vpop.f32.mrf.mxu0  ;;  %v10329_v51 = vpop.f32.mrf.mxu1  ;;  %10427 = vmatprep.mubr.msk.bf16.mxu1 %vm11107_vm2, %v11105_v0 }
 0x20b   : > { %7092 = vst.msk [vmem:[%s11408_s12 + $0x11c] sm:$0xf] %vm7020_vm4, %v9030_v46  ;;  %v4686_v52 = vmax.f32 %v2977_v47, 0.0  ;;  %7334 = vst.msk [vmem:[%s11408_s12 + $0x4e4] sm:$0xf] %vm7020_vm4, %v9272_v48  ;;  %v4928_v53 = vmax.f32 %v3945_v49, 0.0 }
 0x20c   : > { %v2979_v54 = vpop.f32.mrf.mxu0  ;;  %v3947_v56 = vpop.f32.mrf.mxu1 }
 0x20d   : > { %v9031_v58 = vpack.c.bf16 %v4686_v52, %v4686_v52  ;;  %v2980_v59 = vadd.f32 %v12085_v5, %v2979_v54  ;;  %v9273_v61 = vpack.c.bf16 %v4928_v53, %v4928_v53  ;;  %v3948_v62 = vadd.f32 %v12085_v5, %v3947_v56 }
 0x20e   : > { %v9846_v63 = vpop.f32.mrf.mxu0  ;;  %v10330_v1 = vpop.f32.mrf.mxu1 }
 0x20f   : > { %7093 = vst.msk [vmem:[%s11408_s12 + $0x120] sm:$0xf] %vm7020_vm4, %v9031_v58  ;;  %v4687_v2 = vmax.f32 %v2980_v59, 0.0  ;;  %7335 = vst.msk [vmem:[%s11408_s12 + $0x4e8] sm:$0xf] %vm7020_vm4, %v9273_v61  ;;  %v4929_v3 = vmax.f32 %v3948_v62, 0.0 }
 0x210   : > { %v2984_v4 = vpop.f32.mrf.mxu0  ;;  %9944 = vmatmul.mubr.msk.bf16.gmra.mxu0 %vm1923_vm3, %v10892_v55  ;;  %v3952_v6 = vpop.f32.mrf.mxu1  ;;  %10428 = vmatmul.mubr.msk.bf16.gmra.mxu1 %vm1923_vm3, %v10893_v57  ;;  %v10898_v59 = vld [vmem:[%s11184_s5 + $0x200] sm:$0xff]   ;;  %v10899_v62 = vld [vmem:[%s11184_s5 + $0x5c8] sm:$0xff]  }
 0x211   : > { %v9032_v7 = vpack.c.bf16 %v4687_v2, %v4687_v2  ;;  %v2985_v8 = vadd.f32 %v12085_v5, %v2984_v4  ;;  %v9274_v60 = vpack.c.bf16 %v4929_v3, %v4929_v3  ;;  %v3953_v9 = vadd.f32 %v12085_v5, %v3952_v6  ;;  %9947 = vmatprep.mubr.msk.bf16.mxu0 %vm11107_vm2, %v11105_v0 }
 0x212   : > { %v9849_v10 = vpop.f32.mrf.mxu0  ;;  %v10333_v11 = vpop.f32.mrf.mxu1  ;;  %10431 = vmatprep.mubr.msk.bf16.mxu1 %vm11107_vm2, %v11105_v0 }
 0x213   : > { %7094 = vst.msk [vmem:[%s11408_s12 + $0x124] sm:$0xf] %vm7020_vm4, %v9032_v7  ;;  %v4688_v12 = vmax.f32 %v2985_v8, 0.0  ;;  %7336 = vst.msk [vmem:[%s11408_s12 + $0x4ec] sm:$0xf] %vm7020_vm4, %v9274_v60  ;;  %v4930_v13 = vmax.f32 %v3953_v9, 0.0 }
 0x214   : > { %v2987_v14 = vpop.f32.mrf.mxu0  ;;  %v3955_v16 = vpop.f32.mrf.mxu1 }
 0x215   : > { %v9033_v18 = vpack.c.bf16 %v4688_v12, %v4688_v12  ;;  %v2988_v19 = vadd.f32 %v12085_v5, %v2987_v14  ;;  %v9275_v20 = vpack.c.bf16 %v4930_v13, %v4930_v13  ;;  %v3956_v21 = vadd.f32 %v12085_v5, %v3955_v16 }
 0x216   : > { %v9850_v22 = vpop.f32.mrf.mxu0  ;;  %v10334_v23 = vpop.f32.mrf.mxu1 }
 0x217   : > { %7095 = vst.msk [vmem:[%s11408_s12 + $0x128] sm:$0xf] %vm7020_vm4, %v9033_v18  ;;  %v4689_v24 = vmax.f32 %v2988_v19, 0.0  ;;  %7337 = vst.msk [vmem:[%s11408_s12 + $0x4f0] sm:$0xf] %vm7020_vm4, %v9275_v20  ;;  %v4931_v25 = vmax.f32 %v3956_v21, 0.0 }
 0x218   : > { %v2992_v26 = vpop.f32.mrf.mxu0  ;;  %9948 = vmatmul.mubr.msk.bf16.gmra.mxu0 %vm1923_vm3, %v10894_v15  ;;  %v3960_v27 = vpop.f32.mrf.mxu1  ;;  %10432 = vmatmul.mubr.msk.bf16.gmra.mxu1 %vm1923_vm3, %v10895_v17  ;;  %v10900_v19 = vld [vmem:[%s11184_s5 + $0x208] sm:$0xff]   ;;  %v10901_v21 = vld [vmem:[%s11184_s5 + $0x5d0] sm:$0xff]  }
 0x219   : > { %v9034_v28 = vpack.c.bf16 %v4689_v24, %v4689_v24  ;;  %v2993_v29 = vadd.f32 %v12085_v5, %v2992_v26  ;;  %v9276_v30 = vpack.c.bf16 %v4931_v25, %v4931_v25  ;;  %v3961_v31 = vadd.f32 %v12085_v5, %v3960_v27  ;;  %9951 = vmatprep.mubr.msk.bf16.mxu0 %vm11107_vm2, %v11105_v0 }
 0x21a   : > { %v9853_v32 = vpop.f32.mrf.mxu0  ;;  %v10337_v33 = vpop.f32.mrf.mxu1  ;;  %10435 = vmatprep.mubr.msk.bf16.mxu1 %vm11107_vm2, %v11105_v0 }
 0x21b   : > { %7096 = vst.msk [vmem:[%s11408_s12 + $0x12c] sm:$0xf] %vm7020_vm4, %v9034_v28  ;;  %v4690_v34 = vmax.f32 %v2993_v29, 0.0  ;;  %7338 = vst.msk [vmem:[%s11408_s12 + $0x4f4] sm:$0xf] %vm7020_vm4, %v9276_v30  ;;  %v4932_v35 = vmax.f32 %v3961_v31, 0.0 }
 0x21c   : > { %v2995_v36 = vpop.f32.mrf.mxu0  ;;  %v3963_v38 = vpop.f32.mrf.mxu1 }
 0x21d   : > { %v9035_v40 = vpack.c.bf16 %v4690_v34, %v4690_v34  ;;  %v2996_v41 = vadd.f32 %v12085_v5, %v2995_v36  ;;  %v9277_v42 = vpack.c.bf16 %v4932_v35, %v4932_v35  ;;  %v3964_v43 = vadd.f32 %v12085_v5, %v3963_v38 }
 0x21e   : > { %v9854_v44 = vpop.f32.mrf.mxu0  ;;  %v10338_v45 = vpop.f32.mrf.mxu1 }
 0x21f   : > { %7097 = vst.msk [vmem:[%s11408_s12 + $0x130] sm:$0xf] %vm7020_vm4, %v9035_v40  ;;  %v4691_v46 = vmax.f32 %v2996_v41, 0.0  ;;  %7339 = vst.msk [vmem:[%s11408_s12 + $0x4f8] sm:$0xf] %vm7020_vm4, %v9277_v42  ;;  %v4933_v47 = vmax.f32 %v3964_v43, 0.0 }
 0x220   : > { %v3000_v48 = vpop.f32.mrf.mxu0  ;;  %9952 = vmatmul.mubr.msk.bf16.gmra.mxu0 %vm1923_vm3, %v10896_v37  ;;  %v3968_v49 = vpop.f32.mrf.mxu1  ;;  %10436 = vmatmul.mubr.msk.bf16.gmra.mxu1 %vm1923_vm3, %v10897_v39  ;;  %v10902_v41 = vld [vmem:[%s11184_s5 + $0x210] sm:$0xff]   ;;  %v10903_v43 = vld [vmem:[%s11184_s5 + $0x5d8] sm:$0xff]  }
 0x221   : > { %v9036_v50 = vpack.c.bf16 %v4691_v46, %v4691_v46  ;;  %v3001_v51 = vadd.f32 %v12085_v5, %v3000_v48  ;;  %v9278_v52 = vpack.c.bf16 %v4933_v47, %v4933_v47  ;;  %v3969_v53 = vadd.f32 %v12085_v5, %v3968_v49  ;;  %9955 = vmatprep.mubr.msk.bf16.mxu0 %vm11107_vm2, %v11105_v0 }
 0x222   : > { %v9857_v54 = vpop.f32.mrf.mxu0  ;;  %v10341_v55 = vpop.f32.mrf.mxu1  ;;  %10439 = vmatprep.mubr.msk.bf16.mxu1 %vm11107_vm2, %v11105_v0 }
 0x223   : > { %7098 = vst.msk [vmem:[%s11408_s12 + $0x134] sm:$0xf] %vm7020_vm4, %v9036_v50  ;;  %v4692_v56 = vmax.f32 %v3001_v51, 0.0  ;;  %7340 = vst.msk [vmem:[%s11408_s12 + $0x4fc] sm:$0xf] %vm7020_vm4, %v9278_v52  ;;  %v4934_v57 = vmax.f32 %v3969_v53, 0.0 }
 0x224   : > { %v3003_v58 = vpop.f32.mrf.mxu0  ;;  %v3971_v61 = vpop.f32.mrf.mxu1 }
 0x225   : > { %v9037_v63 = vpack.c.bf16 %v4692_v56, %v4692_v56  ;;  %v3004_v1 = vadd.f32 %v12085_v5, %v3003_v58  ;;  %v9279_v2 = vpack.c.bf16 %v4934_v57, %v4934_v57  ;;  %v3972_v3 = vadd.f32 %v12085_v5, %v3971_v61 }
 0x226   : > { %v9858_v4 = vpop.f32.mrf.mxu0  ;;  %v10342_v6 = vpop.f32.mrf.mxu1 }
 0x227   : > { %7099 = vst.msk [vmem:[%s11408_s12 + $0x138] sm:$0xf] %vm7020_vm4, %v9037_v63  ;;  %v4693_v7 = vmax.f32 %v3004_v1, 0.0  ;;  %7341 = vst.msk [vmem:[%s11408_s12 + $0x500] sm:$0xf] %vm7020_vm4, %v9279_v2  ;;  %v4935_v8 = vmax.f32 %v3972_v3, 0.0 }
 0x228   : > { %v3008_v60 = vpop.f32.mrf.mxu0  ;;  %9956 = vmatmul.mubr.msk.bf16.gmra.mxu0 %vm1923_vm3, %v10898_v59  ;;  %v3976_v9 = vpop.f32.mrf.mxu1  ;;  %10440 = vmatmul.mubr.msk.bf16.gmra.mxu1 %vm1923_vm3, %v10899_v62  ;;  %v10904_v1 = vld [vmem:[%s11184_s5 + $0x218] sm:$0xff]   ;;  %v10905_v3 = vld [vmem:[%s11184_s5 + $0x5e0] sm:$0xff]  }
 0x229   : > { %v9038_v10 = vpack.c.bf16 %v4693_v7, %v4693_v7  ;;  %v3009_v11 = vadd.f32 %v12085_v5, %v3008_v60  ;;  %v9280_v12 = vpack.c.bf16 %v4935_v8, %v4935_v8  ;;  %v3977_v13 = vadd.f32 %v12085_v5, %v3976_v9  ;;  %9959 = vmatprep.mubr.msk.bf16.mxu0 %vm11107_vm2, %v11105_v0 }
 0x22a   : > { %v9861_v14 = vpop.f32.mrf.mxu0  ;;  %v10345_v15 = vpop.f32.mrf.mxu1  ;;  %10443 = vmatprep.mubr.msk.bf16.mxu1 %vm11107_vm2, %v11105_v0 }
 0x22b   : > { %7100 = vst.msk [vmem:[%s11408_s12 + $0x13c] sm:$0xf] %vm7020_vm4, %v9038_v10  ;;  %v4694_v16 = vmax.f32 %v3009_v11, 0.0  ;;  %7342 = vst.msk [vmem:[%s11408_s12 + $0x504] sm:$0xf] %vm7020_vm4, %v9280_v12  ;;  %v4936_v17 = vmax.f32 %v3977_v13, 0.0 }
 0x22c   : > { %v3011_v18 = vpop.f32.mrf.mxu0  ;;  %v3979_v20 = vpop.f32.mrf.mxu1 }
 0x22d   : > { %v9039_v22 = vpack.c.bf16 %v4694_v16, %v4694_v16  ;;  %v3012_v23 = vadd.f32 %v12085_v5, %v3011_v18  ;;  %v9281_v24 = vpack.c.bf16 %v4936_v17, %v4936_v17  ;;  %v3980_v25 = vadd.f32 %v12085_v5, %v3979_v20 }
 0x22e   : > { %v9862_v26 = vpop.f32.mrf.mxu0  ;;  %v10346_v27 = vpop.f32.mrf.mxu1 }
 0x22f   : > { %7101 = vst.msk [vmem:[%s11408_s12 + $0x140] sm:$0xf] %vm7020_vm4, %v9039_v22  ;;  %v4695_v28 = vmax.f32 %v3012_v23, 0.0  ;;  %7343 = vst.msk [vmem:[%s11408_s12 + $0x508] sm:$0xf] %vm7020_vm4, %v9281_v24  ;;  %v4937_v29 = vmax.f32 %v3980_v25, 0.0 }
 0x230   : > { %v3016_v30 = vpop.f32.mrf.mxu0  ;;  %9960 = vmatmul.mubr.msk.bf16.gmra.mxu0 %vm1923_vm3, %v10900_v19  ;;  %v3984_v31 = vpop.f32.mrf.mxu1  ;;  %10444 = vmatmul.mubr.msk.bf16.gmra.mxu1 %vm1923_vm3, %v10901_v21  ;;  %v10906_v23 = vld [vmem:[%s11184_s5 + $0x220] sm:$0xff]   ;;  %v10907_v25 = vld [vmem:[%s11184_s5 + $0x5e8] sm:$0xff]  }
 0x231   : > { %v9040_v32 = vpack.c.bf16 %v4695_v28, %v4695_v28  ;;  %v3017_v33 = vadd.f32 %v12085_v5, %v3016_v30  ;;  %v9282_v34 = vpack.c.bf16 %v4937_v29, %v4937_v29  ;;  %v3985_v35 = vadd.f32 %v12085_v5, %v3984_v31  ;;  %9963 = vmatprep.mubr.msk.bf16.mxu0 %vm11107_vm2, %v11105_v0 }
 0x232   : > { %v9865_v36 = vpop.f32.mrf.mxu0  ;;  %v10349_v37 = vpop.f32.mrf.mxu1  ;;  %10447 = vmatprep.mubr.msk.bf16.mxu1 %vm11107_vm2, %v11105_v0 }
 0x233   : > { %7102 = vst.msk [vmem:[%s11408_s12 + $0x144] sm:$0xf] %vm7020_vm4, %v9040_v32  ;;  %v4696_v38 = vmax.f32 %v3017_v33, 0.0  ;;  %7344 = vst.msk [vmem:[%s11408_s12 + $0x50c] sm:$0xf] %vm7020_vm4, %v9282_v34  ;;  %v4938_v39 = vmax.f32 %v3985_v35, 0.0 }
 0x234   : > { %v3019_v40 = vpop.f32.mrf.mxu0  ;;  %v3987_v42 = vpop.f32.mrf.mxu1 }
 0x235   : > { %v9041_v44 = vpack.c.bf16 %v4696_v38, %v4696_v38  ;;  %v3020_v45 = vadd.f32 %v12085_v5, %v3019_v40  ;;  %v9283_v46 = vpack.c.bf16 %v4938_v39, %v4938_v39  ;;  %v3988_v47 = vadd.f32 %v12085_v5, %v3987_v42 }
 0x236   : > { %v9866_v48 = vpop.f32.mrf.mxu0  ;;  %v10350_v49 = vpop.f32.mrf.mxu1 }
 0x237   : > { %7103 = vst.msk [vmem:[%s11408_s12 + $0x148] sm:$0xf] %vm7020_vm4, %v9041_v44  ;;  %v4697_v50 = vmax.f32 %v3020_v45, 0.0  ;;  %7345 = vst.msk [vmem:[%s11408_s12 + $0x510] sm:$0xf] %vm7020_vm4, %v9283_v46  ;;  %v4939_v51 = vmax.f32 %v3988_v47, 0.0 }
 0x238   : > { %v3024_v52 = vpop.f32.mrf.mxu0  ;;  %9964 = vmatmul.mubr.msk.bf16.gmra.mxu0 %vm1923_vm3, %v10902_v41  ;;  %v3992_v53 = vpop.f32.mrf.mxu1  ;;  %10448 = vmatmul.mubr.msk.bf16.gmra.mxu1 %vm1923_vm3, %v10903_v43  ;;  %v10908_v45 = vld [vmem:[%s11184_s5 + $0x228] sm:$0xff]   ;;  %v10909_v47 = vld [vmem:[%s11184_s5 + $0x5f0] sm:$0xff]  }
 0x239   : > { %v9042_v54 = vpack.c.bf16 %v4697_v50, %v4697_v50  ;;  %v3025_v55 = vadd.f32 %v12085_v5, %v3024_v52  ;;  %v9284_v56 = vpack.c.bf16 %v4939_v51, %v4939_v51  ;;  %v3993_v57 = vadd.f32 %v12085_v5, %v3992_v53  ;;  %9967 = vmatprep.mubr.msk.bf16.mxu0 %vm11107_vm2, %v11105_v0 }
 0x23a   : > { %v9869_v58 = vpop.f32.mrf.mxu0  ;;  %v10353_v59 = vpop.f32.mrf.mxu1  ;;  %10451 = vmatprep.mubr.msk.bf16.mxu1 %vm11107_vm2, %v11105_v0 }
 0x23b   : > { %7104 = vst.msk [vmem:[%s11408_s12 + $0x14c] sm:$0xf] %vm7020_vm4, %v9042_v54  ;;  %v4698_v61 = vmax.f32 %v3025_v55, 0.0  ;;  %7346 = vst.msk [vmem:[%s11408_s12 + $0x514] sm:$0xf] %vm7020_vm4, %v9284_v56  ;;  %v4940_v62 = vmax.f32 %v3993_v57, 0.0 }
 0x23c   : > { %v3027_v63 = vpop.f32.mrf.mxu0  ;;  %v3995_v2 = vpop.f32.mrf.mxu1 }
 0x23d   : > { %v9043_v4 = vpack.c.bf16 %v4698_v61, %v4698_v61  ;;  %v3028_v6 = vadd.f32 %v12085_v5, %v3027_v63  ;;  %v9285_v7 = vpack.c.bf16 %v4940_v62, %v4940_v62  ;;  %v3996_v8 = vadd.f32 %v12085_v5, %v3995_v2 }
 0x23e   : > { %v9870_v60 = vpop.f32.mrf.mxu0  ;;  %v10354_v9 = vpop.f32.mrf.mxu1 }
 0x23f   : > { %7105 = vst.msk [vmem:[%s11408_s12 + $0x150] sm:$0xf] %vm7020_vm4, %v9043_v4  ;;  %v4699_v10 = vmax.f32 %v3028_v6, 0.0  ;;  %7347 = vst.msk [vmem:[%s11408_s12 + $0x518] sm:$0xf] %vm7020_vm4, %v9285_v7  ;;  %v4941_v11 = vmax.f32 %v3996_v8, 0.0 }
 0x240   : > { %v3032_v12 = vpop.f32.mrf.mxu0  ;;  %9968 = vmatmul.mubr.msk.bf16.gmra.mxu0 %vm1923_vm3, %v10904_v1  ;;  %v4000_v13 = vpop.f32.mrf.mxu1  ;;  %10452 = vmatmul.mubr.msk.bf16.gmra.mxu1 %vm1923_vm3, %v10905_v3  ;;  %v10910_v6 = vld [vmem:[%s11184_s5 + $0x230] sm:$0xff]   ;;  %v10911_v8 = vld [vmem:[%s11184_s5 + $0x5f8] sm:$0xff]  }
 0x241   : > { %v9044_v14 = vpack.c.bf16 %v4699_v10, %v4699_v10  ;;  %v3033_v15 = vadd.f32 %v12085_v5, %v3032_v12  ;;  %v9286_v16 = vpack.c.bf16 %v4941_v11, %v4941_v11  ;;  %v4001_v17 = vadd.f32 %v12085_v5, %v4000_v13  ;;  %9971 = vmatprep.mubr.msk.bf16.mxu0 %vm11107_vm2, %v11105_v0 }
 0x242   : > { %v9873_v18 = vpop.f32.mrf.mxu0  ;;  %v10357_v19 = vpop.f32.mrf.mxu1  ;;  %10455 = vmatprep.mubr.msk.bf16.mxu1 %vm11107_vm2, %v11105_v0 }
 0x243   : > { %7106 = vst.msk [vmem:[%s11408_s12 + $0x154] sm:$0xf] %vm7020_vm4, %v9044_v14  ;;  %v4700_v20 = vmax.f32 %v3033_v15, 0.0  ;;  %7348 = vst.msk [vmem:[%s11408_s12 + $0x51c] sm:$0xf] %vm7020_vm4, %v9286_v16  ;;  %v4942_v21 = vmax.f32 %v4001_v17, 0.0 }
 0x244   : > { %v3035_v22 = vpop.f32.mrf.mxu0  ;;  %v4003_v24 = vpop.f32.mrf.mxu1 }
 0x245   : > { %v9045_v26 = vpack.c.bf16 %v4700_v20, %v4700_v20  ;;  %v3036_v27 = vadd.f32 %v12085_v5, %v3035_v22  ;;  %v9287_v28 = vpack.c.bf16 %v4942_v21, %v4942_v21  ;;  %v4004_v29 = vadd.f32 %v12085_v5, %v4003_v24 }
 0x246   : > { %v9874_v30 = vpop.f32.mrf.mxu0  ;;  %v10358_v31 = vpop.f32.mrf.mxu1 }
 0x247   : > { %7107 = vst.msk [vmem:[%s11408_s12 + $0x158] sm:$0xf] %vm7020_vm4, %v9045_v26  ;;  %v4701_v32 = vmax.f32 %v3036_v27, 0.0  ;;  %7349 = vst.msk [vmem:[%s11408_s12 + $0x520] sm:$0xf] %vm7020_vm4, %v9287_v28  ;;  %v4943_v33 = vmax.f32 %v4004_v29, 0.0 }
 0x248   : > { %v3040_v34 = vpop.f32.mrf.mxu0  ;;  %9972 = vmatmul.mubr.msk.bf16.gmra.mxu0 %vm1923_vm3, %v10906_v23  ;;  %v4008_v35 = vpop.f32.mrf.mxu1  ;;  %10456 = vmatmul.mubr.msk.bf16.gmra.mxu1 %vm1923_vm3, %v10907_v25  ;;  %v10912_v27 = vld [vmem:[%s11184_s5 + $0x238] sm:$0xff]   ;;  %v10913_v29 = vld [vmem:[%s11184_s5 + $0x600] sm:$0xff]  }
 0x249   : > { %v9046_v36 = vpack.c.bf16 %v4701_v32, %v4701_v32  ;;  %v3041_v37 = vadd.f32 %v12085_v5, %v3040_v34  ;;  %v9288_v38 = vpack.c.bf16 %v4943_v33, %v4943_v33  ;;  %v4009_v39 = vadd.f32 %v12085_v5, %v4008_v35  ;;  %9975 = vmatprep.mubr.msk.bf16.mxu0 %vm11107_vm2, %v11105_v0 }
 0x24a   : > { %v9877_v40 = vpop.f32.mrf.mxu0  ;;  %v10361_v41 = vpop.f32.mrf.mxu1  ;;  %10459 = vmatprep.mubr.msk.bf16.mxu1 %vm11107_vm2, %v11105_v0 }
 0x24b   : > { %7108 = vst.msk [vmem:[%s11408_s12 + $0x15c] sm:$0xf] %vm7020_vm4, %v9046_v36  ;;  %v4702_v42 = vmax.f32 %v3041_v37, 0.0  ;;  %7350 = vst.msk [vmem:[%s11408_s12 + $0x524] sm:$0xf] %vm7020_vm4, %v9288_v38  ;;  %v4944_v43 = vmax.f32 %v4009_v39, 0.0 }
 0x24c   : > { %v3043_v44 = vpop.f32.mrf.mxu0  ;;  %v4011_v46 = vpop.f32.mrf.mxu1 }
 0x24d   : > { %v9047_v48 = vpack.c.bf16 %v4702_v42, %v4702_v42  ;;  %v3044_v49 = vadd.f32 %v12085_v5, %v3043_v44  ;;  %v9289_v50 = vpack.c.bf16 %v4944_v43, %v4944_v43  ;;  %v4012_v51 = vadd.f32 %v12085_v5, %v4011_v46 }
 0x24e   : > { %v9878_v52 = vpop.f32.mrf.mxu0  ;;  %v10362_v53 = vpop.f32.mrf.mxu1 }
 0x24f   : > { %7109 = vst.msk [vmem:[%s11408_s12 + $0x160] sm:$0xf] %vm7020_vm4, %v9047_v48  ;;  %v4703_v54 = vmax.f32 %v3044_v49, 0.0  ;;  %7351 = vst.msk [vmem:[%s11408_s12 + $0x528] sm:$0xf] %vm7020_vm4, %v9289_v50  ;;  %v4945_v55 = vmax.f32 %v4012_v51, 0.0 }
 0x250   : > { %v3048_v56 = vpop.f32.mrf.mxu0  ;;  %9976 = vmatmul.mubr.msk.bf16.gmra.mxu0 %vm1923_vm3, %v10908_v45  ;;  %v4016_v57 = vpop.f32.mrf.mxu1  ;;  %10460 = vmatmul.mubr.msk.bf16.gmra.mxu1 %vm1923_vm3, %v10909_v47  ;;  %v10914_v49 = vld [vmem:[%s11184_s5 + $0x240] sm:$0xff]   ;;  %v10915_v51 = vld [vmem:[%s11184_s5 + $0x608] sm:$0xff]  }
 0x251   : > { %v9048_v58 = vpack.c.bf16 %v4703_v54, %v4703_v54  ;;  %v3049_v59 = vadd.f32 %v12085_v5, %v3048_v56  ;;  %v9290_v61 = vpack.c.bf16 %v4945_v55, %v4945_v55  ;;  %v4017_v62 = vadd.f32 %v12085_v5, %v4016_v57  ;;  %9979 = vmatprep.mubr.msk.bf16.mxu0 %vm11107_vm2, %v11105_v0 }
 0x252   : > { %v9881_v63 = vpop.f32.mrf.mxu0  ;;  %v10365_v1 = vpop.f32.mrf.mxu1  ;;  %10463 = vmatprep.mubr.msk.bf16.mxu1 %vm11107_vm2, %v11105_v0 }
 0x253   : > { %7110 = vst.msk [vmem:[%s11408_s12 + $0x164] sm:$0xf] %vm7020_vm4, %v9048_v58  ;;  %v4704_v2 = vmax.f32 %v3049_v59, 0.0  ;;  %7352 = vst.msk [vmem:[%s11408_s12 + $0x52c] sm:$0xf] %vm7020_vm4, %v9290_v61  ;;  %v4946_v3 = vmax.f32 %v4017_v62, 0.0 }
 0x254   : > { %v3051_v4 = vpop.f32.mrf.mxu0  ;;  %v4019_v7 = vpop.f32.mrf.mxu1 }
 0x255   : > { %v9049_v60 = vpack.c.bf16 %v4704_v2, %v4704_v2  ;;  %v3052_v9 = vadd.f32 %v12085_v5, %v3051_v4  ;;  %v9291_v10 = vpack.c.bf16 %v4946_v3, %v4946_v3  ;;  %v4020_v11 = vadd.f32 %v12085_v5, %v4019_v7 }
 0x256   : > { %v9882_v12 = vpop.f32.mrf.mxu0  ;;  %v10366_v13 = vpop.f32.mrf.mxu1 }
 0x257   : > { %7111 = vst.msk [vmem:[%s11408_s12 + $0x168] sm:$0xf] %vm7020_vm4, %v9049_v60  ;;  %v4705_v14 = vmax.f32 %v3052_v9, 0.0  ;;  %7353 = vst.msk [vmem:[%s11408_s12 + $0x530] sm:$0xf] %vm7020_vm4, %v9291_v10  ;;  %v4947_v15 = vmax.f32 %v4020_v11, 0.0 }
 0x258   : > { %v3056_v16 = vpop.f32.mrf.mxu0  ;;  %9980 = vmatmul.mubr.msk.bf16.gmra.mxu0 %vm1923_vm3, %v10910_v6  ;;  %v4024_v17 = vpop.f32.mrf.mxu1  ;;  %10464 = vmatmul.mubr.msk.bf16.gmra.mxu1 %vm1923_vm3, %v10911_v8  ;;  %v10916_v9 = vld [vmem:[%s11184_s5 + $0x248] sm:$0xff]   ;;  %v10917_v11 = vld [vmem:[%s11184_s5 + $0x610] sm:$0xff]  }
 0x259   : > { %v9050_v18 = vpack.c.bf16 %v4705_v14, %v4705_v14  ;;  %v3057_v19 = vadd.f32 %v12085_v5, %v3056_v16  ;;  %v9292_v20 = vpack.c.bf16 %v4947_v15, %v4947_v15  ;;  %v4025_v21 = vadd.f32 %v12085_v5, %v4024_v17  ;;  %9983 = vmatprep.mubr.msk.bf16.mxu0 %vm11107_vm2, %v11105_v0 }
 0x25a   : > { %v9885_v22 = vpop.f32.mrf.mxu0  ;;  %v10369_v23 = vpop.f32.mrf.mxu1  ;;  %10467 = vmatprep.mubr.msk.bf16.mxu1 %vm11107_vm2, %v11105_v0 }
 0x25b   : > { %7112 = vst.msk [vmem:[%s11408_s12 + $0x16c] sm:$0xf] %vm7020_vm4, %v9050_v18  ;;  %v4706_v24 = vmax.f32 %v3057_v19, 0.0  ;;  %7354 = vst.msk [vmem:[%s11408_s12 + $0x534] sm:$0xf] %vm7020_vm4, %v9292_v20  ;;  %v4948_v25 = vmax.f32 %v4025_v21, 0.0 }
 0x25c   : > { %v3059_v26 = vpop.f32.mrf.mxu0  ;;  %v4027_v28 = vpop.f32.mrf.mxu1 }
 0x25d   : > { %v9051_v30 = vpack.c.bf16 %v4706_v24, %v4706_v24  ;;  %v3060_v31 = vadd.f32 %v12085_v5, %v3059_v26  ;;  %v9293_v32 = vpack.c.bf16 %v4948_v25, %v4948_v25  ;;  %v4028_v33 = vadd.f32 %v12085_v5, %v4027_v28 }
 0x25e   : > { %v9886_v34 = vpop.f32.mrf.mxu0  ;;  %v10370_v35 = vpop.f32.mrf.mxu1 }
 0x25f   : > { %7113 = vst.msk [vmem:[%s11408_s12 + $0x170] sm:$0xf] %vm7020_vm4, %v9051_v30  ;;  %v4707_v36 = vmax.f32 %v3060_v31, 0.0  ;;  %7355 = vst.msk [vmem:[%s11408_s12 + $0x538] sm:$0xf] %vm7020_vm4, %v9293_v32  ;;  %v4949_v37 = vmax.f32 %v4028_v33, 0.0 }
 0x260   : > { %v3064_v38 = vpop.f32.mrf.mxu0  ;;  %9984 = vmatmul.mubr.msk.bf16.gmra.mxu0 %vm1923_vm3, %v10912_v27  ;;  %v4032_v39 = vpop.f32.mrf.mxu1  ;;  %10468 = vmatmul.mubr.msk.bf16.gmra.mxu1 %vm1923_vm3, %v10913_v29  ;;  %v10918_v31 = vld [vmem:[%s11184_s5 + $0x250] sm:$0xff]   ;;  %v10919_v33 = vld [vmem:[%s11184_s5 + $0x618] sm:$0xff]  }
 0x261   : > { %v9052_v40 = vpack.c.bf16 %v4707_v36, %v4707_v36  ;;  %v3065_v41 = vadd.f32 %v12085_v5, %v3064_v38  ;;  %v9294_v42 = vpack.c.bf16 %v4949_v37, %v4949_v37  ;;  %v4033_v43 = vadd.f32 %v12085_v5, %v4032_v39  ;;  %9987 = vmatprep.mubr.msk.bf16.mxu0 %vm11107_vm2, %v11105_v0 }
 0x262   : > { %v9889_v44 = vpop.f32.mrf.mxu0  ;;  %v10373_v45 = vpop.f32.mrf.mxu1  ;;  %10471 = vmatprep.mubr.msk.bf16.mxu1 %vm11107_vm2, %v11105_v0 }
 0x263   : > { %7114 = vst.msk [vmem:[%s11408_s12 + $0x174] sm:$0xf] %vm7020_vm4, %v9052_v40  ;;  %v4708_v46 = vmax.f32 %v3065_v41, 0.0  ;;  %7356 = vst.msk [vmem:[%s11408_s12 + $0x53c] sm:$0xf] %vm7020_vm4, %v9294_v42  ;;  %v4950_v47 = vmax.f32 %v4033_v43, 0.0 }
 0x264   : > { %v3067_v48 = vpop.f32.mrf.mxu0  ;;  %v4035_v50 = vpop.f32.mrf.mxu1 }
 0x265   : > { %v9053_v52 = vpack.c.bf16 %v4708_v46, %v4708_v46  ;;  %v3068_v53 = vadd.f32 %v12085_v5, %v3067_v48  ;;  %v9295_v54 = vpack.c.bf16 %v4950_v47, %v4950_v47  ;;  %v4036_v55 = vadd.f32 %v12085_v5, %v4035_v50 }
 0x266   : > { %v9890_v56 = vpop.f32.mrf.mxu0  ;;  %v10374_v57 = vpop.f32.mrf.mxu1 }
 0x267   : > { %7115 = vst.msk [vmem:[%s11408_s12 + $0x178] sm:$0xf] %vm7020_vm4, %v9053_v52  ;;  %v4709_v58 = vmax.f32 %v3068_v53, 0.0  ;;  %7357 = vst.msk [vmem:[%s11408_s12 + $0x540] sm:$0xf] %vm7020_vm4, %v9295_v54  ;;  %v4951_v59 = vmax.f32 %v4036_v55, 0.0 }
 0x268   : > { %v3072_v61 = vpop.f32.mrf.mxu0  ;;  %9988 = vmatmul.mubr.msk.bf16.gmra.mxu0 %vm1923_vm3, %v10914_v49  ;;  %v4040_v62 = vpop.f32.mrf.mxu1  ;;  %10472 = vmatmul.mubr.msk.bf16.gmra.mxu1 %vm1923_vm3, %v10915_v51  ;;  %v10920_v53 = vld [vmem:[%s11184_s5 + $0x258] sm:$0xff]   ;;  %v10921_v55 = vld [vmem:[%s11184_s5 + $0x620] sm:$0xff]  }
 0x269   : > { %v9054_v63 = vpack.c.bf16 %v4709_v58, %v4709_v58  ;;  %v3073_v1 = vadd.f32 %v12085_v5, %v3072_v61  ;;  %v9296_v2 = vpack.c.bf16 %v4951_v59, %v4951_v59  ;;  %v4041_v3 = vadd.f32 %v12085_v5, %v4040_v62  ;;  %9991 = vmatprep.mubr.msk.bf16.mxu0 %vm11107_vm2, %v11105_v0 }
 0x26a   : > { %v9893_v4 = vpop.f32.mrf.mxu0  ;;  %v10377_v6 = vpop.f32.mrf.mxu1  ;;  %10475 = vmatprep.mubr.msk.bf16.mxu1 %vm11107_vm2, %v11105_v0 }
 0x26b   : > { %7116 = vst.msk [vmem:[%s11408_s12 + $0x17c] sm:$0xf] %vm7020_vm4, %v9054_v63  ;;  %v4710_v7 = vmax.f32 %v3073_v1, 0.0  ;;  %7358 = vst.msk [vmem:[%s11408_s12 + $0x544] sm:$0xf] %vm7020_vm4, %v9296_v2  ;;  %v4952_v8 = vmax.f32 %v4041_v3, 0.0 }
 0x26c   : > { %v3075_v60 = vpop.f32.mrf.mxu0  ;;  %v4043_v10 = vpop.f32.mrf.mxu1 }
 0x26d   : > { %v9055_v12 = vpack.c.bf16 %v4710_v7, %v4710_v7  ;;  %v3076_v13 = vadd.f32 %v12085_v5, %v3075_v60  ;;  %v9297_v14 = vpack.c.bf16 %v4952_v8, %v4952_v8  ;;  %v4044_v15 = vadd.f32 %v12085_v5, %v4043_v10 }
 0x26e   : > { %v9894_v16 = vpop.f32.mrf.mxu0  ;;  %v10378_v17 = vpop.f32.mrf.mxu1 }
 0x26f   : > { %7117 = vst.msk [vmem:[%s11408_s12 + $0x180] sm:$0xf] %vm7020_vm4, %v9055_v12  ;;  %v4711_v18 = vmax.f32 %v3076_v13, 0.0  ;;  %7359 = vst.msk [vmem:[%s11408_s12 + $0x548] sm:$0xf] %vm7020_vm4, %v9297_v14  ;;  %v4953_v19 = vmax.f32 %v4044_v15, 0.0 }
 0x270   : > { %v3080_v20 = vpop.f32.mrf.mxu0  ;;  %9992 = vmatmul.mubr.msk.bf16.gmra.mxu0 %vm1923_vm3, %v10916_v9  ;;  %v4048_v21 = vpop.f32.mrf.mxu1  ;;  %10476 = vmatmul.mubr.msk.bf16.gmra.mxu1 %vm1923_vm3, %v10917_v11  ;;  %v10922_v13 = vld [vmem:[%s11184_s5 + $0x260] sm:$0xff]  }
 0x271   : > { %v9056_v22 = vpack.c.bf16 %v4711_v18, %v4711_v18  ;;  %v3081_v23 = vadd.f32 %v12085_v5, %v3080_v20  ;;  %v9298_v24 = vpack.c.bf16 %v4953_v19, %v4953_v19  ;;  %v4049_v25 = vadd.f32 %v12085_v5, %v4048_v21  ;;  %9995 = vmatprep.mubr.msk.bf16.mxu0 %vm11107_vm2, %v11105_v0  ;;  %v12441_v16 = vld [vmem:[%s13838_s2] ss:$0 sm:$0xff] }
 0x272   : > { %v9897_v26 = vpop.f32.mrf.mxu0  ;;  %v10381_v27 = vpop.f32.mrf.mxu1  ;;  %10479 = vmatprep.mubr.msk.bf16.mxu1 %vm11107_vm2, %v11105_v0 }
 0x273   : > { %7118 = vst.msk [vmem:[%s11408_s12 + $0x184] sm:$0xf] %vm7020_vm4, %v9056_v22  ;;  %v4712_v28 = vmax.f32 %v3081_v23, 0.0  ;;  %7360 = vst.msk [vmem:[%s11408_s12 + $0x54c] sm:$0xf] %vm7020_vm4, %v9298_v24  ;;  %v4954_v29 = vmax.f32 %v4049_v25, 0.0 }
 0x274   : > { %v3083_v30 = vpop.f32.mrf.mxu0  ;;  %v4051_v32 = vpop.f32.mrf.mxu1 }
 0x275   : > { %v9057_v34 = vpack.c.bf16 %v4712_v28, %v4712_v28  ;;  %v3084_v35 = vadd.f32 %v12085_v5, %v3083_v30  ;;  %v9299_v36 = vpack.c.bf16 %v4954_v29, %v4954_v29  ;;  %v4052_v37 = vadd.f32 %v12085_v5, %v4051_v32 }
 0x276   : > { %v9898_v38 = vpop.f32.mrf.mxu0  ;;  %v10382_v39 = vpop.f32.mrf.mxu1 }
 0x277   : > { %7119 = vst.msk [vmem:[%s11408_s12 + $0x188] sm:$0xf] %vm7020_vm4, %v9057_v34  ;;  %v4713_v40 = vmax.f32 %v3084_v35, 0.0  ;;  %7361 = vst.msk [vmem:[%s11408_s12 + $0x550] sm:$0xf] %vm7020_vm4, %v9299_v36  ;;  %v4955_v41 = vmax.f32 %v4052_v37, 0.0 }
 0x278   : > { %v3088_v42 = vpop.f32.mrf.mxu0  ;;  %9996 = vmatmul.mubr.msk.bf16.gmra.mxu0 %vm1923_vm3, %v10918_v31  ;;  %v4056_v43 = vpop.f32.mrf.mxu1  ;;  %10480 = vmatmul.mubr.msk.bf16.gmra.mxu1 %vm1923_vm3, %v10919_v33  ;;  %v10924_v35 = vld [vmem:[%s11184_s5 + $0x268] sm:$0xff]   ;;  %v10925_v37 = vld [vmem:[%s11184_s5 + $0x630] sm:$0xff]  }
 0x279   : > { %v9058_v44 = vpack.c.bf16 %v4713_v40, %v4713_v40  ;;  %v3089_v45 = vadd.f32 %v12085_v5, %v3088_v42  ;;  %v9300_v46 = vpack.c.bf16 %v4955_v41, %v4955_v41  ;;  %v4057_v47 = vadd.f32 %v12085_v5, %v4056_v43  ;;  %9999 = vmatprep.mubr.msk.bf16.mxu0 %vm11107_vm2, %v11105_v0 }
 0x27a   : > { %v9901_v48 = vpop.f32.mrf.mxu0  ;;  %v10385_v49 = vpop.f32.mrf.mxu1  ;;  %10483 = vmatprep.mubr.msk.bf16.mxu1 %vm11107_vm2, %v11105_v0 }
 0x27b   : > { %7120 = vst.msk [vmem:[%s11408_s12 + $0x18c] sm:$0xf] %vm7020_vm4, %v9058_v44  ;;  %v4714_v50 = vmax.f32 %v3089_v45, 0.0  ;;  %7362 = vst.msk [vmem:[%s11408_s12 + $0x554] sm:$0xf] %vm7020_vm4, %v9300_v46  ;;  %v4956_v51 = vmax.f32 %v4057_v47, 0.0 }
 0x27c   : > { %v3091_v52 = vpop.f32.mrf.mxu0  ;;  %v4059_v54 = vpop.f32.mrf.mxu1 }
 0x27d   : > { %v9059_v56 = vpack.c.bf16 %v4714_v50, %v4714_v50  ;;  %v3092_v57 = vadd.f32 %v12085_v5, %v3091_v52  ;;  %v9301_v58 = vpack.c.bf16 %v4956_v51, %v4956_v51  ;;  %v4060_v59 = vadd.f32 %v12085_v5, %v4059_v54 }
 0x27e   : > { %v9902_v61 = vpop.f32.mrf.mxu0  ;;  %v10386_v62 = vpop.f32.mrf.mxu1 }
 0x27f   : > { %7121 = vst.msk [vmem:[%s11408_s12 + $0x190] sm:$0xf] %vm7020_vm4, %v9059_v56  ;;  %v4715_v63 = vmax.f32 %v3092_v57, 0.0  ;;  %7363 = vst.msk [vmem:[%s11408_s12 + $0x558] sm:$0xf] %vm7020_vm4, %v9301_v58  ;;  %v4957_v1 = vmax.f32 %v4060_v59, 0.0 }
 0x280   : > { %v3096_v2 = vpop.f32.mrf.mxu0  ;;  %10000 = vmatmul.mubr.msk.bf16.gmra.mxu0 %vm1923_vm3, %v10920_v53  ;;  %v4064_v3 = vpop.f32.mrf.mxu1  ;;  %10484 = vmatmul.mubr.msk.bf16.gmra.mxu1 %vm1923_vm3, %v10921_v55  ;;  %v10926_v57 = vld [vmem:[%s11184_s5 + $0x270] sm:$0xff]   ;;  %v10927_v59 = vld [vmem:[%s11184_s5 + $0x638] sm:$0xff]  }
 0x281   : > { %v9060_v4 = vpack.c.bf16 %v4715_v63, %v4715_v63  ;;  %v3097_v6 = vadd.f32 %v12085_v5, %v3096_v2  ;;  %v9302_v7 = vpack.c.bf16 %v4957_v1, %v4957_v1  ;;  %v4065_v8 = vadd.f32 %v12085_v5, %v4064_v3  ;;  %10003 = vmatprep.mubr.msk.bf16.mxu0 %vm11107_vm2, %v11105_v0  ;;  %v10923_v5 = vld [vmem:[%s11184_s5 + $0x628] sm:$0xff]  }
 0x282   : > { %v9905_v60 = vpop.f32.mrf.mxu0  ;;  %v10389_v9 = vpop.f32.mrf.mxu1  ;;  %10487 = vmatprep.mubr.msk.bf16.mxu1 %vm11107_vm2, %v11105_v0 }
 0x283   : > { %7122 = vst.msk [vmem:[%s11408_s12 + $0x194] sm:$0xf] %vm7020_vm4, %v9060_v4  ;;  %v4716_v10 = vmax.f32 %v3097_v6, 0.0  ;;  %7364 = vst.msk [vmem:[%s11408_s12 + $0x55c] sm:$0xf] %vm7020_vm4, %v9302_v7  ;;  %v4958_v11 = vmax.f32 %v4065_v8, 0.0 }
 0x284   : > { %v3099_v12 = vpop.f32.mrf.mxu0  ;;  %v4067_v14 = vpop.f32.mrf.mxu1 }
 0x285   : > { %v9061_v15 = vpack.c.bf16 %v4716_v10, %v4716_v10  ;;  %v3100_v17 = vadd.f32 %v12441_v16, %v3099_v12  ;;  %v9303_v18 = vpack.c.bf16 %v4958_v11, %v4958_v11  ;;  %v4068_v19 = vadd.f32 %v12441_v16, %v4067_v14 }
 0x286   : > { %v9906_v20 = vpop.f32.mrf.mxu0  ;;  %v10390_v21 = vpop.f32.mrf.mxu1 }
 0x287   : > { %7123 = vst.msk [vmem:[%s11408_s12 + $0x198] sm:$0xf] %vm7020_vm4, %v9061_v15  ;;  %v4717_v22 = vmax.f32 %v3100_v17, 0.0  ;;  %7365 = vst.msk [vmem:[%s11408_s12 + $0x560] sm:$0xf] %vm7020_vm4, %v9303_v18  ;;  %v4959_v23 = vmax.f32 %v4068_v19, 0.0 }
 0x288   : > { %v3104_v24 = vpop.f32.mrf.mxu0  ;;  %10004 = vmatmul.mubr.msk.bf16.gmra.mxu0 %vm1923_vm3, %v10922_v13  ;;  %v4072_v25 = vpop.f32.mrf.mxu1  ;;  %10488 = vmatmul.mubr.msk.bf16.gmra.mxu1 %vm1923_vm3, %v10923_v5  ;;  %v10928_v17 = vld [vmem:[%s11184_s5 + $0x278] sm:$0xff]   ;;  %v10929_v19 = vld [vmem:[%s11184_s5 + $0x640] sm:$0xff]  }
 0x289   : > { %v9062_v26 = vpack.c.bf16 %v4717_v22, %v4717_v22  ;;  %v3105_v27 = vadd.f32 %v12441_v16, %v3104_v24  ;;  %v9304_v28 = vpack.c.bf16 %v4959_v23, %v4959_v23  ;;  %v4073_v29 = vadd.f32 %v12441_v16, %v4072_v25  ;;  %10007 = vmatprep.mubr.msk.bf16.mxu0 %vm11107_vm2, %v11105_v0 }
 0x28a   : > { %v9909_v30 = vpop.f32.mrf.mxu0  ;;  %v10393_v31 = vpop.f32.mrf.mxu1  ;;  %10491 = vmatprep.mubr.msk.bf16.mxu1 %vm11107_vm2, %v11105_v0 }
 0x28b   : > { %7124 = vst.msk [vmem:[%s11408_s12 + $0x19c] sm:$0xf] %vm7020_vm4, %v9062_v26  ;;  %v4718_v32 = vmax.f32 %v3105_v27, 0.0  ;;  %7366 = vst.msk [vmem:[%s11408_s12 + $0x564] sm:$0xf] %vm7020_vm4, %v9304_v28  ;;  %v4960_v33 = vmax.f32 %v4073_v29, 0.0 }
 0x28c   : > { %v3107_v34 = vpop.f32.mrf.mxu0  ;;  %v4075_v36 = vpop.f32.mrf.mxu1 }
 0x28d   : > { %v9063_v38 = vpack.c.bf16 %v4718_v32, %v4718_v32  ;;  %v3108_v39 = vadd.f32 %v12441_v16, %v3107_v34  ;;  %v9305_v40 = vpack.c.bf16 %v4960_v33, %v4960_v33  ;;  %v4076_v41 = vadd.f32 %v12441_v16, %v4075_v36 }
 0x28e   : > { %v9910_v42 = vpop.f32.mrf.mxu0  ;;  %v10394_v43 = vpop.f32.mrf.mxu1 }
 0x28f   : > { %7125 = vst.msk [vmem:[%s11408_s12 + $0x1a0] sm:$0xf] %vm7020_vm4, %v9063_v38  ;;  %v4719_v44 = vmax.f32 %v3108_v39, 0.0  ;;  %7367 = vst.msk [vmem:[%s11408_s12 + $0x568] sm:$0xf] %vm7020_vm4, %v9305_v40  ;;  %v4961_v45 = vmax.f32 %v4076_v41, 0.0 }
 0x290   : > { %v3112_v46 = vpop.f32.mrf.mxu0  ;;  %10008 = vmatmul.mubr.msk.bf16.gmra.mxu0 %vm1923_vm3, %v10924_v35  ;;  %v4080_v47 = vpop.f32.mrf.mxu1  ;;  %10492 = vmatmul.mubr.msk.bf16.gmra.mxu1 %vm1923_vm3, %v10925_v37  ;;  %v10930_v39 = vld [vmem:[%s11184_s5 + $0x280] sm:$0xff]   ;;  %v10931_v41 = vld [vmem:[%s11184_s5 + $0x648] sm:$0xff]  }
 0x291   : > { %v9064_v48 = vpack.c.bf16 %v4719_v44, %v4719_v44  ;;  %v3113_v49 = vadd.f32 %v12441_v16, %v3112_v46  ;;  %v9306_v50 = vpack.c.bf16 %v4961_v45, %v4961_v45  ;;  %v4081_v51 = vadd.f32 %v12441_v16, %v4080_v47  ;;  %10011 = vmatprep.mubr.msk.bf16.mxu0 %vm11107_vm2, %v11105_v0 }
 0x292   : > { %v9913_v52 = vpop.f32.mrf.mxu0  ;;  %v10397_v53 = vpop.f32.mrf.mxu1  ;;  %10495 = vmatprep.mubr.msk.bf16.mxu1 %vm11107_vm2, %v11105_v0 }
 0x293   : > { %7126 = vst.msk [vmem:[%s11408_s12 + $0x1a4] sm:$0xf] %vm7020_vm4, %v9064_v48  ;;  %v4720_v54 = vmax.f32 %v3113_v49, 0.0  ;;  %7368 = vst.msk [vmem:[%s11408_s12 + $0x56c] sm:$0xf] %vm7020_vm4, %v9306_v50  ;;  %v4962_v55 = vmax.f32 %v4081_v51, 0.0 }
 0x294   : > { %v3115_v56 = vpop.f32.mrf.mxu0  ;;  %v4083_v58 = vpop.f32.mrf.mxu1 }
 0x295   : > { %v9065_v61 = vpack.c.bf16 %v4720_v54, %v4720_v54  ;;  %v3116_v62 = vadd.f32 %v12441_v16, %v3115_v56  ;;  %v9307_v63 = vpack.c.bf16 %v4962_v55, %v4962_v55  ;;  %v4084_v1 = vadd.f32 %v12441_v16, %v4083_v58 }
 0x296   : > { %v9914_v2 = vpop.f32.mrf.mxu0  ;;  %v10398_v3 = vpop.f32.mrf.mxu1 }
 0x297   : > { %7127 = vst.msk [vmem:[%s11408_s12 + $0x1a8] sm:$0xf] %vm7020_vm4, %v9065_v61  ;;  %v4721_v4 = vmax.f32 %v3116_v62, 0.0  ;;  %7369 = vst.msk [vmem:[%s11408_s12 + $0x570] sm:$0xf] %vm7020_vm4, %v9307_v63  ;;  %v4963_v6 = vmax.f32 %v4084_v1, 0.0 }
 0x298   : > { %v3120_v7 = vpop.f32.mrf.mxu0  ;;  %10012 = vmatmul.mubr.msk.bf16.gmra.mxu0 %vm1923_vm3, %v10926_v57  ;;  %v4088_v8 = vpop.f32.mrf.mxu1  ;;  %10496 = vmatmul.mubr.msk.bf16.gmra.mxu1 %vm1923_vm3, %v10927_v59  ;;  %v10932_v62 = vld [vmem:[%s11184_s5 + $0x288] sm:$0xff]   ;;  %v10933_v1 = vld [vmem:[%s11184_s5 + $0x650] sm:$0xff]  }
 0x299   : > { %v9066_v60 = vpack.c.bf16 %v4721_v4, %v4721_v4  ;;  %v3121_v9 = vadd.f32 %v12441_v16, %v3120_v7  ;;  %v9308_v10 = vpack.c.bf16 %v4963_v6, %v4963_v6  ;;  %v4089_v11 = vadd.f32 %v12441_v16, %v4088_v8  ;;  %10015 = vmatprep.mubr.msk.bf16.mxu0 %vm11107_vm2, %v11105_v0 }
 0x29a   : > { %v9917_v12 = vpop.f32.mrf.mxu0  ;;  %v10401_v13 = vpop.f32.mrf.mxu1  ;;  %10499 = vmatprep.mubr.msk.bf16.mxu1 %vm11107_vm2, %v11105_v0 }
 0x29b   : > { %7128 = vst.msk [vmem:[%s11408_s12 + $0x1ac] sm:$0xf] %vm7020_vm4, %v9066_v60  ;;  %v4722_v14 = vmax.f32 %v3121_v9, 0.0  ;;  %7370 = vst.msk [vmem:[%s11408_s12 + $0x574] sm:$0xf] %vm7020_vm4, %v9308_v10  ;;  %v4964_v5 = vmax.f32 %v4089_v11, 0.0 }
 0x29c   : > { %v3123_v15 = vpop.f32.mrf.mxu0  ;;  %v4091_v18 = vpop.f32.mrf.mxu1 }
 0x29d   : > { %v9067_v20 = vpack.c.bf16 %v4722_v14, %v4722_v14  ;;  %v3124_v21 = vadd.f32 %v12441_v16, %v3123_v15  ;;  %v9309_v22 = vpack.c.bf16 %v4964_v5, %v4964_v5  ;;  %v4092_v23 = vadd.f32 %v12441_v16, %v4091_v18 }
 0x29e   : > { %v9918_v24 = vpop.f32.mrf.mxu0  ;;  %v10402_v25 = vpop.f32.mrf.mxu1 }
 0x29f   : > { %7129 = vst.msk [vmem:[%s11408_s12 + $0x1b0] sm:$0xf] %vm7020_vm4, %v9067_v20  ;;  %v4723_v26 = vmax.f32 %v3124_v21, 0.0  ;;  %7371 = vst.msk [vmem:[%s11408_s12 + $0x578] sm:$0xf] %vm7020_vm4, %v9309_v22  ;;  %v4965_v27 = vmax.f32 %v4092_v23, 0.0 }
 0x2a0   : > { %v3128_v28 = vpop.f32.mrf.mxu0  ;;  %10016 = vmatmul.mubr.msk.bf16.gmra.mxu0 %vm1923_vm3, %v10928_v17  ;;  %v4096_v29 = vpop.f32.mrf.mxu1  ;;  %10500 = vmatmul.mubr.msk.bf16.gmra.mxu1 %vm1923_vm3, %v10929_v19  ;;  %v10934_v21 = vld [vmem:[%s11184_s5 + $0x290] sm:$0xff]   ;;  %v10935_v23 = vld [vmem:[%s11184_s5 + $0x658] sm:$0xff]  }
 0x2a1   : > { %v9068_v30 = vpack.c.bf16 %v4723_v26, %v4723_v26  ;;  %v3129_v31 = vadd.f32 %v12441_v16, %v3128_v28  ;;  %v9310_v32 = vpack.c.bf16 %v4965_v27, %v4965_v27  ;;  %v4097_v33 = vadd.f32 %v12441_v16, %v4096_v29  ;;  %10019 = vmatprep.mubr.msk.bf16.mxu0 %vm11107_vm2, %v11105_v0 }
 0x2a2   : > { %v9921_v34 = vpop.f32.mrf.mxu0  ;;  %v10405_v35 = vpop.f32.mrf.mxu1  ;;  %10503 = vmatprep.mubr.msk.bf16.mxu1 %vm11107_vm2, %v11105_v0 }
 0x2a3   : > { %7130 = vst.msk [vmem:[%s11408_s12 + $0x1b4] sm:$0xf] %vm7020_vm4, %v9068_v30  ;;  %v4724_v36 = vmax.f32 %v3129_v31, 0.0  ;;  %7372 = vst.msk [vmem:[%s11408_s12 + $0x57c] sm:$0xf] %vm7020_vm4, %v9310_v32  ;;  %v4966_v37 = vmax.f32 %v4097_v33, 0.0 }
 0x2a4   : > { %v3131_v38 = vpop.f32.mrf.mxu0  ;;  %v4099_v40 = vpop.f32.mrf.mxu1 }
 0x2a5   : > { %v9069_v42 = vpack.c.bf16 %v4724_v36, %v4724_v36  ;;  %v3132_v43 = vadd.f32 %v12441_v16, %v3131_v38  ;;  %v9311_v44 = vpack.c.bf16 %v4966_v37, %v4966_v37  ;;  %v4100_v45 = vadd.f32 %v12441_v16, %v4099_v40 }
 0x2a6   : > { %v9922_v46 = vpop.f32.mrf.mxu0  ;;  %v10406_v47 = vpop.f32.mrf.mxu1 }
 0x2a7   : > { %7131 = vst.msk [vmem:[%s11408_s12 + $0x1b8] sm:$0xf] %vm7020_vm4, %v9069_v42  ;;  %v4725_v48 = vmax.f32 %v3132_v43, 0.0  ;;  %7373 = vst.msk [vmem:[%s11408_s12 + $0x580] sm:$0xf] %vm7020_vm4, %v9311_v44  ;;  %v4967_v49 = vmax.f32 %v4100_v45, 0.0 }
 0x2a8   : > { %v3136_v50 = vpop.f32.mrf.mxu0  ;;  %10020 = vmatmul.mubr.msk.bf16.gmra.mxu0 %vm1923_vm3, %v10930_v39  ;;  %v4104_v51 = vpop.f32.mrf.mxu1  ;;  %10504 = vmatmul.mubr.msk.bf16.gmra.mxu1 %vm1923_vm3, %v10931_v41  ;;  %v10936_v43 = vld [vmem:[%s11184_s5 + $0x298] sm:$0xff]   ;;  %v10937_v45 = vld [vmem:[%s11184_s5 + $0x660] sm:$0xff]  }
 0x2a9   : > { %v9070_v52 = vpack.c.bf16 %v4725_v48, %v4725_v48  ;;  %v3137_v53 = vadd.f32 %v12441_v16, %v3136_v50  ;;  %v9312_v54 = vpack.c.bf16 %v4967_v49, %v4967_v49  ;;  %v4105_v55 = vadd.f32 %v12441_v16, %v4104_v51  ;;  %10023 = vmatprep.mubr.msk.bf16.mxu0 %vm11107_vm2, %v11105_v0 }
 0x2aa   : > { %v9925_v56 = vpop.f32.mrf.mxu0  ;;  %v10409_v57 = vpop.f32.mrf.mxu1  ;;  %10507 = vmatprep.mubr.msk.bf16.mxu1 %vm11107_vm2, %v11105_v0 }
 0x2ab   : > { %7132 = vst.msk [vmem:[%s11408_s12 + $0x1bc] sm:$0xf] %vm7020_vm4, %v9070_v52  ;;  %v4726_v58 = vmax.f32 %v3137_v53, 0.0  ;;  %7374 = vst.msk [vmem:[%s11408_s12 + $0x584] sm:$0xf] %vm7020_vm4, %v9312_v54  ;;  %v4968_v59 = vmax.f32 %v4105_v55, 0.0 }
 0x2ac   : > { %v3139_v61 = vpop.f32.mrf.mxu0  ;;  %v4107_v63 = vpop.f32.mrf.mxu1 }
 0x2ad   : > { %v9071_v2 = vpack.c.bf16 %v4726_v58, %v4726_v58  ;;  %v3140_v3 = vadd.f32 %v12441_v16, %v3139_v61  ;;  %v9313_v4 = vpack.c.bf16 %v4968_v59, %v4968_v59  ;;  %v4108_v6 = vadd.f32 %v12441_v16, %v4107_v63 }
 0x2ae   : > { %v9926_v7 = vpop.f32.mrf.mxu0  ;;  %v10410_v8 = vpop.f32.mrf.mxu1 }
 0x2af   : > { %7133 = vst.msk [vmem:[%s11408_s12 + $0x1c0] sm:$0xf] %vm7020_vm4, %v9071_v2  ;;  %v4727_v60 = vmax.f32 %v3140_v3, 0.0  ;;  %7375 = vst.msk [vmem:[%s11408_s12 + $0x588] sm:$0xf] %vm7020_vm4, %v9313_v4  ;;  %v4969_v9 = vmax.f32 %v4108_v6, 0.0 }
 0x2b0   : > { %v3144_v10 = vpop.f32.mrf.mxu0  ;;  %10024 = vmatmul.mubr.msk.bf16.gmra.mxu0 %vm1923_vm3, %v10932_v62  ;;  %v4112_v11 = vpop.f32.mrf.mxu1  ;;  %10508 = vmatmul.mubr.msk.bf16.gmra.mxu1 %vm1923_vm3, %v10933_v1  ;;  %v10938_v3 = vld [vmem:[%s11184_s5 + $0x2a0] sm:$0xff]   ;;  %v10939_v6 = vld [vmem:[%s11184_s5 + $0x668] sm:$0xff]  }
 0x2b1   : > { %v9072_v12 = vpack.c.bf16 %v4727_v60, %v4727_v60  ;;  %v3145_v13 = vadd.f32 %v12441_v16, %v3144_v10  ;;  %v9314_v14 = vpack.c.bf16 %v4969_v9, %v4969_v9  ;;  %v4113_v5 = vadd.f32 %v12441_v16, %v4112_v11  ;;  %10027 = vmatprep.mubr.msk.bf16.mxu0 %vm11107_vm2, %v11105_v0 }
 0x2b2   : > { %v9929_v15 = vpop.f32.mrf.mxu0  ;;  %v10413_v17 = vpop.f32.mrf.mxu1  ;;  %10511 = vmatprep.mubr.msk.bf16.mxu1 %vm11107_vm2, %v11105_v0 }
 0x2b3   : > { %7134 = vst.msk [vmem:[%s11408_s12 + $0x1c4] sm:$0xf] %vm7020_vm4, %v9072_v12  ;;  %v4728_v18 = vmax.f32 %v3145_v13, 0.0  ;;  %7376 = vst.msk [vmem:[%s11408_s12 + $0x58c] sm:$0xf] %vm7020_vm4, %v9314_v14  ;;  %v4970_v19 = vmax.f32 %v4113_v5, 0.0 }
 0x2b4   : > { %v3147_v20 = vpop.f32.mrf.mxu0  ;;  %v4115_v22 = vpop.f32.mrf.mxu1 }
 0x2b5   : > { %v9073_v24 = vpack.c.bf16 %v4728_v18, %v4728_v18  ;;  %v3148_v25 = vadd.f32 %v12441_v16, %v3147_v20  ;;  %v9315_v26 = vpack.c.bf16 %v4970_v19, %v4970_v19  ;;  %v4116_v27 = vadd.f32 %v12441_v16, %v4115_v22 }
 0x2b6   : > { %v9930_v28 = vpop.f32.mrf.mxu0  ;;  %v10414_v29 = vpop.f32.mrf.mxu1 }
 0x2b7   : > { %7135 = vst.msk [vmem:[%s11408_s12 + $0x1c8] sm:$0xf] %vm7020_vm4, %v9073_v24  ;;  %v4729_v30 = vmax.f32 %v3148_v25, 0.0  ;;  %7377 = vst.msk [vmem:[%s11408_s12 + $0x590] sm:$0xf] %vm7020_vm4, %v9315_v26  ;;  %v4971_v31 = vmax.f32 %v4116_v27, 0.0 }
 0x2b8   : > { %v3152_v32 = vpop.f32.mrf.mxu0  ;;  %10028 = vmatmul.mubr.msk.bf16.gmra.mxu0 %vm1923_vm3, %v10934_v21  ;;  %v4120_v33 = vpop.f32.mrf.mxu1  ;;  %10512 = vmatmul.mubr.msk.bf16.gmra.mxu1 %vm1923_vm3, %v10935_v23  ;;  %v10940_v25 = vld [vmem:[%s11184_s5 + $0x2a8] sm:$0xff]   ;;  %v10941_v27 = vld [vmem:[%s11184_s5 + $0x670] sm:$0xff]  }
 0x2b9   : > { %v9074_v34 = vpack.c.bf16 %v4729_v30, %v4729_v30  ;;  %v3153_v35 = vadd.f32 %v12441_v16, %v3152_v32  ;;  %v9316_v36 = vpack.c.bf16 %v4971_v31, %v4971_v31  ;;  %v4121_v37 = vadd.f32 %v12441_v16, %v4120_v33  ;;  %10031 = vmatprep.mubr.msk.bf16.mxu0 %vm11107_vm2, %v11105_v0 }
 0x2ba   : > { %v9933_v38 = vpop.f32.mrf.mxu0  ;;  %v10417_v39 = vpop.f32.mrf.mxu1  ;;  %10515 = vmatprep.mubr.msk.bf16.mxu1 %vm11107_vm2, %v11105_v0 }
 0x2bb   : > { %7136 = vst.msk [vmem:[%s11408_s12 + $0x1cc] sm:$0xf] %vm7020_vm4, %v9074_v34  ;;  %v4730_v40 = vmax.f32 %v3153_v35, 0.0  ;;  %7378 = vst.msk [vmem:[%s11408_s12 + $0x594] sm:$0xf] %vm7020_vm4, %v9316_v36  ;;  %v4972_v41 = vmax.f32 %v4121_v37, 0.0 }
 0x2bc   : > { %v3155_v42 = vpop.f32.mrf.mxu0  ;;  %v4123_v44 = vpop.f32.mrf.mxu1 }
 0x2bd   : > { %v9075_v46 = vpack.c.bf16 %v4730_v40, %v4730_v40  ;;  %v3156_v47 = vadd.f32 %v12441_v16, %v3155_v42  ;;  %v9317_v48 = vpack.c.bf16 %v4972_v41, %v4972_v41  ;;  %v4124_v49 = vadd.f32 %v12441_v16, %v4123_v44 }
 0x2be   : > { %v9934_v50 = vpop.f32.mrf.mxu0  ;;  %v10418_v51 = vpop.f32.mrf.mxu1 }
 0x2bf   : > { %7137 = vst.msk [vmem:[%s11408_s12 + $0x1d0] sm:$0xf] %vm7020_vm4, %v9075_v46  ;;  %v4731_v52 = vmax.f32 %v3156_v47, 0.0  ;;  %7379 = vst.msk [vmem:[%s11408_s12 + $0x598] sm:$0xf] %vm7020_vm4, %v9317_v48  ;;  %v4973_v53 = vmax.f32 %v4124_v49, 0.0 }
 0x2c0   : > { %v3160_v54 = vpop.f32.mrf.mxu0  ;;  %10032 = vmatmul.mubr.msk.bf16.gmra.mxu0 %vm1923_vm3, %v10936_v43  ;;  %v4128_v55 = vpop.f32.mrf.mxu1  ;;  %10516 = vmatmul.mubr.msk.bf16.gmra.mxu1 %vm1923_vm3, %v10937_v45  ;;  %v10942_v47 = vld [vmem:[%s11184_s5 + $0x2b0] sm:$0xff]   ;;  %v10943_v49 = vld [vmem:[%s11184_s5 + $0x678] sm:$0xff]  }
 0x2c1   : > { %v9076_v56 = vpack.c.bf16 %v4731_v52, %v4731_v52  ;;  %v3161_v57 = vadd.f32 %v12441_v16, %v3160_v54  ;;  %v9318_v58 = vpack.c.bf16 %v4973_v53, %v4973_v53  ;;  %v4129_v59 = vadd.f32 %v12441_v16, %v4128_v55  ;;  %10035 = vmatprep.mubr.msk.bf16.mxu0 %vm11107_vm2, %v11105_v0 }
 0x2c2   : > { %v9937_v61 = vpop.f32.mrf.mxu0  ;;  %v10421_v62 = vpop.f32.mrf.mxu1  ;;  %10519 = vmatprep.mubr.msk.bf16.mxu1 %vm11107_vm2, %v11105_v0 }
 0x2c3   : > { %7138 = vst.msk [vmem:[%s11408_s12 + $0x1d4] sm:$0xf] %vm7020_vm4, %v9076_v56  ;;  %v4732_v63 = vmax.f32 %v3161_v57, 0.0  ;;  %7380 = vst.msk [vmem:[%s11408_s12 + $0x59c] sm:$0xf] %vm7020_vm4, %v9318_v58  ;;  %v4974_v1 = vmax.f32 %v4129_v59, 0.0 }
 0x2c4   : > { %v3163_v2 = vpop.f32.mrf.mxu0  ;;  %v4131_v4 = vpop.f32.mrf.mxu1 }
 0x2c5   : > { %v9077_v7 = vpack.c.bf16 %v4732_v63, %v4732_v63  ;;  %v3164_v8 = vadd.f32 %v12441_v16, %v3163_v2  ;;  %v9319_v60 = vpack.c.bf16 %v4974_v1, %v4974_v1  ;;  %v4132_v9 = vadd.f32 %v12441_v16, %v4131_v4 }
 0x2c6   : > { %v9938_v10 = vpop.f32.mrf.mxu0  ;;  %v10422_v11 = vpop.f32.mrf.mxu1 }
 0x2c7   : > { %7139 = vst.msk [vmem:[%s11408_s12 + $0x1d8] sm:$0xf] %vm7020_vm4, %v9077_v7  ;;  %v4733_v12 = vmax.f32 %v3164_v8, 0.0  ;;  %7381 = vst.msk [vmem:[%s11408_s12 + $0x5a0] sm:$0xf] %vm7020_vm4, %v9319_v60  ;;  %v4975_v13 = vmax.f32 %v4132_v9, 0.0 }
 0x2c8   : > { %v3168_v14 = vpop.f32.mrf.mxu0  ;;  %10036 = vmatmul.mubr.msk.bf16.gmra.mxu0 %vm1923_vm3, %v10938_v3  ;;  %v4136_v5 = vpop.f32.mrf.mxu1  ;;  %10520 = vmatmul.mubr.msk.bf16.gmra.mxu1 %vm1923_vm3, %v10939_v6  ;;  %v10944_v8 = vld [vmem:[%s11184_s5 + $0x2b8] sm:$0xff]   ;;  %v10945_v9 = vld [vmem:[%s11184_s5 + $0x680] sm:$0xff]  }
 0x2c9   : > { %v9078_v15 = vpack.c.bf16 %v4733_v12, %v4733_v12  ;;  %v3169_v17 = vadd.f32 %v12441_v16, %v3168_v14  ;;  %v9320_v18 = vpack.c.bf16 %v4975_v13, %v4975_v13  ;;  %v4137_v19 = vadd.f32 %v12441_v16, %v4136_v5  ;;  %10039 = vmatprep.mubr.msk.bf16.mxu0 %vm11107_vm2, %v11105_v0 }
 0x2ca   : > { %v9941_v20 = vpop.f32.mrf.mxu0  ;;  %v10425_v21 = vpop.f32.mrf.mxu1  ;;  %10523 = vmatprep.mubr.msk.bf16.mxu1 %vm11107_vm2, %v11105_v0 }
 0x2cb   : > { %7140 = vst.msk [vmem:[%s11408_s12 + $0x1dc] sm:$0xf] %vm7020_vm4, %v9078_v15  ;;  %v4734_v22 = vmax.f32 %v3169_v17, 0.0  ;;  %7382 = vst.msk [vmem:[%s11408_s12 + $0x5a4] sm:$0xf] %vm7020_vm4, %v9320_v18  ;;  %v4976_v23 = vmax.f32 %v4137_v19, 0.0 }
 0x2cc   : > { %v3171_v24 = vpop.f32.mrf.mxu0  ;;  %v4139_v26 = vpop.f32.mrf.mxu1 }
 0x2cd   : > { %v9079_v28 = vpack.c.bf16 %v4734_v22, %v4734_v22  ;;  %v3172_v29 = vadd.f32 %v12441_v16, %v3171_v24  ;;  %v9321_v30 = vpack.c.bf16 %v4976_v23, %v4976_v23  ;;  %v4140_v31 = vadd.f32 %v12441_v16, %v4139_v26 }
 0x2ce   : > { %v9942_v32 = vpop.f32.mrf.mxu0  ;;  %v10426_v33 = vpop.f32.mrf.mxu1 }
 0x2cf   : > { %7141 = vst.msk [vmem:[%s11408_s12 + $0x1e0] sm:$0xf] %vm7020_vm4, %v9079_v28  ;;  %v4735_v34 = vmax.f32 %v3172_v29, 0.0  ;;  %7383 = vst.msk [vmem:[%s11408_s12 + $0x5a8] sm:$0xf] %vm7020_vm4, %v9321_v30  ;;  %v4977_v35 = vmax.f32 %v4140_v31, 0.0 }
 0x2d0   : > { %v3176_v36 = vpop.f32.mrf.mxu0  ;;  %10040 = vmatmul.mubr.msk.bf16.gmra.mxu0 %vm1923_vm3, %v10940_v25  ;;  %v4144_v37 = vpop.f32.mrf.mxu1  ;;  %10524 = vmatmul.mubr.msk.bf16.gmra.mxu1 %vm1923_vm3, %v10941_v27  ;;  %v10946_v29 = vld [vmem:[%s11184_s5 + $0x2c0] sm:$0xff]   ;;  %v10947_v31 = vld [vmem:[%s11184_s5 + $0x688] sm:$0xff]  }
 0x2d1   : > { %v9080_v38 = vpack.c.bf16 %v4735_v34, %v4735_v34  ;;  %v3177_v39 = vadd.f32 %v12441_v16, %v3176_v36  ;;  %v9322_v40 = vpack.c.bf16 %v4977_v35, %v4977_v35  ;;  %v4145_v41 = vadd.f32 %v12441_v16, %v4144_v37  ;;  %10043 = vmatprep.mubr.msk.bf16.mxu0 %vm11107_vm2, %v11105_v0 }
 0x2d2   : > { %v9945_v42 = vpop.f32.mrf.mxu0  ;;  %v10429_v43 = vpop.f32.mrf.mxu1  ;;  %10527 = vmatprep.mubr.msk.bf16.mxu1 %vm11107_vm2, %v11105_v0 }
 0x2d3   : > { %7142 = vst.msk [vmem:[%s11408_s12 + $0x1e4] sm:$0xf] %vm7020_vm4, %v9080_v38  ;;  %v4736_v44 = vmax.f32 %v3177_v39, 0.0  ;;  %7384 = vst.msk [vmem:[%s11408_s12 + $0x5ac] sm:$0xf] %vm7020_vm4, %v9322_v40  ;;  %v4978_v45 = vmax.f32 %v4145_v41, 0.0 }
 0x2d4   : > { %v3179_v46 = vpop.f32.mrf.mxu0  ;;  %v4147_v48 = vpop.f32.mrf.mxu1 }
 0x2d5   : > { %v9081_v50 = vpack.c.bf16 %v4736_v44, %v4736_v44  ;;  %v3180_v51 = vadd.f32 %v12441_v16, %v3179_v46  ;;  %v9323_v52 = vpack.c.bf16 %v4978_v45, %v4978_v45  ;;  %v4148_v53 = vadd.f32 %v12441_v16, %v4147_v48 }
 0x2d6   : > { %v9946_v54 = vpop.f32.mrf.mxu0  ;;  %v10430_v55 = vpop.f32.mrf.mxu1 }
 0x2d7   : > { %7143 = vst.msk [vmem:[%s11408_s12 + $0x1e8] sm:$0xf] %vm7020_vm4, %v9081_v50  ;;  %v4737_v56 = vmax.f32 %v3180_v51, 0.0  ;;  %7385 = vst.msk [vmem:[%s11408_s12 + $0x5b0] sm:$0xf] %vm7020_vm4, %v9323_v52  ;;  %v4979_v57 = vmax.f32 %v4148_v53, 0.0 }
 0x2d8   : > { %v3184_v58 = vpop.f32.mrf.mxu0  ;;  %10044 = vmatmul.mubr.msk.bf16.gmra.mxu0 %vm1923_vm3, %v10942_v47  ;;  %v4152_v59 = vpop.f32.mrf.mxu1  ;;  %10528 = vmatmul.mubr.msk.bf16.gmra.mxu1 %vm1923_vm3, %v10943_v49  ;;  %v10948_v51 = vld [vmem:[%s11184_s5 + $0x2c8] sm:$0xff]   ;;  %v10949_v53 = vld [vmem:[%s11184_s5 + $0x690] sm:$0xff]  }
 0x2d9   : > { %v9082_v61 = vpack.c.bf16 %v4737_v56, %v4737_v56  ;;  %v3185_v62 = vadd.f32 %v12441_v16, %v3184_v58  ;;  %v9324_v63 = vpack.c.bf16 %v4979_v57, %v4979_v57  ;;  %v4153_v1 = vadd.f32 %v12441_v16, %v4152_v59  ;;  %10047 = vmatprep.mubr.msk.bf16.mxu0 %vm11107_vm2, %v11105_v0 }
 0x2da   : > { %v9949_v2 = vpop.f32.mrf.mxu0  ;;  %v10433_v3 = vpop.f32.mrf.mxu1  ;;  %10531 = vmatprep.mubr.msk.bf16.mxu1 %vm11107_vm2, %v11105_v0 }
 0x2db   : > { %7144 = vst.msk [vmem:[%s11408_s12 + $0x1ec] sm:$0xf] %vm7020_vm4, %v9082_v61  ;;  %v4738_v4 = vmax.f32 %v3185_v62, 0.0  ;;  %7386 = vst.msk [vmem:[%s11408_s12 + $0x5b4] sm:$0xf] %vm7020_vm4, %v9324_v63  ;;  %v4980_v6 = vmax.f32 %v4153_v1, 0.0 }
 0x2dc   : > { %v3187_v7 = vpop.f32.mrf.mxu0  ;;  %v4155_v60 = vpop.f32.mrf.mxu1 }
 0x2dd   : > { %v9083_v10 = vpack.c.bf16 %v4738_v4, %v4738_v4  ;;  %v3188_v11 = vadd.f32 %v12441_v16, %v3187_v7  ;;  %v9325_v12 = vpack.c.bf16 %v4980_v6, %v4980_v6  ;;  %v4156_v13 = vadd.f32 %v12441_v16, %v4155_v60 }
 0x2de   : > { %v9950_v14 = vpop.f32.mrf.mxu0  ;;  %v10434_v5 = vpop.f32.mrf.mxu1 }
 0x2df   : > { %7145 = vst.msk [vmem:[%s11408_s12 + $0x1f0] sm:$0xf] %vm7020_vm4, %v9083_v10  ;;  %v4739_v15 = vmax.f32 %v3188_v11, 0.0  ;;  %7387 = vst.msk [vmem:[%s11408_s12 + $0x5b8] sm:$0xf] %vm7020_vm4, %v9325_v12  ;;  %v4981_v17 = vmax.f32 %v4156_v13, 0.0 }
 0x2e0   : > { %v3192_v18 = vpop.f32.mrf.mxu0  ;;  %10048 = vmatmul.mubr.msk.bf16.gmra.mxu0 %vm1923_vm3, %v10944_v8  ;;  %v4160_v19 = vpop.f32.mrf.mxu1  ;;  %10532 = vmatmul.mubr.msk.bf16.gmra.mxu1 %vm1923_vm3, %v10945_v9  ;;  %v10950_v11 = vld [vmem:[%s11184_s5 + $0x2d0] sm:$0xff]   ;;  %v10951_v13 = vld [vmem:[%s11184_s5 + $0x698] sm:$0xff]  }
 0x2e1   : > { %v9084_v20 = vpack.c.bf16 %v4739_v15, %v4739_v15  ;;  %v3193_v21 = vadd.f32 %v12441_v16, %v3192_v18  ;;  %v9326_v22 = vpack.c.bf16 %v4981_v17, %v4981_v17  ;;  %v4161_v23 = vadd.f32 %v12441_v16, %v4160_v19  ;;  %10051 = vmatprep.mubr.msk.bf16.mxu0 %vm11107_vm2, %v11105_v0 }
 0x2e2   : > { %v9953_v24 = vpop.f32.mrf.mxu0  ;;  %v10437_v25 = vpop.f32.mrf.mxu1  ;;  %10535 = vmatprep.mubr.msk.bf16.mxu1 %vm11107_vm2, %v11105_v0 }
 0x2e3   : > { %7146 = vst.msk [vmem:[%s11408_s12 + $0x1f4] sm:$0xf] %vm7020_vm4, %v9084_v20  ;;  %v4740_v26 = vmax.f32 %v3193_v21, 0.0  ;;  %7388 = vst.msk [vmem:[%s11408_s12 + $0x5bc] sm:$0xf] %vm7020_vm4, %v9326_v22  ;;  %v4982_v27 = vmax.f32 %v4161_v23, 0.0 }
 0x2e4   : > { %v3195_v28 = vpop.f32.mrf.mxu0  ;;  %v4163_v30 = vpop.f32.mrf.mxu1 }
 0x2e5   : > { %v9085_v32 = vpack.c.bf16 %v4740_v26, %v4740_v26  ;;  %v3196_v33 = vadd.f32 %v12441_v16, %v3195_v28  ;;  %v9327_v34 = vpack.c.bf16 %v4982_v27, %v4982_v27  ;;  %v4164_v35 = vadd.f32 %v12441_v16, %v4163_v30 }
 0x2e6   : > { %v9954_v36 = vpop.f32.mrf.mxu0  ;;  %v10438_v37 = vpop.f32.mrf.mxu1 }
 0x2e7   : > { %7147 = vst.msk [vmem:[%s11408_s12 + $0x1f8] sm:$0xf] %vm7020_vm4, %v9085_v32  ;;  %v4741_v38 = vmax.f32 %v3196_v33, 0.0  ;;  %7389 = vst.msk [vmem:[%s11408_s12 + $0x5c0] sm:$0xf] %vm7020_vm4, %v9327_v34  ;;  %v4983_v39 = vmax.f32 %v4164_v35, 0.0 }
 0x2e8   : > { %v3200_v40 = vpop.f32.mrf.mxu0  ;;  %10052 = vmatmul.mubr.msk.bf16.gmra.mxu0 %vm1923_vm3, %v10946_v29  ;;  %v4168_v41 = vpop.f32.mrf.mxu1  ;;  %10536 = vmatmul.mubr.msk.bf16.gmra.mxu1 %vm1923_vm3, %v10947_v31  ;;  %v10952_v33 = vld [vmem:[%s11184_s5 + $0x2d8] sm:$0xff]   ;;  %v10953_v35 = vld [vmem:[%s11184_s5 + $0x6a0] sm:$0xff]  }
 0x2e9   : > { %v9086_v42 = vpack.c.bf16 %v4741_v38, %v4741_v38  ;;  %v3201_v43 = vadd.f32 %v12441_v16, %v3200_v40  ;;  %v9328_v44 = vpack.c.bf16 %v4983_v39, %v4983_v39  ;;  %v4169_v45 = vadd.f32 %v12441_v16, %v4168_v41  ;;  %10055 = vmatprep.mubr.msk.bf16.mxu0 %vm11107_vm2, %v11105_v0 }
 0x2ea   : > { %v9957_v46 = vpop.f32.mrf.mxu0  ;;  %v10441_v47 = vpop.f32.mrf.mxu1  ;;  %10539 = vmatprep.mubr.msk.bf16.mxu1 %vm11107_vm2, %v11105_v0 }
 0x2eb   : > { %7148 = vst.msk [vmem:[%s11408_s12 + $0x1fc] sm:$0xf] %vm7020_vm4, %v9086_v42  ;;  %v4742_v48 = vmax.f32 %v3201_v43, 0.0  ;;  %7390 = vst.msk [vmem:[%s11408_s12 + $0x5c4] sm:$0xf] %vm7020_vm4, %v9328_v44  ;;  %v4984_v49 = vmax.f32 %v4169_v45, 0.0 }
 0x2ec   : > { %v3203_v50 = vpop.f32.mrf.mxu0  ;;  %v4171_v52 = vpop.f32.mrf.mxu1 }
 0x2ed   : > { %v9087_v54 = vpack.c.bf16 %v4742_v48, %v4742_v48  ;;  %v3204_v55 = vadd.f32 %v12441_v16, %v3203_v50  ;;  %v9329_v56 = vpack.c.bf16 %v4984_v49, %v4984_v49  ;;  %v4172_v57 = vadd.f32 %v12441_v16, %v4171_v52 }
 0x2ee   : > { %v9958_v58 = vpop.f32.mrf.mxu0  ;;  %v10442_v59 = vpop.f32.mrf.mxu1 }
 0x2ef   : > { %7149 = vst.msk [vmem:[%s11408_s12 + $0x200] sm:$0xf] %vm7020_vm4, %v9087_v54  ;;  %v4743_v61 = vmax.f32 %v3204_v55, 0.0  ;;  %7391 = vst.msk [vmem:[%s11408_s12 + $0x5c8] sm:$0xf] %vm7020_vm4, %v9329_v56  ;;  %v4985_v62 = vmax.f32 %v4172_v57, 0.0 }
 0x2f0   : > { %v3208_v63 = vpop.f32.mrf.mxu0  ;;  %10056 = vmatmul.mubr.msk.bf16.gmra.mxu0 %vm1923_vm3, %v10948_v51  ;;  %v4176_v1 = vpop.f32.mrf.mxu1  ;;  %10540 = vmatmul.mubr.msk.bf16.gmra.mxu1 %vm1923_vm3, %v10949_v53  ;;  %v10954_v55 = vld [vmem:[%s11184_s5 + $0x2e0] sm:$0xff]   ;;  %v10955_v57 = vld [vmem:[%s11184_s5 + $0x6a8] sm:$0xff]  }
 0x2f1   : > { %v9088_v2 = vpack.c.bf16 %v4743_v61, %v4743_v61  ;;  %v3209_v3 = vadd.f32 %v12441_v16, %v3208_v63  ;;  %v9330_v4 = vpack.c.bf16 %v4985_v62, %v4985_v62  ;;  %v4177_v6 = vadd.f32 %v12441_v16, %v4176_v1  ;;  %10059 = vmatprep.mubr.msk.bf16.mxu0 %vm11107_vm2, %v11105_v0 }
 0x2f2   : > { %v9961_v7 = vpop.f32.mrf.mxu0  ;;  %v10445_v8 = vpop.f32.mrf.mxu1  ;;  %10543 = vmatprep.mubr.msk.bf16.mxu1 %vm11107_vm2, %v11105_v0 }
 0x2f3   : > { %7150 = vst.msk [vmem:[%s11408_s12 + $0x204] sm:$0xf] %vm7020_vm4, %v9088_v2  ;;  %v4744_v60 = vmax.f32 %v3209_v3, 0.0  ;;  %7392 = vst.msk [vmem:[%s11408_s12 + $0x5cc] sm:$0xf] %vm7020_vm4, %v9330_v4  ;;  %v4986_v9 = vmax.f32 %v4177_v6, 0.0 }
 0x2f4   : > { %v3211_v10 = vpop.f32.mrf.mxu0  ;;  %v4179_v12 = vpop.f32.mrf.mxu1 }
 0x2f5   : > { %v9089_v14 = vpack.c.bf16 %v4744_v60, %v4744_v60  ;;  %v3212_v5 = vadd.f32 %v12441_v16, %v3211_v10  ;;  %v9331_v15 = vpack.c.bf16 %v4986_v9, %v4986_v9  ;;  %v4180_v17 = vadd.f32 %v12441_v16, %v4179_v12 }
 0x2f6   : > { %v9962_v18 = vpop.f32.mrf.mxu0  ;;  %v10446_v19 = vpop.f32.mrf.mxu1 }
 0x2f7   : > { %7151 = vst.msk [vmem:[%s11408_s12 + $0x208] sm:$0xf] %vm7020_vm4, %v9089_v14  ;;  %v4745_v20 = vmax.f32 %v3212_v5, 0.0  ;;  %7393 = vst.msk [vmem:[%s11408_s12 + $0x5d0] sm:$0xf] %vm7020_vm4, %v9331_v15  ;;  %v4987_v21 = vmax.f32 %v4180_v17, 0.0 }
 0x2f8   : > { %v3216_v22 = vpop.f32.mrf.mxu0  ;;  %10060 = vmatmul.mubr.msk.bf16.gmra.mxu0 %vm1923_vm3, %v10950_v11  ;;  %v4184_v23 = vpop.f32.mrf.mxu1  ;;  %10544 = vmatmul.mubr.msk.bf16.gmra.mxu1 %vm1923_vm3, %v10951_v13  ;;  %v10956_v5 = vld [vmem:[%s11184_s5 + $0x2e8] sm:$0xff]   ;;  %v10957_v17 = vld [vmem:[%s11184_s5 + $0x6b0] sm:$0xff]  }
 0x2f9   : > { %v9090_v24 = vpack.c.bf16 %v4745_v20, %v4745_v20  ;;  %v3217_v25 = vadd.f32 %v12441_v16, %v3216_v22  ;;  %v9332_v26 = vpack.c.bf16 %v4987_v21, %v4987_v21  ;;  %v4185_v27 = vadd.f32 %v12441_v16, %v4184_v23  ;;  %10063 = vmatprep.mubr.msk.bf16.mxu0 %vm11107_vm2, %v11105_v0  ;;  %v12787_v21 = vld [vmem:[%s13838_s2] ss:$0 sm:$0xff] }
 0x2fa   : > { %v9965_v28 = vpop.f32.mrf.mxu0  ;;  %v10449_v29 = vpop.f32.mrf.mxu1  ;;  %10547 = vmatprep.mubr.msk.bf16.mxu1 %vm11107_vm2, %v11105_v0 }
 0x2fb   : > { %7152 = vst.msk [vmem:[%s11408_s12 + $0x20c] sm:$0xf] %vm7020_vm4, %v9090_v24  ;;  %v4746_v30 = vmax.f32 %v3217_v25, 0.0  ;;  %7394 = vst.msk [vmem:[%s11408_s12 + $0x5d4] sm:$0xf] %vm7020_vm4, %v9332_v26  ;;  %v4988_v31 = vmax.f32 %v4185_v27, 0.0 }
 0x2fc   : > { %v3219_v32 = vpop.f32.mrf.mxu0  ;;  %v4187_v34 = vpop.f32.mrf.mxu1 }
 0x2fd   : > { %v9091_v36 = vpack.c.bf16 %v4746_v30, %v4746_v30  ;;  %v3220_v37 = vadd.f32 %v12441_v16, %v3219_v32  ;;  %v9333_v38 = vpack.c.bf16 %v4988_v31, %v4988_v31  ;;  %v4188_v39 = vadd.f32 %v12441_v16, %v4187_v34 }
 0x2fe   : > { %v9966_v40 = vpop.f32.mrf.mxu0  ;;  %v10450_v41 = vpop.f32.mrf.mxu1 }
 0x2ff   : > { %7153 = vst.msk [vmem:[%s11408_s12 + $0x210] sm:$0xf] %vm7020_vm4, %v9091_v36  ;;  %v4747_v42 = vmax.f32 %v3220_v37, 0.0  ;;  %7395 = vst.msk [vmem:[%s11408_s12 + $0x5d8] sm:$0xf] %vm7020_vm4, %v9333_v38  ;;  %v4989_v43 = vmax.f32 %v4188_v39, 0.0 }
 0x300   : > { %v3224_v44 = vpop.f32.mrf.mxu0  ;;  %10064 = vmatmul.mubr.msk.bf16.gmra.mxu0 %vm1923_vm3, %v10952_v33  ;;  %v4192_v45 = vpop.f32.mrf.mxu1  ;;  %10548 = vmatmul.mubr.msk.bf16.gmra.mxu1 %vm1923_vm3, %v10953_v35  ;;  %v10958_v37 = vld [vmem:[%s11184_s5 + $0x2f0] sm:$0xff]   ;;  %v10959_v39 = vld [vmem:[%s11184_s5 + $0x6b8] sm:$0xff]  }
 0x301   : > { %v9092_v46 = vpack.c.bf16 %v4747_v42, %v4747_v42  ;;  %v3225_v47 = vadd.f32 %v12441_v16, %v3224_v44  ;;  %v9334_v48 = vpack.c.bf16 %v4989_v43, %v4989_v43  ;;  %v4193_v49 = vadd.f32 %v12441_v16, %v4192_v45  ;;  %10067 = vmatprep.mubr.msk.bf16.mxu0 %vm11107_vm2, %v11105_v0 }
 0x302   : > { %v9969_v50 = vpop.f32.mrf.mxu0  ;;  %v10453_v51 = vpop.f32.mrf.mxu1  ;;  %10551 = vmatprep.mubr.msk.bf16.mxu1 %vm11107_vm2, %v11105_v0 }
 0x303   : > { %7154 = vst.msk [vmem:[%s11408_s12 + $0x214] sm:$0xf] %vm7020_vm4, %v9092_v46  ;;  %v4748_v52 = vmax.f32 %v3225_v47, 0.0  ;;  %7396 = vst.msk [vmem:[%s11408_s12 + $0x5dc] sm:$0xf] %vm7020_vm4, %v9334_v48  ;;  %v4990_v53 = vmax.f32 %v4193_v49, 0.0 }
 0x304   : > { %v3227_v54 = vpop.f32.mrf.mxu0  ;;  %v4195_v56 = vpop.f32.mrf.mxu1 }
 0x305   : > { %v9093_v58 = vpack.c.bf16 %v4748_v52, %v4748_v52  ;;  %v3228_v59 = vadd.f32 %v12441_v16, %v3227_v54  ;;  %v9335_v61 = vpack.c.bf16 %v4990_v53, %v4990_v53  ;;  %v4196_v62 = vadd.f32 %v12441_v16, %v4195_v56 }
 0x306   : > { %v9970_v63 = vpop.f32.mrf.mxu0  ;;  %v10454_v1 = vpop.f32.mrf.mxu1 }
 0x307   : > { %7155 = vst.msk [vmem:[%s11408_s12 + $0x218] sm:$0xf] %vm7020_vm4, %v9093_v58  ;;  %v4749_v2 = vmax.f32 %v3228_v59, 0.0  ;;  %7397 = vst.msk [vmem:[%s11408_s12 + $0x5e0] sm:$0xf] %vm7020_vm4, %v9335_v61  ;;  %v4991_v3 = vmax.f32 %v4196_v62, 0.0 }
 0x308   : > { %v3232_v4 = vpop.f32.mrf.mxu0  ;;  %10068 = vmatmul.mubr.msk.bf16.gmra.mxu0 %vm1923_vm3, %v10954_v55  ;;  %v4200_v6 = vpop.f32.mrf.mxu1  ;;  %10552 = vmatmul.mubr.msk.bf16.gmra.mxu1 %vm1923_vm3, %v10955_v57  ;;  %v10960_v59 = vld [vmem:[%s11184_s5 + $0x2f8] sm:$0xff]   ;;  %v10961_v62 = vld [vmem:[%s11184_s5 + $0x6c0] sm:$0xff]  }
 0x309   : > { %v9094_v7 = vpack.c.bf16 %v4749_v2, %v4749_v2  ;;  %v3233_v8 = vadd.f32 %v12441_v16, %v3232_v4  ;;  %v9336_v60 = vpack.c.bf16 %v4991_v3, %v4991_v3  ;;  %v4201_v9 = vadd.f32 %v12441_v16, %v4200_v6  ;;  %10071 = vmatprep.mubr.msk.bf16.mxu0 %vm11107_vm2, %v11105_v0 }
 0x30a   : > { %v9973_v10 = vpop.f32.mrf.mxu0  ;;  %v10457_v11 = vpop.f32.mrf.mxu1  ;;  %10555 = vmatprep.mubr.msk.bf16.mxu1 %vm11107_vm2, %v11105_v0 }
 0x30b   : > { %7156 = vst.msk [vmem:[%s11408_s12 + $0x21c] sm:$0xf] %vm7020_vm4, %v9094_v7  ;;  %v4750_v12 = vmax.f32 %v3233_v8, 0.0  ;;  %7398 = vst.msk [vmem:[%s11408_s12 + $0x5e4] sm:$0xf] %vm7020_vm4, %v9336_v60  ;;  %v4992_v13 = vmax.f32 %v4201_v9, 0.0 }
 0x30c   : > { %v3235_v14 = vpop.f32.mrf.mxu0  ;;  %v4203_v15 = vpop.f32.mrf.mxu1 }
 0x30d   : > { %v9095_v18 = vpack.c.bf16 %v4750_v12, %v4750_v12  ;;  %v3236_v19 = vadd.f32 %v12441_v16, %v3235_v14  ;;  %v9337_v20 = vpack.c.bf16 %v4992_v13, %v4992_v13  ;;  %v4204_v22 = vadd.f32 %v12787_v21, %v4203_v15 }
 0x30e   : > { %v9974_v23 = vpop.f32.mrf.mxu0  ;;  %v10458_v24 = vpop.f32.mrf.mxu1 }
 0x30f   : > { %7157 = vst.msk [vmem:[%s11408_s12 + $0x220] sm:$0xf] %vm7020_vm4, %v9095_v18  ;;  %v4751_v25 = vmax.f32 %v3236_v19, 0.0  ;;  %7399 = vst.msk [vmem:[%s11408_s12 + $0x5e8] sm:$0xf] %vm7020_vm4, %v9337_v20  ;;  %v4993_v26 = vmax.f32 %v4204_v22, 0.0 }
 0x310   : > { %v3240_v27 = vpop.f32.mrf.mxu0  ;;  %10072 = vmatmul.mubr.msk.bf16.gmra.mxu0 %vm1923_vm3, %v10956_v5  ;;  %v4208_v16 = vpop.f32.mrf.mxu1  ;;  %10556 = vmatmul.mubr.msk.bf16.gmra.mxu1 %vm1923_vm3, %v10957_v17  ;;  %v10962_v19 = vld [vmem:[%s11184_s5 + $0x300] sm:$0xff]   ;;  %v10963_v22 = vld [vmem:[%s11184_s5 + $0x6c8] sm:$0xff]  }
 0x311   : > { %v9096_v28 = vpack.c.bf16 %v4751_v25, %v4751_v25  ;;  %v3241_v29 = vadd.f32 %v12787_v21, %v3240_v27  ;;  %v9338_v30 = vpack.c.bf16 %v4993_v26, %v4993_v26  ;;  %v4209_v31 = vadd.f32 %v12787_v21, %v4208_v16  ;;  %10075 = vmatprep.mubr.msk.bf16.mxu0 %vm11107_vm2, %v11105_v0 }
 0x312   : > { %v9977_v32 = vpop.f32.mrf.mxu0  ;;  %v10461_v33 = vpop.f32.mrf.mxu1  ;;  %10559 = vmatprep.mubr.msk.bf16.mxu1 %vm11107_vm2, %v11105_v0 }
 0x313   : > { %7158 = vst.msk [vmem:[%s11408_s12 + $0x224] sm:$0xf] %vm7020_vm4, %v9096_v28  ;;  %v4752_v34 = vmax.f32 %v3241_v29, 0.0  ;;  %7400 = vst.msk [vmem:[%s11408_s12 + $0x5ec] sm:$0xf] %vm7020_vm4, %v9338_v30  ;;  %v4994_v35 = vmax.f32 %v4209_v31, 0.0 }
 0x314   : > { %v3243_v36 = vpop.f32.mrf.mxu0  ;;  %v4211_v38 = vpop.f32.mrf.mxu1 }
 0x315   : > { %v9097_v40 = vpack.c.bf16 %v4752_v34, %v4752_v34  ;;  %v3244_v41 = vadd.f32 %v12787_v21, %v3243_v36  ;;  %v9339_v42 = vpack.c.bf16 %v4994_v35, %v4994_v35  ;;  %v4212_v43 = vadd.f32 %v12787_v21, %v4211_v38 }
 0x316   : > { %v9978_v44 = vpop.f32.mrf.mxu0  ;;  %v10462_v45 = vpop.f32.mrf.mxu1 }
 0x317   : > { %7159 = vst.msk [vmem:[%s11408_s12 + $0x228] sm:$0xf] %vm7020_vm4, %v9097_v40  ;;  %v4753_v46 = vmax.f32 %v3244_v41, 0.0  ;;  %7401 = vst.msk [vmem:[%s11408_s12 + $0x5f0] sm:$0xf] %vm7020_vm4, %v9339_v42  ;;  %v4995_v47 = vmax.f32 %v4212_v43, 0.0 }
 0x318   : > { %v3248_v48 = vpop.f32.mrf.mxu0  ;;  %10076 = vmatmul.mubr.msk.bf16.gmra.mxu0 %vm1923_vm3, %v10958_v37  ;;  %v4216_v49 = vpop.f32.mrf.mxu1  ;;  %10560 = vmatmul.mubr.msk.bf16.gmra.mxu1 %vm1923_vm3, %v10959_v39  ;;  %v10964_v41 = vld [vmem:[%s11184_s5 + $0x308] sm:$0xff]   ;;  %v10965_v43 = vld [vmem:[%s11184_s5 + $0x6d0] sm:$0xff]  }
 0x319   : > { %v9098_v50 = vpack.c.bf16 %v4753_v46, %v4753_v46  ;;  %v3249_v51 = vadd.f32 %v12787_v21, %v3248_v48  ;;  %v9340_v52 = vpack.c.bf16 %v4995_v47, %v4995_v47  ;;  %v4217_v53 = vadd.f32 %v12787_v21, %v4216_v49  ;;  %10079 = vmatprep.mubr.msk.bf16.mxu0 %vm11107_vm2, %v11105_v0 }
 0x31a   : > { %v9981_v54 = vpop.f32.mrf.mxu0  ;;  %v10465_v55 = vpop.f32.mrf.mxu1  ;;  %10563 = vmatprep.mubr.msk.bf16.mxu1 %vm11107_vm2, %v11105_v0 }
 0x31b   : > { %7160 = vst.msk [vmem:[%s11408_s12 + $0x22c] sm:$0xf] %vm7020_vm4, %v9098_v50  ;;  %v4754_v56 = vmax.f32 %v3249_v51, 0.0  ;;  %7402 = vst.msk [vmem:[%s11408_s12 + $0x5f4] sm:$0xf] %vm7020_vm4, %v9340_v52  ;;  %v4996_v57 = vmax.f32 %v4217_v53, 0.0 }
 0x31c   : > { %v3251_v58 = vpop.f32.mrf.mxu0  ;;  %v4219_v61 = vpop.f32.mrf.mxu1 }
 0x31d   : > { %v9099_v63 = vpack.c.bf16 %v4754_v56, %v4754_v56  ;;  %v3252_v1 = vadd.f32 %v12787_v21, %v3251_v58  ;;  %v9341_v2 = vpack.c.bf16 %v4996_v57, %v4996_v57  ;;  %v4220_v3 = vadd.f32 %v12787_v21, %v4219_v61 }
 0x31e   : > { %v9982_v4 = vpop.f32.mrf.mxu0  ;;  %v10466_v6 = vpop.f32.mrf.mxu1 }
 0x31f   : > { %7161 = vst.msk [vmem:[%s11408_s12 + $0x230] sm:$0xf] %vm7020_vm4, %v9099_v63  ;;  %v4755_v7 = vmax.f32 %v3252_v1, 0.0  ;;  %7403 = vst.msk [vmem:[%s11408_s12 + $0x5f8] sm:$0xf] %vm7020_vm4, %v9341_v2  ;;  %v4997_v8 = vmax.f32 %v4220_v3, 0.0 }
 0x320   : > { %v3256_v60 = vpop.f32.mrf.mxu0  ;;  %10080 = vmatmul.mubr.msk.bf16.gmra.mxu0 %vm1923_vm3, %v10960_v59  ;;  %v4224_v9 = vpop.f32.mrf.mxu1  ;;  %10564 = vmatmul.mubr.msk.bf16.gmra.mxu1 %vm1923_vm3, %v10961_v62  ;;  %v10966_v1 = vld [vmem:[%s11184_s5 + $0x310] sm:$0xff]   ;;  %v10967_v3 = vld [vmem:[%s11184_s5 + $0x6d8] sm:$0xff]  }
 0x321   : > { %v9100_v10 = vpack.c.bf16 %v4755_v7, %v4755_v7  ;;  %v3257_v11 = vadd.f32 %v12787_v21, %v3256_v60  ;;  %v9342_v12 = vpack.c.bf16 %v4997_v8, %v4997_v8  ;;  %v4225_v13 = vadd.f32 %v12787_v21, %v4224_v9  ;;  %10083 = vmatprep.mubr.msk.bf16.mxu0 %vm11107_vm2, %v11105_v0 }
 0x322   : > { %v9985_v14 = vpop.f32.mrf.mxu0  ;;  %v10469_v5 = vpop.f32.mrf.mxu1  ;;  %10567 = vmatprep.mubr.msk.bf16.mxu1 %vm11107_vm2, %v11105_v0 }
 0x323   : > { %7162 = vst.msk [vmem:[%s11408_s12 + $0x234] sm:$0xf] %vm7020_vm4, %v9100_v10  ;;  %v4756_v15 = vmax.f32 %v3257_v11, 0.0  ;;  %7404 = vst.msk [vmem:[%s11408_s12 + $0x5fc] sm:$0xf] %vm7020_vm4, %v9342_v12  ;;  %v4998_v17 = vmax.f32 %v4225_v13, 0.0 }
 0x324   : > { %v3259_v18 = vpop.f32.mrf.mxu0  ;;  %v4227_v20 = vpop.f32.mrf.mxu1 }
 0x325   : > { %v9101_v23 = vpack.c.bf16 %v4756_v15, %v4756_v15  ;;  %v3260_v24 = vadd.f32 %v12787_v21, %v3259_v18  ;;  %v9343_v25 = vpack.c.bf16 %v4998_v17, %v4998_v17  ;;  %v4228_v26 = vadd.f32 %v12787_v21, %v4227_v20 }
 0x326   : > { %v9986_v27 = vpop.f32.mrf.mxu0  ;;  %v10470_v16 = vpop.f32.mrf.mxu1 }
 0x327   : > { %7163 = vst.msk [vmem:[%s11408_s12 + $0x238] sm:$0xf] %vm7020_vm4, %v9101_v23  ;;  %v4757_v28 = vmax.f32 %v3260_v24, 0.0  ;;  %7405 = vst.msk [vmem:[%s11408_s12 + $0x600] sm:$0xf] %vm7020_vm4, %v9343_v25  ;;  %v4999_v29 = vmax.f32 %v4228_v26, 0.0 }
 0x328   : > { %v3264_v30 = vpop.f32.mrf.mxu0  ;;  %10084 = vmatmul.mubr.msk.bf16.gmra.mxu0 %vm1923_vm3, %v10962_v19  ;;  %v4232_v31 = vpop.f32.mrf.mxu1  ;;  %10568 = vmatmul.mubr.msk.bf16.gmra.mxu1 %vm1923_vm3, %v10963_v22  ;;  %v10968_v24 = vld [vmem:[%s11184_s5 + $0x318] sm:$0xff]   ;;  %v10969_v26 = vld [vmem:[%s11184_s5 + $0x6e0] sm:$0xff]  }
 0x329   : > { %v9102_v32 = vpack.c.bf16 %v4757_v28, %v4757_v28  ;;  %v3265_v33 = vadd.f32 %v12787_v21, %v3264_v30  ;;  %v9344_v34 = vpack.c.bf16 %v4999_v29, %v4999_v29  ;;  %v4233_v35 = vadd.f32 %v12787_v21, %v4232_v31  ;;  %10087 = vmatprep.mubr.msk.bf16.mxu0 %vm11107_vm2, %v11105_v0 }
 0x32a   : > { %v9989_v36 = vpop.f32.mrf.mxu0  ;;  %v10473_v37 = vpop.f32.mrf.mxu1  ;;  %10571 = vmatprep.mubr.msk.bf16.mxu1 %vm11107_vm2, %v11105_v0 }
 0x32b   : > { %7164 = vst.msk [vmem:[%s11408_s12 + $0x23c] sm:$0xf] %vm7020_vm4, %v9102_v32  ;;  %v4758_v38 = vmax.f32 %v3265_v33, 0.0  ;;  %7406 = vst.msk [vmem:[%s11408_s12 + $0x604] sm:$0xf] %vm7020_vm4, %v9344_v34  ;;  %v5000_v39 = vmax.f32 %v4233_v35, 0.0 }
 0x32c   : > { %v3267_v40 = vpop.f32.mrf.mxu0  ;;  %v4235_v42 = vpop.f32.mrf.mxu1 }
 0x32d   : > { %v9103_v44 = vpack.c.bf16 %v4758_v38, %v4758_v38  ;;  %v3268_v45 = vadd.f32 %v12787_v21, %v3267_v40  ;;  %v9345_v46 = vpack.c.bf16 %v5000_v39, %v5000_v39  ;;  %v4236_v47 = vadd.f32 %v12787_v21, %v4235_v42 }
 0x32e   : > { %v9990_v48 = vpop.f32.mrf.mxu0  ;;  %v10474_v49 = vpop.f32.mrf.mxu1 }
 0x32f   : > { %7165 = vst.msk [vmem:[%s11408_s12 + $0x240] sm:$0xf] %vm7020_vm4, %v9103_v44  ;;  %v4759_v50 = vmax.f32 %v3268_v45, 0.0  ;;  %7407 = vst.msk [vmem:[%s11408_s12 + $0x608] sm:$0xf] %vm7020_vm4, %v9345_v46  ;;  %v5001_v51 = vmax.f32 %v4236_v47, 0.0 }
 0x330   : > { %v3272_v52 = vpop.f32.mrf.mxu0  ;;  %10088 = vmatmul.mubr.msk.bf16.gmra.mxu0 %vm1923_vm3, %v10964_v41  ;;  %v4240_v53 = vpop.f32.mrf.mxu1  ;;  %10572 = vmatmul.mubr.msk.bf16.gmra.mxu1 %vm1923_vm3, %v10965_v43  ;;  %v10970_v45 = vld [vmem:[%s11184_s5 + $0x320] sm:$0xff]   ;;  %v10971_v47 = vld [vmem:[%s11184_s5 + $0x6e8] sm:$0xff]  }
 0x331   : > { %v9104_v54 = vpack.c.bf16 %v4759_v50, %v4759_v50  ;;  %v3273_v55 = vadd.f32 %v12787_v21, %v3272_v52  ;;  %v9346_v56 = vpack.c.bf16 %v5001_v51, %v5001_v51  ;;  %v4241_v57 = vadd.f32 %v12787_v21, %v4240_v53  ;;  %10091 = vmatprep.mubr.msk.bf16.mxu0 %vm11107_vm2, %v11105_v0 }
 0x332   : > { %v9993_v58 = vpop.f32.mrf.mxu0  ;;  %v10477_v59 = vpop.f32.mrf.mxu1  ;;  %10575 = vmatprep.mubr.msk.bf16.mxu1 %vm11107_vm2, %v11105_v0 }
 0x333   : > { %7166 = vst.msk [vmem:[%s11408_s12 + $0x244] sm:$0xf] %vm7020_vm4, %v9104_v54  ;;  %v4760_v61 = vmax.f32 %v3273_v55, 0.0  ;;  %7408 = vst.msk [vmem:[%s11408_s12 + $0x60c] sm:$0xf] %vm7020_vm4, %v9346_v56  ;;  %v5002_v62 = vmax.f32 %v4241_v57, 0.0 }
 0x334   : > { %v3275_v63 = vpop.f32.mrf.mxu0  ;;  %v4243_v2 = vpop.f32.mrf.mxu1 }
 0x335   : > { %v9105_v4 = vpack.c.bf16 %v4760_v61, %v4760_v61  ;;  %v3276_v6 = vadd.f32 %v12787_v21, %v3275_v63  ;;  %v9347_v7 = vpack.c.bf16 %v5002_v62, %v5002_v62  ;;  %v4244_v8 = vadd.f32 %v12787_v21, %v4243_v2 }
 0x336   : > { %v9994_v60 = vpop.f32.mrf.mxu0  ;;  %v10478_v9 = vpop.f32.mrf.mxu1 }
 0x337   : > { %7167 = vst.msk [vmem:[%s11408_s12 + $0x248] sm:$0xf] %vm7020_vm4, %v9105_v4  ;;  %v4761_v10 = vmax.f32 %v3276_v6, 0.0  ;;  %7409 = vst.msk [vmem:[%s11408_s12 + $0x610] sm:$0xf] %vm7020_vm4, %v9347_v7  ;;  %v5003_v11 = vmax.f32 %v4244_v8, 0.0 }
 0x338   : > { %v3280_v12 = vpop.f32.mrf.mxu0  ;;  %10092 = vmatmul.mubr.msk.bf16.gmra.mxu0 %vm1923_vm3, %v10966_v1  ;;  %v4248_v13 = vpop.f32.mrf.mxu1  ;;  %10576 = vmatmul.mubr.msk.bf16.gmra.mxu1 %vm1923_vm3, %v10967_v3  ;;  %v10972_v6 = vld [vmem:[%s11184_s5 + $0x328] sm:$0xff]   ;;  %v10973_v8 = vld [vmem:[%s11184_s5 + $0x6f0] sm:$0xff]  }
 0x339   : > { %v9106_v14 = vpack.c.bf16 %v4761_v10, %v4761_v10  ;;  %v3281_v5 = vadd.f32 %v12787_v21, %v3280_v12  ;;  %v9348_v15 = vpack.c.bf16 %v5003_v11, %v5003_v11  ;;  %v4249_v17 = vadd.f32 %v12787_v21, %v4248_v13  ;;  %10095 = vmatprep.mubr.msk.bf16.mxu0 %vm11107_vm2, %v11105_v0 }
 0x33a   : > { %v9997_v18 = vpop.f32.mrf.mxu0  ;;  %v10481_v19 = vpop.f32.mrf.mxu1  ;;  %10579 = vmatprep.mubr.msk.bf16.mxu1 %vm11107_vm2, %v11105_v0 }
 0x33b   : > { %7168 = vst.msk [vmem:[%s11408_s12 + $0x24c] sm:$0xf] %vm7020_vm4, %v9106_v14  ;;  %v4762_v20 = vmax.f32 %v3281_v5, 0.0  ;;  %7410 = vst.msk [vmem:[%s11408_s12 + $0x614] sm:$0xf] %vm7020_vm4, %v9348_v15  ;;  %v5004_v22 = vmax.f32 %v4249_v17, 0.0 }
 0x33c   : > { %v3283_v23 = vpop.f32.mrf.mxu0  ;;  %v4251_v25 = vpop.f32.mrf.mxu1 }
 0x33d   : > { %v9107_v27 = vpack.c.bf16 %v4762_v20, %v4762_v20  ;;  %v3284_v16 = vadd.f32 %v12787_v21, %v3283_v23  ;;  %v9349_v28 = vpack.c.bf16 %v5004_v22, %v5004_v22  ;;  %v4252_v29 = vadd.f32 %v12787_v21, %v4251_v25 }
 0x33e   : > { %v9998_v30 = vpop.f32.mrf.mxu0  ;;  %v10482_v31 = vpop.f32.mrf.mxu1 }
 0x33f   : > { %7169 = vst.msk [vmem:[%s11408_s12 + $0x250] sm:$0xf] %vm7020_vm4, %v9107_v27  ;;  %v4763_v32 = vmax.f32 %v3284_v16, 0.0  ;;  %7411 = vst.msk [vmem:[%s11408_s12 + $0x618] sm:$0xf] %vm7020_vm4, %v9349_v28  ;;  %v5005_v33 = vmax.f32 %v4252_v29, 0.0 }
 0x340   : > { %v3288_v34 = vpop.f32.mrf.mxu0  ;;  %10096 = vmatmul.mubr.msk.bf16.gmra.mxu0 %vm1923_vm3, %v10968_v24  ;;  %v4256_v35 = vpop.f32.mrf.mxu1  ;;  %10580 = vmatmul.mubr.msk.bf16.gmra.mxu1 %vm1923_vm3, %v10969_v26  ;;  %v10974_v16 = vld [vmem:[%s11184_s5 + $0x330] sm:$0xff]   ;;  %v10975_v29 = vld [vmem:[%s11184_s5 + $0x6f8] sm:$0xff]  }
 0x341   : > { %v9108_v36 = vpack.c.bf16 %v4763_v32, %v4763_v32  ;;  %v3289_v37 = vadd.f32 %v12787_v21, %v3288_v34  ;;  %v9350_v38 = vpack.c.bf16 %v5005_v33, %v5005_v33  ;;  %v4257_v39 = vadd.f32 %v12787_v21, %v4256_v35  ;;  %10099 = vmatprep.mubr.msk.bf16.mxu0 %vm11107_vm2, %v11105_v0 }
 0x342   : > { %v10001_v40 = vpop.f32.mrf.mxu0  ;;  %v10485_v41 = vpop.f32.mrf.mxu1  ;;  %10583 = vmatprep.mubr.msk.bf16.mxu1 %vm11107_vm2, %v11105_v0 }
 0x343   : > { %7170 = vst.msk [vmem:[%s11408_s12 + $0x254] sm:$0xf] %vm7020_vm4, %v9108_v36  ;;  %v4764_v42 = vmax.f32 %v3289_v37, 0.0  ;;  %7412 = vst.msk [vmem:[%s11408_s12 + $0x61c] sm:$0xf] %vm7020_vm4, %v9350_v38  ;;  %v5006_v43 = vmax.f32 %v4257_v39, 0.0 }
 0x344   : > { %v3291_v44 = vpop.f32.mrf.mxu0  ;;  %v4259_v46 = vpop.f32.mrf.mxu1 }
 0x345   : > { %v9109_v48 = vpack.c.bf16 %v4764_v42, %v4764_v42  ;;  %v3292_v49 = vadd.f32 %v12787_v21, %v3291_v44  ;;  %v9351_v50 = vpack.c.bf16 %v5006_v43, %v5006_v43  ;;  %v4260_v51 = vadd.f32 %v12787_v21, %v4259_v46 }
 0x346   : > { %v10002_v52 = vpop.f32.mrf.mxu0  ;;  %v10486_v53 = vpop.f32.mrf.mxu1 }
 0x347   : > { %7171 = vst.msk [vmem:[%s11408_s12 + $0x258] sm:$0xf] %vm7020_vm4, %v9109_v48  ;;  %v4765_v54 = vmax.f32 %v3292_v49, 0.0  ;;  %7413 = vst.msk [vmem:[%s11408_s12 + $0x620] sm:$0xf] %vm7020_vm4, %v9351_v50  ;;  %v5007_v55 = vmax.f32 %v4260_v51, 0.0 }
 0x348   : > { %v3296_v56 = vpop.f32.mrf.mxu0  ;;  %10100 = vmatmul.mubr.msk.bf16.gmra.mxu0 %vm1923_vm3, %v10970_v45  ;;  %v4264_v57 = vpop.f32.mrf.mxu1  ;;  %10584 = vmatmul.mubr.msk.bf16.gmra.mxu1 %vm1923_vm3, %v10971_v47  ;;  %v10976_v49 = vld [vmem:[%s11184_s5 + $0x338] sm:$0xff]   ;;  %v10977_v51 = vld [vmem:[%s11184_s5 + $0x700] sm:$0xff]  }
 0x349   : > { %v9110_v58 = vpack.c.bf16 %v4765_v54, %v4765_v54  ;;  %v3297_v59 = vadd.f32 %v12787_v21, %v3296_v56  ;;  %v9352_v61 = vpack.c.bf16 %v5007_v55, %v5007_v55  ;;  %v4265_v62 = vadd.f32 %v12787_v21, %v4264_v57  ;;  %10103 = vmatprep.mubr.msk.bf16.mxu0 %vm11107_vm2, %v11105_v0 }
 0x34a   : > { %v10005_v63 = vpop.f32.mrf.mxu0  ;;  %v10489_v1 = vpop.f32.mrf.mxu1  ;;  %10587 = vmatprep.mubr.msk.bf16.mxu1 %vm11107_vm2, %v11105_v0 }
 0x34b   : > { %7172 = vst.msk [vmem:[%s11408_s12 + $0x25c] sm:$0xf] %vm7020_vm4, %v9110_v58  ;;  %v4766_v2 = vmax.f32 %v3297_v59, 0.0  ;;  %7414 = vst.msk [vmem:[%s11408_s12 + $0x624] sm:$0xf] %vm7020_vm4, %v9352_v61  ;;  %v5008_v3 = vmax.f32 %v4265_v62, 0.0 }
 0x34c   : > { %v3299_v4 = vpop.f32.mrf.mxu0  ;;  %v4267_v7 = vpop.f32.mrf.mxu1 }
 0x34d   : > { %v9111_v60 = vpack.c.bf16 %v4766_v2, %v4766_v2  ;;  %v3300_v9 = vadd.f32 %v12787_v21, %v3299_v4  ;;  %v9353_v10 = vpack.c.bf16 %v5008_v3, %v5008_v3  ;;  %v4268_v11 = vadd.f32 %v12787_v21, %v4267_v7 }
 0x34e   : > { %v10006_v12 = vpop.f32.mrf.mxu0  ;;  %v10490_v13 = vpop.f32.mrf.mxu1 }
 0x34f   : > { %7173 = vst.msk [vmem:[%s11408_s12 + $0x260] sm:$0xf] %vm7020_vm4, %v9111_v60  ;;  %v4767_v14 = vmax.f32 %v3300_v9, 0.0  ;;  %7415 = vst.msk [vmem:[%s11408_s12 + $0x628] sm:$0xf] %vm7020_vm4, %v9353_v10  ;;  %v5009_v5 = vmax.f32 %v4268_v11, 0.0 }
 0x350   : > { %v3304_v15 = vpop.f32.mrf.mxu0  ;;  %10104 = vmatmul.mubr.msk.bf16.gmra.mxu0 %vm1923_vm3, %v10972_v6  ;;  %v4272_v17 = vpop.f32.mrf.mxu1  ;;  %10588 = vmatmul.mubr.msk.bf16.gmra.mxu1 %vm1923_vm3, %v10973_v8  ;;  %v10978_v9 = vld [vmem:[%s11184_s5 + $0x340] sm:$0xff]   ;;  %v10979_v11 = vld [vmem:[%s11184_s5 + $0x708] sm:$0xff]  }
 0x351   : > { %v9112_v18 = vpack.c.bf16 %v4767_v14, %v4767_v14  ;;  %v3305_v19 = vadd.f32 %v12787_v21, %v3304_v15  ;;  %v9354_v20 = vpack.c.bf16 %v5009_v5, %v5009_v5  ;;  %v4273_v22 = vadd.f32 %v12787_v21, %v4272_v17  ;;  %10107 = vmatprep.mubr.msk.bf16.mxu0 %vm11107_vm2, %v11105_v0 }
 0x352   : > { %v10009_v23 = vpop.f32.mrf.mxu0  ;;  %v10493_v24 = vpop.f32.mrf.mxu1  ;;  %10591 = vmatprep.mubr.msk.bf16.mxu1 %vm11107_vm2, %v11105_v0 }
 0x353   : > { %7174 = vst.msk [vmem:[%s11408_s12 + $0x264] sm:$0xf] %vm7020_vm4, %v9112_v18  ;;  %v4768_v25 = vmax.f32 %v3305_v19, 0.0  ;;  %7416 = vst.msk [vmem:[%s11408_s12 + $0x62c] sm:$0xf] %vm7020_vm4, %v9354_v20  ;;  %v5010_v26 = vmax.f32 %v4273_v22, 0.0 }
 0x354   : > { %v3307_v27 = vpop.f32.mrf.mxu0  ;;  %v4275_v28 = vpop.f32.mrf.mxu1 }
 0x355   : > { %v9113_v30 = vpack.c.bf16 %v4768_v25, %v4768_v25  ;;  %v3308_v31 = vadd.f32 %v12787_v21, %v3307_v27  ;;  %v9355_v32 = vpack.c.bf16 %v5010_v26, %v5010_v26  ;;  %v4276_v33 = vadd.f32 %v12787_v21, %v4275_v28 }
 0x356   : > { %v10010_v34 = vpop.f32.mrf.mxu0  ;;  %v10494_v35 = vpop.f32.mrf.mxu1 }
 0x357   : > { %7175 = vst.msk [vmem:[%s11408_s12 + $0x268] sm:$0xf] %vm7020_vm4, %v9113_v30  ;;  %v4769_v36 = vmax.f32 %v3308_v31, 0.0  ;;  %7417 = vst.msk [vmem:[%s11408_s12 + $0x630] sm:$0xf] %vm7020_vm4, %v9355_v32  ;;  %v5011_v37 = vmax.f32 %v4276_v33, 0.0 }
 0x358   : > { %v3312_v38 = vpop.f32.mrf.mxu0  ;;  %10108 = vmatmul.mubr.msk.bf16.gmra.mxu0 %vm1923_vm3, %v10974_v16  ;;  %v4280_v39 = vpop.f32.mrf.mxu1  ;;  %10592 = vmatmul.mubr.msk.bf16.gmra.mxu1 %vm1923_vm3, %v10975_v29  ;;  %v10980_v31 = vld [vmem:[%s11184_s5 + $0x348] sm:$0xff]   ;;  %v10981_v33 = vld [vmem:[%s11184_s5 + $0x710] sm:$0xff]  }
 0x359   : > { %v9114_v40 = vpack.c.bf16 %v4769_v36, %v4769_v36  ;;  %v3313_v41 = vadd.f32 %v12787_v21, %v3312_v38  ;;  %v9356_v42 = vpack.c.bf16 %v5011_v37, %v5011_v37  ;;  %v4281_v43 = vadd.f32 %v12787_v21, %v4280_v39  ;;  %10111 = vmatprep.mubr.msk.bf16.mxu0 %vm11107_vm2, %v11105_v0 }
 0x35a   : > { %v10013_v44 = vpop.f32.mrf.mxu0  ;;  %v10497_v45 = vpop.f32.mrf.mxu1  ;;  %10595 = vmatprep.mubr.msk.bf16.mxu1 %vm11107_vm2, %v11105_v0 }
 0x35b   : > { %7176 = vst.msk [vmem:[%s11408_s12 + $0x26c] sm:$0xf] %vm7020_vm4, %v9114_v40  ;;  %v4770_v46 = vmax.f32 %v3313_v41, 0.0  ;;  %7418 = vst.msk [vmem:[%s11408_s12 + $0x634] sm:$0xf] %vm7020_vm4, %v9356_v42  ;;  %v5012_v47 = vmax.f32 %v4281_v43, 0.0 }
 0x35c   : > { %v3315_v48 = vpop.f32.mrf.mxu0  ;;  %v4283_v50 = vpop.f32.mrf.mxu1 }
 0x35d   : > { %v9115_v52 = vpack.c.bf16 %v4770_v46, %v4770_v46  ;;  %v3316_v53 = vadd.f32 %v12787_v21, %v3315_v48  ;;  %v9357_v54 = vpack.c.bf16 %v5012_v47, %v5012_v47  ;;  %v4284_v55 = vadd.f32 %v12787_v21, %v4283_v50 }
 0x35e   : > { %v10014_v56 = vpop.f32.mrf.mxu0  ;;  %v10498_v57 = vpop.f32.mrf.mxu1 }
 0x35f   : > { %7177 = vst.msk [vmem:[%s11408_s12 + $0x270] sm:$0xf] %vm7020_vm4, %v9115_v52  ;;  %v4771_v58 = vmax.f32 %v3316_v53, 0.0  ;;  %7419 = vst.msk [vmem:[%s11408_s12 + $0x638] sm:$0xf] %vm7020_vm4, %v9357_v54  ;;  %v5013_v59 = vmax.f32 %v4284_v55, 0.0 }
 0x360   : > { %v3320_v61 = vpop.f32.mrf.mxu0  ;;  %10112 = vmatmul.mubr.msk.bf16.gmra.mxu0 %vm1923_vm3, %v10976_v49  ;;  %v4288_v62 = vpop.f32.mrf.mxu1  ;;  %10596 = vmatmul.mubr.msk.bf16.gmra.mxu1 %vm1923_vm3, %v10977_v51  ;;  %v10982_v53 = vld [vmem:[%s11184_s5 + $0x350] sm:$0xff]   ;;  %v10983_v55 = vld [vmem:[%s11184_s5 + $0x718] sm:$0xff]  }
 0x361   : > { %v9116_v63 = vpack.c.bf16 %v4771_v58, %v4771_v58  ;;  %v3321_v1 = vadd.f32 %v12787_v21, %v3320_v61  ;;  %v9358_v2 = vpack.c.bf16 %v5013_v59, %v5013_v59  ;;  %v4289_v3 = vadd.f32 %v12787_v21, %v4288_v62  ;;  %10115 = vmatprep.mubr.msk.bf16.mxu0 %vm11107_vm2, %v11105_v0 }
 0x362   : > { %v10017_v4 = vpop.f32.mrf.mxu0  ;;  %v10501_v6 = vpop.f32.mrf.mxu1  ;;  %10599 = vmatprep.mubr.msk.bf16.mxu1 %vm11107_vm2, %v11105_v0 }
 0x363   : > { %7178 = vst.msk [vmem:[%s11408_s12 + $0x274] sm:$0xf] %vm7020_vm4, %v9116_v63  ;;  %v4772_v7 = vmax.f32 %v3321_v1, 0.0  ;;  %7420 = vst.msk [vmem:[%s11408_s12 + $0x63c] sm:$0xf] %vm7020_vm4, %v9358_v2  ;;  %v5014_v8 = vmax.f32 %v4289_v3, 0.0 }
 0x364   : > { %v3323_v60 = vpop.f32.mrf.mxu0  ;;  %v4291_v10 = vpop.f32.mrf.mxu1 }
 0x365   : > { %v9117_v12 = vpack.c.bf16 %v4772_v7, %v4772_v7  ;;  %v3324_v13 = vadd.f32 %v12787_v21, %v3323_v60  ;;  %v9359_v14 = vpack.c.bf16 %v5014_v8, %v5014_v8  ;;  %v4292_v5 = vadd.f32 %v12787_v21, %v4291_v10 }
 0x366   : > { %v10018_v15 = vpop.f32.mrf.mxu0  ;;  %v10502_v17 = vpop.f32.mrf.mxu1 }
 0x367   : > { %7179 = vst.msk [vmem:[%s11408_s12 + $0x278] sm:$0xf] %vm7020_vm4, %v9117_v12  ;;  %v4773_v18 = vmax.f32 %v3324_v13, 0.0  ;;  %7421 = vst.msk [vmem:[%s11408_s12 + $0x640] sm:$0xf] %vm7020_vm4, %v9359_v14  ;;  %v5015_v19 = vmax.f32 %v4292_v5, 0.0 }
 0x368   : > { %v3328_v20 = vpop.f32.mrf.mxu0  ;;  %10116 = vmatmul.mubr.msk.bf16.gmra.mxu0 %vm1923_vm3, %v10978_v9  ;;  %v4296_v22 = vpop.f32.mrf.mxu1  ;;  %10600 = vmatmul.mubr.msk.bf16.gmra.mxu1 %vm1923_vm3, %v10979_v11  ;;  %v10984_v13 = vld [vmem:[%s11184_s5 + $0x358] sm:$0xff]   ;;  %v10985_v5 = vld [vmem:[%s11184_s5 + $0x720] sm:$0xff]  }
 0x369   : > { %v9118_v23 = vpack.c.bf16 %v4773_v18, %v4773_v18  ;;  %v3329_v24 = vadd.f32 %v12787_v21, %v3328_v20  ;;  %v9360_v25 = vpack.c.bf16 %v5015_v19, %v5015_v19  ;;  %v4297_v26 = vadd.f32 %v12787_v21, %v4296_v22  ;;  %10119 = vmatprep.mubr.msk.bf16.mxu0 %vm11107_vm2, %v11105_v0 }
 0x36a   : > { %v10021_v27 = vpop.f32.mrf.mxu0  ;;  %v10505_v16 = vpop.f32.mrf.mxu1  ;;  %10603 = vmatprep.mubr.msk.bf16.mxu1 %vm11107_vm2, %v11105_v0 }
 0x36b   : > { %7180 = vst.msk [vmem:[%s11408_s12 + $0x27c] sm:$0xf] %vm7020_vm4, %v9118_v23  ;;  %v4774_v28 = vmax.f32 %v3329_v24, 0.0  ;;  %7422 = vst.msk [vmem:[%s11408_s12 + $0x644] sm:$0xf] %vm7020_vm4, %v9360_v25  ;;  %v5016_v29 = vmax.f32 %v4297_v26, 0.0 }
 0x36c   : > { %v3331_v30 = vpop.f32.mrf.mxu0  ;;  %v4299_v32 = vpop.f32.mrf.mxu1 }
 0x36d   : > { %v9119_v34 = vpack.c.bf16 %v4774_v28, %v4774_v28  ;;  %v3332_v35 = vadd.f32 %v12787_v21, %v3331_v30  ;;  %v9361_v36 = vpack.c.bf16 %v5016_v29, %v5016_v29  ;;  %v4300_v37 = vadd.f32 %v12787_v21, %v4299_v32 }
 0x36e   : > { %v10022_v38 = vpop.f32.mrf.mxu0  ;;  %v10506_v39 = vpop.f32.mrf.mxu1 }
 0x36f   : > { %7181 = vst.msk [vmem:[%s11408_s12 + $0x280] sm:$0xf] %vm7020_vm4, %v9119_v34  ;;  %v4775_v40 = vmax.f32 %v3332_v35, 0.0  ;;  %7423 = vst.msk [vmem:[%s11408_s12 + $0x648] sm:$0xf] %vm7020_vm4, %v9361_v36  ;;  %v5017_v41 = vmax.f32 %v4300_v37, 0.0 }
 0x370   : > { %v3336_v42 = vpop.f32.mrf.mxu0  ;;  %10120 = vmatmul.mubr.msk.bf16.gmra.mxu0 %vm1923_vm3, %v10980_v31  ;;  %v4304_v43 = vpop.f32.mrf.mxu1  ;;  %10604 = vmatmul.mubr.msk.bf16.gmra.mxu1 %vm1923_vm3, %v10981_v33  ;;  %v10986_v35 = vld [vmem:[%s11184_s5 + $0x360] sm:$0xff]   ;;  %v10987_v37 = vld [vmem:[%s11184_s5 + $0x728] sm:$0xff]  }
 0x371   : > { %v9120_v44 = vpack.c.bf16 %v4775_v40, %v4775_v40  ;;  %v3337_v45 = vadd.f32 %v12787_v21, %v3336_v42  ;;  %v9362_v46 = vpack.c.bf16 %v5017_v41, %v5017_v41  ;;  %v4305_v47 = vadd.f32 %v12787_v21, %v4304_v43  ;;  %10123 = vmatprep.mubr.msk.bf16.mxu0 %vm11107_vm2, %v11105_v0 }
 0x372   : > { %v10025_v48 = vpop.f32.mrf.mxu0  ;;  %v10509_v49 = vpop.f32.mrf.mxu1  ;;  %10607 = vmatprep.mubr.msk.bf16.mxu1 %vm11107_vm2, %v11105_v0 }
 0x373   : > { %7182 = vst.msk [vmem:[%s11408_s12 + $0x284] sm:$0xf] %vm7020_vm4, %v9120_v44  ;;  %v4776_v50 = vmax.f32 %v3337_v45, 0.0  ;;  %7424 = vst.msk [vmem:[%s11408_s12 + $0x64c] sm:$0xf] %vm7020_vm4, %v9362_v46  ;;  %v5018_v51 = vmax.f32 %v4305_v47, 0.0 }
 0x374   : > { %v3339_v52 = vpop.f32.mrf.mxu0  ;;  %v4307_v54 = vpop.f32.mrf.mxu1 }
 0x375   : > { %v9121_v56 = vpack.c.bf16 %v4776_v50, %v4776_v50  ;;  %v3340_v57 = vadd.f32 %v12787_v21, %v3339_v52  ;;  %v9363_v58 = vpack.c.bf16 %v5018_v51, %v5018_v51  ;;  %v4308_v59 = vadd.f32 %v12787_v21, %v4307_v54 }
 0x376   : > { %v10026_v61 = vpop.f32.mrf.mxu0  ;;  %v10510_v62 = vpop.f32.mrf.mxu1 }
 0x377   : > { %7183 = vst.msk [vmem:[%s11408_s12 + $0x288] sm:$0xf] %vm7020_vm4, %v9121_v56  ;;  %v4777_v63 = vmax.f32 %v3340_v57, 0.0  ;;  %7425 = vst.msk [vmem:[%s11408_s12 + $0x650] sm:$0xf] %vm7020_vm4, %v9363_v58  ;;  %v5019_v1 = vmax.f32 %v4308_v59, 0.0 }
 0x378   : > { %v3344_v2 = vpop.f32.mrf.mxu0  ;;  %10124 = vmatmul.mubr.msk.bf16.gmra.mxu0 %vm1923_vm3, %v10982_v53  ;;  %v4312_v3 = vpop.f32.mrf.mxu1  ;;  %10608 = vmatmul.mubr.msk.bf16.gmra.mxu1 %vm1923_vm3, %v10983_v55  ;;  %v10988_v57 = vld [vmem:[%s11184_s5 + $0x368] sm:$0xff]   ;;  %v10989_v59 = vld [vmem:[%s11184_s5 + $0x730] sm:$0xff]  }
 0x379   : > { %v9122_v4 = vpack.c.bf16 %v4777_v63, %v4777_v63  ;;  %v3345_v6 = vadd.f32 %v12787_v21, %v3344_v2  ;;  %v9364_v7 = vpack.c.bf16 %v5019_v1, %v5019_v1  ;;  %v4313_v8 = vadd.f32 %v12787_v21, %v4312_v3  ;;  %10127 = vmatprep.mubr.msk.bf16.mxu0 %vm11107_vm2, %v11105_v0 }
 0x37a   : > { %v10029_v60 = vpop.f32.mrf.mxu0  ;;  %v10513_v9 = vpop.f32.mrf.mxu1  ;;  %10611 = vmatprep.mubr.msk.bf16.mxu1 %vm11107_vm2, %v11105_v0 }
 0x37b   : > { %7184 = vst.msk [vmem:[%s11408_s12 + $0x28c] sm:$0xf] %vm7020_vm4, %v9122_v4  ;;  %v4778_v10 = vmax.f32 %v3345_v6, 0.0  ;;  %7426 = vst.msk [vmem:[%s11408_s12 + $0x654] sm:$0xf] %vm7020_vm4, %v9364_v7  ;;  %v5020_v11 = vmax.f32 %v4313_v8, 0.0 }
 0x37c   : > { %v3347_v12 = vpop.f32.mrf.mxu0  ;;  %v4315_v14 = vpop.f32.mrf.mxu1 }
 0x37d   : > { %v9123_v15 = vpack.c.bf16 %v4778_v10, %v4778_v10  ;;  %v3348_v17 = vadd.f32 %v12787_v21, %v3347_v12  ;;  %v9365_v18 = vpack.c.bf16 %v5020_v11, %v5020_v11  ;;  %v4316_v19 = vadd.f32 %v12787_v21, %v4315_v14 }
 0x37e   : > { %v10030_v20 = vpop.f32.mrf.mxu0  ;;  %v10514_v22 = vpop.f32.mrf.mxu1 }
 0x37f   : > { %7185 = vst.msk [vmem:[%s11408_s12 + $0x290] sm:$0xf] %vm7020_vm4, %v9123_v15  ;;  %v4779_v23 = vmax.f32 %v3348_v17, 0.0  ;;  %7427 = vst.msk [vmem:[%s11408_s12 + $0x658] sm:$0xf] %vm7020_vm4, %v9365_v18  ;;  %v5021_v24 = vmax.f32 %v4316_v19, 0.0 }
 0x380   : > { %v3352_v25 = vpop.f32.mrf.mxu0  ;;  %10128 = vmatmul.mubr.msk.bf16.gmra.mxu0 %vm1923_vm3, %v10984_v13  ;;  %v4320_v26 = vpop.f32.mrf.mxu1  ;;  %10612 = vmatmul.mubr.msk.bf16.gmra.mxu1 %vm1923_vm3, %v10985_v5  ;;  %v10990_v17 = vld [vmem:[%s11184_s5 + $0x370] sm:$0xff]   ;;  %v10991_v19 = vld [vmem:[%s11184_s5 + $0x738] sm:$0xff]  }
 0x381   : > { %v9124_v27 = vpack.c.bf16 %v4779_v23, %v4779_v23  ;;  %v3353_v16 = vadd.f32 %v12787_v21, %v3352_v25  ;;  %v9366_v28 = vpack.c.bf16 %v5021_v24, %v5021_v24  ;;  %v4321_v29 = vadd.f32 %v12787_v21, %v4320_v26  ;;  %10131 = vmatprep.mubr.msk.bf16.mxu0 %vm11107_vm2, %v11105_v0 }
 0x382   : > { %v10033_v30 = vpop.f32.mrf.mxu0  ;;  %v10517_v31 = vpop.f32.mrf.mxu1  ;;  %10615 = vmatprep.mubr.msk.bf16.mxu1 %vm11107_vm2, %v11105_v0 }
 0x383   : > { %7186 = vst.msk [vmem:[%s11408_s12 + $0x294] sm:$0xf] %vm7020_vm4, %v9124_v27  ;;  %v4780_v32 = vmax.f32 %v3353_v16, 0.0  ;;  %7428 = vst.msk [vmem:[%s11408_s12 + $0x65c] sm:$0xf] %vm7020_vm4, %v9366_v28  ;;  %v5022_v33 = vmax.f32 %v4321_v29, 0.0 }
 0x384   : > { %v3355_v34 = vpop.f32.mrf.mxu0  ;;  %v4323_v36 = vpop.f32.mrf.mxu1 }
 0x385   : > { %v9125_v38 = vpack.c.bf16 %v4780_v32, %v4780_v32  ;;  %v3356_v39 = vadd.f32 %v12787_v21, %v3355_v34  ;;  %v9367_v40 = vpack.c.bf16 %v5022_v33, %v5022_v33  ;;  %v4324_v41 = vadd.f32 %v12787_v21, %v4323_v36 }
 0x386   : > { %v10034_v42 = vpop.f32.mrf.mxu0  ;;  %v10518_v43 = vpop.f32.mrf.mxu1 }
 0x387   : > { %7187 = vst.msk [vmem:[%s11408_s12 + $0x298] sm:$0xf] %vm7020_vm4, %v9125_v38  ;;  %v4781_v44 = vmax.f32 %v3356_v39, 0.0  ;;  %7429 = vst.msk [vmem:[%s11408_s12 + $0x660] sm:$0xf] %vm7020_vm4, %v9367_v40  ;;  %v5023_v45 = vmax.f32 %v4324_v41, 0.0 }
 0x388   : > { %v3360_v46 = vpop.f32.mrf.mxu0  ;;  %10132 = vmatmul.mubr.msk.bf16.gmra.mxu0 %vm1923_vm3, %v10986_v35  ;;  %v4328_v47 = vpop.f32.mrf.mxu1  ;;  %10616 = vmatmul.mubr.msk.bf16.gmra.mxu1 %vm1923_vm3, %v10987_v37  ;;  %v10992_v39 = vld [vmem:[%s11184_s5 + $0x378] sm:$0xff]   ;;  %v10993_v41 = vld [vmem:[%s11184_s5 + $0x740] sm:$0xff]  }
 0x389   : > { %v9126_v48 = vpack.c.bf16 %v4781_v44, %v4781_v44  ;;  %v3361_v49 = vadd.f32 %v12787_v21, %v3360_v46  ;;  %v9368_v50 = vpack.c.bf16 %v5023_v45, %v5023_v45  ;;  %v4329_v51 = vadd.f32 %v12787_v21, %v4328_v47  ;;  %10135 = vmatprep.mubr.msk.bf16.mxu0 %vm11107_vm2, %v11105_v0 }
 0x38a   : > { %v10037_v52 = vpop.f32.mrf.mxu0  ;;  %v10521_v53 = vpop.f32.mrf.mxu1  ;;  %10619 = vmatprep.mubr.msk.bf16.mxu1 %vm11107_vm2, %v11105_v0 }
 0x38b   : > { %7188 = vst.msk [vmem:[%s11408_s12 + $0x29c] sm:$0xf] %vm7020_vm4, %v9126_v48  ;;  %v4782_v54 = vmax.f32 %v3361_v49, 0.0  ;;  %7430 = vst.msk [vmem:[%s11408_s12 + $0x664] sm:$0xf] %vm7020_vm4, %v9368_v50  ;;  %v5024_v55 = vmax.f32 %v4329_v51, 0.0 }
 0x38c   : > { %v3363_v56 = vpop.f32.mrf.mxu0  ;;  %v4331_v58 = vpop.f32.mrf.mxu1 }
 0x38d   : > { %v9127_v61 = vpack.c.bf16 %v4782_v54, %v4782_v54  ;;  %v3364_v62 = vadd.f32 %v12787_v21, %v3363_v56  ;;  %v9369_v63 = vpack.c.bf16 %v5024_v55, %v5024_v55  ;;  %v4332_v1 = vadd.f32 %v12787_v21, %v4331_v58 }
 0x38e   : > { %v10038_v2 = vpop.f32.mrf.mxu0  ;;  %v10522_v3 = vpop.f32.mrf.mxu1 }
 0x38f   : > { %7189 = vst.msk [vmem:[%s11408_s12 + $0x2a0] sm:$0xf] %vm7020_vm4, %v9127_v61  ;;  %v4783_v4 = vmax.f32 %v3364_v62, 0.0  ;;  %7431 = vst.msk [vmem:[%s11408_s12 + $0x668] sm:$0xf] %vm7020_vm4, %v9369_v63  ;;  %v5025_v6 = vmax.f32 %v4332_v1, 0.0 }
 0x390   : > { %v3368_v7 = vpop.f32.mrf.mxu0  ;;  %10136 = vmatmul.mubr.msk.bf16.gmra.mxu0 %vm1923_vm3, %v10988_v57  ;;  %v4336_v8 = vpop.f32.mrf.mxu1  ;;  %10620 = vmatmul.mubr.msk.bf16.gmra.mxu1 %vm1923_vm3, %v10989_v59  ;;  %v10994_v62 = vld [vmem:[%s11184_s5 + $0x380] sm:$0xff]   ;;  %v10995_v1 = vld [vmem:[%s11184_s5 + $0x748] sm:$0xff]  }
 0x391   : > { %v9128_v60 = vpack.c.bf16 %v4783_v4, %v4783_v4  ;;  %v3369_v9 = vadd.f32 %v12787_v21, %v3368_v7  ;;  %v9370_v10 = vpack.c.bf16 %v5025_v6, %v5025_v6  ;;  %v4337_v11 = vadd.f32 %v12787_v21, %v4336_v8  ;;  %10139 = vmatprep.mubr.msk.bf16.mxu0 %vm11107_vm2, %v11105_v0 }
 0x392   : > { %v10041_v12 = vpop.f32.mrf.mxu0  ;;  %v10525_v13 = vpop.f32.mrf.mxu1  ;;  %10623 = vmatprep.mubr.msk.bf16.mxu1 %vm11107_vm2, %v11105_v0 }
 0x393   : > { %7190 = vst.msk [vmem:[%s11408_s12 + $0x2a4] sm:$0xf] %vm7020_vm4, %v9128_v60  ;;  %v4784_v14 = vmax.f32 %v3369_v9, 0.0  ;;  %7432 = vst.msk [vmem:[%s11408_s12 + $0x66c] sm:$0xf] %vm7020_vm4, %v9370_v10  ;;  %v5026_v5 = vmax.f32 %v4337_v11, 0.0 }
 0x394   : > { %v3371_v15 = vpop.f32.mrf.mxu0  ;;  %v4339_v18 = vpop.f32.mrf.mxu1 }
 0x395   : > { %v9129_v20 = vpack.c.bf16 %v4784_v14, %v4784_v14  ;;  %v3372_v22 = vadd.f32 %v12787_v21, %v3371_v15  ;;  %v9371_v23 = vpack.c.bf16 %v5026_v5, %v5026_v5  ;;  %v4340_v24 = vadd.f32 %v12787_v21, %v4339_v18  ;;  %v13139_v21 = vld [vmem:[%s13838_s2] ss:$0 sm:$0xff] }
 0x396   : > { %v10042_v25 = vpop.f32.mrf.mxu0  ;;  %v10526_v26 = vpop.f32.mrf.mxu1 }
 0x397   : > { %7191 = vst.msk [vmem:[%s11408_s12 + $0x2a8] sm:$0xf] %vm7020_vm4, %v9129_v20  ;;  %v4785_v27 = vmax.f32 %v3372_v22, 0.0  ;;  %7433 = vst.msk [vmem:[%s11408_s12 + $0x670] sm:$0xf] %vm7020_vm4, %v9371_v23  ;;  %v5027_v16 = vmax.f32 %v4340_v24, 0.0 }
 0x398   : > { %v3376_v28 = vpop.f32.mrf.mxu0  ;;  %10140 = vmatmul.mubr.msk.bf16.gmra.mxu0 %vm1923_vm3, %v10990_v17  ;;  %v4344_v29 = vpop.f32.mrf.mxu1  ;;  %10624 = vmatmul.mubr.msk.bf16.gmra.mxu1 %vm1923_vm3, %v10991_v19  ;;  %v10996_v22 = vld [vmem:[%s11184_s5 + $0x388] sm:$0xff]   ;;  %v10997_v24 = vld [vmem:[%s11184_s5 + $0x750] sm:$0xff]  }
 0x399   : > { %v9130_v30 = vpack.c.bf16 %v4785_v27, %v4785_v27  ;;  %v3377_v31 = vadd.f32 %v13139_v21, %v3376_v28  ;;  %v9372_v32 = vpack.c.bf16 %v5027_v16, %v5027_v16  ;;  %v4345_v33 = vadd.f32 %v13139_v21, %v4344_v29  ;;  %10143 = vmatprep.mubr.msk.bf16.mxu0 %vm11107_vm2, %v11105_v0 }
 0x39a   : > { %v10045_v34 = vpop.f32.mrf.mxu0  ;;  %v10529_v35 = vpop.f32.mrf.mxu1  ;;  %10627 = vmatprep.mubr.msk.bf16.mxu1 %vm11107_vm2, %v11105_v0 }
 0x39b   : > { %7192 = vst.msk [vmem:[%s11408_s12 + $0x2ac] sm:$0xf] %vm7020_vm4, %v9130_v30  ;;  %v4786_v36 = vmax.f32 %v3377_v31, 0.0  ;;  %7434 = vst.msk [vmem:[%s11408_s12 + $0x674] sm:$0xf] %vm7020_vm4, %v9372_v32  ;;  %v5028_v37 = vmax.f32 %v4345_v33, 0.0 }
 0x39c   : > { %v3379_v38 = vpop.f32.mrf.mxu0  ;;  %v4347_v40 = vpop.f32.mrf.mxu1 }
 0x39d   : > { %v9131_v42 = vpack.c.bf16 %v4786_v36, %v4786_v36  ;;  %v3380_v43 = vadd.f32 %v13139_v21, %v3379_v38  ;;  %v9373_v44 = vpack.c.bf16 %v5028_v37, %v5028_v37  ;;  %v4348_v45 = vadd.f32 %v13139_v21, %v4347_v40 }
 0x39e   : > { %v10046_v46 = vpop.f32.mrf.mxu0  ;;  %v10530_v47 = vpop.f32.mrf.mxu1 }
 0x39f   : > { %7193 = vst.msk [vmem:[%s11408_s12 + $0x2b0] sm:$0xf] %vm7020_vm4, %v9131_v42  ;;  %v4787_v48 = vmax.f32 %v3380_v43, 0.0  ;;  %7435 = vst.msk [vmem:[%s11408_s12 + $0x678] sm:$0xf] %vm7020_vm4, %v9373_v44  ;;  %v5029_v49 = vmax.f32 %v4348_v45, 0.0 }
 0x3a0   : > { %v3384_v50 = vpop.f32.mrf.mxu0  ;;  %10144 = vmatmul.mubr.msk.bf16.gmra.mxu0 %vm1923_vm3, %v10992_v39  ;;  %v4352_v51 = vpop.f32.mrf.mxu1  ;;  %10628 = vmatmul.mubr.msk.bf16.gmra.mxu1 %vm1923_vm3, %v10993_v41  ;;  %v10998_v43 = vld [vmem:[%s11184_s5 + $0x390] sm:$0xff]   ;;  %v10999_v45 = vld [vmem:[%s11184_s5 + $0x758] sm:$0xff]  }
 0x3a1   : > { %v9132_v52 = vpack.c.bf16 %v4787_v48, %v4787_v48  ;;  %v3385_v53 = vadd.f32 %v13139_v21, %v3384_v50  ;;  %v9374_v54 = vpack.c.bf16 %v5029_v49, %v5029_v49  ;;  %v4353_v55 = vadd.f32 %v13139_v21, %v4352_v51  ;;  %10147 = vmatprep.mubr.msk.bf16.mxu0 %vm11107_vm2, %v11105_v0 }
 0x3a2   : > { %v10049_v56 = vpop.f32.mrf.mxu0  ;;  %v10533_v57 = vpop.f32.mrf.mxu1  ;;  %10631 = vmatprep.mubr.msk.bf16.mxu1 %vm11107_vm2, %v11105_v0 }
 0x3a3   : > { %7194 = vst.msk [vmem:[%s11408_s12 + $0x2b4] sm:$0xf] %vm7020_vm4, %v9132_v52  ;;  %v4788_v58 = vmax.f32 %v3385_v53, 0.0  ;;  %7436 = vst.msk [vmem:[%s11408_s12 + $0x67c] sm:$0xf] %vm7020_vm4, %v9374_v54  ;;  %v5030_v59 = vmax.f32 %v4353_v55, 0.0 }
 0x3a4   : > { %v3387_v61 = vpop.f32.mrf.mxu0  ;;  %v4355_v63 = vpop.f32.mrf.mxu1 }
 0x3a5   : > { %v9133_v2 = vpack.c.bf16 %v4788_v58, %v4788_v58  ;;  %v3388_v3 = vadd.f32 %v13139_v21, %v3387_v61  ;;  %v9375_v4 = vpack.c.bf16 %v5030_v59, %v5030_v59  ;;  %v4356_v6 = vadd.f32 %v13139_v21, %v4355_v63 }
 0x3a6   : > { %v10050_v7 = vpop.f32.mrf.mxu0  ;;  %v10534_v8 = vpop.f32.mrf.mxu1 }
 0x3a7   : > { %7195 = vst.msk [vmem:[%s11408_s12 + $0x2b8] sm:$0xf] %vm7020_vm4, %v9133_v2  ;;  %v4789_v60 = vmax.f32 %v3388_v3, 0.0  ;;  %7437 = vst.msk [vmem:[%s11408_s12 + $0x680] sm:$0xf] %vm7020_vm4, %v9375_v4  ;;  %v5031_v9 = vmax.f32 %v4356_v6, 0.0 }
 0x3a8   : > { %v3392_v10 = vpop.f32.mrf.mxu0  ;;  %10148 = vmatmul.mubr.msk.bf16.gmra.mxu0 %vm1923_vm3, %v10994_v62  ;;  %v4360_v11 = vpop.f32.mrf.mxu1  ;;  %10632 = vmatmul.mubr.msk.bf16.gmra.mxu1 %vm1923_vm3, %v10995_v1  ;;  %v11000_v3 = vld [vmem:[%s11184_s5 + $0x398] sm:$0xff]   ;;  %v11001_v6 = vld [vmem:[%s11184_s5 + $0x760] sm:$0xff]  }
 0x3a9   : > { %v9134_v12 = vpack.c.bf16 %v4789_v60, %v4789_v60  ;;  %v3393_v13 = vadd.f32 %v13139_v21, %v3392_v10  ;;  %v9376_v14 = vpack.c.bf16 %v5031_v9, %v5031_v9  ;;  %v4361_v5 = vadd.f32 %v13139_v21, %v4360_v11  ;;  %10151 = vmatprep.mubr.msk.bf16.mxu0 %vm11107_vm2, %v11105_v0 }
 0x3aa   : > { %v10053_v15 = vpop.f32.mrf.mxu0  ;;  %v10537_v17 = vpop.f32.mrf.mxu1  ;;  %10635 = vmatprep.mubr.msk.bf16.mxu1 %vm11107_vm2, %v11105_v0 }
 0x3ab   : > { %7196 = vst.msk [vmem:[%s11408_s12 + $0x2bc] sm:$0xf] %vm7020_vm4, %v9134_v12  ;;  %v4790_v18 = vmax.f32 %v3393_v13, 0.0  ;;  %7438 = vst.msk [vmem:[%s11408_s12 + $0x684] sm:$0xf] %vm7020_vm4, %v9376_v14  ;;  %v5032_v19 = vmax.f32 %v4361_v5, 0.0 }
 0x3ac   : > { %v3395_v20 = vpop.f32.mrf.mxu0  ;;  %v4363_v23 = vpop.f32.mrf.mxu1 }
 0x3ad   : > { %v9135_v25 = vpack.c.bf16 %v4790_v18, %v4790_v18  ;;  %v3396_v26 = vadd.f32 %v13139_v21, %v3395_v20  ;;  %v9377_v27 = vpack.c.bf16 %v5032_v19, %v5032_v19  ;;  %v4364_v16 = vadd.f32 %v13139_v21, %v4363_v23 }
 0x3ae   : > { %v10054_v28 = vpop.f32.mrf.mxu0  ;;  %v10538_v29 = vpop.f32.mrf.mxu1 }
 0x3af   : > { %7197 = vst.msk [vmem:[%s11408_s12 + $0x2c0] sm:$0xf] %vm7020_vm4, %v9135_v25  ;;  %v4791_v30 = vmax.f32 %v3396_v26, 0.0  ;;  %7439 = vst.msk [vmem:[%s11408_s12 + $0x688] sm:$0xf] %vm7020_vm4, %v9377_v27  ;;  %v5033_v31 = vmax.f32 %v4364_v16, 0.0 }
 0x3b0   : > { %v3400_v32 = vpop.f32.mrf.mxu0  ;;  %10152 = vmatmul.mubr.msk.bf16.gmra.mxu0 %vm1923_vm3, %v10996_v22  ;;  %v4368_v33 = vpop.f32.mrf.mxu1  ;;  %10636 = vmatmul.mubr.msk.bf16.gmra.mxu1 %vm1923_vm3, %v10997_v24  ;;  %v11002_v26 = vld [vmem:[%s11184_s5 + $0x3a0] sm:$0xff]   ;;  %v11003_v16 = vld [vmem:[%s11184_s5 + $0x768] sm:$0xff]  }
 0x3b1   : > { %v9136_v34 = vpack.c.bf16 %v4791_v30, %v4791_v30  ;;  %v3401_v35 = vadd.f32 %v13139_v21, %v3400_v32  ;;  %v9378_v36 = vpack.c.bf16 %v5033_v31, %v5033_v31  ;;  %v4369_v37 = vadd.f32 %v13139_v21, %v4368_v33  ;;  %10155 = vmatprep.mubr.msk.bf16.mxu0 %vm11107_vm2, %v11105_v0 }
 0x3b2   : > { %v10057_v38 = vpop.f32.mrf.mxu0  ;;  %v10541_v39 = vpop.f32.mrf.mxu1  ;;  %10639 = vmatprep.mubr.msk.bf16.mxu1 %vm11107_vm2, %v11105_v0 }
 0x3b3   : > { %7198 = vst.msk [vmem:[%s11408_s12 + $0x2c4] sm:$0xf] %vm7020_vm4, %v9136_v34  ;;  %v4792_v40 = vmax.f32 %v3401_v35, 0.0  ;;  %7440 = vst.msk [vmem:[%s11408_s12 + $0x68c] sm:$0xf] %vm7020_vm4, %v9378_v36  ;;  %v5034_v41 = vmax.f32 %v4369_v37, 0.0 }
 0x3b4   : > { %v3403_v42 = vpop.f32.mrf.mxu0  ;;  %v4371_v44 = vpop.f32.mrf.mxu1 }
 0x3b5   : > { %v9137_v46 = vpack.c.bf16 %v4792_v40, %v4792_v40  ;;  %v3404_v47 = vadd.f32 %v13139_v21, %v3403_v42  ;;  %v9379_v48 = vpack.c.bf16 %v5034_v41, %v5034_v41  ;;  %v4372_v49 = vadd.f32 %v13139_v21, %v4371_v44 }
 0x3b6   : > { %v10058_v50 = vpop.f32.mrf.mxu0  ;;  %v10542_v51 = vpop.f32.mrf.mxu1 }
 0x3b7   : > { %7199 = vst.msk [vmem:[%s11408_s12 + $0x2c8] sm:$0xf] %vm7020_vm4, %v9137_v46  ;;  %v4793_v52 = vmax.f32 %v3404_v47, 0.0  ;;  %7441 = vst.msk [vmem:[%s11408_s12 + $0x690] sm:$0xf] %vm7020_vm4, %v9379_v48  ;;  %v5035_v53 = vmax.f32 %v4372_v49, 0.0 }
 0x3b8   : > { %v3408_v54 = vpop.f32.mrf.mxu0  ;;  %10156 = vmatmul.mubr.msk.bf16.gmra.mxu0 %vm1923_vm3, %v10998_v43  ;;  %v4376_v55 = vpop.f32.mrf.mxu1  ;;  %10640 = vmatmul.mubr.msk.bf16.gmra.mxu1 %vm1923_vm3, %v10999_v45  ;;  %v11004_v47 = vld [vmem:[%s11184_s5 + $0x3a8] sm:$0xff]   ;;  %v11005_v49 = vld [vmem:[%s11184_s5 + $0x770] sm:$0xff]  }
 0x3b9   : > { %v9138_v56 = vpack.c.bf16 %v4793_v52, %v4793_v52  ;;  %v3409_v57 = vadd.f32 %v13139_v21, %v3408_v54  ;;  %v9380_v58 = vpack.c.bf16 %v5035_v53, %v5035_v53  ;;  %v4377_v59 = vadd.f32 %v13139_v21, %v4376_v55  ;;  %10159 = vmatprep.mubr.msk.bf16.mxu0 %vm11107_vm2, %v11105_v0 }
 0x3ba   : > { %v10061_v61 = vpop.f32.mrf.mxu0  ;;  %v10545_v62 = vpop.f32.mrf.mxu1  ;;  %10643 = vmatprep.mubr.msk.bf16.mxu1 %vm11107_vm2, %v11105_v0 }
 0x3bb   : > { %7200 = vst.msk [vmem:[%s11408_s12 + $0x2cc] sm:$0xf] %vm7020_vm4, %v9138_v56  ;;  %v4794_v63 = vmax.f32 %v3409_v57, 0.0  ;;  %7442 = vst.msk [vmem:[%s11408_s12 + $0x694] sm:$0xf] %vm7020_vm4, %v9380_v58  ;;  %v5036_v1 = vmax.f32 %v4377_v59, 0.0 }
 0x3bc   : > { %v3411_v2 = vpop.f32.mrf.mxu0  ;;  %v4379_v4 = vpop.f32.mrf.mxu1 }
 0x3bd   : > { %v9139_v7 = vpack.c.bf16 %v4794_v63, %v4794_v63  ;;  %v3412_v8 = vadd.f32 %v13139_v21, %v3411_v2  ;;  %v9381_v60 = vpack.c.bf16 %v5036_v1, %v5036_v1  ;;  %v4380_v9 = vadd.f32 %v13139_v21, %v4379_v4 }
 0x3be   : > { %v10062_v10 = vpop.f32.mrf.mxu0  ;;  %v10546_v11 = vpop.f32.mrf.mxu1 }
 0x3bf   : > { %7201 = vst.msk [vmem:[%s11408_s12 + $0x2d0] sm:$0xf] %vm7020_vm4, %v9139_v7  ;;  %v4795_v12 = vmax.f32 %v3412_v8, 0.0  ;;  %7443 = vst.msk [vmem:[%s11408_s12 + $0x698] sm:$0xf] %vm7020_vm4, %v9381_v60  ;;  %v5037_v13 = vmax.f32 %v4380_v9, 0.0 }
 0x3c0   : > { %v3416_v14 = vpop.f32.mrf.mxu0  ;;  %10160 = vmatmul.mubr.msk.bf16.gmra.mxu0 %vm1923_vm3, %v11000_v3  ;;  %v4384_v5 = vpop.f32.mrf.mxu1  ;;  %10644 = vmatmul.mubr.msk.bf16.gmra.mxu1 %vm1923_vm3, %v11001_v6  ;;  %v11006_v8 = vld [vmem:[%s11184_s5 + $0x3b0] sm:$0xff]   ;;  %v11007_v9 = vld [vmem:[%s11184_s5 + $0x778] sm:$0xff]  }
 0x3c1   : > { %v9140_v15 = vpack.c.bf16 %v4795_v12, %v4795_v12  ;;  %v3417_v17 = vadd.f32 %v13139_v21, %v3416_v14  ;;  %v9382_v18 = vpack.c.bf16 %v5037_v13, %v5037_v13  ;;  %v4385_v19 = vadd.f32 %v13139_v21, %v4384_v5  ;;  %10163 = vmatprep.mubr.msk.bf16.mxu0 %vm11107_vm2, %v11105_v0 }
 0x3c2   : > { %v10065_v20 = vpop.f32.mrf.mxu0  ;;  %v10549_v22 = vpop.f32.mrf.mxu1  ;;  %10647 = vmatprep.mubr.msk.bf16.mxu1 %vm11107_vm2, %v11105_v0 }
 0x3c3   : > { %7202 = vst.msk [vmem:[%s11408_s12 + $0x2d4] sm:$0xf] %vm7020_vm4, %v9140_v15  ;;  %v4796_v23 = vmax.f32 %v3417_v17, 0.0  ;;  %7444 = vst.msk [vmem:[%s11408_s12 + $0x69c] sm:$0xf] %vm7020_vm4, %v9382_v18  ;;  %v5038_v24 = vmax.f32 %v4385_v19, 0.0 }
 0x3c4   : > { %v3419_v25 = vpop.f32.mrf.mxu0  ;;  %v4387_v27 = vpop.f32.mrf.mxu1 }
 0x3c5   : > { %v9141_v28 = vpack.c.bf16 %v4796_v23, %v4796_v23  ;;  %v3420_v29 = vadd.f32 %v13139_v21, %v3419_v25  ;;  %v9383_v30 = vpack.c.bf16 %v5038_v24, %v5038_v24  ;;  %v4388_v31 = vadd.f32 %v13139_v21, %v4387_v27 }
 0x3c6   : > { %v10066_v32 = vpop.f32.mrf.mxu0  ;;  %v10550_v33 = vpop.f32.mrf.mxu1 }
 0x3c7   : > { %7203 = vst.msk [vmem:[%s11408_s12 + $0x2d8] sm:$0xf] %vm7020_vm4, %v9141_v28  ;;  %v4797_v34 = vmax.f32 %v3420_v29, 0.0  ;;  %7445 = vst.msk [vmem:[%s11408_s12 + $0x6a0] sm:$0xf] %vm7020_vm4, %v9383_v30  ;;  %v5039_v35 = vmax.f32 %v4388_v31, 0.0 }
 0x3c8   : > { %v3424_v36 = vpop.f32.mrf.mxu0  ;;  %10164 = vmatmul.mubr.msk.bf16.gmra.mxu0 %vm1923_vm3, %v11002_v26  ;;  %v4392_v37 = vpop.f32.mrf.mxu1  ;;  %10648 = vmatmul.mubr.msk.bf16.gmra.mxu1 %vm1923_vm3, %v11003_v16  ;;  %v11008_v29 = vld [vmem:[%s11184_s5 + $0x3b8] sm:$0xff]   ;;  %v11009_v31 = vld [vmem:[%s11184_s5 + $0x780] ss:$0 sps:$4 sm:$0xff]  }
 0x3c9   : > { %v9142_v38 = vpack.c.bf16 %v4797_v34, %v4797_v34  ;;  %v3425_v39 = vadd.f32 %v13139_v21, %v3424_v36  ;;  %v9384_v40 = vpack.c.bf16 %v5039_v35, %v5039_v35  ;;  %v4393_v41 = vadd.f32 %v13139_v21, %v4392_v37  ;;  %10167 = vmatprep.mubr.msk.bf16.mxu0 %vm11107_vm2, %v11105_v0 }
 0x3ca   : > { %v10069_v42 = vpop.f32.mrf.mxu0  ;;  %v10553_v43 = vpop.f32.mrf.mxu1  ;;  %10651 = vmatprep.mubr.msk.bf16.mxu1 %vm11107_vm2, %v11105_v0 }
 0x3cb   : > { %7204 = vst.msk [vmem:[%s11408_s12 + $0x2dc] sm:$0xf] %vm7020_vm4, %v9142_v38  ;;  %v4798_v44 = vmax.f32 %v3425_v39, 0.0  ;;  %7446 = vst.msk [vmem:[%s11408_s12 + $0x6a4] sm:$0xf] %vm7020_vm4, %v9384_v40  ;;  %v5040_v45 = vmax.f32 %v4393_v41, 0.0 }
 0x3cc   : > { %v3427_v46 = vpop.f32.mrf.mxu0  ;;  %v4395_v48 = vpop.f32.mrf.mxu1 }
 0x3cd   : > { %v9143_v50 = vpack.c.bf16 %v4798_v44, %v4798_v44  ;;  %v3428_v51 = vadd.f32 %v13139_v21, %v3427_v46  ;;  %v9385_v52 = vpack.c.bf16 %v5040_v45, %v5040_v45  ;;  %v4396_v53 = vadd.f32 %v13139_v21, %v4395_v48 }
 0x3ce   : > { %v10070_v54 = vpop.f32.mrf.mxu0  ;;  %v10554_v55 = vpop.f32.mrf.mxu1 }
 0x3cf   : > { %7205 = vst.msk [vmem:[%s11408_s12 + $0x2e0] sm:$0xf] %vm7020_vm4, %v9143_v50  ;;  %v4799_v56 = vmax.f32 %v3428_v51, 0.0  ;;  %7447 = vst.msk [vmem:[%s11408_s12 + $0x6a8] sm:$0xf] %vm7020_vm4, %v9385_v52  ;;  %v5041_v57 = vmax.f32 %v4396_v53, 0.0 }
 0x3d0   : > { %v3432_v58 = vpop.f32.mrf.mxu0  ;;  %10168 = vmatmul.mubr.msk.bf16.gmra.mxu0 %vm1923_vm3, %v11004_v47  ;;  %v4400_v59 = vpop.f32.mrf.mxu1  ;;  %10652 = vmatmul.mubr.msk.bf16.gmra.mxu1 %vm1923_vm3, %v11005_v49  ;;  %v11010_v51 = vld [vmem:[%s11184_s5 + $0x3c0] sm:$0xff]  }
 0x3d1   : > { %v9144_v61 = vpack.c.bf16 %v4799_v56, %v4799_v56  ;;  %v3433_v62 = vadd.f32 %v13139_v21, %v3432_v58  ;;  %v9386_v63 = vpack.c.bf16 %v5041_v57, %v5041_v57  ;;  %v4401_v1 = vadd.f32 %v13139_v21, %v4400_v59  ;;  %10171 = vmatprep.mubr.msk.bf16.mxu0 %vm11107_vm2, %v11105_v0 }
 0x3d2   : > { %v10073_v2 = vpop.f32.mrf.mxu0  ;;  %v10557_v3 = vpop.f32.mrf.mxu1  ;;  %10655 = vmatprep.mubr.msk.bf16.mxu1 %vm11107_vm2, %v11105_v0 }
 0x3d3   : > { %7206 = vst.msk [vmem:[%s11408_s12 + $0x2e4] sm:$0xf] %vm7020_vm4, %v9144_v61  ;;  %v4800_v4 = vmax.f32 %v3433_v62, 0.0  ;;  %7448 = vst.msk [vmem:[%s11408_s12 + $0x6ac] sm:$0xf] %vm7020_vm4, %v9386_v63  ;;  %v5042_v6 = vmax.f32 %v4401_v1, 0.0 }
 0x3d4   : > { %v3435_v7 = vpop.f32.mrf.mxu0  ;;  %v4403_v60 = vpop.f32.mrf.mxu1 }
 0x3d5   : > { %v9145_v10 = vpack.c.bf16 %v4800_v4, %v4800_v4  ;;  %v3436_v11 = vadd.f32 %v13139_v21, %v3435_v7  ;;  %v9387_v12 = vpack.c.bf16 %v5042_v6, %v5042_v6  ;;  %v4404_v13 = vadd.f32 %v13139_v21, %v4403_v60 }
 0x3d6   : > { %v10074_v14 = vpop.f32.mrf.mxu0  ;;  %v10558_v5 = vpop.f32.mrf.mxu1 }
 0x3d7   : > { %7207 = vst.msk [vmem:[%s11408_s12 + $0x2e8] sm:$0xf] %vm7020_vm4, %v9145_v10  ;;  %v4801_v15 = vmax.f32 %v3436_v11, 0.0  ;;  %7449 = vst.msk [vmem:[%s11408_s12 + $0x6b0] sm:$0xf] %vm7020_vm4, %v9387_v12  ;;  %v5043_v17 = vmax.f32 %v4404_v13, 0.0 }
 0x3d8   : > { %v3440_v18 = vpop.f32.mrf.mxu0  ;;  %10172 = vmatmul.mubr.msk.bf16.gmra.mxu0 %vm1923_vm3, %v11006_v8  ;;  %v4408_v19 = vpop.f32.mrf.mxu1  ;;  %10656 = vmatmul.mubr.msk.bf16.gmra.mxu1 %vm1923_vm3, %v11007_v9 }
 0x3d9   : > { %v9146_v20 = vpack.c.bf16 %v4801_v15, %v4801_v15  ;;  %v3441_v22 = vadd.f32 %v13139_v21, %v3440_v18  ;;  %v9388_v23 = vpack.c.bf16 %v5043_v17, %v5043_v17  ;;  %v4409_v24 = vadd.f32 %v13139_v21, %v4408_v19  ;;  %10175 = vmatprep.mubr.msk.bf16.mxu0 %vm11107_vm2, %v11105_v0 }
 0x3da   : > { %v10077_v25 = vpop.f32.mrf.mxu0  ;;  %v10561_v26 = vpop.f32.mrf.mxu1  ;;  %10659 = vmatprep.mubr.msk.bf16.mxu1 %vm11107_vm2, %v11105_v0 }
 0x3db   : > { %7208 = vst.msk [vmem:[%s11408_s12 + $0x2ec] sm:$0xf] %vm7020_vm4, %v9146_v20  ;;  %v4802_v27 = vmax.f32 %v3441_v22, 0.0  ;;  %7450 = vst.msk [vmem:[%s11408_s12 + $0x6b4] sm:$0xf] %vm7020_vm4, %v9388_v23  ;;  %v5044_v16 = vmax.f32 %v4409_v24, 0.0 }
 0x3dc   : > { %v3443_v28 = vpop.f32.mrf.mxu0  ;;  %v4411_v30 = vpop.f32.mrf.mxu1 }
 0x3dd   : > { %v9147_v32 = vpack.c.bf16 %v4802_v27, %v4802_v27  ;;  %v3444_v33 = vadd.f32 %v13139_v21, %v3443_v28  ;;  %v9389_v34 = vpack.c.bf16 %v5044_v16, %v5044_v16  ;;  %v4412_v35 = vadd.f32 %v13139_v21, %v4411_v30 }
 0x3de   : > { %v10078_v36 = vpop.f32.mrf.mxu0  ;;  %v10562_v37 = vpop.f32.mrf.mxu1 }
 0x3df   : > { %7209 = vst.msk [vmem:[%s11408_s12 + $0x2f0] sm:$0xf] %vm7020_vm4, %v9147_v32  ;;  %v4803_v38 = vmax.f32 %v3444_v33, 0.0  ;;  %7451 = vst.msk [vmem:[%s11408_s12 + $0x6b8] sm:$0xf] %vm7020_vm4, %v9389_v34  ;;  %v5045_v39 = vmax.f32 %v4412_v35, 0.0 }
 0x3e0   : > { %v3448_v40 = vpop.f32.mrf.mxu0  ;;  %10176 = vmatmul.mubr.msk.bf16.gmra.mxu0 %vm1923_vm3, %v11008_v29  ;;  %v4416_v41 = vpop.f32.mrf.mxu1  ;;  %10660 = vmatmul.mubr.msk.bf16.gmra.mxu1 %vm1923_vm3, %v11009_v31 }
 0x3e1   : > { %v9148_v42 = vpack.c.bf16 %v4803_v38, %v4803_v38  ;;  %v3449_v43 = vadd.f32 %v13139_v21, %v3448_v40  ;;  %v9390_v44 = vpack.c.bf16 %v5045_v39, %v5045_v39  ;;  %v4417_v45 = vadd.f32 %v13139_v21, %v4416_v41  ;;  %10179 = vmatprep.mubr.msk.bf16.mxu0 %vm11107_vm2, %v11105_v0 }
 0x3e2   : > { %v10081_v46 = vpop.f32.mrf.mxu0  ;;  %v10565_v47 = vpop.f32.mrf.mxu1 }
 0x3e3   : > { %7210 = vst.msk [vmem:[%s11408_s12 + $0x2f4] sm:$0xf] %vm7020_vm4, %v9148_v42  ;;  %v4804_v48 = vmax.f32 %v3449_v43, 0.0  ;;  %7452 = vst.msk [vmem:[%s11408_s12 + $0x6bc] sm:$0xf] %vm7020_vm4, %v9390_v44  ;;  %v5046_v49 = vmax.f32 %v4417_v45, 0.0 }
 0x3e4   : > { %v3451_v50 = vpop.f32.mrf.mxu0  ;;  %v4419_v52 = vpop.f32.mrf.mxu1 }
 0x3e5   : > { %v9149_v53 = vpack.c.bf16 %v4804_v48, %v4804_v48  ;;  %v3452_v54 = vadd.f32 %v13139_v21, %v3451_v50  ;;  %v9391_v55 = vpack.c.bf16 %v5046_v49, %v5046_v49  ;;  %v4420_v56 = vadd.f32 %v13139_v21, %v4419_v52 }
 0x3e6   : > { %v10082_v0 = vpop.f32.mrf.mxu0  ;;  %v10566_v57 = vpop.f32.mrf.mxu1 }
 0x3e7   : > { %7211 = vst.msk [vmem:[%s11408_s12 + $0x2f8] sm:$0xf] %vm7020_vm4, %v9149_v53  ;;  %v4805_v58 = vmax.f32 %v3452_v54, 0.0  ;;  %7453 = vst.msk [vmem:[%s11408_s12 + $0x6c0] sm:$0xf] %vm7020_vm4, %v9391_v55  ;;  %v5047_v59 = vmax.f32 %v4420_v56, 0.0 }
 0x3e8   : > { %v3456_v61 = vpop.f32.mrf.mxu0  ;;  %10180 = vmatmul.mubr.msk.bf16.gmra.mxu0 %vm1923_vm3, %v11010_v51  ;;  %v4424_v62 = vpop.f32.mrf.mxu1 }
 0x3e9   : > { %v9150_v63 = vpack.c.bf16 %v4805_v58, %v4805_v58  ;;  %v3457_v1 = vadd.f32 %v13139_v21, %v3456_v61  ;;  %v9392_v2 = vpack.c.bf16 %v5047_v59, %v5047_v59  ;;  %v4425_v3 = vadd.f32 %v13139_v21, %v4424_v62 }
 0x3ea   : > { %v10085_v4 = vpop.f32.mrf.mxu0  ;;  %v10569_v6 = vpop.f32.mrf.mxu1 }
 0x3eb   : > { %7212 = vst.msk [vmem:[%s11408_s12 + $0x2fc] sm:$0xf] %vm7020_vm4, %v9150_v63  ;;  %v4806_v7 = vmax.f32 %v3457_v1, 0.0  ;;  %7454 = vst.msk [vmem:[%s11408_s12 + $0x6c4] sm:$0xf] %vm7020_vm4, %v9392_v2  ;;  %v5048_v8 = vmax.f32 %v4425_v3, 0.0 }
 0x3ec   : > { %v3459_v60 = vpop.f32.mrf.mxu0  ;;  %v4427_v9 = vpop.f32.mrf.mxu1 }
 0x3ed   : > { %v9151_v10 = vpack.c.bf16 %v4806_v7, %v4806_v7  ;;  %v3460_v11 = vadd.f32 %v13139_v21, %v3459_v60  ;;  %v9393_v12 = vpack.c.bf16 %v5048_v8, %v5048_v8  ;;  %v4428_v13 = vadd.f32 %v13139_v21, %v4427_v9 }
 0x3ee   : > { %v10086_v14 = vpop.f32.mrf.mxu0  ;;  %v10570_v5 = vpop.f32.mrf.mxu1 }
 0x3ef   : > { %7213 = vst.msk [vmem:[%s11408_s12 + $0x300] sm:$0xf] %vm7020_vm4, %v9151_v10  ;;  %v4807_v15 = vmax.f32 %v3460_v11, 0.0  ;;  %7455 = vst.msk [vmem:[%s11408_s12 + $0x6c8] sm:$0xf] %vm7020_vm4, %v9393_v12  ;;  %v5049_v17 = vmax.f32 %v4428_v13, 0.0 }
 0x3f0   : > { %v3464_v18 = vpop.f32.mrf.mxu0  ;;  %v4432_v19 = vpop.f32.mrf.mxu1 }
 0x3f1   : > { %v9152_v20 = vpack.c.bf16 %v4807_v15, %v4807_v15  ;;  %v3465_v22 = vadd.f32 %v13139_v21, %v3464_v18  ;;  %v9394_v23 = vpack.c.bf16 %v5049_v17, %v5049_v17  ;;  %v4433_v24 = vadd.f32 %v13139_v21, %v4432_v19 }
 0x3f2   : > { %v10089_v25 = vpop.f32.mrf.mxu0  ;;  %v10573_v26 = vpop.f32.mrf.mxu1 }
 0x3f3   : > { %7214 = vst.msk [vmem:[%s11408_s12 + $0x304] sm:$0xf] %vm7020_vm4, %v9152_v20  ;;  %v4808_v27 = vmax.f32 %v3465_v22, 0.0  ;;  %7456 = vst.msk [vmem:[%s11408_s12 + $0x6cc] sm:$0xf] %vm7020_vm4, %v9394_v23  ;;  %v5050_v16 = vmax.f32 %v4433_v24, 0.0 }
 0x3f4   : > { %v3467_v28 = vpop.f32.mrf.mxu0  ;;  %v4435_v29 = vpop.f32.mrf.mxu1 }
 0x3f5   : > { %v9153_v30 = vpack.c.bf16 %v4808_v27, %v4808_v27  ;;  %v3468_v31 = vadd.f32 %v13139_v21, %v3467_v28  ;;  %v9395_v32 = vpack.c.bf16 %v5050_v16, %v5050_v16  ;;  %v4436_v33 = vadd.f32 %v13139_v21, %v4435_v29 }
 0x3f6   : > { %v10090_v34 = vpop.f32.mrf.mxu0  ;;  %v10574_v35 = vpop.f32.mrf.mxu1 }
 0x3f7   : > { %7215 = vst.msk [vmem:[%s11408_s12 + $0x308] sm:$0xf] %vm7020_vm4, %v9153_v30  ;;  %v4809_v36 = vmax.f32 %v3468_v31, 0.0  ;;  %7457 = vst.msk [vmem:[%s11408_s12 + $0x6d0] sm:$0xf] %vm7020_vm4, %v9395_v32  ;;  %v5051_v37 = vmax.f32 %v4436_v33, 0.0 }
 0x3f8   : > { %v3472_v38 = vpop.f32.mrf.mxu0  ;;  %v4440_v39 = vpop.f32.mrf.mxu1 }
 0x3f9   : > { %v9154_v40 = vpack.c.bf16 %v4809_v36, %v4809_v36  ;;  %v3473_v41 = vadd.f32 %v13139_v21, %v3472_v38  ;;  %v9396_v42 = vpack.c.bf16 %v5051_v37, %v5051_v37  ;;  %v4441_v43 = vadd.f32 %v13139_v21, %v4440_v39 }
 0x3fa   : > { %v10093_v44 = vpop.f32.mrf.mxu0  ;;  %v10577_v45 = vpop.f32.mrf.mxu1 }
 0x3fb   : > { %7216 = vst.msk [vmem:[%s11408_s12 + $0x30c] sm:$0xf] %vm7020_vm4, %v9154_v40  ;;  %v4810_v46 = vmax.f32 %v3473_v41, 0.0  ;;  %7458 = vst.msk [vmem:[%s11408_s12 + $0x6d4] sm:$0xf] %vm7020_vm4, %v9396_v42  ;;  %v5052_v47 = vmax.f32 %v4441_v43, 0.0 }
 0x3fc   : > { %v3475_v48 = vpop.f32.mrf.mxu0  ;;  %v4443_v49 = vpop.f32.mrf.mxu1 }
 0x3fd   : > { %v9155_v50 = vpack.c.bf16 %v4810_v46, %v4810_v46  ;;  %v3476_v51 = vadd.f32 %v13139_v21, %v3475_v48  ;;  %v9397_v52 = vpack.c.bf16 %v5052_v47, %v5052_v47  ;;  %v4444_v53 = vadd.f32 %v13139_v21, %v4443_v49 }
 0x3fe   : > { %v10094_v54 = vpop.f32.mrf.mxu0  ;;  %v10578_v55 = vpop.f32.mrf.mxu1 }
 0x3ff   : > { %7217 = vst.msk [vmem:[%s11408_s12 + $0x310] sm:$0xf] %vm7020_vm4, %v9155_v50  ;;  %v4811_v56 = vmax.f32 %v3476_v51, 0.0  ;;  %7459 = vst.msk [vmem:[%s11408_s12 + $0x6d8] sm:$0xf] %vm7020_vm4, %v9397_v52  ;;  %v5053_v0 = vmax.f32 %v4444_v53, 0.0 }
 0x400   : > { %v3480_v57 = vpop.f32.mrf.mxu0  ;;  %v4448_v58 = vpop.f32.mrf.mxu1 }
 0x401   : > { %v9156_v59 = vpack.c.bf16 %v4811_v56, %v4811_v56  ;;  %v3481_v61 = vadd.f32 %v13139_v21, %v3480_v57  ;;  %v9398_v62 = vpack.c.bf16 %v5053_v0, %v5053_v0  ;;  %v4449_v63 = vadd.f32 %v13139_v21, %v4448_v58 }
 0x402   : > { %v10097_v1 = vpop.f32.mrf.mxu0  ;;  %v10581_v2 = vpop.f32.mrf.mxu1 }
 0x403   : > { %7218 = vst.msk [vmem:[%s11408_s12 + $0x314] sm:$0xf] %vm7020_vm4, %v9156_v59  ;;  %v4812_v3 = vmax.f32 %v3481_v61, 0.0  ;;  %7460 = vst.msk [vmem:[%s11408_s12 + $0x6dc] sm:$0xf] %vm7020_vm4, %v9398_v62  ;;  %v5054_v4 = vmax.f32 %v4449_v63, 0.0 }
 0x404   : > { %v3483_v6 = vpop.f32.mrf.mxu0  ;;  %v4451_v7 = vpop.f32.mrf.mxu1 }
 0x405   : > { %v9157_v8 = vpack.c.bf16 %v4812_v3, %v4812_v3  ;;  %v3484_v60 = vadd.f32 %v13139_v21, %v3483_v6  ;;  %v9399_v9 = vpack.c.bf16 %v5054_v4, %v5054_v4  ;;  %v4452_v10 = vadd.f32 %v13139_v21, %v4451_v7 }
 0x406   : > { %v10098_v11 = vpop.f32.mrf.mxu0  ;;  %v10582_v12 = vpop.f32.mrf.mxu1 }
 0x407   : > { %7219 = vst.msk [vmem:[%s11408_s12 + $0x318] sm:$0xf] %vm7020_vm4, %v9157_v8  ;;  %v4813_v13 = vmax.f32 %v3484_v60, 0.0  ;;  %7461 = vst.msk [vmem:[%s11408_s12 + $0x6e0] sm:$0xf] %vm7020_vm4, %v9399_v9  ;;  %v5055_v14 = vmax.f32 %v4452_v10, 0.0 }
 0x408   : > { %v3488_v5 = vpop.f32.mrf.mxu0  ;;  %v4456_v15 = vpop.f32.mrf.mxu1 }
 0x409   : > { %v9158_v17 = vpack.c.bf16 %v4813_v13, %v4813_v13  ;;  %v3489_v18 = vadd.f32 %v13139_v21, %v3488_v5  ;;  %v9400_v19 = vpack.c.bf16 %v5055_v14, %v5055_v14  ;;  %v4457_v20 = vadd.f32 %v13139_v21, %v4456_v15 }
 0x40a   : > { %v10101_v22 = vpop.f32.mrf.mxu0  ;;  %v10585_v23 = vpop.f32.mrf.mxu1 }
 0x40b   : > { %7220 = vst.msk [vmem:[%s11408_s12 + $0x31c] sm:$0xf] %vm7020_vm4, %v9158_v17  ;;  %v4814_v24 = vmax.f32 %v3489_v18, 0.0  ;;  %7462 = vst.msk [vmem:[%s11408_s12 + $0x6e4] sm:$0xf] %vm7020_vm4, %v9400_v19  ;;  %v5056_v25 = vmax.f32 %v4457_v20, 0.0 }
 0x40c   : > { %v3491_v26 = vpop.f32.mrf.mxu0  ;;  %v4459_v27 = vpop.f32.mrf.mxu1 }
 0x40d   : > { %v9159_v16 = vpack.c.bf16 %v4814_v24, %v4814_v24  ;;  %v3492_v28 = vadd.f32 %v13139_v21, %v3491_v26  ;;  %v9401_v29 = vpack.c.bf16 %v5056_v25, %v5056_v25  ;;  %v4460_v30 = vadd.f32 %v13139_v21, %v4459_v27 }
 0x40e   : > { %v10102_v31 = vpop.f32.mrf.mxu0  ;;  %v10586_v32 = vpop.f32.mrf.mxu1 }
 0x40f   : > { %7221 = vst.msk [vmem:[%s11408_s12 + $0x320] sm:$0xf] %vm7020_vm4, %v9159_v16  ;;  %v4815_v33 = vmax.f32 %v3492_v28, 0.0  ;;  %7463 = vst.msk [vmem:[%s11408_s12 + $0x6e8] sm:$0xf] %vm7020_vm4, %v9401_v29  ;;  %v5057_v34 = vmax.f32 %v4460_v30, 0.0 }
 0x410   : > { %v3496_v35 = vpop.f32.mrf.mxu0  ;;  %v4464_v36 = vpop.f32.mrf.mxu1 }
 0x411   : > { %v9160_v37 = vpack.c.bf16 %v4815_v33, %v4815_v33  ;;  %v3497_v38 = vadd.f32 %v13139_v21, %v3496_v35  ;;  %v9402_v39 = vpack.c.bf16 %v5057_v34, %v5057_v34  ;;  %v4465_v40 = vadd.f32 %v13139_v21, %v4464_v36 }
 0x412   : > { %v10105_v41 = vpop.f32.mrf.mxu0  ;;  %v10589_v42 = vpop.f32.mrf.mxu1 }
 0x413   : > { %7222 = vst.msk [vmem:[%s11408_s12 + $0x324] sm:$0xf] %vm7020_vm4, %v9160_v37  ;;  %v4816_v43 = vmax.f32 %v3497_v38, 0.0  ;;  %7464 = vst.msk [vmem:[%s11408_s12 + $0x6ec] sm:$0xf] %vm7020_vm4, %v9402_v39  ;;  %v5058_v44 = vmax.f32 %v4465_v40, 0.0 }
 0x414   : > { %v3499_v45 = vpop.f32.mrf.mxu0  ;;  %v4467_v46 = vpop.f32.mrf.mxu1 }
 0x415   : > { %v9161_v47 = vpack.c.bf16 %v4816_v43, %v4816_v43  ;;  %v3500_v48 = vadd.f32 %v13139_v21, %v3499_v45  ;;  %v9403_v49 = vpack.c.bf16 %v5058_v44, %v5058_v44  ;;  %v4468_v50 = vadd.f32 %v13139_v21, %v4467_v46 }
 0x416   : > { %v10106_v51 = vpop.f32.mrf.mxu0  ;;  %v10590_v52 = vpop.f32.mrf.mxu1 }
 0x417   : > { %7223 = vst.msk [vmem:[%s11408_s12 + $0x328] sm:$0xf] %vm7020_vm4, %v9161_v47  ;;  %v4817_v53 = vmax.f32 %v3500_v48, 0.0  ;;  %7465 = vst.msk [vmem:[%s11408_s12 + $0x6f0] sm:$0xf] %vm7020_vm4, %v9403_v49  ;;  %v5059_v54 = vmax.f32 %v4468_v50, 0.0 }
 0x418   : > { %v3504_v55 = vpop.f32.mrf.mxu0  ;;  %v4472_v56 = vpop.f32.mrf.mxu1 }
 0x419   : > { %v9162_v0 = vpack.c.bf16 %v4817_v53, %v4817_v53  ;;  %v3505_v57 = vadd.f32 %v13139_v21, %v3504_v55  ;;  %v9404_v58 = vpack.c.bf16 %v5059_v54, %v5059_v54  ;;  %v4473_v59 = vadd.f32 %v13139_v21, %v4472_v56  ;;  %v13448_v55 = vld [vmem:[%s13838_s2] ss:$0 sm:$0xff] }
 0x41a   : > { %v10109_v61 = vpop.f32.mrf.mxu0  ;;  %v10593_v62 = vpop.f32.mrf.mxu1 }
 0x41b   : > { %7224 = vst.msk [vmem:[%s11408_s12 + $0x32c] sm:$0xf] %vm7020_vm4, %v9162_v0  ;;  %v4818_v63 = vmax.f32 %v3505_v57, 0.0  ;;  %7466 = vst.msk [vmem:[%s11408_s12 + $0x6f4] sm:$0xf] %vm7020_vm4, %v9404_v58  ;;  %v5060_v1 = vmax.f32 %v4473_v59, 0.0 }
 0x41c   : > { %v3507_v2 = vpop.f32.mrf.mxu0  ;;  %v4475_v3 = vpop.f32.mrf.mxu1 }
 0x41d   : > { %v9163_v4 = vpack.c.bf16 %v4818_v63, %v4818_v63  ;;  %v3508_v6 = vadd.f32 %v13139_v21, %v3507_v2  ;;  %v9405_v7 = vpack.c.bf16 %v5060_v1, %v5060_v1  ;;  %v4476_v8 = vadd.f32 %v13139_v21, %v4475_v3 }
 0x41e   : > { %v10110_v60 = vpop.f32.mrf.mxu0  ;;  %v10594_v9 = vpop.f32.mrf.mxu1 }
 0x41f   : > { %7225 = vst.msk [vmem:[%s11408_s12 + $0x330] sm:$0xf] %vm7020_vm4, %v9163_v4  ;;  %v4819_v10 = vmax.f32 %v3508_v6, 0.0  ;;  %7467 = vst.msk [vmem:[%s11408_s12 + $0x6f8] sm:$0xf] %vm7020_vm4, %v9405_v7  ;;  %v5061_v11 = vmax.f32 %v4476_v8, 0.0 }
 0x420   : > { %v3512_v12 = vpop.f32.mrf.mxu0  ;;  %v4480_v13 = vpop.f32.mrf.mxu1 }
 0x421   : > { %v9164_v14 = vpack.c.bf16 %v4819_v10, %v4819_v10  ;;  %v3513_v5 = vadd.f32 %v13139_v21, %v3512_v12  ;;  %v9406_v15 = vpack.c.bf16 %v5061_v11, %v5061_v11  ;;  %v4481_v17 = vadd.f32 %v13139_v21, %v4480_v13 }
 0x422   : > { %v10113_v18 = vpop.f32.mrf.mxu0  ;;  %v10597_v19 = vpop.f32.mrf.mxu1 }
 0x423   : > { %7226 = vst.msk [vmem:[%s11408_s12 + $0x334] sm:$0xf] %vm7020_vm4, %v9164_v14  ;;  %v4820_v20 = vmax.f32 %v3513_v5, 0.0  ;;  %7468 = vst.msk [vmem:[%s11408_s12 + $0x6fc] sm:$0xf] %vm7020_vm4, %v9406_v15  ;;  %v5062_v22 = vmax.f32 %v4481_v17, 0.0 }
 0x424   : > { %v3515_v23 = vpop.f32.mrf.mxu0  ;;  %v4483_v24 = vpop.f32.mrf.mxu1 }
 0x425   : > { %v9165_v25 = vpack.c.bf16 %v4820_v20, %v4820_v20  ;;  %v3516_v26 = vadd.f32 %v13139_v21, %v3515_v23  ;;  %v9407_v27 = vpack.c.bf16 %v5062_v22, %v5062_v22  ;;  %v4484_v16 = vadd.f32 %v13139_v21, %v4483_v24 }
 0x426   : > { %v10114_v28 = vpop.f32.mrf.mxu0  ;;  %v10598_v29 = vpop.f32.mrf.mxu1 }
 0x427   : > { %7227 = vst.msk [vmem:[%s11408_s12 + $0x338] sm:$0xf] %vm7020_vm4, %v9165_v25  ;;  %v4821_v30 = vmax.f32 %v3516_v26, 0.0  ;;  %7469 = vst.msk [vmem:[%s11408_s12 + $0x700] sm:$0xf] %vm7020_vm4, %v9407_v27  ;;  %v5063_v31 = vmax.f32 %v4484_v16, 0.0 }
 0x428   : > { %v3520_v32 = vpop.f32.mrf.mxu0  ;;  %v4488_v33 = vpop.f32.mrf.mxu1 }
 0x429   : > { %v9166_v34 = vpack.c.bf16 %v4821_v30, %v4821_v30  ;;  %v3521_v35 = vadd.f32 %v13139_v21, %v3520_v32  ;;  %v9408_v36 = vpack.c.bf16 %v5063_v31, %v5063_v31  ;;  %v4489_v37 = vadd.f32 %v13139_v21, %v4488_v33 }
 0x42a   : > { %v10117_v38 = vpop.f32.mrf.mxu0  ;;  %v10601_v39 = vpop.f32.mrf.mxu1 }
 0x42b   : > { %7228 = vst.msk [vmem:[%s11408_s12 + $0x33c] sm:$0xf] %vm7020_vm4, %v9166_v34  ;;  %v4822_v40 = vmax.f32 %v3521_v35, 0.0  ;;  %7470 = vst.msk [vmem:[%s11408_s12 + $0x704] sm:$0xf] %vm7020_vm4, %v9408_v36  ;;  %v5064_v41 = vmax.f32 %v4489_v37, 0.0 }
 0x42c   : > { %v3523_v42 = vpop.f32.mrf.mxu0  ;;  %v4491_v43 = vpop.f32.mrf.mxu1 }
 0x42d   : > { %v9167_v44 = vpack.c.bf16 %v4822_v40, %v4822_v40  ;;  %v3524_v45 = vadd.f32 %v13139_v21, %v3523_v42  ;;  %v9409_v46 = vpack.c.bf16 %v5064_v41, %v5064_v41  ;;  %v4492_v47 = vadd.f32 %v13139_v21, %v4491_v43 }
 0x42e   : > { %v10118_v48 = vpop.f32.mrf.mxu0  ;;  %v10602_v49 = vpop.f32.mrf.mxu1 }
 0x42f   : > { %7229 = vst.msk [vmem:[%s11408_s12 + $0x340] sm:$0xf] %vm7020_vm4, %v9167_v44  ;;  %v4823_v50 = vmax.f32 %v3524_v45, 0.0  ;;  %7471 = vst.msk [vmem:[%s11408_s12 + $0x708] sm:$0xf] %vm7020_vm4, %v9409_v46  ;;  %v5065_v51 = vmax.f32 %v4492_v47, 0.0 }
 0x430   : > { %v3528_v52 = vpop.f32.mrf.mxu0  ;;  %v4496_v53 = vpop.f32.mrf.mxu1 }
 0x431   : > { %v9168_v54 = vpack.c.bf16 %v4823_v50, %v4823_v50  ;;  %v3529_v21 = vadd.f32 %v13448_v55, %v3528_v52  ;;  %v9410_v56 = vpack.c.bf16 %v5065_v51, %v5065_v51  ;;  %v4497_v0 = vadd.f32 %v13448_v55, %v4496_v53 }
 0x432   : > { %v10121_v57 = vpop.f32.mrf.mxu0  ;;  %v10605_v58 = vpop.f32.mrf.mxu1 }
 0x433   : > { %7230 = vst.msk [vmem:[%s11408_s12 + $0x344] sm:$0xf] %vm7020_vm4, %v9168_v54  ;;  %v4824_v59 = vmax.f32 %v3529_v21, 0.0  ;;  %7472 = vst.msk [vmem:[%s11408_s12 + $0x70c] sm:$0xf] %vm7020_vm4, %v9410_v56  ;;  %v5066_v61 = vmax.f32 %v4497_v0, 0.0 }
 0x434   : > { %v3531_v62 = vpop.f32.mrf.mxu0  ;;  %v4499_v63 = vpop.f32.mrf.mxu1 }
 0x435   : > { %v9169_v1 = vpack.c.bf16 %v4824_v59, %v4824_v59  ;;  %v3532_v2 = vadd.f32 %v13448_v55, %v3531_v62  ;;  %v9411_v3 = vpack.c.bf16 %v5066_v61, %v5066_v61  ;;  %v4500_v4 = vadd.f32 %v13448_v55, %v4499_v63 }
 0x436   : > { %v10122_v6 = vpop.f32.mrf.mxu0  ;;  %v10606_v7 = vpop.f32.mrf.mxu1 }
 0x437   : > { %7231 = vst.msk [vmem:[%s11408_s12 + $0x348] sm:$0xf] %vm7020_vm4, %v9169_v1  ;;  %v4825_v8 = vmax.f32 %v3532_v2, 0.0  ;;  %7473 = vst.msk [vmem:[%s11408_s12 + $0x710] sm:$0xf] %vm7020_vm4, %v9411_v3  ;;  %v5067_v60 = vmax.f32 %v4500_v4, 0.0 }
 0x438   : > { %v3536_v9 = vpop.f32.mrf.mxu0  ;;  %v4504_v10 = vpop.f32.mrf.mxu1 }
 0x439   : > { %v9170_v11 = vpack.c.bf16 %v4825_v8, %v4825_v8  ;;  %v3537_v12 = vadd.f32 %v13448_v55, %v3536_v9  ;;  %v9412_v13 = vpack.c.bf16 %v5067_v60, %v5067_v60  ;;  %v4505_v14 = vadd.f32 %v13448_v55, %v4504_v10 }
 0x43a   : > { %v10125_v5 = vpop.f32.mrf.mxu0  ;;  %v10609_v15 = vpop.f32.mrf.mxu1 }
 0x43b   : > { %7232 = vst.msk [vmem:[%s11408_s12 + $0x34c] sm:$0xf] %vm7020_vm4, %v9170_v11  ;;  %v4826_v17 = vmax.f32 %v3537_v12, 0.0  ;;  %7474 = vst.msk [vmem:[%s11408_s12 + $0x714] sm:$0xf] %vm7020_vm4, %v9412_v13  ;;  %v5068_v18 = vmax.f32 %v4505_v14, 0.0 }
 0x43c   : > { %v3539_v19 = vpop.f32.mrf.mxu0  ;;  %v4507_v20 = vpop.f32.mrf.mxu1 }
 0x43d   : > { %v9171_v22 = vpack.c.bf16 %v4826_v17, %v4826_v17  ;;  %v3540_v23 = vadd.f32 %v13448_v55, %v3539_v19  ;;  %v9413_v24 = vpack.c.bf16 %v5068_v18, %v5068_v18  ;;  %v4508_v25 = vadd.f32 %v13448_v55, %v4507_v20 }
 0x43e   : > { %v10126_v26 = vpop.f32.mrf.mxu0  ;;  %v10610_v27 = vpop.f32.mrf.mxu1 }
 0x43f   : > { %7233 = vst.msk [vmem:[%s11408_s12 + $0x350] sm:$0xf] %vm7020_vm4, %v9171_v22  ;;  %v4827_v16 = vmax.f32 %v3540_v23, 0.0  ;;  %7475 = vst.msk [vmem:[%s11408_s12 + $0x718] sm:$0xf] %vm7020_vm4, %v9413_v24  ;;  %v5069_v28 = vmax.f32 %v4508_v25, 0.0 }
 0x440   : > { %v3544_v29 = vpop.f32.mrf.mxu0  ;;  %v4512_v30 = vpop.f32.mrf.mxu1 }
 0x441   : > { %v9172_v31 = vpack.c.bf16 %v4827_v16, %v4827_v16  ;;  %v3545_v32 = vadd.f32 %v13448_v55, %v3544_v29  ;;  %v9414_v33 = vpack.c.bf16 %v5069_v28, %v5069_v28  ;;  %v4513_v34 = vadd.f32 %v13448_v55, %v4512_v30 }
 0x442   : > { %v10129_v35 = vpop.f32.mrf.mxu0  ;;  %v10613_v36 = vpop.f32.mrf.mxu1 }
 0x443   : > { %7234 = vst.msk [vmem:[%s11408_s12 + $0x354] sm:$0xf] %vm7020_vm4, %v9172_v31  ;;  %v4828_v37 = vmax.f32 %v3545_v32, 0.0  ;;  %7476 = vst.msk [vmem:[%s11408_s12 + $0x71c] sm:$0xf] %vm7020_vm4, %v9414_v33  ;;  %v5070_v38 = vmax.f32 %v4513_v34, 0.0 }
 0x444   : > { %v3547_v39 = vpop.f32.mrf.mxu0  ;;  %v4515_v40 = vpop.f32.mrf.mxu1 }
 0x445   : > { %v9173_v41 = vpack.c.bf16 %v4828_v37, %v4828_v37  ;;  %v3548_v42 = vadd.f32 %v13448_v55, %v3547_v39  ;;  %v9415_v43 = vpack.c.bf16 %v5070_v38, %v5070_v38  ;;  %v4516_v44 = vadd.f32 %v13448_v55, %v4515_v40 }
 0x446   : > { %v10130_v45 = vpop.f32.mrf.mxu0  ;;  %v10614_v46 = vpop.f32.mrf.mxu1 }
 0x447   : > { %7235 = vst.msk [vmem:[%s11408_s12 + $0x358] sm:$0xf] %vm7020_vm4, %v9173_v41  ;;  %v4829_v47 = vmax.f32 %v3548_v42, 0.0  ;;  %7477 = vst.msk [vmem:[%s11408_s12 + $0x720] sm:$0xf] %vm7020_vm4, %v9415_v43  ;;  %v5071_v48 = vmax.f32 %v4516_v44, 0.0 }
 0x448   : > { %v3552_v49 = vpop.f32.mrf.mxu0  ;;  %v4520_v50 = vpop.f32.mrf.mxu1 }
 0x449   : > { %v9174_v51 = vpack.c.bf16 %v4829_v47, %v4829_v47  ;;  %v3553_v52 = vadd.f32 %v13448_v55, %v3552_v49  ;;  %v9416_v53 = vpack.c.bf16 %v5071_v48, %v5071_v48  ;;  %v4521_v54 = vadd.f32 %v13448_v55, %v4520_v50 }
 0x44a   : > { %v10133_v21 = vpop.f32.mrf.mxu0  ;;  %v10617_v56 = vpop.f32.mrf.mxu1 }
 0x44b   : > { %7236 = vst.msk [vmem:[%s11408_s12 + $0x35c] sm:$0xf] %vm7020_vm4, %v9174_v51  ;;  %v4830_v0 = vmax.f32 %v3553_v52, 0.0  ;;  %7478 = vst.msk [vmem:[%s11408_s12 + $0x724] sm:$0xf] %vm7020_vm4, %v9416_v53  ;;  %v5072_v57 = vmax.f32 %v4521_v54, 0.0 }
 0x44c   : > { %v3555_v58 = vpop.f32.mrf.mxu0  ;;  %v4523_v59 = vpop.f32.mrf.mxu1 }
 0x44d   : > { %v9175_v61 = vpack.c.bf16 %v4830_v0, %v4830_v0  ;;  %v3556_v62 = vadd.f32 %v13448_v55, %v3555_v58  ;;  %v9417_v63 = vpack.c.bf16 %v5072_v57, %v5072_v57  ;;  %v4524_v1 = vadd.f32 %v13448_v55, %v4523_v59 }
 0x44e   : > { %v10134_v2 = vpop.f32.mrf.mxu0  ;;  %v10618_v3 = vpop.f32.mrf.mxu1 }
 0x44f   : > { %7237 = vst.msk [vmem:[%s11408_s12 + $0x360] sm:$0xf] %vm7020_vm4, %v9175_v61  ;;  %v4831_v4 = vmax.f32 %v3556_v62, 0.0  ;;  %7479 = vst.msk [vmem:[%s11408_s12 + $0x728] sm:$0xf] %vm7020_vm4, %v9417_v63  ;;  %v5073_v6 = vmax.f32 %v4524_v1, 0.0 }
 0x450   : > { %v3560_v7 = vpop.f32.mrf.mxu0  ;;  %v4528_v8 = vpop.f32.mrf.mxu1 }
 0x451   : > { %v9176_v60 = vpack.c.bf16 %v4831_v4, %v4831_v4  ;;  %v3561_v9 = vadd.f32 %v13448_v55, %v3560_v7  ;;  %v9418_v10 = vpack.c.bf16 %v5073_v6, %v5073_v6  ;;  %v4529_v11 = vadd.f32 %v13448_v55, %v4528_v8 }
 0x452   : > { %v10137_v12 = vpop.f32.mrf.mxu0  ;;  %v10621_v13 = vpop.f32.mrf.mxu1 }
 0x453   : > { %7238 = vst.msk [vmem:[%s11408_s12 + $0x364] sm:$0xf] %vm7020_vm4, %v9176_v60  ;;  %v4832_v14 = vmax.f32 %v3561_v9, 0.0  ;;  %7480 = vst.msk [vmem:[%s11408_s12 + $0x72c] sm:$0xf] %vm7020_vm4, %v9418_v10  ;;  %v5074_v5 = vmax.f32 %v4529_v11, 0.0 }
 0x454   : > { %v3563_v15 = vpop.f32.mrf.mxu0  ;;  %v4531_v17 = vpop.f32.mrf.mxu1 }
 0x455   : > { %v9177_v18 = vpack.c.bf16 %v4832_v14, %v4832_v14  ;;  %v3564_v19 = vadd.f32 %v13448_v55, %v3563_v15  ;;  %v9419_v20 = vpack.c.bf16 %v5074_v5, %v5074_v5  ;;  %v4532_v22 = vadd.f32 %v13448_v55, %v4531_v17 }
 0x456   : > { %v10138_v23 = vpop.f32.mrf.mxu0  ;;  %v10622_v24 = vpop.f32.mrf.mxu1 }
 0x457   : > { %7239 = vst.msk [vmem:[%s11408_s12 + $0x368] sm:$0xf] %vm7020_vm4, %v9177_v18  ;;  %v4833_v25 = vmax.f32 %v3564_v19, 0.0  ;;  %7481 = vst.msk [vmem:[%s11408_s12 + $0x730] sm:$0xf] %vm7020_vm4, %v9419_v20  ;;  %v5075_v26 = vmax.f32 %v4532_v22, 0.0 }
 0x458   : > { %v3568_v27 = vpop.f32.mrf.mxu0  ;;  %v4536_v16 = vpop.f32.mrf.mxu1 }
 0x459   : > { %v9178_v28 = vpack.c.bf16 %v4833_v25, %v4833_v25  ;;  %v3569_v29 = vadd.f32 %v13448_v55, %v3568_v27  ;;  %v9420_v30 = vpack.c.bf16 %v5075_v26, %v5075_v26  ;;  %v4537_v31 = vadd.f32 %v13448_v55, %v4536_v16 }
 0x45a   : > { %v10141_v32 = vpop.f32.mrf.mxu0  ;;  %v10625_v33 = vpop.f32.mrf.mxu1 }
 0x45b   : > { %7240 = vst.msk [vmem:[%s11408_s12 + $0x36c] sm:$0xf] %vm7020_vm4, %v9178_v28  ;;  %v4834_v34 = vmax.f32 %v3569_v29, 0.0  ;;  %7482 = vst.msk [vmem:[%s11408_s12 + $0x734] sm:$0xf] %vm7020_vm4, %v9420_v30  ;;  %v5076_v35 = vmax.f32 %v4537_v31, 0.0 }
 0x45c   : > { %v3571_v36 = vpop.f32.mrf.mxu0  ;;  %v4539_v37 = vpop.f32.mrf.mxu1 }
 0x45d   : > { %v9179_v38 = vpack.c.bf16 %v4834_v34, %v4834_v34  ;;  %v3572_v39 = vadd.f32 %v13448_v55, %v3571_v36  ;;  %v9421_v40 = vpack.c.bf16 %v5076_v35, %v5076_v35  ;;  %v4540_v41 = vadd.f32 %v13448_v55, %v4539_v37 }
 0x45e   : > { %v10142_v42 = vpop.f32.mrf.mxu0  ;;  %v10626_v43 = vpop.f32.mrf.mxu1 }
 0x45f   : > { %7241 = vst.msk [vmem:[%s11408_s12 + $0x370] sm:$0xf] %vm7020_vm4, %v9179_v38  ;;  %v4835_v44 = vmax.f32 %v3572_v39, 0.0  ;;  %7483 = vst.msk [vmem:[%s11408_s12 + $0x738] sm:$0xf] %vm7020_vm4, %v9421_v40  ;;  %v5077_v45 = vmax.f32 %v4540_v41, 0.0 }
 0x460   : > { %v3576_v46 = vpop.f32.mrf.mxu0  ;;  %v4544_v47 = vpop.f32.mrf.mxu1 }
 0x461   : > { %v9180_v48 = vpack.c.bf16 %v4835_v44, %v4835_v44  ;;  %v3577_v49 = vadd.f32 %v13448_v55, %v3576_v46  ;;  %v9422_v50 = vpack.c.bf16 %v5077_v45, %v5077_v45  ;;  %v4545_v51 = vadd.f32 %v13448_v55, %v4544_v47 }
 0x462   : > { %v10145_v52 = vpop.f32.mrf.mxu0  ;;  %v10629_v53 = vpop.f32.mrf.mxu1 }
 0x463   : > { %7242 = vst.msk [vmem:[%s11408_s12 + $0x374] sm:$0xf] %vm7020_vm4, %v9180_v48  ;;  %v4836_v54 = vmax.f32 %v3577_v49, 0.0  ;;  %7484 = vst.msk [vmem:[%s11408_s12 + $0x73c] sm:$0xf] %vm7020_vm4, %v9422_v50  ;;  %v5078_v21 = vmax.f32 %v4545_v51, 0.0 }
 0x464   : > { %v3579_v56 = vpop.f32.mrf.mxu0  ;;  %v4547_v0 = vpop.f32.mrf.mxu1 }
 0x465   : > { %v9181_v57 = vpack.c.bf16 %v4836_v54, %v4836_v54  ;;  %v3580_v58 = vadd.f32 %v13448_v55, %v3579_v56  ;;  %v9423_v59 = vpack.c.bf16 %v5078_v21, %v5078_v21  ;;  %v4548_v61 = vadd.f32 %v13448_v55, %v4547_v0 }
 0x466   : > { %v10146_v62 = vpop.f32.mrf.mxu0  ;;  %v10630_v63 = vpop.f32.mrf.mxu1 }
 0x467   : > { %7243 = vst.msk [vmem:[%s11408_s12 + $0x378] sm:$0xf] %vm7020_vm4, %v9181_v57  ;;  %v4837_v1 = vmax.f32 %v3580_v58, 0.0  ;;  %7485 = vst.msk [vmem:[%s11408_s12 + $0x740] sm:$0xf] %vm7020_vm4, %v9423_v59  ;;  %v5079_v2 = vmax.f32 %v4548_v61, 0.0 }
 0x468   : > { %v3584_v3 = vpop.f32.mrf.mxu0  ;;  %v4552_v4 = vpop.f32.mrf.mxu1 }
 0x469   : > { %v9182_v6 = vpack.c.bf16 %v4837_v1, %v4837_v1  ;;  %v3585_v7 = vadd.f32 %v13448_v55, %v3584_v3  ;;  %v9424_v8 = vpack.c.bf16 %v5079_v2, %v5079_v2  ;;  %v4553_v60 = vadd.f32 %v13448_v55, %v4552_v4 }
 0x46a   : > { %v10149_v9 = vpop.f32.mrf.mxu0  ;;  %v10633_v10 = vpop.f32.mrf.mxu1 }
 0x46b   : > { %7244 = vst.msk [vmem:[%s11408_s12 + $0x37c] sm:$0xf] %vm7020_vm4, %v9182_v6  ;;  %v4838_v11 = vmax.f32 %v3585_v7, 0.0  ;;  %7486 = vst.msk [vmem:[%s11408_s12 + $0x744] sm:$0xf] %vm7020_vm4, %v9424_v8  ;;  %v5080_v12 = vmax.f32 %v4553_v60, 0.0 }
 0x46c   : > { %v3587_v13 = vpop.f32.mrf.mxu0  ;;  %v4555_v14 = vpop.f32.mrf.mxu1 }
 0x46d   : > { %v9183_v5 = vpack.c.bf16 %v4838_v11, %v4838_v11  ;;  %v3588_v15 = vadd.f32 %v13448_v55, %v3587_v13  ;;  %v9425_v17 = vpack.c.bf16 %v5080_v12, %v5080_v12  ;;  %v4556_v18 = vadd.f32 %v13448_v55, %v4555_v14 }
 0x46e   : > { %v10150_v19 = vpop.f32.mrf.mxu0  ;;  %v10634_v20 = vpop.f32.mrf.mxu1 }
 0x46f   : > { %7245 = vst.msk [vmem:[%s11408_s12 + $0x380] sm:$0xf] %vm7020_vm4, %v9183_v5  ;;  %v4839_v22 = vmax.f32 %v3588_v15, 0.0  ;;  %7487 = vst.msk [vmem:[%s11408_s12 + $0x748] sm:$0xf] %vm7020_vm4, %v9425_v17  ;;  %v5081_v23 = vmax.f32 %v4556_v18, 0.0 }
 0x470   : > { %v3592_v24 = vpop.f32.mrf.mxu0  ;;  %v4560_v25 = vpop.f32.mrf.mxu1 }
 0x471   : > { %v9184_v26 = vpack.c.bf16 %v4839_v22, %v4839_v22  ;;  %v3593_v27 = vadd.f32 %v13448_v55, %v3592_v24  ;;  %v9426_v16 = vpack.c.bf16 %v5081_v23, %v5081_v23  ;;  %v4561_v28 = vadd.f32 %v13448_v55, %v4560_v25 }
 0x472   : > { %v10153_v29 = vpop.f32.mrf.mxu0  ;;  %v10637_v30 = vpop.f32.mrf.mxu1 }
 0x473   : > { %7246 = vst.msk [vmem:[%s11408_s12 + $0x384] sm:$0xf] %vm7020_vm4, %v9184_v26  ;;  %v4840_v31 = vmax.f32 %v3593_v27, 0.0  ;;  %7488 = vst.msk [vmem:[%s11408_s12 + $0x74c] sm:$0xf] %vm7020_vm4, %v9426_v16  ;;  %v5082_v32 = vmax.f32 %v4561_v28, 0.0 }
 0x474   : > { %v3595_v33 = vpop.f32.mrf.mxu0  ;;  %v4563_v34 = vpop.f32.mrf.mxu1 }
 0x475   : > { %v9185_v35 = vpack.c.bf16 %v4840_v31, %v4840_v31  ;;  %v3596_v36 = vadd.f32 %v13448_v55, %v3595_v33  ;;  %v9427_v37 = vpack.c.bf16 %v5082_v32, %v5082_v32  ;;  %v4564_v38 = vadd.f32 %v13448_v55, %v4563_v34 }
 0x476   : > { %v10154_v39 = vpop.f32.mrf.mxu0  ;;  %v10638_v40 = vpop.f32.mrf.mxu1 }
 0x477   : > { %7247 = vst.msk [vmem:[%s11408_s12 + $0x388] sm:$0xf] %vm7020_vm4, %v9185_v35  ;;  %v4841_v41 = vmax.f32 %v3596_v36, 0.0  ;;  %7489 = vst.msk [vmem:[%s11408_s12 + $0x750] sm:$0xf] %vm7020_vm4, %v9427_v37  ;;  %v5083_v42 = vmax.f32 %v4564_v38, 0.0 }
 0x478   : > { %v3600_v43 = vpop.f32.mrf.mxu0  ;;  %v4568_v44 = vpop.f32.mrf.mxu1 }
 0x479   : > { %v9186_v45 = vpack.c.bf16 %v4841_v41, %v4841_v41  ;;  %v3601_v46 = vadd.f32 %v13448_v55, %v3600_v43  ;;  %v9428_v47 = vpack.c.bf16 %v5083_v42, %v5083_v42  ;;  %v4569_v48 = vadd.f32 %v13448_v55, %v4568_v44 }
 0x47a   : > { %v10157_v49 = vpop.f32.mrf.mxu0  ;;  %v10641_v50 = vpop.f32.mrf.mxu1 }
 0x47b   : > { %7248 = vst.msk [vmem:[%s11408_s12 + $0x38c] sm:$0xf] %vm7020_vm4, %v9186_v45  ;;  %v4842_v51 = vmax.f32 %v3601_v46, 0.0  ;;  %7490 = vst.msk [vmem:[%s11408_s12 + $0x754] sm:$0xf] %vm7020_vm4, %v9428_v47  ;;  %v5084_v52 = vmax.f32 %v4569_v48, 0.0 }
 0x47c   : > { %v3603_v53 = vpop.f32.mrf.mxu0  ;;  %v4571_v54 = vpop.f32.mrf.mxu1 }
 0x47d   : > { %v9187_v21 = vpack.c.bf16 %v4842_v51, %v4842_v51  ;;  %v3604_v56 = vadd.f32 %v13448_v55, %v3603_v53  ;;  %v9429_v0 = vpack.c.bf16 %v5084_v52, %v5084_v52  ;;  %v4572_v57 = vadd.f32 %v13448_v55, %v4571_v54 }
 0x47e   : > { %v10158_v58 = vpop.f32.mrf.mxu0  ;;  %v10642_v59 = vpop.f32.mrf.mxu1 }
 0x47f   : > { %7249 = vst.msk [vmem:[%s11408_s12 + $0x390] sm:$0xf] %vm7020_vm4, %v9187_v21  ;;  %v4843_v61 = vmax.f32 %v3604_v56, 0.0  ;;  %7491 = vst.msk [vmem:[%s11408_s12 + $0x758] sm:$0xf] %vm7020_vm4, %v9429_v0  ;;  %v5085_v62 = vmax.f32 %v4572_v57, 0.0 }
 0x480   : > { %v3608_v63 = vpop.f32.mrf.mxu0  ;;  %v4576_v1 = vpop.f32.mrf.mxu1 }
 0x481   : > { %v9188_v2 = vpack.c.bf16 %v4843_v61, %v4843_v61  ;;  %v3609_v3 = vadd.f32 %v13448_v55, %v3608_v63  ;;  %v9430_v4 = vpack.c.bf16 %v5085_v62, %v5085_v62  ;;  %v4577_v6 = vadd.f32 %v13448_v55, %v4576_v1 }
 0x482   : > { %v10161_v7 = vpop.f32.mrf.mxu0  ;;  %v10645_v8 = vpop.f32.mrf.mxu1 }
 0x483   : > { %7250 = vst.msk [vmem:[%s11408_s12 + $0x394] sm:$0xf] %vm7020_vm4, %v9188_v2  ;;  %v4844_v60 = vmax.f32 %v3609_v3, 0.0  ;;  %7492 = vst.msk [vmem:[%s11408_s12 + $0x75c] sm:$0xf] %vm7020_vm4, %v9430_v4  ;;  %v5086_v9 = vmax.f32 %v4577_v6, 0.0 }
 0x484   : > { %v3611_v10 = vpop.f32.mrf.mxu0  ;;  %v4579_v11 = vpop.f32.mrf.mxu1 }
 0x485   : > { %v9189_v12 = vpack.c.bf16 %v4844_v60, %v4844_v60  ;;  %v3612_v13 = vadd.f32 %v13448_v55, %v3611_v10  ;;  %v9431_v14 = vpack.c.bf16 %v5086_v9, %v5086_v9  ;;  %v4580_v5 = vadd.f32 %v13448_v55, %v4579_v11 }
 0x486   : > { %v10162_v15 = vpop.f32.mrf.mxu0  ;;  %v10646_v17 = vpop.f32.mrf.mxu1 }
 0x487   : > { %7251 = vst.msk [vmem:[%s11408_s12 + $0x398] sm:$0xf] %vm7020_vm4, %v9189_v12  ;;  %v4845_v18 = vmax.f32 %v3612_v13, 0.0  ;;  %7493 = vst.msk [vmem:[%s11408_s12 + $0x760] sm:$0xf] %vm7020_vm4, %v9431_v14  ;;  %v5087_v19 = vmax.f32 %v4580_v5, 0.0 }
 0x488   : > { %v3616_v20 = vpop.f32.mrf.mxu0  ;;  %v4584_v22 = vpop.f32.mrf.mxu1 }
 0x489   : > { %v9190_v23 = vpack.c.bf16 %v4845_v18, %v4845_v18  ;;  %v3617_v24 = vadd.f32 %v13448_v55, %v3616_v20  ;;  %v9432_v25 = vpack.c.bf16 %v5087_v19, %v5087_v19  ;;  %v4585_v26 = vadd.f32 %v13448_v55, %v4584_v22 }
 0x48a   : > { %v10165_v27 = vpop.f32.mrf.mxu0  ;;  %v10649_v16 = vpop.f32.mrf.mxu1 }
 0x48b   : > { %7252 = vst.msk [vmem:[%s11408_s12 + $0x39c] sm:$0xf] %vm7020_vm4, %v9190_v23  ;;  %v4846_v28 = vmax.f32 %v3617_v24, 0.0  ;;  %7494 = vst.msk [vmem:[%s11408_s12 + $0x764] sm:$0xf] %vm7020_vm4, %v9432_v25  ;;  %v5088_v29 = vmax.f32 %v4585_v26, 0.0 }
 0x48c   : > { %v3619_v30 = vpop.f32.mrf.mxu0  ;;  %v4587_v31 = vpop.f32.mrf.mxu1 }
 0x48d   : > { %v9191_v32 = vpack.c.bf16 %v4846_v28, %v4846_v28  ;;  %v3620_v33 = vadd.f32 %v13448_v55, %v3619_v30  ;;  %v9433_v34 = vpack.c.bf16 %v5088_v29, %v5088_v29  ;;  %v4588_v35 = vadd.f32 %v13448_v55, %v4587_v31 }
 0x48e   : > { %v10166_v36 = vpop.f32.mrf.mxu0  ;;  %v10650_v37 = vpop.f32.mrf.mxu1 }
 0x48f   : > { %7253 = vst.msk [vmem:[%s11408_s12 + $0x3a0] sm:$0xf] %vm7020_vm4, %v9191_v32  ;;  %v4847_v38 = vmax.f32 %v3620_v33, 0.0  ;;  %7495 = vst.msk [vmem:[%s11408_s12 + $0x768] sm:$0xf] %vm7020_vm4, %v9433_v34  ;;  %v5089_v39 = vmax.f32 %v4588_v35, 0.0 }
 0x490   : > { %v3624_v40 = vpop.f32.mrf.mxu0  ;;  %v4592_v41 = vpop.f32.mrf.mxu1 }
 0x491   : > { %v9192_v42 = vpack.c.bf16 %v4847_v38, %v4847_v38  ;;  %v3625_v43 = vadd.f32 %v13448_v55, %v3624_v40  ;;  %v9434_v44 = vpack.c.bf16 %v5089_v39, %v5089_v39  ;;  %v4593_v45 = vadd.f32 %v13448_v55, %v4592_v41 }
 0x492   : > { %v10169_v46 = vpop.f32.mrf.mxu0  ;;  %v10653_v47 = vpop.f32.mrf.mxu1 }
 0x493   : > { %7254 = vst.msk [vmem:[%s11408_s12 + $0x3a4] sm:$0xf] %vm7020_vm4, %v9192_v42  ;;  %v4848_v48 = vmax.f32 %v3625_v43, 0.0  ;;  %7496 = vst.msk [vmem:[%s11408_s12 + $0x76c] sm:$0xf] %vm7020_vm4, %v9434_v44  ;;  %v5090_v49 = vmax.f32 %v4593_v45, 0.0 }
 0x494   : > { %v3627_v50 = vpop.f32.mrf.mxu0  ;;  %v4595_v51 = vpop.f32.mrf.mxu1 }
 0x495   : > { %v9193_v52 = vpack.c.bf16 %v4848_v48, %v4848_v48  ;;  %v3628_v53 = vadd.f32 %v13448_v55, %v3627_v50  ;;  %v9435_v54 = vpack.c.bf16 %v5090_v49, %v5090_v49  ;;  %v4596_v21 = vadd.f32 %v13448_v55, %v4595_v51 }
 0x496   : > { %v10170_v56 = vpop.f32.mrf.mxu0  ;;  %v10654_v0 = vpop.f32.mrf.mxu1 }
 0x497   : > { %7255 = vst.msk [vmem:[%s11408_s12 + $0x3a8] sm:$0xf] %vm7020_vm4, %v9193_v52  ;;  %v4849_v57 = vmax.f32 %v3628_v53, 0.0  ;;  %7497 = vst.msk [vmem:[%s11408_s12 + $0x770] sm:$0xf] %vm7020_vm4, %v9435_v54  ;;  %v5091_v58 = vmax.f32 %v4596_v21, 0.0 }
 0x498   : > { %v3632_v59 = vpop.f32.mrf.mxu0  ;;  %v4600_v61 = vpop.f32.mrf.mxu1 }
 0x499   : > { %v9194_v62 = vpack.c.bf16 %v4849_v57, %v4849_v57  ;;  %v3633_v63 = vadd.f32 %v13448_v55, %v3632_v59  ;;  %v9436_v1 = vpack.c.bf16 %v5091_v58, %v5091_v58  ;;  %v4601_v2 = vadd.f32 %v13448_v55, %v4600_v61 }
 0x49a   : > { %v10173_v3 = vpop.f32.mrf.mxu0  ;;  %v10657_v4 = vpop.f32.mrf.mxu1 }
 0x49b   : > { %7256 = vst.msk [vmem:[%s11408_s12 + $0x3ac] sm:$0xf] %vm7020_vm4, %v9194_v62  ;;  %v4850_v6 = vmax.f32 %v3633_v63, 0.0  ;;  %7498 = vst.msk [vmem:[%s11408_s12 + $0x774] sm:$0xf] %vm7020_vm4, %v9436_v1  ;;  %v5092_v7 = vmax.f32 %v4601_v2, 0.0 }
 0x49c   : > { %v3635_v8 = vpop.f32.mrf.mxu0  ;;  %v4603_v60 = vpop.f32.mrf.mxu1 }
 0x49d   : > { %v9195_v9 = vpack.c.bf16 %v4850_v6, %v4850_v6  ;;  %v3636_v10 = vadd.f32 %v13448_v55, %v3635_v8  ;;  %v9437_v11 = vpack.c.bf16 %v5092_v7, %v5092_v7  ;;  %v4604_v12 = vadd.f32 %v13448_v55, %v4603_v60 }
 0x49e   : > { %v10174_v13 = vpop.f32.mrf.mxu0  ;;  %v10658_v14 = vpop.f32.mrf.mxu1 }
 0x49f   : > { %7257 = vst.msk [vmem:[%s11408_s12 + $0x3b0] sm:$0xf] %vm7020_vm4, %v9195_v9  ;;  %v4851_v5 = vmax.f32 %v3636_v10, 0.0  ;;  %7499 = vst.msk [vmem:[%s11408_s12 + $0x778] sm:$0xf] %vm7020_vm4, %v9437_v11  ;;  %v5093_v15 = vmax.f32 %v4604_v12, 0.0 }
 0x4a0   : > { %v3640_v17 = vpop.f32.mrf.mxu0  ;;  %v4608_v18 = vpop.f32.mrf.mxu1 }
 0x4a1   : > { %v9196_v19 = vpack.c.bf16 %v4851_v5, %v4851_v5  ;;  %v3641_v20 = vadd.f32 %v13448_v55, %v3640_v17  ;;  %v9438_v22 = vpack.c.bf16 %v5093_v15, %v5093_v15  ;;  %v4609_v23 = vadd.f32 %v13448_v55, %v4608_v18 }
 0x4a2   : > { %v10177_v24 = vpop.f32.mrf.mxu0  ;;  %v10661_v25 = vpop.f32.mrf.mxu1 }
 0x4a3   : > { %7258 = vst.msk [vmem:[%s11408_s12 + $0x3b4] sm:$0xf] %vm7020_vm4, %v9196_v19  ;;  %v4852_v26 = vmax.f32 %v3641_v20, 0.0  ;;  %7500 = vst.msk [vmem:[%s11408_s12 + $0x77c] sm:$0xf] %vm7020_vm4, %v9438_v22  ;;  %v5094_v27 = vmax.f32 %v4609_v23, 0.0 }
 0x4a4   : > { %v3643_v16 = vpop.f32.mrf.mxu0  ;;  %v4611_v28 = vpop.f32.mrf.mxu1 }
 0x4a5   : > { %v9197_v29 = vpack.c.bf16 %v4852_v26, %v4852_v26  ;;  %v3644_v30 = vadd.f32 %v13448_v55, %v3643_v16  ;;  %v9439_v31 = vpack.c.bf16 %v5094_v27, %v5094_v27 }
 0x4a6   : > { %v10178_v32 = vpop.f32.mrf.mxu0  ;;  %v10662_v33 = vpop.f32.mrf.mxu1 }
 0x4a7   : > { %7259 = vst.msk [vmem:[%s11408_s12 + $0x3b8] sm:$0xf] %vm7020_vm4, %v9197_v29  ;;  %v4853_v34 = vmax.f32 %v3644_v30, 0.0  ;;  %7501 = vst.msk [vmem:[%s11408_s12 + $0x780] sm:$0xf] %vm7020_vm4, %v9439_v31 }
 0x4a8   : > { %v3648_v35 = vpop.f32.mrf.mxu0 }
 0x4a9   : > { %v9198_v36 = vpack.c.bf16 %v4853_v34, %v4853_v34  ;;  %v3649_v37 = vadd.f32 %v13448_v55, %v3648_v35 }
 0x4aa   : > { %v10181_v38 = vpop.f32.mrf.mxu0 }
 0x4ab   : > { %7260 = vst.msk [vmem:[%s11408_s12 + $0x3bc] sm:$0xf] %vm7020_vm4, %v9198_v36  ;;  %v4854_v39 = vmax.f32 %v3649_v37, 0.0 }
 0x4ac   : > { %v3651_v40 = vpop.f32.mrf.mxu0 }
 0x4ad   : > { %v9199_v41 = vpack.c.bf16 %v4854_v39, %v4854_v39  ;;  %v3652_v42 = vadd.f32 %v13448_v55, %v3651_v40 }
 0x4ae   : > { %v10182_v43 = vpop.f32.mrf.mxu0 }
 0x4af   : > { %7261 = vst.msk [vmem:[%s11408_s12 + $0x3c0] sm:$0xf] %vm7020_vm4, %v9199_v41  ;;  %v4855_v44 = vmax.f32 %v3652_v42, 0.0  ;;  %7508 = sbr.rel (!%p11153_p4) target bundleno = 1285 (0x505), region = 36 }
 0x4b1   : > { %v9200_v45 = vpack.c.bf16 %v4855_v44, %v4855_v44 }
 0x4b3   : > { %7262 = vst.msk [vmem:[%s11408_s12 + $0x3c4] sm:$0xf] %vm7020_vm4, %v9200_v45 }
 0x4b4   : > { %s13848_s6 = smov (!%p7511_p8, %s7510_s6), 481 }
 0x4b5   : > { %s8944_s11 = sshll.u32 %s13848_s6, 6 }
 0x4b6   : > { %p8947_p9 = scmp.eq.s32.totalorder %s8944_s11, 0 }
 0x4b7   : > { %s13650_s14 = sshrl.u32 (!%p8947_p9), %s13848_s6, 6 }
 0x4b8   : > { %7519 = sbr.rel (%p8947_p9) target bundleno = 1285 (0x505), region = 40  ;;  %p8948_p10 = scmp.le.s32.totalorder (!%p8947_p9), %s13650_s14, 0 }
 0x4bd   : > { %7926 = sbr.rel (%p8948_p10) target bundleno = 1268 (0x4f4), region = 112  ;;  %s13841_s15 = smov (!%p8948_p10), %s13644_s10 }
 0x4be   : > { %s13842_s20 = smov (!%p8948_p10), %s11408_s12  ;;  %s13659_s23 = smov (!%p8948_p10), 0  }
 0x4bf   : > { %s13661_s17 = smov (!%p8948_p10), 0  }
 0x4c2 LB: >> { %v7536_v55 = vld [vmem:[%s11079_s20] sm:$0xf]  ;;  %v7538_v46 = vld [vmem:[%s11079_s20 + $0x4] sm:$0xf]  ;;  %v7540_v47 = vld [vmem:[%s11079_s20 + $0x8] sm:$0xf]  ;;  %s11087_s17 = sphi %s13661_s17, %s7530_s17   ;;  %s11083_s23 = sphi %s13659_s23, %s13843_s23   ;;  %s11079_s20 = sphi %s13842_s20, %s7669_s20   ;;  %s11075_s15 = sphi %s13841_s15, %s7670_s15  }
 0x4c3   : >> { %7537 = vst [vmem:[%s11075_s15] sm:$0xf] %v7536_v55  ;;  %7539 = vst [vmem:[%s11075_s15 + $0x4] sm:$0xf] %v7538_v46  ;;  %v7542_v48 = vld [vmem:[%s11079_s20 + $0xc] sm:$0xf]  ;;  %s7664_s18 = sadd.s32 1, %s11083_s23 }
 0x4c4   : >> { %7541 = vst [vmem:[%s11075_s15 + $0x8] sm:$0xf] %v7540_v47  ;;  %v7544_v49 = vld [vmem:[%s11079_s20 + $0x10] sm:$0xf]  ;;  %v7546_v50 = vld [vmem:[%s11079_s20 + $0x14] sm:$0xf]  ;;  %p7665_p11 = scmp.ge.s32.totalorder %s7664_s18, %s13650_s14 }
 0x4c5   : >> { %7543 = vst [vmem:[%s11075_s15 + $0xc] sm:$0xf] %v7542_v48  ;;  %7545 = vst [vmem:[%s11075_s15 + $0x10] sm:$0xf] %v7544_v49  ;;  %v7548_v51 = vld [vmem:[%s11079_s20 + $0x18] sm:$0xf] }
 0x4c6   : >> { %7547 = vst [vmem:[%s11075_s15 + $0x14] sm:$0xf] %v7546_v50  ;;  %v7550_v52 = vld [vmem:[%s11079_s20 + $0x1c] sm:$0xf]  ;;  %v7552_v53 = vld [vmem:[%s11079_s20 + $0x20] sm:$0xf] }
 0x4c7   : >> { %7549 = vst [vmem:[%s11075_s15 + $0x18] sm:$0xf] %v7548_v51  ;;  %7551 = vst [vmem:[%s11075_s15 + $0x1c] sm:$0xf] %v7550_v52  ;;  %v7554_v54 = vld [vmem:[%s11079_s20 + $0x24] sm:$0xf] }
 0x4c8   : >> { %7553 = vst [vmem:[%s11075_s15 + $0x20] sm:$0xf] %v7552_v53  ;;  %v7556_v21 = vld [vmem:[%s11079_s20 + $0x28] sm:$0xf]  ;;  %v7558_v56 = vld [vmem:[%s11079_s20 + $0x2c] sm:$0xf] }
 0x4c9   : >> { %7555 = vst [vmem:[%s11075_s15 + $0x24] sm:$0xf] %v7554_v54  ;;  %7557 = vst [vmem:[%s11075_s15 + $0x28] sm:$0xf] %v7556_v21  ;;  %v7560_v0 = vld [vmem:[%s11079_s20 + $0x30] sm:$0xf] }
 0x4ca   : >> { %7559 = vst [vmem:[%s11075_s15 + $0x2c] sm:$0xf] %v7558_v56  ;;  %v7562_v57 = vld [vmem:[%s11079_s20 + $0x34] sm:$0xf]  ;;  %v7564_v58 = vld [vmem:[%s11079_s20 + $0x38] sm:$0xf] }
 0x4cb   : >> { %7561 = vst [vmem:[%s11075_s15 + $0x30] sm:$0xf] %v7560_v0  ;;  %7563 = vst [vmem:[%s11075_s15 + $0x34] sm:$0xf] %v7562_v57  ;;  %v7566_v59 = vld [vmem:[%s11079_s20 + $0x3c] sm:$0xf] }
 0x4cc   : >> { %7565 = vst [vmem:[%s11075_s15 + $0x38] sm:$0xf] %v7564_v58  ;;  %v7568_v61 = vld [vmem:[%s11079_s20 + $0x40] sm:$0xf]  ;;  %v7570_v62 = vld [vmem:[%s11079_s20 + $0x44] sm:$0xf] }
 0x4cd   : >> { %7567 = vst [vmem:[%s11075_s15 + $0x3c] sm:$0xf] %v7566_v59  ;;  %7569 = vst [vmem:[%s11075_s15 + $0x40] sm:$0xf] %v7568_v61  ;;  %v7572_v63 = vld [vmem:[%s11079_s20 + $0x48] sm:$0xf] }
 0x4ce   : >> { %7571 = vst [vmem:[%s11075_s15 + $0x44] sm:$0xf] %v7570_v62  ;;  %v7574_v1 = vld [vmem:[%s11079_s20 + $0x4c] sm:$0xf]  ;;  %v7576_v2 = vld [vmem:[%s11079_s20 + $0x50] sm:$0xf] }
 0x4cf   : >> { %7573 = vst [vmem:[%s11075_s15 + $0x48] sm:$0xf] %v7572_v63  ;;  %7575 = vst [vmem:[%s11075_s15 + $0x4c] sm:$0xf] %v7574_v1  ;;  %v7578_v3 = vld [vmem:[%s11079_s20 + $0x54] sm:$0xf] }
 0x4d0   : >> { %7577 = vst [vmem:[%s11075_s15 + $0x50] sm:$0xf] %v7576_v2  ;;  %v7580_v4 = vld [vmem:[%s11079_s20 + $0x58] sm:$0xf]  ;;  %v7582_v6 = vld [vmem:[%s11079_s20 + $0x5c] sm:$0xf] }
 0x4d1   : >> { %7579 = vst [vmem:[%s11075_s15 + $0x54] sm:$0xf] %v7578_v3  ;;  %7581 = vst [vmem:[%s11075_s15 + $0x58] sm:$0xf] %v7580_v4  ;;  %v7584_v7 = vld [vmem:[%s11079_s20 + $0x60] sm:$0xf] }
 0x4d2   : >> { %7583 = vst [vmem:[%s11075_s15 + $0x5c] sm:$0xf] %v7582_v6  ;;  %v7586_v8 = vld [vmem:[%s11079_s20 + $0x64] sm:$0xf]  ;;  %v7588_v60 = vld [vmem:[%s11079_s20 + $0x68] sm:$0xf] }
 0x4d3   : >> { %7585 = vst [vmem:[%s11075_s15 + $0x60] sm:$0xf] %v7584_v7  ;;  %7587 = vst [vmem:[%s11075_s15 + $0x64] sm:$0xf] %v7586_v8  ;;  %v7590_v9 = vld [vmem:[%s11079_s20 + $0x6c] sm:$0xf] }
 0x4d4   : >> { %7589 = vst [vmem:[%s11075_s15 + $0x68] sm:$0xf] %v7588_v60  ;;  %v7592_v10 = vld [vmem:[%s11079_s20 + $0x70] sm:$0xf]  ;;  %v7594_v11 = vld [vmem:[%s11079_s20 + $0x74] sm:$0xf] }
 0x4d5   : >> { %7591 = vst [vmem:[%s11075_s15 + $0x6c] sm:$0xf] %v7590_v9  ;;  %7593 = vst [vmem:[%s11075_s15 + $0x70] sm:$0xf] %v7592_v10  ;;  %v7596_v12 = vld [vmem:[%s11079_s20 + $0x78] sm:$0xf] }
 0x4d6   : >> { %7595 = vst [vmem:[%s11075_s15 + $0x74] sm:$0xf] %v7594_v11  ;;  %v7598_v13 = vld [vmem:[%s11079_s20 + $0x7c] sm:$0xf]  ;;  %v7600_v14 = vld [vmem:[%s11079_s20 + $0x80] sm:$0xf] }
 0x4d7   : >> { %7597 = vst [vmem:[%s11075_s15 + $0x78] sm:$0xf] %v7596_v12  ;;  %7599 = vst [vmem:[%s11075_s15 + $0x7c] sm:$0xf] %v7598_v13  ;;  %v7602_v5 = vld [vmem:[%s11079_s20 + $0x84] sm:$0xf] }
 0x4d8   : >> { %7601 = vst [vmem:[%s11075_s15 + $0x80] sm:$0xf] %v7600_v14  ;;  %v7604_v15 = vld [vmem:[%s11079_s20 + $0x88] sm:$0xf]  ;;  %v7606_v17 = vld [vmem:[%s11079_s20 + $0x8c] sm:$0xf] }
 0x4d9   : >> { %7603 = vst [vmem:[%s11075_s15 + $0x84] sm:$0xf] %v7602_v5  ;;  %7605 = vst [vmem:[%s11075_s15 + $0x88] sm:$0xf] %v7604_v15  ;;  %v7608_v18 = vld [vmem:[%s11079_s20 + $0x90] sm:$0xf] }
 0x4da   : >> { %7607 = vst [vmem:[%s11075_s15 + $0x8c] sm:$0xf] %v7606_v17  ;;  %v7610_v19 = vld [vmem:[%s11079_s20 + $0x94] sm:$0xf]  ;;  %v7612_v20 = vld [vmem:[%s11079_s20 + $0x98] sm:$0xf] }
 0x4db   : >> { %7609 = vst [vmem:[%s11075_s15 + $0x90] sm:$0xf] %v7608_v18  ;;  %7611 = vst [vmem:[%s11075_s15 + $0x94] sm:$0xf] %v7610_v19  ;;  %v7614_v22 = vld [vmem:[%s11079_s20 + $0x9c] sm:$0xf] }
 0x4dc   : >> { %7613 = vst [vmem:[%s11075_s15 + $0x98] sm:$0xf] %v7612_v20  ;;  %v7616_v23 = vld [vmem:[%s11079_s20 + $0xa0] sm:$0xf]  ;;  %v7618_v24 = vld [vmem:[%s11079_s20 + $0xa4] sm:$0xf] }
 0x4dd   : >> { %7615 = vst [vmem:[%s11075_s15 + $0x9c] sm:$0xf] %v7614_v22  ;;  %7617 = vst [vmem:[%s11075_s15 + $0xa0] sm:$0xf] %v7616_v23  ;;  %v7620_v25 = vld [vmem:[%s11079_s20 + $0xa8] sm:$0xf] }
 0x4de   : >> { %7619 = vst [vmem:[%s11075_s15 + $0xa4] sm:$0xf] %v7618_v24  ;;  %v7622_v26 = vld [vmem:[%s11079_s20 + $0xac] sm:$0xf]  ;;  %v7624_v27 = vld [vmem:[%s11079_s20 + $0xb0] sm:$0xf] }
 0x4df   : >> { %7621 = vst [vmem:[%s11075_s15 + $0xa8] sm:$0xf] %v7620_v25  ;;  %7623 = vst [vmem:[%s11075_s15 + $0xac] sm:$0xf] %v7622_v26  ;;  %v7626_v16 = vld [vmem:[%s11079_s20 + $0xb4] sm:$0xf] }
 0x4e0   : >> { %7625 = vst [vmem:[%s11075_s15 + $0xb0] sm:$0xf] %v7624_v27  ;;  %v7628_v28 = vld [vmem:[%s11079_s20 + $0xb8] sm:$0xf]  ;;  %v7630_v29 = vld [vmem:[%s11079_s20 + $0xbc] sm:$0xf] }
 0x4e1   : >> { %7627 = vst [vmem:[%s11075_s15 + $0xb4] sm:$0xf] %v7626_v16  ;;  %7629 = vst [vmem:[%s11075_s15 + $0xb8] sm:$0xf] %v7628_v28  ;;  %v7632_v30 = vld [vmem:[%s11079_s20 + $0xc0] sm:$0xf] }
 0x4e2   : >> { %7631 = vst [vmem:[%s11075_s15 + $0xbc] sm:$0xf] %v7630_v29  ;;  %v7634_v31 = vld [vmem:[%s11079_s20 + $0xc4] sm:$0xf]  ;;  %v7636_v32 = vld [vmem:[%s11079_s20 + $0xc8] sm:$0xf] }
 0x4e3   : >> { %7633 = vst [vmem:[%s11075_s15 + $0xc0] sm:$0xf] %v7632_v30  ;;  %7635 = vst [vmem:[%s11075_s15 + $0xc4] sm:$0xf] %v7634_v31  ;;  %v7638_v33 = vld [vmem:[%s11079_s20 + $0xcc] sm:$0xf] }
 0x4e4   : >> { %7637 = vst [vmem:[%s11075_s15 + $0xc8] sm:$0xf] %v7636_v32  ;;  %v7640_v34 = vld [vmem:[%s11079_s20 + $0xd0] sm:$0xf]  ;;  %v7642_v35 = vld [vmem:[%s11079_s20 + $0xd4] sm:$0xf] }
 0x4e5   : >> { %7639 = vst [vmem:[%s11075_s15 + $0xcc] sm:$0xf] %v7638_v33  ;;  %7641 = vst [vmem:[%s11075_s15 + $0xd0] sm:$0xf] %v7640_v34  ;;  %v7644_v36 = vld [vmem:[%s11079_s20 + $0xd8] sm:$0xf] }
 0x4e6   : >> { %7643 = vst [vmem:[%s11075_s15 + $0xd4] sm:$0xf] %v7642_v35  ;;  %v7646_v37 = vld [vmem:[%s11079_s20 + $0xdc] sm:$0xf]  ;;  %v7648_v38 = vld [vmem:[%s11079_s20 + $0xe0] sm:$0xf] }
 0x4e7   : >> { %7645 = vst [vmem:[%s11075_s15 + $0xd8] sm:$0xf] %v7644_v36  ;;  %7647 = vst [vmem:[%s11075_s15 + $0xdc] sm:$0xf] %v7646_v37  ;;  %v7650_v39 = vld [vmem:[%s11079_s20 + $0xe4] sm:$0xf] }
 0x4e8   : >> { %7649 = vst [vmem:[%s11075_s15 + $0xe0] sm:$0xf] %v7648_v38  ;;  %v7652_v40 = vld [vmem:[%s11079_s20 + $0xe8] sm:$0xf]  ;;  %v7654_v41 = vld [vmem:[%s11079_s20 + $0xec] sm:$0xf] }
 0x4e9   : >> { %7651 = vst [vmem:[%s11075_s15 + $0xe4] sm:$0xf] %v7650_v39  ;;  %7653 = vst [vmem:[%s11075_s15 + $0xe8] sm:$0xf] %v7652_v40  ;;  %v7656_v42 = vld [vmem:[%s11079_s20 + $0xf0] sm:$0xf] }
 0x4ea   : >> { %7655 = vst [vmem:[%s11075_s15 + $0xec] sm:$0xf] %v7654_v41  ;;  %v7658_v43 = vld [vmem:[%s11079_s20 + $0xf4] sm:$0xf]  ;;  %v7660_v44 = vld [vmem:[%s11079_s20 + $0xf8] sm:$0xf] }
 0x4eb   : >> { %7657 = vst [vmem:[%s11075_s15 + $0xf0] sm:$0xf] %v7656_v42  ;;  %7659 = vst [vmem:[%s11075_s15 + $0xf4] sm:$0xf] %v7658_v43  ;;  %v7662_v45 = vld [vmem:[%s11079_s20 + $0xfc] sm:$0xf] }
 0x4ec   : >> { %7661 = vst [vmem:[%s11075_s15 + $0xf8] sm:$0xf] %v7660_v44  ;;  %7663 = vst [vmem:[%s11075_s15 + $0xfc] sm:$0xf] %v7662_v45  ;;  %s13850_s18 = smov (%p7665_p11, %s7664_s18), 0  ;;  %s7530_s17 = sadd.s32 1, %s11087_s17  }
 0x4ed   : >> { %s8949_s21 = sshll.u32 %s13850_s18, 8  ;;  %p7529_p12 = scmp.ge.s32.totalorder %s7530_s17, %s13650_s14 }
 0x4ee   : >> { %s7669_s20 = scalar_lea.vmem %s11408_s12, %s8949_s21 [#allocation2]   ;;  %s7670_s15 = scalar_lea.vmem %s13644_s10, %s8949_s21  }
 0x4ef   : >> { %s13843_s23 = smov %s13850_s18  ;;  %7532 = sbr.rel (!%p7529_p12) target bundleno = 1218 (0x4c2), region = 118 }
 0x4f4 PF: > { %s13818_s22 = sand.u32 63, %s13848_s6   ;;  %s9441_s24 = sshll.u32 %s13650_s14, 8 }
 0x4f5   : > { %s7675_s25 = scalar_lea.vmem %s11408_s12, %s9441_s24 [#allocation2]   ;;  %s7677_s26 = scalar_lea.vmem %s13644_s10, %s9441_s24  }
 0x4f6   : > { %p8954_p13 = scmp.le.s32.totalorder %s13818_s22, 0 }
 0x4f7   : > { %s11089_s27 = smov (!%p8954_p13), %s7677_s26   ;;  %s11093_s28 = smov (!%p8954_p13), %s7675_s25  }
 0x4f8   : > { %7940 = sbr.rel (%p8954_p13) target bundleno = 1285 (0x505), region = 123  ;;  %s11097_s29 = smov (!%p8954_p13), 0  }
 0x4f9   : > { %s11101_s30 = smov (!%p8954_p13), 0  }
 0x4fd LB: >> { %v7687_v55 = vld [vmem:[%s11095_s28] sm:$0xf]  ;;  %s7689_s4 = sadd.s32 1, %s11099_s29  ;;  %s7681_s30 = sadd.s32 1, %s11103_s30   ;;  %s11103_s30 = sphi %s11101_s30, %s7681_s30   ;;  %s11099_s29 = sphi %s11097_s29, %s11098_s29   ;;  %s11095_s28 = sphi %s11093_s28, %s7694_s28   ;;  %s11091_s27 = sphi %s11089_s27, %s7695_s27  }
 0x4fe   : >> { %7688 = vst [vmem:[%s11091_s27] sm:$0xf] %v7687_v55  ;;  %p7690_p0 = scmp.ge.s32.totalorder %s7689_s4, %s13818_s22  ;;  %p7680_p1 = scmp.ge.s32.totalorder %s7681_s30, %s13818_s22 }
 0x500   : >> { %s13852_s4 = smov (%p7690_p0, %s7689_s4), 0  ;;  %7683 = sbr.rel (!%p7680_p1) target bundleno = 1277 (0x4fd), region = 129 }
 0x501   : >> { %s8955_s12 = sshll.u32 %s13852_s4, 2  ;;  %s11098_s29 = smov %s13852_s4  }
 0x502   : >> { %s7694_s28 = scalar_lea.vmem %s7675_s25, %s8955_s12 [#allocation2]   ;;  %s7695_s27 = scalar_lea.vmem %s7677_s26, %s8955_s12  }
 0x505 PF: > { %p10_p2 = scmp.ge.s32.totalorder %s11143_s16, 4   ;;  %s13844_s12 = smov %s11067_s13 }
 0x506   : > { %s13845_s13 = smov %s11151_s19  ;;  %s13846_s14 = smov %s11143_s16 }
 0x507   :  { %12 = sbr.rel (!%p10_p2) target bundleno = 2 (0x2), region = 140 }

// kernel: _lambda_.6
= control target key start
LH: loop header
LB: loop body
LE: loop exit
PB: predicated region body
PF: predicated region fallthrough
CT: control target
= control target key end

     0   :  { %s4846_s12 = smov 0   ;;  %s4848_s13 = smov 0   ;;  %s5982_s0 = inlined_call_operand.vmem [shape: bf16[1682,400], index: 0, kind: input, shape index: {}]   ;;  %s5983_s1 = inlined_call_operand.vmem [shape: bf16[400,32], index: 1, kind: input, shape index: {}]   ;;  %s5984_s2 = inlined_call_operand.vmem [shape: f32[1,32], index: 2, kind: input, shape index: {}]   ;;  %s5985_s3 = inlined_call_operand.vmem [shape: bf16[1682,32], index: 3, kind: output, shape index: {}]  }
   0x1   :  { %s4850_s14 = smov 0  }
   0x2 LB: > { %s4859_s15 = sadd.s32 4294967295, %s4791_s14   ;;  %s4861_s16 = sadd.s32 1, %s4791_s14   ;;  %s4791_s14 = sphi %s4850_s14, %s5992_s14   ;;  %s4787_s13 = sphi %s4848_s13, %s5991_s13   ;;  %s4783_s12 = sphi %s4846_s12, %s5990_s12  }
   0x3   : > { %s85_s17 = ssub.s32 %s4791_s14, %s4861_s16  ;;  %s88_s18 = sadd.s32 1, %s4787_s13 }
   0x4   : > { %p86_p0 = scmp.eq.s32.totalorder %s85_s17, 0  ;;  %p98_p1 = scmp.ne.s32.totalorder %s4787_s13, %s4783_s12 }
   0x5   : > { %p99_p2 = scmp.eq.s32.totalorder %s4859_s15, 1  ;;  %p3809_p3 = scmp.ge.s32.totalorder %s4791_s14, 1 }
   0x6   : > { %s4869_s19 = scalar_select %p86_p0, %s4787_s13, %s88_s18  }
   0x7   : > { %p4871_p4 = por %p99_p2, %p98_p1  ;;  %p149_p5 = scmp.lt.s32.totalorder %s4791_s14, 3 }
   0x9   : > { %p150_p6 = pnand %p3809_p3, %p149_p5 }
   0xa   : > { %s4892_s29 = smul.u32 (!%p150_p6), 106, %s4859_s15  ;;  %s175_s17 = sand.u32 (!%p150_p6), 1, %s4783_s12  }
   0xb   : > { %153 = sbr.rel (%p150_p6) target bundleno = 784 (0x310), region = 32 }
   0xc   : > { %p184_p7 = scmp.lt.s32.totalorder (!%p150_p6), %s4892_s29, 210  ;;  %s4334_s18 = smul.u32 (!%p150_p6), 424, %s175_s17 }
   0xe   : > { %s5152_s12 = scalar_lea.vmem (!%p150_p6), [#allocation2], %s4334_s18  }
  0x10   : > { %v4424_v0 = vld [vmem:[%s5983_s1 + $0x38] sm:$0xff]   ;;  %v4825_v1 = vmov 0   ;;  %v4425_v2 = vld [vmem:[%s5983_s1 + $0x30] sm:$0xff]   ;;  %v4426_v3 = vld [vmem:[%s5983_s1 + $0x28] sm:$0xff]   ;;  %s185_s11 = scalar_select %p184_p7, %s4892_s29, 210  ;;  %vm1627_vm0 = vcmask 130048  }
  0x11   : > { %1787 = vmatprep.subr.bf16.mxu0 %v4825_v1  ;;  %2244 = vmatprep.subr.bf16.mxu1 %v4825_v1  ;;  %v4431_v4 = vld [vmem:[%s5983_s1 + $0xb8] sm:$0xff]   ;;  %v4433_v5 = vld [vmem:[%s5983_s1 + $0xb0] sm:$0xff]   ;;  %v4427_v6 = vld [vmem:[%s5983_s1 + $0x20] sm:$0xff]   ;;  %vm3231_vm1 = vcmask 257024   ;;  %s3346_s24 = ssub.s32 (%p4871_p4), 211, %s4892_s29  ;;  %s4331_s25 = smul.u32 (%p4871_p4), 424, %s4859_s15 }
  0x12   : > { %1788 = vmatpush1.bf16.msra.mxu0 %v4424_v0  ;;  %2245 = vmatpush1.bf16.msra.mxu1 %v4431_v4  ;;  %v4435_v7 = vld [vmem:[%s5983_s1 + $0xa8] sm:$0xff]   ;;  %v4428_v8 = vld [vmem:[%s5983_s1 + $0x18] sm:$0xff]   ;;  %v4437_v9 = vld [vmem:[%s5983_s1 + $0xa0] sm:$0xff]   ;;  %s4224_s22 = sshll.u32 %s185_s11, 4  ;;  %p3347_p8 = scmp.lt.s32.totalorder (%p4871_p4), %s3346_s24, 106 }
  0x13   : > { %1789 = vmatprep.subr.bf16.mxu0 %v4825_v1  ;;  %2246 = vmatprep.subr.bf16.mxu1 %v4825_v1  ;;  %v4429_v10 = vld [vmem:[%s5983_s1 + $0x10] sm:$0xff]   ;;  %v4439_v11 = vld [vmem:[%s5983_s1 + $0x98] sm:$0xff]   ;;  %v4430_v12 = vld [vmem:[%s5983_s1 + $0x8] sm:$0xff]   ;;  %s4930_s30 = scalar_lea.vmem %s5982_s0, %s4224_s22  ;;  %s5790_s28 = scalar_lea.vmem (%p4871_p4), %s5985_s3, %s4331_s25  }
  0x14   : > { %v4441_v13 = vld [vmem:[%s5983_s1 + $0x90] sm:$0xff]   ;;  %v4450_v14 = vld [vmem:[%s4930_s30 + $0xc] ss:$16 sps:$4 sm:$0xff]   ;;  %v4432_v15 = vld [vmem:[%s5983_s1] sm:$0xff]  }
  0x15   : > { %4050 = vmatprep.mubr.msk.bf16.mxu1 %vm1627_vm0, %v4450_v14  ;;  %v4454_v16 = vld [vmem:[%s4930_s30 + $0x4] ss:$16 sps:$4 sm:$0xff]   ;;  %v4443_v17 = vld [vmem:[%s5983_s1 + $0x88] sm:$0xff]   ;;  %v4434_v18 = vld [vmem:[%s5983_s1 + $0x78] sm:$0xff]  }
  0x16   : > { %1790 = vmatpush1.bf16.msra.mxu0 %v4425_v2  ;;  %2247 = vmatpush1.bf16.msra.mxu1 %v4433_v5  ;;  %v4445_v19 = vld [vmem:[%s5983_s1 + $0x80] sm:$0xff]   ;;  %v4436_v20 = vld [vmem:[%s5983_s1 + $0x70] sm:$0xff]   ;;  %v4438_v22 = vld [vmem:[%s5983_s1 + $0x68] sm:$0xff]  }
  0x17   : > { %1791 = vmatprep.subr.bf16.mxu0 %v4825_v1  ;;  %2248 = vmatprep.subr.bf16.mxu1 %v4825_v1  ;;  %v4447_v21 = vld [vmem:[%s5983_s1 + $0xc0] sm:$0xff]   ;;  %v4448_v23 = vld [vmem:[%s4930_s30 + $0x8] ss:$16 sps:$4 sm:$0xff]   ;;  %v4455_v24 = vld [vmem:[%s4930_s30 + $0x2c] ss:$16 sps:$4 sm:$0xff]  }
  0x18   : > { %1819 = vmatprep.mubr.bf16.mxu0 %v4454_v16  ;;  %v4440_v25 = vld [vmem:[%s5983_s1 + $0x60] sm:$0xff]   ;;  %v4442_v26 = vld [vmem:[%s5983_s1 + $0x58] sm:$0xff]   ;;  %v4444_v29 = vld [vmem:[%s5983_s1 + $0x50] sm:$0xff]  }
  0x19   : > { %v4457_v27 = vld [vmem:[%s4930_s30 + $0x28] ss:$16 sps:$4 sm:$0xff]   ;;  %v4461_v28 = vld [vmem:[%s4930_s30 + $0x4c] ss:$16 sps:$4 sm:$0xff]   ;;  %v4451_v33 = vld [vmem:[%s5983_s1 + $0x40] sm:$0xff]  }
  0x1a   : > { %1792 = vmatpush1.bf16.msra.mxu0 %v4426_v3  ;;  %2249 = vmatpush1.bf16.msra.mxu1 %v4435_v7  ;;  %v4446_v30 = vld [vmem:[%s5983_s1 + $0x48] sm:$0xff]   ;;  %v4452_v34 = vld [vmem:[%s4930_s30] ss:$16 sps:$4 sm:$0xff]   ;;  %v4458_v35 = vld [vmem:[%s4930_s30 + $0x24] ss:$16 sps:$4 sm:$0xff]  }
  0x1b   : > { %1793 = vmatprep.subr.bf16.mxu0 %v4825_v1  ;;  %2250 = vmatprep.subr.bf16.mxu1 %v4825_v1  ;;  %v4463_v31 = vld [vmem:[%s4930_s30 + $0x48] ss:$16 sps:$4 sm:$0xff]   ;;  %v4467_v32 = vld [vmem:[%s4930_s30 + $0x6c] ss:$16 sps:$4 sm:$0xff]   ;;  %v4460_v38 = vld [vmem:[%s4930_s30 + $0x20] ss:$16 sps:$4 sm:$0xff]  }
  0x1c   : > { %v4469_v36 = vld [vmem:[%s4930_s30 + $0x68] ss:$16 sps:$4 sm:$0xff]   ;;  %v4473_v37 = vld [vmem:[%s4930_s30 + $0x8c] ss:$16 sps:$4 sm:$0xff]   ;;  %v4464_v39 = vld [vmem:[%s4930_s30 + $0x44] ss:$16 sps:$4 sm:$0xff]  }
  0x1d   : > { %v4475_v40 = vld [vmem:[%s4930_s30 + $0x88] ss:$16 sps:$4 sm:$0xff]   ;;  %v4479_v41 = vld [vmem:[%s4930_s30 + $0xac] ss:$16 sps:$4 sm:$0xff]   ;;  %v4466_v42 = vld [vmem:[%s4930_s30 + $0x40] ss:$16 sps:$4 sm:$0xff]  }
  0x1e   : > { %1794 = vmatpush1.bf16.msra.mxu0 %v4427_v6  ;;  %2251 = vmatpush1.bf16.msra.mxu1 %v4437_v9  ;;  %v4470_v43 = vld [vmem:[%s4930_s30 + $0x64] ss:$16 sps:$4 sm:$0xff]   ;;  %v4481_v44 = vld [vmem:[%s4930_s30 + $0xa8] ss:$16 sps:$4 sm:$0xff]   ;;  %v4485_v45 = vld [vmem:[%s4930_s30 + $0xcc] ss:$16 sps:$4 sm:$0xff]  }
  0x1f   : > { %1795 = vmatprep.subr.bf16.mxu0 %v4825_v1  ;;  %2252 = vmatprep.subr.bf16.mxu1 %v4825_v1  ;;  %v4472_v46 = vld [vmem:[%s4930_s30 + $0x60] ss:$16 sps:$4 sm:$0xff]   ;;  %v4476_v47 = vld [vmem:[%s4930_s30 + $0x84] ss:$16 sps:$4 sm:$0xff]   ;;  %v4487_v48 = vld [vmem:[%s4930_s30 + $0xc8] ss:$16 sps:$4 sm:$0xff]  }
  0x20   : > { %v4491_v49 = vld [vmem:[%s4930_s30 + $0xec] ss:$16 sps:$4 sm:$0xff]   ;;  %v4478_v50 = vld [vmem:[%s4930_s30 + $0x80] ss:$16 sps:$4 sm:$0xff]   ;;  %v4482_v51 = vld [vmem:[%s4930_s30 + $0xa4] ss:$16 sps:$4 sm:$0xff]  }
  0x21   : > { %v4493_v52 = vld [vmem:[%s4930_s30 + $0xe8] ss:$16 sps:$4 sm:$0xff]   ;;  %v4497_v53 = vld [vmem:[%s4930_s30 + $0x10c] ss:$16 sps:$4 sm:$0xff]   ;;  %v4484_v54 = vld [vmem:[%s4930_s30 + $0xa0] ss:$16 sps:$4 sm:$0xff]  }
  0x22   : > { %1796 = vmatpush1.bf16.msra.mxu0 %v4428_v8  ;;  %2253 = vmatpush1.bf16.msra.mxu1 %v4439_v11  ;;  %v4488_v55 = vld [vmem:[%s4930_s30 + $0xc4] ss:$16 sps:$4 sm:$0xff]   ;;  %v4499_v56 = vld [vmem:[%s4930_s30 + $0x108] ss:$16 sps:$4 sm:$0xff]   ;;  %v4503_v57 = vld [vmem:[%s4930_s30 + $0x12c] ss:$16 sps:$4 sm:$0xff]  }
  0x23   : > { %1797 = vmatprep.subr.bf16.mxu0 %v4825_v1  ;;  %2254 = vmatprep.subr.bf16.mxu1 %v4825_v1  ;;  %v4490_v58 = vld [vmem:[%s4930_s30 + $0xc0] ss:$16 sps:$4 sm:$0xff]   ;;  %v4494_v59 = vld [vmem:[%s4930_s30 + $0xe4] ss:$16 sps:$4 sm:$0xff]   ;;  %v4505_v60 = vld [vmem:[%s4930_s30 + $0x128] ss:$16 sps:$4 sm:$0xff]  }
  0x24   : > { %v4509_v61 = vld [vmem:[%s4930_s30 + $0x14c] ss:$16 sps:$4 sm:$0xff]   ;;  %v4496_v62 = vld [vmem:[%s4930_s30 + $0xe0] ss:$16 sps:$4 sm:$0xff]   ;;  %v4500_v63 = vld [vmem:[%s4930_s30 + $0x104] ss:$16 sps:$4 sm:$0xff]  }
  0x25   : > { %v4511_v0 = vld [vmem:[%s4930_s30 + $0x148] ss:$16 sps:$4 sm:$0xff]   ;;  %v4502_v2 = vld [vmem:[%s4930_s30 + $0x100] ss:$16 sps:$4 sm:$0xff]   ;;  %v4506_v3 = vld [vmem:[%s4930_s30 + $0x124] ss:$16 sps:$4 sm:$0xff]  }
  0x26   : > { %1798 = vmatpush1.bf16.msra.mxu0 %v4429_v10  ;;  %2255 = vmatpush1.bf16.msra.mxu1 %v4441_v13  ;;  %v4517_v4 = vld [vmem:[%s4930_s30 + $0x168] ss:$16 sps:$4 sm:$0xff]   ;;  %v4521_v5 = vld [vmem:[%s4930_s30 + $0x18c] ss:$16 sps:$4 sm:$0xff]   ;;  %v4508_v6 = vld [vmem:[%s4930_s30 + $0x120] ss:$16 sps:$4 sm:$0xff]  }
  0x27   : > { %1799 = vmatprep.subr.bf16.mxu0 %v4825_v1  ;;  %2256 = vmatprep.subr.bf16.mxu1 %v4825_v1  ;;  %v4512_v7 = vld [vmem:[%s4930_s30 + $0x144] ss:$16 sps:$4 sm:$0xff]   ;;  %v4523_v8 = vld [vmem:[%s4930_s30 + $0x188] ss:$16 sps:$4 sm:$0xff]   ;;  %v4527_v9 = vld [vmem:[%s4930_s30 + $0x1ac] ss:$16 sps:$4 sm:$0xff]  }
  0x28   : > { %v4514_v10 = vld [vmem:[%s4930_s30 + $0x140] ss:$16 sps:$4 sm:$0xff]   ;;  %v4518_v11 = vld [vmem:[%s4930_s30 + $0x164] ss:$16 sps:$4 sm:$0xff]   ;;  %v4533_v13 = vld [vmem:[%s4930_s30 + $0x1cc] ss:$16 sps:$4 sm:$0xff]  }
  0x29   : > { %v4520_v14 = vld [vmem:[%s4930_s30 + $0x160] ss:$16 sps:$4 sm:$0xff]   ;;  %v4535_v16 = vld [vmem:[%s4930_s30 + $0x1c8] ss:$16 sps:$4 sm:$0xff]  }
  0x2a   : > { %1800 = vmatpush1.bf16.msra.mxu0 %v4430_v12  ;;  %2257 = vmatpush1.bf16.msra.mxu1 %v4443_v17  ;;  %v4529_v12 = vld [vmem:[%s4930_s30 + $0x1a8] ss:$16 sps:$4 sm:$0xff]   ;;  %v4539_v17 = vld [vmem:[%s4930_s30 + $0x1ec] ss:$16 sps:$4 sm:$0xff]  }
  0x2b   : > { %1801 = vmatprep.subr.bf16.mxu0 %v4825_v1  ;;  %2258 = vmatprep.subr.bf16.mxu1 %v4825_v1 }
  0x2e   : > { %1802 = vmatpush1.bf16.msra.mxu0 %v4432_v15  ;;  %2259 = vmatpush1.bf16.msra.mxu1 %v4445_v19  ;;  %v4524_v15 = vld [vmem:[%s4930_s30 + $0x184] ss:$16 sps:$4 sm:$0xff]  }
  0x2f   : > { %1803 = vmatprep.subr.bf16.mxu0 %v4825_v1  ;;  %2274 = vmatprep.subr.bf16.mxu1 %v4825_v1  ;;  %v4530_v19 = vld [vmem:[%s4930_s30 + $0x1a4] ss:$16 sps:$4 sm:$0xff]  }
  0x32   : > { %1804 = vmatpush2.bf16.msra.mxu0 %v4434_v18  ;;  %2275 = vmatpush2.bf16.msra.mxu1 %v4447_v21  ;;  %v4526_v18 = vld [vmem:[%s4930_s30 + $0x180] ss:$16 sps:$4 sm:$0xff]   ;;  %v4545_v21 = vld [vmem:[%s4930_s30 + $0x20c] ss:$16 sps:$4 sm:$0xff]  }
  0x33   : > { %1805 = vmatprep.subr.bf16.mxu0 %v4825_v1 }
  0x35   : > { %2277 = vmatmul.mubr.bf16.vlgmr.msra.gmra.mxu1 %v4448_v23  ;;  %v4536_v23 = vld [vmem:[%s4930_s30 + $0x1c4] ss:$16 sps:$4 sm:$0xff]  }
  0x36   : > { %1806 = vmatpush2.bf16.msra.mxu0 %v4436_v20  ;;  %4051 = vmatprep.mubr.msk.bf16.mxu1 %vm1627_vm0, %v4455_v24  ;;  %v4541_v20 = vld [vmem:[%s4930_s30 + $0x1e8] ss:$16 sps:$4 sm:$0xff]  }
  0x37   : > { %1807 = vmatprep.subr.bf16.mxu0 %v4825_v1  ;;  %v4547_v24 = vld [vmem:[%s4930_s30 + $0x208] ss:$16 sps:$4 sm:$0xff]  }
  0x3a   : > { %1808 = vmatpush2.bf16.msra.mxu0 %v4438_v22  ;;  %v4532_v22 = vld [vmem:[%s4930_s30 + $0x1a0] ss:$16 sps:$4 sm:$0xff]  }
  0x3b   : > { %1809 = vmatprep.subr.bf16.mxu0 %v4825_v1 }
  0x3d   : > { %2285 = vmatmul.mubr.bf16.gmra.mxu1 %v4457_v27  ;;  %v4542_v27 = vld [vmem:[%s4930_s30 + $0x1e4] ss:$16 sps:$4 sm:$0xff]  }
  0x3e   : > { %1810 = vmatpush2.bf16.msra.mxu0 %v4440_v25  ;;  %4052 = vmatprep.mubr.msk.bf16.mxu1 %vm1627_vm0, %v4461_v28  ;;  %v4551_v25 = vld [vmem:[%s4930_s30 + $0x22c] ss:$16 sps:$4 sm:$0xff]   ;;  %v4553_v28 = vld [vmem:[%s4930_s30 + $0x228] ss:$16 sps:$4 sm:$0xff]  }
  0x3f   : > { %1811 = vmatprep.subr.bf16.mxu0 %v4825_v1 }
  0x42   : > { %1812 = vmatpush2.bf16.msra.mxu0 %v4442_v26  ;;  %v4538_v26 = vld [vmem:[%s4930_s30 + $0x1c0] ss:$16 sps:$4 sm:$0xff]  }
  0x43   : > { %1813 = vmatprep.subr.bf16.mxu0 %v4825_v1 }
  0x45   : > { %2293 = vmatmul.mubr.bf16.gmra.mxu1 %v4463_v31  ;;  %v4548_v31 = vld [vmem:[%s4930_s30 + $0x204] ss:$16 sps:$4 sm:$0xff]  }
  0x46   : > { %1814 = vmatpush2.bf16.msra.mxu0 %v4444_v29  ;;  %4053 = vmatprep.mubr.msk.bf16.mxu1 %vm1627_vm0, %v4467_v32  ;;  %v4557_v29 = vld [vmem:[%s4930_s30 + $0x24c] ss:$16 sps:$4 sm:$0xff]   ;;  %v4559_v32 = vld [vmem:[%s4930_s30 + $0x248] ss:$16 sps:$4 sm:$0xff]  }
  0x47   : > { %1815 = vmatprep.subr.bf16.mxu0 %v4825_v1 }
  0x4a   : > { %1816 = vmatpush2.bf16.msra.mxu0 %v4446_v30  ;;  %v4544_v30 = vld [vmem:[%s4930_s30 + $0x1e0] ss:$16 sps:$4 sm:$0xff]  }
  0x4b   : > { %1817 = vmatprep.subr.bf16.mxu0 %v4825_v1  ;;  %v4515_v1 = vld [vmem:[%s4930_s30 + $0x16c] ss:$16 sps:$4 sm:$0xff]  }
  0x4d   : > { %2301 = vmatmul.mubr.bf16.gmra.mxu1 %v4469_v36  ;;  %v4565_v36 = vld [vmem:[%s4930_s30 + $0x268] ss:$16 sps:$4 sm:$0xff]  }
  0x4e   : > { %1818 = vmatpush2.bf16.msra.mxu0 %v4451_v33  ;;  %4054 = vmatprep.mubr.msk.bf16.mxu1 %vm1627_vm0, %v4473_v37  ;;  %v4563_v33 = vld [vmem:[%s4930_s30 + $0x26c] ss:$16 sps:$4 sm:$0xff]  }
  0x4f   : > { %v4569_v37 = vld [vmem:[%s4930_s30 + $0x28c] ss:$16 sps:$4 sm:$0xff]  }
  0x51   : > { %1820 = vmatmul.mubr.bf16.vlgmr.msra.gmra.mxu0 %v4452_v34  ;;  %v4550_v34 = vld [vmem:[%s4930_s30 + $0x200] ss:$16 sps:$4 sm:$0xff]  }
  0x52   : > { %1827 = vmatprep.mubr.bf16.mxu0 %v4458_v35  ;;  %v4554_v35 = vld [vmem:[%s4930_s30 + $0x224] ss:$16 sps:$4 sm:$0xff]  }
  0x55   : > { %2309 = vmatmul.mubr.bf16.gmra.mxu1 %v4475_v40  ;;  %v4571_v40 = vld [vmem:[%s4930_s30 + $0x288] ss:$16 sps:$4 sm:$0xff]  }
  0x56   : > { %4055 = vmatprep.mubr.msk.bf16.mxu1 %vm1627_vm0, %v4479_v41  ;;  %v4575_v41 = vld [vmem:[%s4930_s30 + $0x2ac] ss:$16 sps:$4 sm:$0xff]  }
  0x59   : > { %1828 = vmatmul.mubr.bf16.gmra.mxu0 %v4460_v38  ;;  %v4556_v38 = vld [vmem:[%s4930_s30 + $0x220] ss:$16 sps:$4 sm:$0xff]  }
  0x5a   : > { %1835 = vmatprep.mubr.bf16.mxu0 %v4464_v39  ;;  %v4560_v39 = vld [vmem:[%s4930_s30 + $0x244] ss:$16 sps:$4 sm:$0xff]  }
  0x5d   : > { %2317 = vmatmul.mubr.bf16.gmra.mxu1 %v4481_v44  ;;  %v4577_v44 = vld [vmem:[%s4930_s30 + $0x2a8] ss:$16 sps:$4 sm:$0xff]  }
  0x5e   : > { %4056 = vmatprep.mubr.msk.bf16.mxu1 %vm1627_vm0, %v4485_v45  ;;  %v4581_v45 = vld [vmem:[%s4930_s30 + $0x2cc] ss:$16 sps:$4 sm:$0xff]  }
  0x61   : > { %1836 = vmatmul.mubr.bf16.gmra.mxu0 %v4466_v42  ;;  %v4562_v42 = vld [vmem:[%s4930_s30 + $0x240] ss:$16 sps:$4 sm:$0xff]  }
  0x62   : > { %1843 = vmatprep.mubr.bf16.mxu0 %v4470_v43  ;;  %v4566_v43 = vld [vmem:[%s4930_s30 + $0x264] ss:$16 sps:$4 sm:$0xff]  }
  0x65   : > { %2325 = vmatmul.mubr.bf16.gmra.mxu1 %v4487_v48  ;;  %v4583_v48 = vld [vmem:[%s4930_s30 + $0x2c8] ss:$16 sps:$4 sm:$0xff]  }
  0x66   : > { %4057 = vmatprep.mubr.msk.bf16.mxu1 %vm1627_vm0, %v4491_v49  ;;  %v4587_v49 = vld [vmem:[%s4930_s30 + $0x2ec] ss:$16 sps:$4 sm:$0xff]  }
  0x69   : > { %1844 = vmatmul.mubr.bf16.gmra.mxu0 %v4472_v46  ;;  %v4568_v46 = vld [vmem:[%s4930_s30 + $0x260] ss:$16 sps:$4 sm:$0xff]  }
  0x6a   : > { %1851 = vmatprep.mubr.bf16.mxu0 %v4476_v47  ;;  %v4572_v47 = vld [vmem:[%s4930_s30 + $0x284] ss:$16 sps:$4 sm:$0xff]  }
  0x6d   : > { %2333 = vmatmul.mubr.bf16.gmra.mxu1 %v4493_v52  ;;  %v4589_v52 = vld [vmem:[%s4930_s30 + $0x2e8] ss:$16 sps:$4 sm:$0xff]  }
  0x6e   : > { %4058 = vmatprep.mubr.msk.bf16.mxu1 %vm1627_vm0, %v4497_v53  ;;  %v4593_v53 = vld [vmem:[%s4930_s30 + $0x30c] ss:$16 sps:$4 sm:$0xff]  }
  0x71   : > { %1852 = vmatmul.mubr.bf16.gmra.mxu0 %v4478_v50  ;;  %v4574_v50 = vld [vmem:[%s4930_s30 + $0x280] ss:$16 sps:$4 sm:$0xff]  }
  0x72   : > { %1859 = vmatprep.mubr.bf16.mxu0 %v4482_v51  ;;  %v4578_v51 = vld [vmem:[%s4930_s30 + $0x2a4] ss:$16 sps:$4 sm:$0xff]  }
  0x75   : > { %2341 = vmatmul.mubr.bf16.gmra.mxu1 %v4499_v56  ;;  %v4595_v56 = vld [vmem:[%s4930_s30 + $0x308] ss:$16 sps:$4 sm:$0xff]  }
  0x76   : > { %4059 = vmatprep.mubr.msk.bf16.mxu1 %vm1627_vm0, %v4503_v57  ;;  %v4598_v57 = vld [vmem:[%s4930_s30 + $0x32c] ss:$16 sps:$4 sm:$0xff]  }
  0x79   : > { %1860 = vmatmul.mubr.bf16.gmra.mxu0 %v4484_v54  ;;  %v4580_v54 = vld [vmem:[%s4930_s30 + $0x2a0] ss:$16 sps:$4 sm:$0xff]  }
  0x7a   : > { %1867 = vmatprep.mubr.bf16.mxu0 %v4488_v55  ;;  %v4584_v55 = vld [vmem:[%s4930_s30 + $0x2c4] ss:$16 sps:$4 sm:$0xff]  }
  0x7d   : > { %2349 = vmatmul.mubr.bf16.gmra.mxu1 %v4505_v60  ;;  %v302_v60 = vld [vmem:[%s4930_s30 + $0x328] sm:$0xff] }
  0x7e   : > { %4060 = vmatprep.mubr.msk.bf16.mxu1 %vm1627_vm0, %v4509_v61  ;;  %v304_v61 = vld [vmem:[%s4930_s30 + $0x338] sm:$0xff] }
  0x81   : > { %1868 = vmatmul.mubr.bf16.gmra.mxu0 %v4490_v58 }
  0x82   : > { %1875 = vmatprep.mubr.bf16.mxu0 %v4494_v59  ;;  %v4586_v59 = vld [vmem:[%s4930_s30 + $0x2c0] ss:$16 sps:$4 sm:$0xff]  }
  0x85   : > { %2357 = vmatmul.mubr.bf16.gmra.mxu1 %v4511_v0 }
  0x86   : > { %4061 = vmatprep.mubr.msk.bf16.mxu1 %vm1627_vm0, %v4515_v1  ;;  %v3915_v1 = vcombine.low %v302_v60, %v304_v61  ;;  %v318_v60 = vld [vmem:[%s4930_s30 + $0x3a8] sm:$0xff]  ;;  %v320_v61 = vld [vmem:[%s4930_s30 + $0x3b8] sm:$0xff] }
  0x89   : > { %1876 = vmatmul.mubr.bf16.gmra.mxu0 %v4496_v62  ;;  %v4590_v62 = vld [vmem:[%s4930_s30 + $0x2e4] ss:$16 sps:$4 sm:$0xff]  }
  0x8a   : > { %1883 = vmatprep.mubr.bf16.mxu0 %v4500_v63 }
  0x8d   : > { %2365 = vmatmul.mubr.bf16.gmra.mxu1 %v4517_v4 }
  0x8e   : > { %4062 = vmatprep.mubr.msk.bf16.mxu1 %vm1627_vm0, %v4521_v5  ;;  %v4592_v5 = vld [vmem:[%s4930_s30 + $0x2e0] ss:$16 sps:$4 sm:$0xff]  }
  0x91   : > { %1884 = vmatmul.mubr.bf16.gmra.mxu0 %v4502_v2  ;;  %v4602_v2 = vld [vmem:[%s4930_s30 + $0x34c] ss:$16 sps:$4 sm:$0xff]  }
  0x92   : > { %1891 = vmatprep.mubr.bf16.mxu0 %v4506_v3 }
  0x95   : > { %2373 = vmatmul.mubr.bf16.gmra.mxu1 %v4523_v8  ;;  %v4596_v8 = vld [vmem:[%s4930_s30 + $0x304] ss:$16 sps:$4 sm:$0xff]  }
  0x96   : > { %4063 = vmatprep.mubr.msk.bf16.mxu1 %vm1627_vm0, %v4527_v9 }
  0x99   : > { %1892 = vmatmul.mubr.bf16.gmra.mxu0 %v4508_v6  ;;  %v306_v6 = vld [vmem:[%s4930_s30 + $0x348] sm:$0xff] }
  0x9a   : > { %1899 = vmatprep.mubr.bf16.mxu0 %v4512_v7  ;;  %v308_v7 = vld [vmem:[%s4930_s30 + $0x358] sm:$0xff] }
  0x9d   : > { %2381 = vmatmul.mubr.bf16.gmra.mxu1 %v4529_v12  ;;  %v4606_v12 = vld [vmem:[%s4930_s30 + $0x36c] ss:$16 sps:$4 sm:$0xff]  }
  0x9e   : > { %4064 = vmatprep.mubr.msk.bf16.mxu1 %vm1627_vm0, %v4533_v13  ;;  %v297_v13 = vld [vmem:[%s4930_s30 + $0x300] sm:$0xff] }
  0xa1   : > { %1900 = vmatmul.mubr.bf16.gmra.mxu0 %v4514_v10 }
  0xa2   : > { %1907 = vmatprep.mubr.bf16.mxu0 %v4518_v11  ;;  %v3919_v11 = vcombine.low %v306_v6, %v308_v7  ;;  %v3931_v6 = vcombine.low %v318_v60, %v320_v61 }
  0xa5   : > { %2389 = vmatmul.mubr.bf16.gmra.mxu1 %v4535_v16 }
  0xa6   : > { %4065 = vmatprep.mubr.msk.bf16.mxu1 %vm1627_vm0, %v4539_v17 }
  0xa9   : > { %1908 = vmatmul.mubr.bf16.gmra.mxu0 %v4520_v14  ;;  %v299_v14 = vld [vmem:[%s4930_s30 + $0x310] sm:$0xff] }
  0xaa   : > { %1915 = vmatprep.mubr.bf16.mxu0 %v4524_v15  ;;  %v3909_v17 = vcombine.low %v297_v13, %v299_v14  ;;  %v311_v13 = vld [vmem:[%s4930_s30 + $0x370] sm:$0xff] }
  0xad   : > { %2397 = vmatmul.mubr.bf16.gmra.mxu1 %v4541_v20  ;;  %v4600_v20 = vld [vmem:[%s4930_s30 + $0x324] ss:$16 sps:$4 sm:$0xff]  }
  0xae   : > { %4066 = vmatprep.mubr.msk.bf16.mxu1 %vm1627_vm0, %v4545_v21 }
  0xb1   : > { %1916 = vmatmul.mubr.bf16.gmra.mxu0 %v4526_v18  ;;  %v310_v18 = vld [vmem:[%s4930_s30 + $0x368] sm:$0xff] }
  0xb2   : > { %1923 = vmatprep.mubr.bf16.mxu0 %v4530_v19  ;;  %v312_v19 = vld [vmem:[%s4930_s30 + $0x378] sm:$0xff] }
  0xb5   : > { %2405 = vmatmul.mubr.bf16.gmra.mxu1 %v4547_v24  ;;  %v3923_v24 = vcombine.low %v310_v18, %v312_v19 }
  0xb6   : > { %4067 = vmatprep.mubr.msk.bf16.mxu1 %vm1627_vm0, %v4551_v25 }
  0xb9   : > { %1924 = vmatmul.mubr.bf16.gmra.mxu0 %v4532_v22  ;;  %v5133_v22 = vld [vmem:[%s5984_s2] ss:$0 sm:$0xff] }
  0xba   : > { %1931 = vmatprep.mubr.bf16.mxu0 %v4536_v23 }
  0xbd   : > { %2413 = vmatmul.mubr.bf16.gmra.mxu1 %v4553_v28  ;;  %v301_v28 = vld [vmem:[%s4930_s30 + $0x320] sm:$0xff] }
  0xbe   : > { %4068 = vmatprep.mubr.msk.bf16.mxu1 %vm1627_vm0, %v4557_v29  ;;  %v303_v29 = vld [vmem:[%s4930_s30 + $0x330] sm:$0xff] }
  0xc1   : > { %1932 = vmatmul.mubr.bf16.gmra.mxu0 %v4538_v26  ;;  %v4610_v26 = vld [vmem:[%s4930_s30 + $0x38c] ss:$16 sps:$4 sm:$0xff]  }
  0xc2   : > { %1939 = vmatprep.mubr.bf16.mxu0 %v4542_v27 }
  0xc5   : > { %2421 = vmatmul.mubr.bf16.gmra.mxu1 %v4559_v32 }
  0xc6   : > { %4069 = vmatprep.mubr.msk.bf16.mxu1 %vm1627_vm0, %v4563_v33 }
  0xc9   : > { %1940 = vmatmul.mubr.bf16.gmra.mxu0 %v4544_v30 }
  0xca   : > { %1947 = vmatprep.mubr.bf16.mxu0 %v4548_v31 }
  0xcd   : > { %2429 = vmatmul.mubr.bf16.gmra.mxu1 %v4565_v36  ;;  %v314_v36 = vld [vmem:[%s4930_s30 + $0x388] sm:$0xff] }
  0xce   : > { %4070 = vmatprep.mubr.msk.bf16.mxu1 %vm1627_vm0, %v4569_v37  ;;  %v316_v37 = vld [vmem:[%s4930_s30 + $0x398] sm:$0xff] }
  0xd1   : > { %1948 = vmatmul.mubr.bf16.gmra.mxu0 %v4550_v34 }
  0xd2   : > { %1955 = vmatprep.mubr.bf16.mxu0 %v4554_v35  ;;  %v3913_v35 = vcombine.low %v301_v28, %v303_v29 }
  0xd5   : > { %2437 = vmatmul.mubr.bf16.gmra.mxu1 %v4571_v40  ;;  %v4604_v40 = vld [vmem:[%s4930_s30 + $0x344] ss:$16 sps:$4 sm:$0xff]  }
  0xd6   : > { %4071 = vmatprep.mubr.msk.bf16.mxu1 %vm1627_vm0, %v4575_v41 }
  0xd9   : > { %1956 = vmatmul.mubr.bf16.gmra.mxu0 %v4556_v38 }
  0xda   : > { %1963 = vmatprep.mubr.bf16.mxu0 %v4560_v39 }
  0xdd   : > { %2445 = vmatmul.mubr.bf16.gmra.mxu1 %v4577_v44 }
  0xde   : > { %4072 = vmatprep.mubr.msk.bf16.mxu1 %vm1627_vm0, %v4581_v45 }
  0xe1   : > { %1964 = vmatmul.mubr.bf16.gmra.mxu0 %v4562_v42 }
  0xe2   : > { %1971 = vmatprep.mubr.bf16.mxu0 %v4566_v43 }
  0xe5   : > { %2453 = vmatmul.mubr.bf16.gmra.mxu1 %v4583_v48  ;;  %v4615_v48 = vld [vmem:[%s4930_s30 + $0x3ac] ss:$16 sps:$4 sm:$0xff]  }
  0xe6   : > { %4073 = vmatprep.mubr.msk.bf16.mxu1 %vm1627_vm0, %v4587_v49 }
  0xe9   : > { %1972 = vmatmul.mubr.bf16.gmra.mxu0 %v4568_v46  ;;  %v3927_v46 = vcombine.low %v314_v36, %v316_v37 }
  0xea   : > { %1979 = vmatprep.mubr.bf16.mxu0 %v4572_v47 }
  0xed   : > { %2461 = vmatmul.mubr.bf16.gmra.mxu1 %v4589_v52  ;;  %v307_v52 = vld [vmem:[%s4930_s30 + $0x350] sm:$0xff] }
  0xee   : > { %4074 = vmatprep.mubr.msk.bf16.mxu1 %vm1627_vm0, %v4593_v53 }
  0xf1   : > { %1980 = vmatmul.mubr.bf16.gmra.mxu0 %v4574_v50 }
  0xf2   : > { %1987 = vmatprep.mubr.bf16.mxu0 %v4578_v51  ;;  %v305_v51 = vld [vmem:[%s4930_s30 + $0x340] sm:$0xff] }
  0xf5   : > { %v2278_v58 = vpop.f32.mrf.mxu1  ;;  %2469 = vmatmul.mubr.bf16.gmra.mxu1 %v4595_v56 }
  0xf6   : > { %4075 = vmatprep.mubr.msk.bf16.mxu1 %vm1627_vm0, %v4598_v57 }
  0xf7   : > { %v2280_v63 = vpop.f32.mrf.mxu1 }
  0xf9   : > { %1988 = vmatmul.mubr.bf16.gmra.mxu0 %v4580_v54  ;;  %v2281_v0 = vpop.f32.mrf.mxu1 }
  0xfa   : > { %1995 = vmatprep.mubr.bf16.mxu0 %v4584_v55 }
  0xfb   : > { %v2283_v3 = vpop.f32.mrf.mxu1 }
  0xfd   : > { %v5112_v4 = vpop.f32.mrf.mxu1  ;;  %2477 = vmatmul.mubr.bf16.gmra.mxu1 %v3915_v1 }
  0xfe   : > { %4076 = vmatprep.mubr.msk.bf16.mxu1 %vm1627_vm0, %v4602_v2 }
  0xff   : > { %v2288_v9 = vpop.f32.mrf.mxu1 }
 0x101   : > { %1996 = vmatmul.mubr.bf16.gmra.mxu0 %v4586_v59  ;;  %v5119_v10 = vpop.f32.mrf.mxu1  ;;  %v3917_v59 = vcombine.low %v305_v51, %v307_v52 }
 0x102   : > { %2003 = vmatprep.mubr.bf16.mxu0 %v4590_v62 }
 0x103   : > { %v2291_v15 = vpop.f32.mrf.mxu1 }
 0x105   : > { %v5124_v16 = vpop.f32.mrf.mxu1  ;;  %2485 = vmatmul.mubr.bf16.gmra.mxu1 %v3919_v11 }
 0x106   : > { %4077 = vmatprep.mubr.msk.bf16.mxu1 %vm1627_vm0, %v4606_v12  ;;  %v309_v12 = vld [vmem:[%s4930_s30 + $0x360] sm:$0xff] }
 0x107   : > { %v2296_v21 = vpop.f32.mrf.mxu1 }
 0x108   : > { %v322_v21 = vld [vmem:[%s4930_s30 + $0x3c8] sm:$0xff] }
 0x109   : > { %2004 = vmatmul.mubr.bf16.gmra.mxu0 %v4592_v5  ;;  %v5136_v23 = vpop.f32.mrf.mxu1 }
 0x10a   : > { %2011 = vmatprep.mubr.bf16.mxu0 %v4596_v8  ;;  %v4620_v8 = vld [vmem:[%s4930_s30 + $0x3cc] ss:$16 sps:$4 sm:$0xff]  }
 0x10b   : > { %v2299_v30 = vpop.f32.mrf.mxu1 }
 0x10d   : > { %v5142_v33 = vpop.f32.mrf.mxu1  ;;  %2493 = vmatmul.mubr.bf16.gmra.mxu1 %v3923_v24  ;;  %v324_v24 = vld [vmem:[%s4930_s30 + $0x3d8] sm:$0xff] }
 0x10e   : > { %4078 = vmatprep.mubr.msk.bf16.mxu1 %vm1627_vm0, %v4610_v26 }
 0x10f   : > { %v2304_v41 = vpop.f32.mrf.mxu1 }
 0x111   : > { %v1821_v25 = vpop.f32.mrf.mxu0  ;;  %2012 = vmatmul.mubr.bf16.gmra.mxu0 %v3909_v17  ;;  %v5149_v45 = vpop.f32.mrf.mxu1 }
 0x112   : > { %v1822_v27 = vadd.f32 %v5133_v22, %v1821_v25  ;;  %2019 = vmatprep.mubr.bf16.mxu0 %v4600_v20  ;;  %v3921_v20 = vcombine.low %v309_v12, %v311_v13 }
 0x113   : > { %v1823_v31 = vpop.f32.mrf.mxu0  ;;  %v2307_v53 = vpop.f32.mrf.mxu1 }
 0x114   : > { %v2279_v32 = vadd.f32 %v2278_v58, %v1822_v27  ;;  %v4614_v27 = vld [vmem:[%s4930_s30 + $0x384] ss:$16 sps:$4 sm:$0xff]  }
 0x115   : > { %v1824_v34 = vpop.f32.mrf.mxu0  ;;  %v5160_v57 = vpop.f32.mrf.mxu1  ;;  %2501 = vmatmul.mubr.bf16.gmra.mxu1 %v3927_v46  ;;  %v328_v46 = vld [vmem:[%s4930_s30 + $0x3f8] sm:$0xff] }
 0x116   : > { %v2701_v38 = vmax.f32 %v2279_v32, 0.0  ;;  %v1825_v39 = vadd.f32 %v5133_v22, %v1824_v34  ;;  %4079 = vmatprep.mubr.msk.bf16.mxu1 %vm1627_vm0, %v4615_v48  ;;  %v3935_v32 = vcombine.low %v322_v21, %v324_v24 }
 0x117   : > { %v1826_v42 = vpop.f32.mrf.mxu0  ;;  %v2312_v1 = vpop.f32.mrf.mxu1 }
 0x118   : > { %v4225_v43 = vpack.c.bf16 %v2701_v38, %v2701_v38  ;;  %v2282_v44 = vadd.f32 %v2281_v0, %v1825_v39  ;;  %v4608_v0 = vld [vmem:[%s4930_s30 + $0x364] ss:$16 sps:$4 sm:$0xff]   ;;  %v4617_v1 = vld [vmem:[%s4930_s30 + $0x3a0] ss:$16 sps:$4 sm:$0xff]  }
 0x119   : > { %v1829_v47 = vpop.f32.mrf.mxu0  ;;  %2020 = vmatmul.mubr.bf16.gmra.mxu0 %v3913_v35  ;;  %v5170_v5 = vpop.f32.mrf.mxu1  ;;  %v4625_v35 = vld [vmem:[%s4930_s30 + $0x3ec] ss:$16 sps:$4 sm:$0xff]  }
 0x11a   : > { %3232 = vst.msk [vmem:[%s5152_s12] sm:$0xf] %vm3231_vm1, %v4225_v43  ;;  %v2702_v49 = vmax.f32 %v2282_v44, 0.0  ;;  %v1830_v50 = vadd.f32 %v5133_v22, %v1829_v47  ;;  %2027 = vmatprep.mubr.bf16.mxu0 %v4604_v40  ;;  %v4612_v43 = vld [vmem:[%s4930_s30 + $0x380] ss:$16 sps:$4 sm:$0xff]   ;;  %v326_v44 = vld [vmem:[%s4930_s30 + $0x3e8] sm:$0xff] }
 0x11b   : > { %v1831_v54 = vpop.f32.mrf.mxu0  ;;  %v2315_v14 = vpop.f32.mrf.mxu1 }
 0x11c   : > { %v4226_v55 = vpack.c.bf16 %v2702_v49, %v2702_v49  ;;  %v2287_v56 = vadd.f32 %v5112_v4, %v1830_v50  ;;  %v4619_v49 = vld [vmem:[%s4930_s30 + $0x3a4] ss:$16 sps:$4 sm:$0xff]   ;;  %v3939_v54 = vcombine.low %v326_v44, %v328_v46 }
 0x11d   : > { %v1832_v58 = vpop.f32.mrf.mxu0  ;;  %v5179_v18 = vpop.f32.mrf.mxu1  ;;  %2509 = vmatmul.mubr.bf16.gmra.mxu1 %v3931_v6 }
 0x11e   : > { %3233 = vst.msk [vmem:[%s5152_s12 + $0x4] sm:$0xf] %vm3231_vm1, %v4226_v55  ;;  %v2703_v62 = vmax.f32 %v2287_v56, 0.0  ;;  %v1833_v63 = vadd.f32 %v5133_v22, %v1832_v58  ;;  %4080 = vmatprep.mubr.msk.bf16.mxu1 %vm1627_vm0, %v4620_v8  ;;  %v4630_v56 = vld [vmem:[%s4930_s30 + $0x40c] ss:$16 sps:$4 sm:$0xff]  }
 0x11f   : > { %v1834_v2 = vpop.f32.mrf.mxu0  ;;  %v2320_v28 = vpop.f32.mrf.mxu1 }
 0x120   : > { %v4227_v3 = vpack.c.bf16 %v2703_v62, %v2703_v62  ;;  %v2290_v4 = vadd.f32 %v5119_v10, %v1833_v63  ;;  %v330_v2 = vld [vmem:[%s4930_s30 + $0x408] sm:$0xff]  ;;  %v336_v28 = vld [vmem:[%s4930_s30 + $0x438] sm:$0xff] }
 0x121   : > { %v1837_v7 = vpop.f32.mrf.mxu0  ;;  %2028 = vmatmul.mubr.bf16.gmra.mxu0 %v3917_v59  ;;  %v5189_v31 = vpop.f32.mrf.mxu1 }
 0x122   : > { %3234 = vst.msk [vmem:[%s5152_s12 + $0x8] sm:$0xf] %vm3231_vm1, %v4227_v3  ;;  %v2704_v9 = vmax.f32 %v2290_v4, 0.0  ;;  %v1838_v11 = vadd.f32 %v5133_v22, %v1837_v7  ;;  %2035 = vmatprep.mubr.bf16.mxu0 %v4608_v0  ;;  %v332_v3 = vld [vmem:[%s4930_s30 + $0x418] sm:$0xff]  ;;  %v4624_v7 = vld [vmem:[%s4930_s30 + $0x3c4] ss:$16 sps:$4 sm:$0xff]  }
 0x123   : > { %v1839_v10 = vpop.f32.mrf.mxu0  ;;  %v2323_v38 = vpop.f32.mrf.mxu1  ;;  %v3943_v13 = vcombine.low %v330_v2, %v332_v3 }
 0x124   : > { %v4228_v15 = vpack.c.bf16 %v2704_v9, %v2704_v9  ;;  %v2295_v17 = vadd.f32 %v5124_v16, %v1838_v11  ;;  %v4635_v10 = vld [vmem:[%s4930_s30 + $0x42c] ss:$16 sps:$4 sm:$0xff]  }
 0x125   : > { %v1840_v19 = vpop.f32.mrf.mxu0  ;;  %v5196_v41 = vpop.f32.mrf.mxu1  ;;  %2517 = vmatmul.mubr.bf16.gmra.mxu1 %v3935_v32 }
 0x126   : > { %3235 = vst.msk [vmem:[%s5152_s12 + $0xc] sm:$0xf] %vm3231_vm1, %v4228_v15  ;;  %v2705_v25 = vmax.f32 %v2295_v17, 0.0  ;;  %v1841_v26 = vadd.f32 %v5133_v22, %v1840_v19  ;;  %4081 = vmatprep.mubr.msk.bf16.mxu1 %vm1627_vm0, %v4625_v35 }
 0x127   : > { %v1842_v29 = vpop.f32.mrf.mxu0  ;;  %v2328_v50 = vpop.f32.mrf.mxu1 }
 0x128   : > { %v4229_v16 = vpack.c.bf16 %v2705_v25, %v2705_v25  ;;  %v2298_v30 = vadd.f32 %v5136_v23, %v1841_v26  ;;  %v4622_v26 = vld [vmem:[%s4930_s30 + $0x3c0] ss:$16 sps:$4 sm:$0xff]   ;;  %v340_v50 = vld [vmem:[%s4930_s30 + $0x458] sm:$0xff] }
 0x129   : > { %v1845_v34 = vpop.f32.mrf.mxu0  ;;  %2036 = vmatmul.mubr.bf16.gmra.mxu0 %v3921_v20  ;;  %v5207_v53 = vpop.f32.mrf.mxu1 }
 0x12a   : > { %3236 = vst.msk [vmem:[%s5152_s12 + $0x10] sm:$0xf] %vm3231_vm1, %v4229_v16  ;;  %v2706_v36 = vmax.f32 %v2298_v30, 0.0  ;;  %v1846_v37 = vadd.f32 %v5133_v22, %v1845_v34  ;;  %2043 = vmatprep.mubr.bf16.mxu0 %v4614_v27  ;;  %v334_v27 = vld [vmem:[%s4930_s30 + $0x428] sm:$0xff]  ;;  %v4629_v30 = vld [vmem:[%s4930_s30 + $0x3e4] ss:$16 sps:$4 sm:$0xff]  }
 0x12b   : > { %v1847_v39 = vpop.f32.mrf.mxu0  ;;  %v2331_v60 = vpop.f32.mrf.mxu1 }
 0x12c   : > { %v4230_v23 = vpack.c.bf16 %v2706_v36, %v2706_v36  ;;  %v2303_v40 = vadd.f32 %v5142_v33, %v1846_v37  ;;  %v3947_v37 = vcombine.low %v334_v27, %v336_v28  ;;  %v4640_v39 = vld [vmem:[%s4930_s30 + $0x44c] ss:$16 sps:$4 sm:$0xff]  }
 0x12d   : > { %v1848_v42 = vpop.f32.mrf.mxu0  ;;  %v5214_v63 = vpop.f32.mrf.mxu1  ;;  %2525 = vmatmul.mubr.bf16.gmra.mxu1 %v3939_v54 }
 0x12e   : > { %3237 = vst.msk [vmem:[%s5152_s12 + $0x14] sm:$0xf] %vm3231_vm1, %v4230_v23  ;;  %v2707_v47 = vmax.f32 %v2303_v40, 0.0  ;;  %v1849_v48 = vadd.f32 %v5133_v22, %v1848_v42  ;;  %4082 = vmatprep.mubr.msk.bf16.mxu1 %vm1627_vm0, %v4630_v56 }
 0x12f   : > { %v1850_v51 = vpop.f32.mrf.mxu0  ;;  %v2336_v8 = vpop.f32.mrf.mxu1 }
 0x130   : > { %v4231_v33 = vpack.c.bf16 %v2707_v47, %v2707_v47  ;;  %v2306_v52 = vadd.f32 %v5149_v45, %v1849_v48  ;;  %v4627_v48 = vld [vmem:[%s4930_s30 + $0x3e0] ss:$16 sps:$4 sm:$0xff]   ;;  %v344_v8 = vld [vmem:[%s4930_s30 + $0x478] sm:$0xff] }
 0x131   : > { %v1853_v55 = vpop.f32.mrf.mxu0  ;;  %2044 = vmatmul.mubr.bf16.gmra.mxu0 %v4612_v43  ;;  %v5225_v12 = vpop.f32.mrf.mxu1 }
 0x132   : > { %3238 = vst.msk [vmem:[%s5152_s12 + $0x18] sm:$0xf] %vm3231_vm1, %v4231_v33  ;;  %v2708_v58 = vmax.f32 %v2306_v52, 0.0  ;;  %v1854_v59 = vadd.f32 %v5133_v22, %v1853_v55  ;;  %2051 = vmatprep.mubr.bf16.mxu0 %v4619_v49  ;;  %v338_v49 = vld [vmem:[%s4930_s30 + $0x448] sm:$0xff]  ;;  %v4634_v52 = vld [vmem:[%s4930_s30 + $0x404] ss:$16 sps:$4 sm:$0xff]  }
 0x133   : > { %v1855_v61 = vpop.f32.mrf.mxu0  ;;  %v2339_v19 = vpop.f32.mrf.mxu1 }
 0x134   : > { %v4232_v45 = vpack.c.bf16 %v2708_v58, %v2708_v58  ;;  %v2311_v62 = vadd.f32 %v5160_v57, %v1854_v59  ;;  %v3951_v59 = vcombine.low %v338_v49, %v340_v50  ;;  %v4645_v61 = vld [vmem:[%s4930_s30 + $0x46c] ss:$16 sps:$4 sm:$0xff]  }
 0x135   : > { %v1856_v0 = vpop.f32.mrf.mxu0  ;;  %v5232_v24 = vpop.f32.mrf.mxu1  ;;  %2533 = vmatmul.mubr.bf16.gmra.mxu1 %v3943_v13 }
 0x136   : > { %3239 = vst.msk [vmem:[%s5152_s12 + $0x1c] sm:$0xf] %vm3231_vm1, %v4232_v45  ;;  %v2709_v4 = vmax.f32 %v2311_v62, 0.0  ;;  %v1857_v6 = vadd.f32 %v5133_v22, %v1856_v0  ;;  %4083 = vmatprep.mubr.msk.bf16.mxu1 %vm1627_vm0, %v4635_v10 }
 0x137   : > { %v1858_v9 = vpop.f32.mrf.mxu0  ;;  %v2344_v32 = vpop.f32.mrf.mxu1 }
 0x138   : > { %v4233_v57 = vpack.c.bf16 %v2709_v4, %v2709_v4  ;;  %v2314_v11 = vadd.f32 %v5170_v5, %v1857_v6  ;;  %v4632_v6 = vld [vmem:[%s4930_s30 + $0x400] ss:$16 sps:$4 sm:$0xff]   ;;  %v348_v32 = vld [vmem:[%s4930_s30 + $0x498] sm:$0xff] }
 0x139   : > { %v1861_v14 = vpop.f32.mrf.mxu0  ;;  %2052 = vmatmul.mubr.bf16.gmra.mxu0 %v4617_v1  ;;  %v5243_v36 = vpop.f32.mrf.mxu1 }
 0x13a   : > { %3240 = vst.msk [vmem:[%s5152_s12 + $0x20] sm:$0xf] %vm3231_vm1, %v4233_v57  ;;  %v2710_v15 = vmax.f32 %v2314_v11, 0.0  ;;  %v1862_v17 = vadd.f32 %v5133_v22, %v1861_v14  ;;  %2059 = vmatprep.mubr.bf16.mxu0 %v4624_v7  ;;  %v342_v7 = vld [vmem:[%s4930_s30 + $0x468] sm:$0xff]  ;;  %v4639_v11 = vld [vmem:[%s4930_s30 + $0x424] ss:$16 sps:$4 sm:$0xff]  }
 0x13b   : > { %v1863_v20 = vpop.f32.mrf.mxu0  ;;  %v2347_v42 = vpop.f32.mrf.mxu1 }
 0x13c   : > { %v4234_v5 = vpack.c.bf16 %v2710_v15, %v2710_v15  ;;  %v2319_v21 = vadd.f32 %v5179_v18, %v1862_v17  ;;  %v3955_v17 = vcombine.low %v342_v7, %v344_v8  ;;  %v4650_v20 = vld [vmem:[%s4930_s30 + $0x48c] ss:$16 sps:$4 sm:$0xff]  }
 0x13d   : > { %v1864_v25 = vpop.f32.mrf.mxu0  ;;  %v5250_v46 = vpop.f32.mrf.mxu1  ;;  %2541 = vmatmul.mubr.bf16.gmra.mxu1 %v3947_v37 }
 0x13e   : > { %3241 = vst.msk [vmem:[%s5152_s12 + $0x24] sm:$0xf] %vm3231_vm1, %v4234_v5  ;;  %v2711_v29 = vmax.f32 %v2319_v21, 0.0  ;;  %v1865_v16 = vadd.f32 %v5133_v22, %v1864_v25  ;;  %4084 = vmatprep.mubr.msk.bf16.mxu1 %vm1627_vm0, %v4640_v39 }
 0x13f   : > { %v1866_v34 = vpop.f32.mrf.mxu0  ;;  %v2352_v54 = vpop.f32.mrf.mxu1 }
 0x140   : > { %v4235_v18 = vpack.c.bf16 %v2711_v29, %v2711_v29  ;;  %v2322_v35 = vadd.f32 %v5189_v31, %v1865_v16  ;;  %v4637_v16 = vld [vmem:[%s4930_s30 + $0x420] ss:$16 sps:$4 sm:$0xff]   ;;  %v352_v54 = vld [vmem:[%s4930_s30 + $0x4b8] sm:$0xff] }
 0x141   : > { %v1869_v38 = vpop.f32.mrf.mxu0  ;;  %2060 = vmatmul.mubr.bf16.gmra.mxu0 %v4622_v26  ;;  %v5261_v58 = vpop.f32.mrf.mxu1 }
 0x142   : > { %3242 = vst.msk [vmem:[%s5152_s12 + $0x28] sm:$0xf] %vm3231_vm1, %v4235_v18  ;;  %v2712_v23 = vmax.f32 %v2322_v35, 0.0  ;;  %v1870_v40 = vadd.f32 %v5133_v22, %v1869_v38  ;;  %2067 = vmatprep.mubr.bf16.mxu0 %v4629_v30  ;;  %v346_v30 = vld [vmem:[%s4930_s30 + $0x488] sm:$0xff]  ;;  %v4644_v35 = vld [vmem:[%s4930_s30 + $0x444] ss:$16 sps:$4 sm:$0xff]  }
 0x143   : > { %v1871_v43 = vpop.f32.mrf.mxu0  ;;  %v2355_v0 = vpop.f32.mrf.mxu1 }
 0x144   : > { %v4236_v31 = vpack.c.bf16 %v2712_v23, %v2712_v23  ;;  %v2327_v44 = vadd.f32 %v5196_v41, %v1870_v40  ;;  %v3959_v40 = vcombine.low %v346_v30, %v348_v32  ;;  %v4655_v43 = vld [vmem:[%s4930_s30 + $0x4ac] ss:$16 sps:$4 sm:$0xff]  }
 0x145   : > { %v1872_v47 = vpop.f32.mrf.mxu0  ;;  %v5268_v3 = vpop.f32.mrf.mxu1  ;;  %2549 = vmatmul.mubr.bf16.gmra.mxu1 %v3951_v59 }
 0x146   : > { %3243 = vst.msk [vmem:[%s5152_s12 + $0x2c] sm:$0xf] %vm3231_vm1, %v4236_v31  ;;  %v2713_v51 = vmax.f32 %v2327_v44, 0.0  ;;  %v1873_v33 = vadd.f32 %v5133_v22, %v1872_v47  ;;  %4085 = vmatprep.mubr.msk.bf16.mxu1 %vm1627_vm0, %v4645_v61 }
 0x147   : > { %v1874_v55 = vpop.f32.mrf.mxu0  ;;  %v2360_v13 = vpop.f32.mrf.mxu1 }
 0x148   : > { %v4237_v41 = vpack.c.bf16 %v2713_v51, %v2713_v51  ;;  %v2330_v56 = vadd.f32 %v5207_v53, %v1873_v33  ;;  %v4642_v33 = vld [vmem:[%s4930_s30 + $0x440] ss:$16 sps:$4 sm:$0xff]   ;;  %v356_v13 = vld [vmem:[%s4930_s30 + $0x4d8] sm:$0xff] }
 0x149   : > { %v1877_v60 = vpop.f32.mrf.mxu0  ;;  %2068 = vmatmul.mubr.bf16.gmra.mxu0 %v4627_v48  ;;  %v5279_v15 = vpop.f32.mrf.mxu1 }
 0x14a   : > { %3244 = vst.msk [vmem:[%s5152_s12 + $0x30] sm:$0xf] %vm3231_vm1, %v4237_v41  ;;  %v2714_v45 = vmax.f32 %v2330_v56, 0.0  ;;  %v1878_v62 = vadd.f32 %v5133_v22, %v1877_v60  ;;  %2075 = vmatprep.mubr.bf16.mxu0 %v4634_v52  ;;  %v350_v52 = vld [vmem:[%s4930_s30 + $0x4a8] sm:$0xff]  ;;  %v4649_v56 = vld [vmem:[%s4930_s30 + $0x464] ss:$16 sps:$4 sm:$0xff]  }
 0x14b   : > { %v1879_v1 = vpop.f32.mrf.mxu0  ;;  %v2363_v25 = vpop.f32.mrf.mxu1 }
 0x14c   : > { %v4238_v53 = vpack.c.bf16 %v2714_v45, %v2714_v45  ;;  %v2335_v2 = vadd.f32 %v5214_v63, %v1878_v62  ;;  %v3963_v62 = vcombine.low %v350_v52, %v352_v54  ;;  %v4660_v1 = vld [vmem:[%s4930_s30 + $0x4cc] ss:$16 sps:$4 sm:$0xff]  }
 0x14d   : > { %v1880_v4 = vpop.f32.mrf.mxu0  ;;  %v5286_v28 = vpop.f32.mrf.mxu1  ;;  %2557 = vmatmul.mubr.bf16.gmra.mxu1 %v3955_v17 }
 0x14e   : > { %3245 = vst.msk [vmem:[%s5152_s12 + $0x34] sm:$0xf] %vm3231_vm1, %v4238_v53  ;;  %v2715_v9 = vmax.f32 %v2335_v2, 0.0  ;;  %v1881_v57 = vadd.f32 %v5133_v22, %v1880_v4  ;;  %4086 = vmatprep.mubr.msk.bf16.mxu1 %vm1627_vm0, %v4650_v20 }
 0x14f   : > { %v1882_v14 = vpop.f32.mrf.mxu0  ;;  %v2368_v37 = vpop.f32.mrf.mxu1 }
 0x150   : > { %v4239_v63 = vpack.c.bf16 %v2715_v9, %v2715_v9  ;;  %v2338_v10 = vadd.f32 %v5225_v12, %v1881_v57  ;;  %v4647_v57 = vld [vmem:[%s4930_s30 + $0x460] ss:$16 sps:$4 sm:$0xff]   ;;  %v360_v37 = vld [vmem:[%s4930_s30 + $0x4f8] sm:$0xff] }
 0x151   : > { %v1885_v19 = vpop.f32.mrf.mxu0  ;;  %2076 = vmatmul.mubr.bf16.gmra.mxu0 %v4632_v6  ;;  %v5297_v23 = vpop.f32.mrf.mxu1 }
 0x152   : > { %3246 = vst.msk [vmem:[%s5152_s12 + $0x38] sm:$0xf] %vm3231_vm1, %v4239_v63  ;;  %v2716_v5 = vmax.f32 %v2338_v10, 0.0  ;;  %v1886_v21 = vadd.f32 %v5133_v22, %v1885_v19  ;;  %2083 = vmatprep.mubr.bf16.mxu0 %v4639_v11  ;;  %v354_v11 = vld [vmem:[%s4930_s30 + $0x4c8] sm:$0xff]  ;;  %v4654_v10 = vld [vmem:[%s4930_s30 + $0x484] ss:$16 sps:$4 sm:$0xff]  }
 0x153   : > { %v1887_v26 = vpop.f32.mrf.mxu0  ;;  %v2371_v47 = vpop.f32.mrf.mxu1 }
 0x154   : > { %v4240_v12 = vpack.c.bf16 %v2716_v5, %v2716_v5  ;;  %v2343_v27 = vadd.f32 %v5232_v24, %v1886_v21  ;;  %v3967_v21 = vcombine.low %v354_v11, %v356_v13  ;;  %v4665_v26 = vld [vmem:[%s4930_s30 + $0x4ec] ss:$16 sps:$4 sm:$0xff]  }
 0x155   : > { %v1888_v29 = vpop.f32.mrf.mxu0  ;;  %v5304_v50 = vpop.f32.mrf.mxu1  ;;  %2565 = vmatmul.mubr.bf16.gmra.mxu1 %v3959_v40 }
 0x156   : > { %3247 = vst.msk [vmem:[%s5152_s12 + $0x3c] sm:$0xf] %vm3231_vm1, %v4240_v12  ;;  %v2717_v34 = vmax.f32 %v2343_v27, 0.0  ;;  %v1889_v18 = vadd.f32 %v5133_v22, %v1888_v29  ;;  %4087 = vmatprep.mubr.msk.bf16.mxu1 %vm1627_vm0, %v4655_v43 }
 0x157   : > { %v1890_v38 = vpop.f32.mrf.mxu0  ;;  %v2376_v59 = vpop.f32.mrf.mxu1 }
 0x158   : > { %v4241_v24 = vpack.c.bf16 %v2717_v34, %v2717_v34  ;;  %v2346_v39 = vadd.f32 %v5243_v36, %v1889_v18  ;;  %v4652_v18 = vld [vmem:[%s4930_s30 + $0x480] ss:$16 sps:$4 sm:$0xff]   ;;  %v364_v59 = vld [vmem:[%s4930_s30 + $0x518] sm:$0xff] }
 0x159   : > { %v1893_v42 = vpop.f32.mrf.mxu0  ;;  %2084 = vmatmul.mubr.bf16.gmra.mxu0 %v4637_v16  ;;  %v5315_v45 = vpop.f32.mrf.mxu1 }
 0x15a   : > { %3248 = vst.msk [vmem:[%s5152_s12 + $0x40] sm:$0xf] %vm3231_vm1, %v4241_v24  ;;  %v2718_v31 = vmax.f32 %v2346_v39, 0.0  ;;  %v1894_v44 = vadd.f32 %v5133_v22, %v1893_v42  ;;  %2091 = vmatprep.mubr.bf16.mxu0 %v4644_v35  ;;  %v358_v35 = vld [vmem:[%s4930_s30 + $0x4e8] sm:$0xff]  ;;  %v4659_v39 = vld [vmem:[%s4930_s30 + $0x4a4] ss:$16 sps:$4 sm:$0xff]  }
 0x15b   : > { %v1895_v48 = vpop.f32.mrf.mxu0  ;;  %v2379_v4 = vpop.f32.mrf.mxu1 }
 0x15c   : > { %v4242_v36 = vpack.c.bf16 %v2718_v31, %v2718_v31  ;;  %v2351_v49 = vadd.f32 %v5250_v46, %v1894_v44  ;;  %v3971_v44 = vcombine.low %v358_v35, %v360_v37  ;;  %v4670_v48 = vld [vmem:[%s4930_s30 + $0x50c] ss:$16 sps:$4 sm:$0xff]  }
 0x15d   : > { %v1896_v51 = vpop.f32.mrf.mxu0  ;;  %v5322_v8 = vpop.f32.mrf.mxu1  ;;  %2573 = vmatmul.mubr.bf16.gmra.mxu1 %v3963_v62 }
 0x15e   : > { %3249 = vst.msk [vmem:[%s5152_s12 + $0x44] sm:$0xf] %vm3231_vm1, %v4242_v36  ;;  %v2719_v55 = vmax.f32 %v2351_v49, 0.0  ;;  %v1897_v41 = vadd.f32 %v5133_v22, %v1896_v51  ;;  %4088 = vmatprep.mubr.msk.bf16.mxu1 %vm1627_vm0, %v4660_v1 }
 0x15f   : > { %v1898_v60 = vpop.f32.mrf.mxu0  ;;  %v2384_v17 = vpop.f32.mrf.mxu1 }
 0x160   : > { %v4243_v46 = vpack.c.bf16 %v2719_v55, %v2719_v55  ;;  %v2354_v61 = vadd.f32 %v5261_v58, %v1897_v41  ;;  %v4657_v41 = vld [vmem:[%s4930_s30 + $0x4a0] ss:$16 sps:$4 sm:$0xff]   ;;  %v368_v17 = vld [vmem:[%s4930_s30 + $0x538] sm:$0xff] }
 0x161   : > { %v1901_v0 = vpop.f32.mrf.mxu0  ;;  %2092 = vmatmul.mubr.bf16.gmra.mxu0 %v4642_v33  ;;  %v5333_v5 = vpop.f32.mrf.mxu1 }
 0x162   : > { %3250 = vst.msk [vmem:[%s5152_s12 + $0x48] sm:$0xf] %vm3231_vm1, %v4243_v46  ;;  %v2720_v53 = vmax.f32 %v2354_v61, 0.0  ;;  %v1902_v2 = vadd.f32 %v5133_v22, %v1901_v0  ;;  %2099 = vmatprep.mubr.bf16.mxu0 %v4649_v56  ;;  %v362_v56 = vld [vmem:[%s4930_s30 + $0x508] sm:$0xff]  ;;  %v4664_v61 = vld [vmem:[%s4930_s30 + $0x4c4] ss:$16 sps:$4 sm:$0xff]  }
 0x163   : > { %v1903_v6 = vpop.f32.mrf.mxu0  ;;  %v2387_v29 = vpop.f32.mrf.mxu1 }
 0x164   : > { %v4244_v58 = vpack.c.bf16 %v2720_v53, %v2720_v53  ;;  %v2359_v7 = vadd.f32 %v5268_v3, %v1902_v2  ;;  %v3975_v2 = vcombine.low %v362_v56, %v364_v59  ;;  %v4675_v6 = vld [vmem:[%s4930_s30 + $0x52c] ss:$16 sps:$4 sm:$0xff]  }
 0x165   : > { %v1904_v9 = vpop.f32.mrf.mxu0  ;;  %v5340_v32 = vpop.f32.mrf.mxu1  ;;  %2581 = vmatmul.mubr.bf16.gmra.mxu1 %v3967_v21 }
 0x166   : > { %3251 = vst.msk [vmem:[%s5152_s12 + $0x4c] sm:$0xf] %vm3231_vm1, %v4244_v58  ;;  %v2721_v14 = vmax.f32 %v2359_v7, 0.0  ;;  %v1905_v63 = vadd.f32 %v5133_v22, %v1904_v9  ;;  %4089 = vmatprep.mubr.msk.bf16.mxu1 %vm1627_vm0, %v4665_v26 }
 0x167   : > { %v1906_v19 = vpop.f32.mrf.mxu0  ;;  %v2392_v40 = vpop.f32.mrf.mxu1 }
 0x168   : > { %v4245_v3 = vpack.c.bf16 %v2721_v14, %v2721_v14  ;;  %v2362_v20 = vadd.f32 %v5279_v15, %v1905_v63  ;;  %v4662_v63 = vld [vmem:[%s4930_s30 + $0x4c0] ss:$16 sps:$4 sm:$0xff]   ;;  %v372_v40 = vld [vmem:[%s4930_s30 + $0x558] sm:$0xff] }
 0x169   : > { %v1909_v25 = vpop.f32.mrf.mxu0  ;;  %2100 = vmatmul.mubr.bf16.gmra.mxu0 %v4647_v57  ;;  %v5351_v31 = vpop.f32.mrf.mxu1 }
 0x16a   : > { %3252 = vst.msk [vmem:[%s5152_s12 + $0x50] sm:$0xf] %vm3231_vm1, %v4245_v3  ;;  %v2722_v12 = vmax.f32 %v2362_v20, 0.0  ;;  %v1910_v27 = vadd.f32 %v5133_v22, %v1909_v25  ;;  %2107 = vmatprep.mubr.bf16.mxu0 %v4654_v10  ;;  %v366_v10 = vld [vmem:[%s4930_s30 + $0x528] sm:$0xff]  ;;  %v4669_v20 = vld [vmem:[%s4930_s30 + $0x4e4] ss:$16 sps:$4 sm:$0xff]  }
 0x16b   : > { %v1911_v16 = vpop.f32.mrf.mxu0  ;;  %v2395_v51 = vpop.f32.mrf.mxu1 }
 0x16c   : > { %v4246_v15 = vpack.c.bf16 %v2722_v12, %v2722_v12  ;;  %v2367_v30 = vadd.f32 %v5286_v28, %v1910_v27  ;;  %v3979_v27 = vcombine.low %v366_v10, %v368_v17  ;;  %v4680_v16 = vld [vmem:[%s4930_s30 + $0x54c] ss:$16 sps:$4 sm:$0xff]  }
 0x16d   : > { %v1912_v34 = vpop.f32.mrf.mxu0  ;;  %v5358_v54 = vpop.f32.mrf.mxu1  ;;  %2589 = vmatmul.mubr.bf16.gmra.mxu1 %v3971_v44 }
 0x16e   : > { %3253 = vst.msk [vmem:[%s5152_s12 + $0x54] sm:$0xf] %vm3231_vm1, %v4246_v15  ;;  %v2723_v38 = vmax.f32 %v2367_v30, 0.0  ;;  %v1913_v24 = vadd.f32 %v5133_v22, %v1912_v34  ;;  %4090 = vmatprep.mubr.msk.bf16.mxu1 %vm1627_vm0, %v4670_v48 }
 0x16f   : > { %v1914_v42 = vpop.f32.mrf.mxu0  ;;  %v2400_v62 = vpop.f32.mrf.mxu1 }
 0x170   : > { %v4247_v28 = vpack.c.bf16 %v2723_v38, %v2723_v38  ;;  %v2370_v43 = vadd.f32 %v5297_v23, %v1913_v24  ;;  %v4667_v24 = vld [vmem:[%s4930_s30 + $0x4e0] ss:$16 sps:$4 sm:$0xff]   ;;  %v376_v62 = vld [vmem:[%s4930_s30 + $0x578] sm:$0xff] }
 0x171   : > { %v1917_v47 = vpop.f32.mrf.mxu0  ;;  %2108 = vmatmul.mubr.bf16.gmra.mxu0 %v4652_v18  ;;  %v5369_v53 = vpop.f32.mrf.mxu1 }
 0x172   : > { %3254 = vst.msk [vmem:[%s5152_s12 + $0x58] sm:$0xf] %vm3231_vm1, %v4247_v28  ;;  %v2724_v36 = vmax.f32 %v2370_v43, 0.0  ;;  %v1918_v49 = vadd.f32 %v5133_v22, %v1917_v47  ;;  %2115 = vmatprep.mubr.bf16.mxu0 %v4659_v39  ;;  %v370_v39 = vld [vmem:[%s4930_s30 + $0x548] sm:$0xff]  ;;  %v4674_v43 = vld [vmem:[%s4930_s30 + $0x504] ss:$16 sps:$4 sm:$0xff]  }
 0x173   : > { %v1919_v33 = vpop.f32.mrf.mxu0  ;;  %v2403_v9 = vpop.f32.mrf.mxu1 }
 0x174   : > { %v4248_v23 = vpack.c.bf16 %v2724_v36, %v2724_v36  ;;  %v2375_v52 = vadd.f32 %v5304_v50, %v1918_v49  ;;  %v3983_v49 = vcombine.low %v370_v39, %v372_v40  ;;  %v4685_v33 = vld [vmem:[%s4930_s30 + $0x56c] ss:$16 sps:$4 sm:$0xff]  }
 0x175   : > { %v1920_v55 = vpop.f32.mrf.mxu0  ;;  %v5376_v13 = vpop.f32.mrf.mxu1  ;;  %2597 = vmatmul.mubr.bf16.gmra.mxu1 %v3975_v2 }
 0x176   : > { %3255 = vst.msk [vmem:[%s5152_s12 + $0x5c] sm:$0xf] %vm3231_vm1, %v4248_v23  ;;  %v2725_v60 = vmax.f32 %v2375_v52, 0.0  ;;  %v1921_v46 = vadd.f32 %v5133_v22, %v1920_v55  ;;  %4091 = vmatprep.mubr.msk.bf16.mxu1 %vm1627_vm0, %v4675_v6 }
 0x177   : > { %v1922_v0 = vpop.f32.mrf.mxu0  ;;  %v2408_v21 = vpop.f32.mrf.mxu1 }
 0x178   : > { %v4249_v50 = vpack.c.bf16 %v2725_v60, %v2725_v60  ;;  %v2378_v1 = vadd.f32 %v5315_v45, %v1921_v46  ;;  %v4672_v46 = vld [vmem:[%s4930_s30 + $0x500] ss:$16 sps:$4 sm:$0xff]   ;;  %v380_v21 = vld [vmem:[%s4930_s30 + $0x598] sm:$0xff] }
 0x179   : > { %v1925_v4 = vpop.f32.mrf.mxu0  ;;  %2116 = vmatmul.mubr.bf16.gmra.mxu0 %v4657_v41  ;;  %v5387_v12 = vpop.f32.mrf.mxu1 }
 0x17a   : > { %3256 = vst.msk [vmem:[%s5152_s12 + $0x60] sm:$0xf] %vm3231_vm1, %v4249_v50  ;;  %v2726_v58 = vmax.f32 %v2378_v1, 0.0  ;;  %v1926_v7 = vadd.f32 %v5133_v22, %v1925_v4  ;;  %2123 = vmatprep.mubr.bf16.mxu0 %v4664_v61  ;;  %v374_v61 = vld [vmem:[%s4930_s30 + $0x568] sm:$0xff]  ;;  %v4679_v1 = vld [vmem:[%s4930_s30 + $0x524] ss:$16 sps:$4 sm:$0xff]  }
 0x17b   : > { %v1927_v57 = vpop.f32.mrf.mxu0  ;;  %v2411_v34 = vpop.f32.mrf.mxu1 }
 0x17c   : > { %v4250_v45 = vpack.c.bf16 %v2726_v58, %v2726_v58  ;;  %v2383_v11 = vadd.f32 %v5322_v8, %v1926_v7  ;;  %v3987_v7 = vcombine.low %v374_v61, %v376_v62  ;;  %v4690_v57 = vld [vmem:[%s4930_s30 + $0x58c] ss:$16 sps:$4 sm:$0xff]  }
 0x17d   : > { %v1928_v14 = vpop.f32.mrf.mxu0  ;;  %v5394_v37 = vpop.f32.mrf.mxu1  ;;  %2605 = vmatmul.mubr.bf16.gmra.mxu1 %v3979_v27 }
 0x17e   : > { %3257 = vst.msk [vmem:[%s5152_s12 + $0x64] sm:$0xf] %vm3231_vm1, %v4250_v45  ;;  %v2727_v19 = vmax.f32 %v2383_v11, 0.0  ;;  %v1929_v3 = vadd.f32 %v5133_v22, %v1928_v14  ;;  %4092 = vmatprep.mubr.msk.bf16.mxu1 %vm1627_vm0, %v4680_v16 }
 0x17f   : > { %v1930_v25 = vpop.f32.mrf.mxu0  ;;  %v2416_v44 = vpop.f32.mrf.mxu1 }
 0x180   : > { %v4251_v8 = vpack.c.bf16 %v2727_v19, %v2727_v19  ;;  %v2386_v26 = vadd.f32 %v5333_v5, %v1929_v3  ;;  %v4677_v3 = vld [vmem:[%s4930_s30 + $0x520] ss:$16 sps:$4 sm:$0xff]   ;;  %v384_v44 = vld [vmem:[%s4930_s30 + $0x5b8] sm:$0xff] }
 0x181   : > { %v1933_v29 = vpop.f32.mrf.mxu0  ;;  %2124 = vmatmul.mubr.bf16.gmra.mxu0 %v4662_v63  ;;  %v5405_v36 = vpop.f32.mrf.mxu1 }
 0x182   : > { %3258 = vst.msk [vmem:[%s5152_s12 + $0x68] sm:$0xf] %vm3231_vm1, %v4251_v8  ;;  %v2728_v15 = vmax.f32 %v2386_v26, 0.0  ;;  %v1934_v30 = vadd.f32 %v5133_v22, %v1933_v29  ;;  %2131 = vmatprep.mubr.bf16.mxu0 %v4669_v20  ;;  %v378_v20 = vld [vmem:[%s4930_s30 + $0x588] sm:$0xff]  ;;  %v4684_v26 = vld [vmem:[%s4930_s30 + $0x544] ss:$16 sps:$4 sm:$0xff]  }
 0x183   : > { %v1935_v18 = vpop.f32.mrf.mxu0  ;;  %v2419_v55 = vpop.f32.mrf.mxu1 }
 0x184   : > { %v4252_v5 = vpack.c.bf16 %v2728_v15, %v2728_v15  ;;  %v2391_v35 = vadd.f32 %v5340_v32, %v1934_v30  ;;  %v3991_v30 = vcombine.low %v378_v20, %v380_v21  ;;  %v4695_v18 = vld [vmem:[%s4930_s30 + $0x5ac] ss:$16 sps:$4 sm:$0xff]  }
 0x185   : > { %v1936_v38 = vpop.f32.mrf.mxu0  ;;  %v5412_v59 = vpop.f32.mrf.mxu1  ;;  %2613 = vmatmul.mubr.bf16.gmra.mxu1 %v3983_v49 }
 0x186   : > { %3259 = vst.msk [vmem:[%s5152_s12 + $0x6c] sm:$0xf] %vm3231_vm1, %v4252_v5  ;;  %v2729_v42 = vmax.f32 %v2391_v35, 0.0  ;;  %v1937_v28 = vadd.f32 %v5133_v22, %v1936_v38  ;;  %4093 = vmatprep.mubr.msk.bf16.mxu1 %vm1627_vm0, %v4685_v33 }
 0x187   : > { %v1938_v47 = vpop.f32.mrf.mxu0  ;;  %v2424_v2 = vpop.f32.mrf.mxu1 }
 0x188   : > { %v4253_v32 = vpack.c.bf16 %v2729_v42, %v2729_v42  ;;  %v2394_v48 = vadd.f32 %v5351_v31, %v1937_v28  ;;  %v4682_v28 = vld [vmem:[%s4930_s30 + $0x540] ss:$16 sps:$4 sm:$0xff]   ;;  %v388_v2 = vld [vmem:[%s4930_s30 + $0x5d8] sm:$0xff] }
 0x189   : > { %v1941_v51 = vpop.f32.mrf.mxu0  ;;  %2132 = vmatmul.mubr.bf16.gmra.mxu0 %v4667_v24  ;;  %v5423_v58 = vpop.f32.mrf.mxu1 }
 0x18a   : > { %3260 = vst.msk [vmem:[%s5152_s12 + $0x70] sm:$0xf] %vm3231_vm1, %v4253_v32  ;;  %v2730_v23 = vmax.f32 %v2394_v48, 0.0  ;;  %v1942_v52 = vadd.f32 %v5133_v22, %v1941_v51  ;;  %2139 = vmatprep.mubr.bf16.mxu0 %v4674_v43  ;;  %v382_v43 = vld [vmem:[%s4930_s30 + $0x5a8] sm:$0xff]  ;;  %v4689_v48 = vld [vmem:[%s4930_s30 + $0x564] ss:$16 sps:$4 sm:$0xff]  }
 0x18b   : > { %v1943_v41 = vpop.f32.mrf.mxu0  ;;  %v2427_v14 = vpop.f32.mrf.mxu1 }
 0x18c   : > { %v4254_v31 = vpack.c.bf16 %v2730_v23, %v2730_v23  ;;  %v2399_v56 = vadd.f32 %v5358_v54, %v1942_v52  ;;  %v3995_v52 = vcombine.low %v382_v43, %v384_v44  ;;  %v4700_v41 = vld [vmem:[%s4930_s30 + $0x5cc] ss:$16 sps:$4 sm:$0xff]  }
 0x18d   : > { %v1944_v60 = vpop.f32.mrf.mxu0  ;;  %v5430_v17 = vpop.f32.mrf.mxu1  ;;  %2621 = vmatmul.mubr.bf16.gmra.mxu1 %v3987_v7 }
 0x18e   : > { %3261 = vst.msk [vmem:[%s5152_s12 + $0x74] sm:$0xf] %vm3231_vm1, %v4254_v31  ;;  %v2731_v0 = vmax.f32 %v2399_v56, 0.0  ;;  %v1945_v50 = vadd.f32 %v5133_v22, %v1944_v60  ;;  %4094 = vmatprep.mubr.msk.bf16.mxu1 %vm1627_vm0, %v4690_v57 }
 0x18f   : > { %v1946_v4 = vpop.f32.mrf.mxu0  ;;  %v2432_v27 = vpop.f32.mrf.mxu1 }
 0x190   : > { %v4255_v54 = vpack.c.bf16 %v2731_v0, %v2731_v0  ;;  %v2402_v6 = vadd.f32 %v5369_v53, %v1945_v50  ;;  %v4687_v50 = vld [vmem:[%s4930_s30 + $0x560] ss:$16 sps:$4 sm:$0xff]   ;;  %v392_v27 = vld [vmem:[%s4930_s30 + $0x5f8] sm:$0xff] }
 0x191   : > { %v1949_v9 = vpop.f32.mrf.mxu0  ;;  %2140 = vmatmul.mubr.bf16.gmra.mxu0 %v4672_v46  ;;  %v5441_v15 = vpop.f32.mrf.mxu1 }
 0x192   : > { %3262 = vst.msk [vmem:[%s5152_s12 + $0x78] sm:$0xf] %vm3231_vm1, %v4255_v54  ;;  %v2732_v45 = vmax.f32 %v2402_v6, 0.0  ;;  %v1950_v11 = vadd.f32 %v5133_v22, %v1949_v9  ;;  %2147 = vmatprep.mubr.bf16.mxu0 %v4679_v1  ;;  %v386_v1 = vld [vmem:[%s4930_s30 + $0x5c8] sm:$0xff]  ;;  %v4694_v6 = vld [vmem:[%s4930_s30 + $0x584] ss:$16 sps:$4 sm:$0xff]  }
 0x193   : > { %v1951_v63 = vpop.f32.mrf.mxu0  ;;  %v2435_v38 = vpop.f32.mrf.mxu1 }
 0x194   : > { %v4256_v53 = vpack.c.bf16 %v2732_v45, %v2732_v45  ;;  %v2407_v10 = vadd.f32 %v5376_v13, %v1950_v11  ;;  %v3999_v11 = vcombine.low %v386_v1, %v388_v2  ;;  %v4705_v63 = vld [vmem:[%s4930_s30 + $0x5ec] ss:$16 sps:$4 sm:$0xff]  }
 0x195   : > { %v1952_v19 = vpop.f32.mrf.mxu0  ;;  %v5448_v40 = vpop.f32.mrf.mxu1  ;;  %2629 = vmatmul.mubr.bf16.gmra.mxu1 %v3991_v30 }
 0x196   : > { %3263 = vst.msk [vmem:[%s5152_s12 + $0x7c] sm:$0xf] %vm3231_vm1, %v4256_v53  ;;  %v2733_v25 = vmax.f32 %v2407_v10, 0.0  ;;  %v1953_v8 = vadd.f32 %v5133_v22, %v1952_v19  ;;  %4095 = vmatprep.mubr.msk.bf16.mxu1 %vm1627_vm0, %v4695_v18 }
 0x197   : > { %v1954_v29 = vpop.f32.mrf.mxu0  ;;  %v2440_v49 = vpop.f32.mrf.mxu1 }
 0x198   : > { %v4257_v13 = vpack.c.bf16 %v2733_v25, %v2733_v25  ;;  %v2410_v16 = vadd.f32 %v5387_v12, %v1953_v8  ;;  %v4692_v8 = vld [vmem:[%s4930_s30 + $0x580] ss:$16 sps:$4 sm:$0xff]   ;;  %v396_v49 = vld [vmem:[%s4930_s30 + $0x618] sm:$0xff] }
 0x199   : > { %v1957_v34 = vpop.f32.mrf.mxu0  ;;  %2148 = vmatmul.mubr.bf16.gmra.mxu0 %v4677_v3  ;;  %v5459_v23 = vpop.f32.mrf.mxu1 }
 0x19a   : > { %3264 = vst.msk [vmem:[%s5152_s12 + $0x80] sm:$0xf] %vm3231_vm1, %v4257_v13  ;;  %v2734_v5 = vmax.f32 %v2410_v16, 0.0  ;;  %v1958_v35 = vadd.f32 %v5133_v22, %v1957_v34  ;;  %2155 = vmatprep.mubr.bf16.mxu0 %v4684_v26  ;;  %v390_v26 = vld [vmem:[%s4930_s30 + $0x5e8] sm:$0xff]  ;;  %v4699_v16 = vld [vmem:[%s4930_s30 + $0x5a4] ss:$16 sps:$4 sm:$0xff]  }
 0x19b   : > { %v1959_v24 = vpop.f32.mrf.mxu0  ;;  %v2443_v56 = vpop.f32.mrf.mxu1 }
 0x19c   : > { %v4258_v12 = vpack.c.bf16 %v2734_v5, %v2734_v5  ;;  %v2415_v39 = vadd.f32 %v5394_v37, %v1958_v35  ;;  %v4003_v35 = vcombine.low %v390_v26, %v392_v27  ;;  %v4710_v24 = vld [vmem:[%s4930_s30 + $0x60c] ss:$16 sps:$4 sm:$0xff]  }
 0x19d   : > { %v1960_v42 = vpop.f32.mrf.mxu0  ;;  %v5471_v62 = vpop.f32.mrf.mxu1  ;;  %2637 = vmatmul.mubr.bf16.gmra.mxu1 %v3995_v52 }
 0x19e   : > { %3265 = vst.msk [vmem:[%s5152_s12 + $0x84] sm:$0xf] %vm3231_vm1, %v4258_v12  ;;  %v2735_v47 = vmax.f32 %v2415_v39, 0.0  ;;  %v1961_v32 = vadd.f32 %v5133_v22, %v1960_v42  ;;  %v5467_v22 = vld [vmem:[%s5984_s2] ss:$0 sm:$0xff]  ;;  %4096 = vmatprep.mubr.msk.bf16.mxu1 %vm1627_vm0, %v4700_v41 }
 0x19f   : > { %v1962_v51 = vpop.f32.mrf.mxu0  ;;  %v2448_v7 = vpop.f32.mrf.mxu1 }
 0x1a0   : > { %v4259_v37 = vpack.c.bf16 %v2735_v47, %v2735_v47  ;;  %v2418_v33 = vadd.f32 %v5405_v36, %v1961_v32  ;;  %v4697_v32 = vld [vmem:[%s4930_s30 + $0x5a0] ss:$16 sps:$4 sm:$0xff]   ;;  %v400_v7 = vld [vmem:[%s4930_s30 + $0x638] sm:$0xff] }
 0x1a1   : > { %v1965_v55 = vpop.f32.mrf.mxu0  ;;  %2156 = vmatmul.mubr.bf16.gmra.mxu0 %v4682_v28  ;;  %v5482_v45 = vpop.f32.mrf.mxu1 }
 0x1a2   : > { %3266 = vst.msk [vmem:[%s5152_s12 + $0x88] sm:$0xf] %vm3231_vm1, %v4259_v37  ;;  %v2736_v31 = vmax.f32 %v2418_v33, 0.0  ;;  %v1966_v36 = vadd.f32 %v5467_v22, %v1965_v55  ;;  %2163 = vmatprep.mubr.bf16.mxu0 %v4689_v48  ;;  %v394_v48 = vld [vmem:[%s4930_s30 + $0x608] sm:$0xff]  ;;  %v4704_v33 = vld [vmem:[%s4930_s30 + $0x5c4] ss:$16 sps:$4 sm:$0xff]  }
 0x1a3   : > { %v1967_v60 = vpop.f32.mrf.mxu0  ;;  %v2451_v19 = vpop.f32.mrf.mxu1 }
 0x1a4   : > { %v4260_v46 = vpack.c.bf16 %v2736_v31, %v2736_v31  ;;  %v2423_v61 = vadd.f32 %v5412_v59, %v1966_v36  ;;  %v4007_v36 = vcombine.low %v394_v48, %v396_v49  ;;  %v4715_v60 = vld [vmem:[%s4930_s30 + $0x62c] ss:$16 sps:$4 sm:$0xff]  }
 0x1a5   : > { %v1968_v0 = vpop.f32.mrf.mxu0  ;;  %v5489_v21 = vpop.f32.mrf.mxu1  ;;  %2645 = vmatmul.mubr.bf16.gmra.mxu1 %v3999_v11 }
 0x1a6   : > { %3267 = vst.msk [vmem:[%s5152_s12 + $0x8c] sm:$0xf] %vm3231_vm1, %v4260_v46  ;;  %v2737_v4 = vmax.f32 %v2423_v61, 0.0  ;;  %v1969_v54 = vadd.f32 %v5467_v22, %v1968_v0  ;;  %4097 = vmatprep.mubr.msk.bf16.mxu1 %vm1627_vm0, %v4705_v63 }
 0x1a7   : > { %v1970_v9 = vpop.f32.mrf.mxu0  ;;  %v2456_v30 = vpop.f32.mrf.mxu1 }
 0x1a8   : > { %v4261_v59 = vpack.c.bf16 %v2737_v4, %v2737_v4  ;;  %v2426_v57 = vadd.f32 %v5423_v58, %v1969_v54  ;;  %v4702_v54 = vld [vmem:[%s4930_s30 + $0x5c0] ss:$16 sps:$4 sm:$0xff]   ;;  %v404_v30 = vld [vmem:[%s4930_s30 + $0x658] sm:$0xff] }
 0x1a9   : > { %v1973_v14 = vpop.f32.mrf.mxu0  ;;  %2164 = vmatmul.mubr.bf16.gmra.mxu0 %v4687_v50  ;;  %v5500_v5 = vpop.f32.mrf.mxu1 }
 0x1aa   : > { %3268 = vst.msk [vmem:[%s5152_s12 + $0x90] sm:$0xf] %vm3231_vm1, %v4261_v59  ;;  %v2738_v53 = vmax.f32 %v2426_v57, 0.0  ;;  %v1974_v10 = vadd.f32 %v5467_v22, %v1973_v14  ;;  %2171 = vmatprep.mubr.bf16.mxu0 %v4694_v6  ;;  %v398_v6 = vld [vmem:[%s4930_s30 + $0x628] sm:$0xff]  ;;  %v4709_v57 = vld [vmem:[%s4930_s30 + $0x5e4] ss:$16 sps:$4 sm:$0xff]  }
 0x1ab   : > { %v1975_v3 = vpop.f32.mrf.mxu0  ;;  %v2459_v42 = vpop.f32.mrf.mxu1 }
 0x1ac   : > { %v4262_v58 = vpack.c.bf16 %v2738_v53, %v2738_v53  ;;  %v2431_v20 = vadd.f32 %v5430_v17, %v1974_v10  ;;  %v4011_v10 = vcombine.low %v398_v6, %v400_v7  ;;  %v4720_v3 = vld [vmem:[%s4930_s30 + $0x64c] ss:$16 sps:$4 sm:$0xff]  }
 0x1ad   : > { %v1976_v25 = vpop.f32.mrf.mxu0  ;;  %v5507_v44 = vpop.f32.mrf.mxu1  ;;  %2653 = vmatmul.mubr.bf16.gmra.mxu1 %v4003_v35 }
 0x1ae   : > { %3269 = vst.msk [vmem:[%s5152_s12 + $0x94] sm:$0xf] %vm3231_vm1, %v4262_v58  ;;  %v2739_v29 = vmax.f32 %v2431_v20, 0.0  ;;  %v1977_v13 = vadd.f32 %v5467_v22, %v1976_v25  ;;  %4098 = vmatprep.mubr.msk.bf16.mxu1 %vm1627_vm0, %v4710_v24 }
 0x1af   : > { %v1978_v34 = vpop.f32.mrf.mxu0  ;;  %v2464_v52 = vpop.f32.mrf.mxu1 }
 0x1b0   : > { %v4263_v17 = vpack.c.bf16 %v2739_v29, %v2739_v29  ;;  %v2434_v18 = vadd.f32 %v5441_v15, %v1977_v13  ;;  %v4707_v13 = vld [vmem:[%s4930_s30 + $0x5e0] ss:$16 sps:$4 sm:$0xff]   ;;  %v408_v52 = vld [vmem:[%s4930_s30 + $0x678] sm:$0xff] }
 0x1b1   : > { %v1981_v38 = vpop.f32.mrf.mxu0  ;;  %2172 = vmatmul.mubr.bf16.gmra.mxu0 %v4692_v8  ;;  %v5518_v31 = vpop.f32.mrf.mxu1 }
 0x1b2   : > { %3270 = vst.msk [vmem:[%s5152_s12 + $0x98] sm:$0xf] %vm3231_vm1, %v4263_v17  ;;  %v2740_v12 = vmax.f32 %v2434_v18, 0.0  ;;  %v1982_v39 = vadd.f32 %v5467_v22, %v1981_v38  ;;  %2179 = vmatprep.mubr.bf16.mxu0 %v4699_v16  ;;  %v402_v16 = vld [vmem:[%s4930_s30 + $0x648] sm:$0xff]  ;;  %v4714_v18 = vld [vmem:[%s4930_s30 + $0x604] ss:$16 sps:$4 sm:$0xff]  }
 0x1b3   : > { %v1983_v28 = vpop.f32.mrf.mxu0  ;;  %v2467_v0 = vpop.f32.mrf.mxu1 }
 0x1b4   : > { %v4264_v15 = vpack.c.bf16 %v2740_v12, %v2740_v12  ;;  %v2439_v43 = vadd.f32 %v5448_v40, %v1982_v39  ;;  %v4015_v39 = vcombine.low %v402_v16, %v404_v30  ;;  %v4725_v28 = vld [vmem:[%s4930_s30 + $0x66c] ss:$16 sps:$4 sm:$0xff]  }
 0x1b5   : > { %v1984_v47 = vpop.f32.mrf.mxu0  ;;  %v5525_v2 = vpop.f32.mrf.mxu1  ;;  %2661 = vmatmul.mubr.bf16.gmra.mxu1 %v4007_v36 }
 0x1b6   : > { %3271 = vst.msk [vmem:[%s5152_s12 + $0x9c] sm:$0xf] %vm3231_vm1, %v4264_v15  ;;  %v2741_v51 = vmax.f32 %v2439_v43, 0.0  ;;  %v1985_v37 = vadd.f32 %v5467_v22, %v1984_v47  ;;  %4099 = vmatprep.mubr.msk.bf16.mxu1 %vm1627_vm0, %v4715_v60 }
 0x1b7   : > { %v1986_v55 = vpop.f32.mrf.mxu0  ;;  %v2472_v11 = vpop.f32.mrf.mxu1 }
 0x1b8   : > { %v4265_v40 = vpack.c.bf16 %v2741_v51, %v2741_v51  ;;  %v2442_v41 = vadd.f32 %v5459_v23, %v1985_v37  ;;  %v4712_v37 = vld [vmem:[%s4930_s30 + $0x600] ss:$16 sps:$4 sm:$0xff]   ;;  %v412_v11 = vld [vmem:[%s4930_s30 + $0x698] sm:$0xff] }
 0x1b9   : > { %v1989_v56 = vpop.f32.mrf.mxu0  ;;  %2180 = vmatmul.mubr.bf16.gmra.mxu0 %v4697_v32  ;;  %v5536_v53 = vpop.f32.mrf.mxu1 }
 0x1ba   : > { %3272 = vst.msk [vmem:[%s5152_s12 + $0xa0] sm:$0xf] %vm3231_vm1, %v4265_v40  ;;  %v2742_v46 = vmax.f32 %v2442_v41, 0.0  ;;  %v1990_v61 = vadd.f32 %v5467_v22, %v1989_v56  ;;  %2187 = vmatprep.mubr.bf16.mxu0 %v4704_v33  ;;  %v406_v33 = vld [vmem:[%s4930_s30 + $0x668] sm:$0xff]  ;;  %v4719_v41 = vld [vmem:[%s4930_s30 + $0x624] ss:$16 sps:$4 sm:$0xff]  }
 0x1bb   : > { %v1991_v50 = vpop.f32.mrf.mxu0  ;;  %v2475_v25 = vpop.f32.mrf.mxu1 }
 0x1bc   : > { %v4266_v23 = vpack.c.bf16 %v2742_v46, %v2742_v46  ;;  %v2447_v1 = vadd.f32 %v5471_v62, %v1990_v61  ;;  %v4019_v61 = vcombine.low %v406_v33, %v408_v52  ;;  %v4730_v50 = vld [vmem:[%s4930_s30 + $0x68c] ss:$16 sps:$4 sm:$0xff]   ;;  %v4734_v52 = vld [vmem:[%s4930_s30 + $0x684] ss:$16 sps:$4 sm:$0xff]  }
 0x1bd   : > { %v1992_v4 = vpop.f32.mrf.mxu0  ;;  %v5543_v27 = vpop.f32.mrf.mxu1  ;;  %2669 = vmatmul.mubr.bf16.gmra.mxu1 %v4011_v10 }
 0x1be   : > { %3273 = vst.msk [vmem:[%s5152_s12 + $0xa4] sm:$0xf] %vm3231_vm1, %v4266_v23  ;;  %v2743_v9 = vmax.f32 %v2447_v1, 0.0  ;;  %v1993_v59 = vadd.f32 %v5467_v22, %v1992_v4  ;;  %4100 = vmatprep.mubr.msk.bf16.mxu1 %vm1627_vm0, %v4720_v3 }
 0x1bf   : > { %v1994_v14 = vpop.f32.mrf.mxu0  ;;  %v2480_v35 = vpop.f32.mrf.mxu1 }
 0x1c0   : > { %v4267_v62 = vpack.c.bf16 %v2743_v9, %v2743_v9  ;;  %v2450_v63 = vadd.f32 %v5482_v45, %v1993_v59  ;;  %v4717_v59 = vld [vmem:[%s4930_s30 + $0x620] ss:$16 sps:$4 sm:$0xff]   ;;  %v4729_v35 = vld [vmem:[%s4930_s30 + $0x664] ss:$16 sps:$4 sm:$0xff]  }
 0x1c1   : > { %v1997_v19 = vpop.f32.mrf.mxu0  ;;  %2188 = vmatmul.mubr.bf16.gmra.mxu0 %v4702_v54  ;;  %v5554_v12 = vpop.f32.mrf.mxu1 }
 0x1c2   : > { %3274 = vst.msk [vmem:[%s5152_s12 + $0xa8] sm:$0xf] %vm3231_vm1, %v4267_v62  ;;  %v2744_v58 = vmax.f32 %v2450_v63, 0.0  ;;  %v1998_v20 = vadd.f32 %v5467_v22, %v1997_v19  ;;  %2195 = vmatprep.mubr.bf16.mxu0 %v4709_v57  ;;  %v410_v57 = vld [vmem:[%s4930_s30 + $0x688] sm:$0xff]  ;;  %v4724_v63 = vld [vmem:[%s4930_s30 + $0x644] ss:$16 sps:$4 sm:$0xff]  }
 0x1c3   : > { %v1999_v8 = vpop.f32.mrf.mxu0  ;;  %v2483_v47 = vpop.f32.mrf.mxu1 }
 0x1c4   : > { %v4268_v45 = vpack.c.bf16 %v2744_v58, %v2744_v58  ;;  %v2455_v26 = vadd.f32 %v5489_v21, %v1998_v20  ;;  %v4023_v20 = vcombine.low %v410_v57, %v412_v11 }
 0x1c5   : > { %v2000_v29 = vpop.f32.mrf.mxu0  ;;  %v5561_v49 = vpop.f32.mrf.mxu1  ;;  %2677 = vmatmul.mubr.bf16.gmra.mxu1 %v4015_v39 }
 0x1c6   : > { %3275 = vst.msk [vmem:[%s5152_s12 + $0xac] sm:$0xf] %vm3231_vm1, %v4268_v45  ;;  %v2745_v34 = vmax.f32 %v2455_v26, 0.0  ;;  %v2001_v17 = vadd.f32 %v5467_v22, %v2000_v29  ;;  %4101 = vmatprep.mubr.msk.bf16.mxu1 %vm1627_vm0, %v4725_v28 }
 0x1c7   : > { %v2002_v38 = vpop.f32.mrf.mxu0  ;;  %v2488_v36 = vpop.f32.mrf.mxu1 }
 0x1c8   : > { %v4269_v21 = vpack.c.bf16 %v2745_v34, %v2745_v34  ;;  %v2458_v24 = vadd.f32 %v5500_v5, %v2001_v17  ;;  %v4722_v34 = vld [vmem:[%s4930_s30 + $0x640] ss:$16 sps:$4 sm:$0xff]  }
 0x1c9   : > { %v2005_v42 = vpop.f32.mrf.mxu0  ;;  %2196 = vmatmul.mubr.bf16.gmra.mxu0 %v4707_v13  ;;  %v5572_v46 = vpop.f32.mrf.mxu1 }
 0x1ca   : > { %3276 = vst.msk [vmem:[%s5152_s12 + $0xb0] sm:$0xf] %vm3231_vm1, %v4269_v21  ;;  %v2746_v15 = vmax.f32 %v2458_v24, 0.0  ;;  %v2006_v43 = vadd.f32 %v5467_v22, %v2005_v42  ;;  %2203 = vmatprep.mubr.bf16.mxu0 %v4714_v18 }
 0x1cb   : > { %v2007_v32 = vpop.f32.mrf.mxu0  ;;  %v2491_v4 = vpop.f32.mrf.mxu1 }
 0x1cc   : > { %v4270_v5 = vpack.c.bf16 %v2746_v15, %v2746_v15  ;;  %v2463_v48 = vadd.f32 %v5507_v44, %v2006_v43 }
 0x1cd   : > { %v2008_v51 = vpop.f32.mrf.mxu0  ;;  %v5579_v7 = vpop.f32.mrf.mxu1  ;;  %2685 = vmatmul.mubr.bf16.gmra.mxu1 %v4019_v61 }
 0x1ce   : > { %3277 = vst.msk [vmem:[%s5152_s12 + $0xb4] sm:$0xf] %vm3231_vm1, %v4270_v5  ;;  %v2747_v55 = vmax.f32 %v2463_v48, 0.0  ;;  %v2009_v40 = vadd.f32 %v5467_v22, %v2008_v51  ;;  %4102 = vmatprep.mubr.msk.bf16.mxu1 %vm1627_vm0, %v4730_v50 }
 0x1cf   : > { %v2010_v56 = vpop.f32.mrf.mxu0  ;;  %v2496_v10 = vpop.f32.mrf.mxu1 }
 0x1d0   : > { %v4271_v44 = vpack.c.bf16 %v2747_v55, %v2747_v55  ;;  %v2466_v60 = vadd.f32 %v5518_v31, %v2009_v40 }
 0x1d1   : > { %v2013_v0 = vpop.f32.mrf.mxu0  ;;  %2204 = vmatmul.mubr.bf16.gmra.mxu0 %v4712_v37  ;;  %v5590_v58 = vpop.f32.mrf.mxu1  ;;  %v4727_v37 = vld [vmem:[%s4930_s30 + $0x660] ss:$16 sps:$4 sm:$0xff]  }
 0x1d2   : > { %3278 = vst.msk [vmem:[%s5152_s12 + $0xb8] sm:$0xf] %vm3231_vm1, %v4271_v44  ;;  %v2748_v23 = vmax.f32 %v2466_v60, 0.0  ;;  %v2014_v1 = vadd.f32 %v5467_v22, %v2013_v0  ;;  %2211 = vmatprep.mubr.bf16.mxu0 %v4719_v41 }
 0x1d3   : > { %v2015_v54 = vpop.f32.mrf.mxu0  ;;  %v2499_v26 = vpop.f32.mrf.mxu1 }
 0x1d4   : > { %v4272_v31 = vpack.c.bf16 %v2748_v23, %v2748_v23  ;;  %v2471_v6 = vadd.f32 %v5525_v2, %v2014_v1  ;;  %v4732_v54 = vld [vmem:[%s4930_s30 + $0x680] ss:$16 sps:$4 sm:$0xff]  }
 0x1d5   : > { %v2016_v9 = vpop.f32.mrf.mxu0  ;;  %2693 = vmatmul.mubr.bf16.gmra.mxu1 %v4023_v20 }
 0x1d6   : > { %3279 = vst.msk [vmem:[%s5152_s12 + $0xbc] sm:$0xf] %vm3231_vm1, %v4272_v31  ;;  %v2749_v14 = vmax.f32 %v2471_v6, 0.0  ;;  %v2017_v62 = vadd.f32 %v5467_v22, %v2016_v9 }
 0x1d7   : > { %v2018_v19 = vpop.f32.mrf.mxu0 }
 0x1d8   : > { %v4273_v3 = vpack.c.bf16 %v2749_v14, %v2749_v14  ;;  %v2474_v2 = vadd.f32 %v5536_v53, %v2017_v62  ;;  %v5596_v53 = vpop.f32.mrf.mxu1 }
 0x1d9   : > { %v2021_v25 = vpop.f32.mrf.mxu0  ;;  %2212 = vmatmul.mubr.bf16.gmra.mxu0 %v4717_v59 }
 0x1da   : > { %3280 = vst.msk [vmem:[%s5152_s12 + $0xc0] sm:$0xf] %vm3231_vm1, %v4273_v3  ;;  %v2750_v8 = vmax.f32 %v2474_v2, 0.0  ;;  %v2022_v45 = vadd.f32 %v5467_v22, %v2021_v25  ;;  %2219 = vmatprep.mubr.bf16.mxu0 %v4724_v63  ;;  %v2504_v38 = vpop.f32.mrf.mxu1 }
 0x1db   : > { %v2023_v29 = vpop.f32.mrf.mxu0 }
 0x1dc   : > { %v4274_v13 = vpack.c.bf16 %v2750_v8, %v2750_v8  ;;  %v2479_v16 = vadd.f32 %v5543_v27, %v2022_v45  ;;  %v2505_v27 = vpop.f32.mrf.mxu1 }
 0x1dd   : > { %v2024_v30 = vpop.f32.mrf.mxu0 }
 0x1de   : > { %3281 = vst.msk [vmem:[%s5152_s12 + $0xc4] sm:$0xf] %vm3231_vm1, %v4274_v13  ;;  %v2751_v17 = vmax.f32 %v2479_v16, 0.0  ;;  %v2025_v18 = vadd.f32 %v5467_v22, %v2024_v30  ;;  %v2507_v43 = vpop.f32.mrf.mxu1 }
 0x1df   : > { %v2026_v21 = vpop.f32.mrf.mxu0 }
 0x1e0   : > { %v4275_v24 = vpack.c.bf16 %v2751_v17, %v2751_v17  ;;  %v2482_v39 = vadd.f32 %v5554_v12, %v2025_v18  ;;  %v2510_v48 = vpop.f32.mrf.mxu1 }
 0x1e1   : > { %v2029_v42 = vpop.f32.mrf.mxu0  ;;  %2220 = vmatmul.mubr.bf16.gmra.mxu0 %v4722_v34 }
 0x1e2   : > { %3282 = vst.msk [vmem:[%s5152_s12 + $0xc8] sm:$0xf] %vm3231_vm1, %v4275_v24  ;;  %v2752_v28 = vmax.f32 %v2482_v39, 0.0  ;;  %v2030_v15 = vadd.f32 %v5467_v22, %v2029_v42  ;;  %2227 = vmatprep.mubr.bf16.mxu0 %v4729_v35  ;;  %v2512_v55 = vpop.f32.mrf.mxu1 }
 0x1e3   : > { %v2031_v47 = vpop.f32.mrf.mxu0 }
 0x1e4   : > { %v4276_v32 = vpack.c.bf16 %v2752_v28, %v2752_v28  ;;  %v2487_v5 = vadd.f32 %v5561_v49, %v2030_v15  ;;  %v2513_v56 = vpop.f32.mrf.mxu1 }
 0x1e5   : > { %v2032_v51 = vpop.f32.mrf.mxu0 }
 0x1e6   : > { %3283 = vst.msk [vmem:[%s5152_s12 + $0xcc] sm:$0xf] %vm3231_vm1, %v4276_v32  ;;  %v2753_v12 = vmax.f32 %v2487_v5, 0.0  ;;  %v2033_v33 = vadd.f32 %v5467_v22, %v2032_v51  ;;  %v2515_v61 = vpop.f32.mrf.mxu1 }
 0x1e7   : > { %v2034_v40 = vpop.f32.mrf.mxu0 }
 0x1e8   : > { %v4277_v41 = vpack.c.bf16 %v2753_v12, %v2753_v12  ;;  %v2490_v36 = vadd.f32 %v5572_v46, %v2033_v33  ;;  %v2518_v1 = vpop.f32.mrf.mxu1 }
 0x1e9   : > { %v2037_v44 = vpop.f32.mrf.mxu0  ;;  %2228 = vmatmul.mubr.bf16.gmra.mxu0 %v4727_v37 }
 0x1ea   : > { %3284 = vst.msk [vmem:[%s5152_s12 + $0xd0] sm:$0xf] %vm3231_vm1, %v4277_v41  ;;  %v2754_v49 = vmax.f32 %v2490_v36, 0.0  ;;  %v2038_v60 = vadd.f32 %v5467_v22, %v2037_v44  ;;  %2235 = vmatprep.mubr.bf16.mxu0 %v4734_v52  ;;  %v2520_v6 = vpop.f32.mrf.mxu1 }
 0x1eb   : > { %v2039_v0 = vpop.f32.mrf.mxu0 }
 0x1ec   : > { %v4278_v50 = vpack.c.bf16 %v2754_v49, %v2754_v49  ;;  %v2495_v23 = vadd.f32 %v5579_v7, %v2038_v60  ;;  %v2521_v11 = vpop.f32.mrf.mxu1 }
 0x1ed   : > { %v2040_v4 = vpop.f32.mrf.mxu0 }
 0x1ee   : > { %3285 = vst.msk [vmem:[%s5152_s12 + $0xd4] sm:$0xf] %vm3231_vm1, %v4278_v50  ;;  %v2755_v46 = vmax.f32 %v2495_v23, 0.0  ;;  %v2041_v31 = vadd.f32 %v5467_v22, %v2040_v4  ;;  %v2523_v63 = vpop.f32.mrf.mxu1 }
 0x1ef   : > { %v2042_v9 = vpop.f32.mrf.mxu0 }
 0x1f0   : > { %v4279_v59 = vpack.c.bf16 %v2755_v46, %v2755_v46  ;;  %v2498_v57 = vadd.f32 %v5590_v58, %v2041_v31  ;;  %v2526_v2 = vpop.f32.mrf.mxu1 }
 0x1f1   : > { %v2045_v14 = vpop.f32.mrf.mxu0  ;;  %2236 = vmatmul.mubr.bf16.gmra.mxu0 %v4732_v54 }
 0x1f2   : > { %3286 = vst.msk [vmem:[%s5152_s12 + $0xd8] sm:$0xf] %vm3231_vm1, %v4279_v59  ;;  %v2756_v7 = vmax.f32 %v2498_v57, 0.0  ;;  %v2046_v62 = vadd.f32 %v5467_v22, %v2045_v14  ;;  %v2528_v8 = vpop.f32.mrf.mxu1 }
 0x1f3   : > { %v2047_v10 = vpop.f32.mrf.mxu0 }
 0x1f4   : > { %v4280_v19 = vpack.c.bf16 %v2756_v7, %v2756_v7  ;;  %v2503_v3 = vadd.f32 %v5596_v53, %v2046_v62  ;;  %v2529_v13 = vpop.f32.mrf.mxu1 }
 0x1f5   : > { %v2048_v20 = vpop.f32.mrf.mxu0 }
 0x1f6   : > { %3287 = vst.msk [vmem:[%s5152_s12 + $0xdc] sm:$0xf] %vm3231_vm1, %v4280_v19  ;;  %v2757_v25 = vmax.f32 %v2503_v3, 0.0  ;;  %v2049_v58 = vadd.f32 %v5467_v22, %v2048_v20  ;;  %v2531_v53 = vpop.f32.mrf.mxu1 }
 0x1f7   : > { %v2050_v45 = vpop.f32.mrf.mxu0 }
 0x1f8   : > { %v4281_v26 = vpack.c.bf16 %v2757_v25, %v2757_v25  ;;  %v2506_v29 = vadd.f32 %v2505_v27, %v2049_v58  ;;  %v2534_v38 = vpop.f32.mrf.mxu1 }
 0x1f9   : > { %v2053_v16 = vpop.f32.mrf.mxu0 }
 0x1fa   : > { %3288 = vst.msk [vmem:[%s5152_s12 + $0xe0] sm:$0xf] %vm3231_vm1, %v4281_v26  ;;  %v2758_v30 = vmax.f32 %v2506_v29, 0.0  ;;  %v2054_v34 = vadd.f32 %v5467_v22, %v2053_v16  ;;  %v2536_v27 = vpop.f32.mrf.mxu1 }
 0x1fb   : > { %v2055_v17 = vpop.f32.mrf.mxu0 }
 0x1fc   : > { %v4282_v18 = vpack.c.bf16 %v2758_v30, %v2758_v30  ;;  %v2511_v35 = vadd.f32 %v2510_v48, %v2054_v34  ;;  %v2537_v43 = vpop.f32.mrf.mxu1 }
 0x1fd   : > { %v2056_v21 = vpop.f32.mrf.mxu0 }
 0x1fe   : > { %3289 = vst.msk [vmem:[%s5152_s12 + $0xe4] sm:$0xf] %vm3231_vm1, %v4282_v18  ;;  %v2759_v24 = vmax.f32 %v2511_v35, 0.0  ;;  %v2057_v39 = vadd.f32 %v5467_v22, %v2056_v21  ;;  %v2539_v48 = vpop.f32.mrf.mxu1 }
 0x1ff   : > { %v2058_v42 = vpop.f32.mrf.mxu0 }
 0x200   : > { %v4283_v28 = vpack.c.bf16 %v2759_v24, %v2759_v24  ;;  %v2514_v15 = vadd.f32 %v2513_v56, %v2057_v39  ;;  %v2542_v33 = vpop.f32.mrf.mxu1 }
 0x201   : > { %v2061_v47 = vpop.f32.mrf.mxu0 }
 0x202   : > { %3290 = vst.msk [vmem:[%s5152_s12 + $0xe8] sm:$0xf] %vm3231_vm1, %v4283_v28  ;;  %v2760_v32 = vmax.f32 %v2514_v15, 0.0  ;;  %v2062_v5 = vadd.f32 %v5467_v22, %v2061_v47  ;;  %v2544_v41 = vpop.f32.mrf.mxu1 }
 0x203   : > { %v2063_v51 = vpop.f32.mrf.mxu0 }
 0x204   : > { %v4284_v37 = vpack.c.bf16 %v2760_v32, %v2760_v32  ;;  %v2519_v12 = vadd.f32 %v2518_v1, %v2062_v5  ;;  %v2545_v49 = vpop.f32.mrf.mxu1 }
 0x205   : > { %v2064_v52 = vpop.f32.mrf.mxu0 }
 0x206   : > { %3291 = vst.msk [vmem:[%s5152_s12 + $0xec] sm:$0xf] %vm3231_vm1, %v4284_v37  ;;  %v2761_v55 = vmax.f32 %v2519_v12, 0.0  ;;  %v2065_v40 = vadd.f32 %v5467_v22, %v2064_v52  ;;  %v2547_v50 = vpop.f32.mrf.mxu1 }
 0x207   : > { %v2066_v36 = vpop.f32.mrf.mxu0 }
 0x208   : > { %v4285_v56 = vpack.c.bf16 %v2761_v55, %v2761_v55  ;;  %v2522_v44 = vadd.f32 %v2521_v11, %v2065_v40  ;;  %v2550_v54 = vpop.f32.mrf.mxu1 }
 0x209   : > { %v2069_v60 = vpop.f32.mrf.mxu0 }
 0x20a   : > { %3292 = vst.msk [vmem:[%s5152_s12 + $0xf0] sm:$0xf] %vm3231_vm1, %v4285_v56  ;;  %v2762_v61 = vmax.f32 %v2522_v44, 0.0  ;;  %v2070_v0 = vadd.f32 %v5467_v22, %v2069_v60  ;;  %v2552_v9 = vpop.f32.mrf.mxu1 }
 0x20b   : > { %v2071_v23 = vpop.f32.mrf.mxu0 }
 0x20c   : > { %v4286_v1 = vpack.c.bf16 %v2762_v61, %v2762_v61  ;;  %v2527_v4 = vadd.f32 %v2526_v2, %v2070_v0  ;;  %v2553_v14 = vpop.f32.mrf.mxu1 }
 0x20d   : > { %v2072_v46 = vpop.f32.mrf.mxu0 }
 0x20e   : > { %3293 = vst.msk [vmem:[%s5152_s12 + $0xf4] sm:$0xf] %vm3231_vm1, %v4286_v1  ;;  %v2763_v31 = vmax.f32 %v2527_v4, 0.0  ;;  %v2073_v6 = vadd.f32 %v5467_v22, %v2072_v46  ;;  %v2555_v10 = vpop.f32.mrf.mxu1 }
 0x20f   : > { %v2074_v59 = vpop.f32.mrf.mxu0 }
 0x210   : > { %v4287_v57 = vpack.c.bf16 %v2763_v31, %v2763_v31  ;;  %v2530_v11 = vadd.f32 %v2529_v13, %v2073_v6  ;;  %v2558_v20 = vpop.f32.mrf.mxu1 }
 0x211   : > { %v2077_v7 = vpop.f32.mrf.mxu0 }
 0x212   : > { %3294 = vst.msk [vmem:[%s5152_s12 + $0xf8] sm:$0xf] %vm3231_vm1, %v4287_v57  ;;  %v2764_v62 = vmax.f32 %v2530_v11, 0.0  ;;  %v2078_v63 = vadd.f32 %v5467_v22, %v2077_v7  ;;  %v2560_v45 = vpop.f32.mrf.mxu1 }
 0x213   : > { %v2079_v19 = vpop.f32.mrf.mxu0 }
 0x214   : > { %v4288_v3 = vpack.c.bf16 %v2764_v62, %v2764_v62  ;;  %v2535_v2 = vadd.f32 %v2534_v38, %v2078_v63  ;;  %v2561_v16 = vpop.f32.mrf.mxu1 }
 0x215   : > { %v2080_v25 = vpop.f32.mrf.mxu0 }
 0x216   : > { %3295 = vst.msk [vmem:[%s5152_s12 + $0xfc] sm:$0xf] %vm3231_vm1, %v4288_v3  ;;  %v2765_v58 = vmax.f32 %v2535_v2, 0.0  ;;  %v2081_v8 = vadd.f32 %v5467_v22, %v2080_v25  ;;  %v2563_v17 = vpop.f32.mrf.mxu1 }
 0x217   : > { %v2082_v26 = vpop.f32.mrf.mxu0 }
 0x218   : > { %v4289_v29 = vpack.c.bf16 %v2765_v58, %v2765_v58  ;;  %v2538_v13 = vadd.f32 %v2537_v43, %v2081_v8  ;;  %v2566_v21 = vpop.f32.mrf.mxu1 }
 0x219   : > { %v2085_v30 = vpop.f32.mrf.mxu0 }
 0x21a   : > { %3296 = vst.msk [vmem:[%s5152_s12 + $0x100] sm:$0xf] %vm3231_vm1, %v4289_v29  ;;  %v2766_v34 = vmax.f32 %v2538_v13, 0.0  ;;  %v2086_v53 = vadd.f32 %v5467_v22, %v2085_v30  ;;  %v2568_v42 = vpop.f32.mrf.mxu1 }
 0x21b   : > { %v2087_v18 = vpop.f32.mrf.mxu0 }
 0x21c   : > { %v4290_v35 = vpack.c.bf16 %v2766_v34, %v2766_v34  ;;  %v2543_v38 = vadd.f32 %v2542_v33, %v2086_v53  ;;  %v2569_v47 = vpop.f32.mrf.mxu1 }
 0x21d   : > { %v2088_v24 = vpop.f32.mrf.mxu0 }
 0x21e   : > { %3297 = vst.msk [vmem:[%s5152_s12 + $0x104] sm:$0xf] %vm3231_vm1, %v4290_v35  ;;  %v2767_v39 = vmax.f32 %v2543_v38, 0.0  ;;  %v2089_v27 = vadd.f32 %v5467_v22, %v2088_v24  ;;  %v2571_v51 = vpop.f32.mrf.mxu1 }
 0x21f   : > { %v2090_v28 = vpop.f32.mrf.mxu0 }
 0x220   : > { %v4291_v15 = vpack.c.bf16 %v2767_v39, %v2767_v39  ;;  %v2546_v43 = vadd.f32 %v2545_v49, %v2089_v27  ;;  %v2574_v52 = vpop.f32.mrf.mxu1 }
 0x221   : > { %v2093_v32 = vpop.f32.mrf.mxu0 }
 0x222   : > { %3298 = vst.msk [vmem:[%s5152_s12 + $0x108] sm:$0xf] %vm3231_vm1, %v4291_v15  ;;  %v2768_v5 = vmax.f32 %v2546_v43, 0.0  ;;  %v2094_v48 = vadd.f32 %v5467_v22, %v2093_v32  ;;  %v2576_v36 = vpop.f32.mrf.mxu1 }
 0x223   : > { %v2095_v37 = vpop.f32.mrf.mxu0 }
 0x224   : > { %v4292_v12 = vpack.c.bf16 %v2768_v5, %v2768_v5  ;;  %v2551_v33 = vadd.f32 %v2550_v54, %v2094_v48  ;;  %v2577_v60 = vpop.f32.mrf.mxu1 }
 0x225   : > { %v2096_v55 = vpop.f32.mrf.mxu0 }
 0x226   : > { %3299 = vst.msk [vmem:[%s5152_s12 + $0x10c] sm:$0xf] %vm3231_vm1, %v4292_v12  ;;  %v2769_v40 = vmax.f32 %v2551_v33, 0.0  ;;  %v2097_v41 = vadd.f32 %v5467_v22, %v2096_v55  ;;  %v2579_v23 = vpop.f32.mrf.mxu1 }
 0x227   : > { %v2098_v56 = vpop.f32.mrf.mxu0 }
 0x228   : > { %v4293_v44 = vpack.c.bf16 %v2769_v40, %v2769_v40  ;;  %v2554_v49 = vadd.f32 %v2553_v14, %v2097_v41  ;;  %v2582_v46 = vpop.f32.mrf.mxu1 }
 0x229   : > { %v2101_v61 = vpop.f32.mrf.mxu0 }
 0x22a   : > { %3300 = vst.msk [vmem:[%s5152_s12 + $0x110] sm:$0xf] %vm3231_vm1, %v4293_v44  ;;  %v2770_v0 = vmax.f32 %v2554_v49, 0.0  ;;  %v2102_v50 = vadd.f32 %v5467_v22, %v2101_v61  ;;  %v2584_v59 = vpop.f32.mrf.mxu1 }
 0x22b   : > { %v2103_v1 = vpop.f32.mrf.mxu0 }
 0x22c   : > { %v4294_v4 = vpack.c.bf16 %v2770_v0, %v2770_v0  ;;  %v2559_v54 = vadd.f32 %v2558_v20, %v2102_v50  ;;  %v2585_v7 = vpop.f32.mrf.mxu1 }
 0x22d   : > { %v2104_v31 = vpop.f32.mrf.mxu0 }
 0x22e   : > { %3301 = vst.msk [vmem:[%s5152_s12 + $0x114] sm:$0xf] %vm3231_vm1, %v4294_v4  ;;  %v2771_v6 = vmax.f32 %v2559_v54, 0.0  ;;  %v2105_v9 = vadd.f32 %v5467_v22, %v2104_v31  ;;  %v2587_v19 = vpop.f32.mrf.mxu1 }
 0x22f   : > { %v2106_v57 = vpop.f32.mrf.mxu0 }
 0x230   : > { %v4295_v11 = vpack.c.bf16 %v2771_v6, %v2771_v6  ;;  %v2562_v14 = vadd.f32 %v2561_v16, %v2105_v9  ;;  %v2590_v25 = vpop.f32.mrf.mxu1 }
 0x231   : > { %v2109_v62 = vpop.f32.mrf.mxu0 }
 0x232   : > { %3302 = vst.msk [vmem:[%s5152_s12 + $0x118] sm:$0xf] %vm3231_vm1, %v4295_v11  ;;  %v2772_v63 = vmax.f32 %v2562_v14, 0.0  ;;  %v2110_v10 = vadd.f32 %v5467_v22, %v2109_v62  ;;  %v2592_v26 = vpop.f32.mrf.mxu1 }
 0x233   : > { %v2111_v3 = vpop.f32.mrf.mxu0 }
 0x234   : > { %v4296_v2 = vpack.c.bf16 %v2772_v63, %v2772_v63  ;;  %v2567_v20 = vadd.f32 %v2566_v21, %v2110_v10  ;;  %v2593_v30 = vpop.f32.mrf.mxu1 }
 0x235   : > { %v2112_v58 = vpop.f32.mrf.mxu0 }
 0x236   : > { %3303 = vst.msk [vmem:[%s5152_s12 + $0x11c] sm:$0xf] %vm3231_vm1, %v4296_v2  ;;  %v2773_v8 = vmax.f32 %v2567_v20, 0.0  ;;  %v2113_v45 = vadd.f32 %v5467_v22, %v2112_v58  ;;  %v2595_v18 = vpop.f32.mrf.mxu1 }
 0x237   : > { %v2114_v29 = vpop.f32.mrf.mxu0 }
 0x238   : > { %v4297_v13 = vpack.c.bf16 %v2773_v8, %v2773_v8  ;;  %v2570_v16 = vadd.f32 %v2569_v47, %v2113_v45  ;;  %v2598_v24 = vpop.f32.mrf.mxu1 }
 0x239   : > { %v2117_v34 = vpop.f32.mrf.mxu0 }
 0x23a   : > { %3304 = vst.msk [vmem:[%s5152_s12 + $0x120] sm:$0xf] %vm3231_vm1, %v4297_v13  ;;  %v2774_v53 = vmax.f32 %v2570_v16, 0.0  ;;  %v2118_v17 = vadd.f32 %v5467_v22, %v2117_v34  ;;  %v2600_v28 = vpop.f32.mrf.mxu1 }
 0x23b   : > { %v2119_v35 = vpop.f32.mrf.mxu0 }
 0x23c   : > { %v4298_v38 = vpack.c.bf16 %v2774_v53, %v2774_v53  ;;  %v2575_v21 = vadd.f32 %v2574_v52, %v2118_v17  ;;  %v2601_v32 = vpop.f32.mrf.mxu1 }
 0x23d   : > { %v2120_v39 = vpop.f32.mrf.mxu0 }
 0x23e   : > { %3305 = vst.msk [vmem:[%s5152_s12 + $0x124] sm:$0xf] %vm3231_vm1, %v4298_v38  ;;  %v2775_v27 = vmax.f32 %v2575_v21, 0.0  ;;  %v2121_v42 = vadd.f32 %v5467_v22, %v2120_v39  ;;  %v2603_v37 = vpop.f32.mrf.mxu1 }
 0x23f   : > { %v2122_v15 = vpop.f32.mrf.mxu0  ;;  %v5713_v37 = vld [vmem:[%s5984_s2] ss:$0 sm:$0xff] }
 0x240   : > { %v4299_v43 = vpack.c.bf16 %v2775_v27, %v2775_v27  ;;  %v2578_v47 = vadd.f32 %v2577_v60, %v2121_v42  ;;  %v2606_v55 = vpop.f32.mrf.mxu1 }
 0x241   : > { %v2125_v5 = vpop.f32.mrf.mxu0 }
 0x242   : > { %3306 = vst.msk [vmem:[%s5152_s12 + $0x128] sm:$0xf] %vm3231_vm1, %v4299_v43  ;;  %v2776_v48 = vmax.f32 %v2578_v47, 0.0  ;;  %v2126_v51 = vadd.f32 %v5467_v22, %v2125_v5  ;;  %v2608_v56 = vpop.f32.mrf.mxu1 }
 0x243   : > { %v2127_v12 = vpop.f32.mrf.mxu0 }
 0x244   : > { %v4300_v33 = vpack.c.bf16 %v2776_v48, %v2776_v48  ;;  %v2583_v52 = vadd.f32 %v2582_v46, %v2126_v51  ;;  %v2609_v61 = vpop.f32.mrf.mxu1 }
 0x245   : > { %v2128_v40 = vpop.f32.mrf.mxu0 }
 0x246   : > { %3307 = vst.msk [vmem:[%s5152_s12 + $0x12c] sm:$0xf] %vm3231_vm1, %v4300_v33  ;;  %v2777_v41 = vmax.f32 %v2583_v52, 0.0  ;;  %v2129_v36 = vadd.f32 %v5467_v22, %v2128_v40  ;;  %v2611_v1 = vpop.f32.mrf.mxu1 }
 0x247   : > { %v2130_v44 = vpop.f32.mrf.mxu0 }
 0x248   : > { %v4301_v49 = vpack.c.bf16 %v2777_v41, %v2777_v41  ;;  %v2586_v60 = vadd.f32 %v2585_v7, %v2129_v36  ;;  %v2614_v31 = vpop.f32.mrf.mxu1 }
 0x249   : > { %v2133_v0 = vpop.f32.mrf.mxu0 }
 0x24a   : > { %3308 = vst.msk [vmem:[%s5152_s12 + $0x130] sm:$0xf] %vm3231_vm1, %v4301_v49  ;;  %v2778_v50 = vmax.f32 %v2586_v60, 0.0  ;;  %v2134_v23 = vadd.f32 %v5467_v22, %v2133_v0  ;;  %v2616_v57 = vpop.f32.mrf.mxu1 }
 0x24b   : > { %v2135_v4 = vpop.f32.mrf.mxu0 }
 0x24c   : > { %v4302_v54 = vpack.c.bf16 %v2778_v50, %v2778_v50  ;;  %v2591_v46 = vadd.f32 %v2590_v25, %v2134_v23  ;;  %v2617_v62 = vpop.f32.mrf.mxu1 }
 0x24d   : > { %v2136_v6 = vpop.f32.mrf.mxu0 }
 0x24e   : > { %3309 = vst.msk [vmem:[%s5152_s12 + $0x134] sm:$0xf] %vm3231_vm1, %v4302_v54  ;;  %v2779_v9 = vmax.f32 %v2591_v46, 0.0  ;;  %v2137_v59 = vadd.f32 %v5467_v22, %v2136_v6  ;;  %v2619_v3 = vpop.f32.mrf.mxu1 }
 0x24f   : > { %v2138_v11 = vpop.f32.mrf.mxu0 }
 0x250   : > { %v4303_v14 = vpack.c.bf16 %v2779_v9, %v2779_v9  ;;  %v2594_v7 = vadd.f32 %v2593_v30, %v2137_v59  ;;  %v2622_v58 = vpop.f32.mrf.mxu1 }
 0x251   : > { %v2141_v63 = vpop.f32.mrf.mxu0 }
 0x252   : > { %3310 = vst.msk [vmem:[%s5152_s12 + $0x138] sm:$0xf] %vm3231_vm1, %v4303_v14  ;;  %v2780_v10 = vmax.f32 %v2594_v7, 0.0  ;;  %v2142_v19 = vadd.f32 %v5467_v22, %v2141_v63  ;;  %v2624_v29 = vpop.f32.mrf.mxu1 }
 0x253   : > { %v2143_v2 = vpop.f32.mrf.mxu0 }
 0x254   : > { %v4304_v20 = vpack.c.bf16 %v2780_v10, %v2780_v10  ;;  %v2599_v25 = vadd.f32 %v2598_v24, %v2142_v19  ;;  %v2625_v34 = vpop.f32.mrf.mxu1 }
 0x255   : > { %v2144_v8 = vpop.f32.mrf.mxu0 }
 0x256   : > { %3311 = vst.msk [vmem:[%s5152_s12 + $0x13c] sm:$0xf] %vm3231_vm1, %v4304_v20  ;;  %v2781_v45 = vmax.f32 %v2599_v25, 0.0  ;;  %v2145_v26 = vadd.f32 %v5467_v22, %v2144_v8  ;;  %v2627_v35 = vpop.f32.mrf.mxu1 }
 0x257   : > { %v2146_v13 = vpop.f32.mrf.mxu0 }
 0x258   : > { %v4305_v16 = vpack.c.bf16 %v2781_v45, %v2781_v45  ;;  %v2602_v30 = vadd.f32 %v2601_v32, %v2145_v26  ;;  %v2630_v39 = vpop.f32.mrf.mxu1 }
 0x259   : > { %v2149_v53 = vpop.f32.mrf.mxu0 }
 0x25a   : > { %3312 = vst.msk [vmem:[%s5152_s12 + $0x140] sm:$0xf] %vm3231_vm1, %v4305_v16  ;;  %v2782_v17 = vmax.f32 %v2602_v30, 0.0  ;;  %v2150_v18 = vadd.f32 %v5467_v22, %v2149_v53  ;;  %v2632_v15 = vpop.f32.mrf.mxu1 }
 0x25b   : > { %v2151_v38 = vpop.f32.mrf.mxu0 }
 0x25c   : > { %v4306_v21 = vpack.c.bf16 %v2782_v17, %v2782_v17  ;;  %v2607_v24 = vadd.f32 %v2606_v55, %v2150_v18  ;;  %v2633_v5 = vpop.f32.mrf.mxu1 }
 0x25d   : > { %v2152_v27 = vpop.f32.mrf.mxu0 }
 0x25e   : > { %3313 = vst.msk [vmem:[%s5152_s12 + $0x144] sm:$0xf] %vm3231_vm1, %v4306_v21  ;;  %v2783_v42 = vmax.f32 %v2607_v24, 0.0  ;;  %v2153_v28 = vadd.f32 %v5467_v22, %v2152_v27  ;;  %v2635_v33 = vpop.f32.mrf.mxu1 }
 0x25f   : > { %v2154_v43 = vpop.f32.mrf.mxu0 }
 0x260   : > { %v4307_v47 = vpack.c.bf16 %v2783_v42, %v2783_v42  ;;  %v2610_v32 = vadd.f32 %v2609_v61, %v2153_v28  ;;  %v2638_v40 = vpop.f32.mrf.mxu1 }
 0x261   : > { %v2157_v48 = vpop.f32.mrf.mxu0 }
 0x262   : > { %3314 = vst.msk [vmem:[%s5152_s12 + $0x148] sm:$0xf] %vm3231_vm1, %v4307_v47  ;;  %v2784_v51 = vmax.f32 %v2610_v32, 0.0  ;;  %v2158_v12 = vadd.f32 %v5713_v37, %v2157_v48  ;;  %v2640_v44 = vpop.f32.mrf.mxu1 }
 0x263   : > { %v2159_v22 = vpop.f32.mrf.mxu0 }
 0x264   : > { %v4308_v52 = vpack.c.bf16 %v2784_v51, %v2784_v51  ;;  %v2615_v55 = vadd.f32 %v2614_v31, %v2158_v12  ;;  %v2641_v0 = vpop.f32.mrf.mxu1 }
 0x265   : > { %v2160_v41 = vpop.f32.mrf.mxu0 }
 0x266   : > { %3315 = vst.msk [vmem:[%s5152_s12 + $0x14c] sm:$0xf] %vm3231_vm1, %v4308_v52  ;;  %v2785_v36 = vmax.f32 %v2615_v55, 0.0  ;;  %v2161_v56 = vadd.f32 %v5713_v37, %v2160_v41  ;;  %v2643_v4 = vpop.f32.mrf.mxu1 }
 0x267   : > { %v2162_v49 = vpop.f32.mrf.mxu0 }
 0x268   : > { %v4309_v60 = vpack.c.bf16 %v2785_v36, %v2785_v36  ;;  %v2618_v61 = vadd.f32 %v2617_v62, %v2161_v56  ;;  %v2646_v6 = vpop.f32.mrf.mxu1 }
 0x269   : > { %v2165_v50 = vpop.f32.mrf.mxu0 }
 0x26a   : > { %3316 = vst.msk [vmem:[%s5152_s12 + $0x150] sm:$0xf] %vm3231_vm1, %v4309_v60  ;;  %v2786_v23 = vmax.f32 %v2618_v61, 0.0  ;;  %v2166_v1 = vadd.f32 %v5713_v37, %v2165_v50  ;;  %v2648_v11 = vpop.f32.mrf.mxu1 }
 0x26b   : > { %v2167_v54 = vpop.f32.mrf.mxu0 }
 0x26c   : > { %v4310_v46 = vpack.c.bf16 %v2786_v23, %v2786_v23  ;;  %v2623_v31 = vadd.f32 %v2622_v58, %v2166_v1  ;;  %v2649_v63 = vpop.f32.mrf.mxu1 }
 0x26d   : > { %v2168_v9 = vpop.f32.mrf.mxu0 }
 0x26e   : > { %3317 = vst.msk [vmem:[%s5152_s12 + $0x154] sm:$0xf] %vm3231_vm1, %v4310_v46  ;;  %v2787_v59 = vmax.f32 %v2623_v31, 0.0  ;;  %v2169_v57 = vadd.f32 %v5713_v37, %v2168_v9  ;;  %v2651_v2 = vpop.f32.mrf.mxu1 }
 0x26f   : > { %v2170_v14 = vpop.f32.mrf.mxu0 }
 0x270   : > { %v4311_v7 = vpack.c.bf16 %v2787_v59, %v2787_v59  ;;  %v2626_v62 = vadd.f32 %v2625_v34, %v2169_v57  ;;  %v2654_v8 = vpop.f32.mrf.mxu1 }
 0x271   : > { %v2173_v10 = vpop.f32.mrf.mxu0 }
 0x272   : > { %3318 = vst.msk [vmem:[%s5152_s12 + $0x158] sm:$0xf] %vm3231_vm1, %v4311_v7  ;;  %v2788_v19 = vmax.f32 %v2626_v62, 0.0  ;;  %v2174_v3 = vadd.f32 %v5713_v37, %v2173_v10  ;;  %v2656_v13 = vpop.f32.mrf.mxu1 }
 0x273   : > { %v2175_v20 = vpop.f32.mrf.mxu0 }
 0x274   : > { %v4312_v25 = vpack.c.bf16 %v2788_v19, %v2788_v19  ;;  %v2631_v58 = vadd.f32 %v2630_v39, %v2174_v3  ;;  %v2657_v53 = vpop.f32.mrf.mxu1 }
 0x275   : > { %v2176_v45 = vpop.f32.mrf.mxu0 }
 0x276   : > { %3319 = vst.msk [vmem:[%s5152_s12 + $0x15c] sm:$0xf] %vm3231_vm1, %v4312_v25  ;;  %v2789_v26 = vmax.f32 %v2631_v58, 0.0  ;;  %v2177_v29 = vadd.f32 %v5713_v37, %v2176_v45  ;;  %v2659_v38 = vpop.f32.mrf.mxu1 }
 0x277   : > { %v2178_v16 = vpop.f32.mrf.mxu0 }
 0x278   : > { %v4313_v30 = vpack.c.bf16 %v2789_v26, %v2789_v26  ;;  %v2634_v34 = vadd.f32 %v2633_v5, %v2177_v29  ;;  %v2662_v27 = vpop.f32.mrf.mxu1 }
 0x279   : > { %v2181_v17 = vpop.f32.mrf.mxu0 }
 0x27a   : > { %3320 = vst.msk [vmem:[%s5152_s12 + $0x160] sm:$0xf] %vm3231_vm1, %v4313_v30  ;;  %v2790_v18 = vmax.f32 %v2634_v34, 0.0  ;;  %v2182_v35 = vadd.f32 %v5713_v37, %v2181_v17  ;;  %v2664_v43 = vpop.f32.mrf.mxu1 }
 0x27b   : > { %v2183_v21 = vpop.f32.mrf.mxu0 }
 0x27c   : > { %v4314_v24 = vpack.c.bf16 %v2790_v18, %v2790_v18  ;;  %v2639_v39 = vadd.f32 %v2638_v40, %v2182_v35  ;;  %v2665_v48 = vpop.f32.mrf.mxu1 }
 0x27d   : > { %v2184_v42 = vpop.f32.mrf.mxu0 }
 0x27e   : > { %3321 = vst.msk [vmem:[%s5152_s12 + $0x164] sm:$0xf] %vm3231_vm1, %v4314_v24  ;;  %v2791_v28 = vmax.f32 %v2639_v39, 0.0  ;;  %v2185_v15 = vadd.f32 %v5713_v37, %v2184_v42  ;;  %v2667_v22 = vpop.f32.mrf.mxu1 }
 0x27f   : > { %v2186_v47 = vpop.f32.mrf.mxu0 }
 0x280   : > { %v4315_v32 = vpack.c.bf16 %v2791_v28, %v2791_v28  ;;  %v2642_v5 = vadd.f32 %v2641_v0, %v2185_v15  ;;  %v2670_v41 = vpop.f32.mrf.mxu1 }
 0x281   : > { %v2189_v51 = vpop.f32.mrf.mxu0 }
 0x282   : > { %3322 = vst.msk [vmem:[%s5152_s12 + $0x168] sm:$0xf] %vm3231_vm1, %v4315_v32  ;;  %v2792_v12 = vmax.f32 %v2642_v5, 0.0  ;;  %v2190_v33 = vadd.f32 %v5713_v37, %v2189_v51  ;;  %v2672_v49 = vpop.f32.mrf.mxu1 }
 0x283   : > { %v2191_v52 = vpop.f32.mrf.mxu0 }
 0x284   : > { %v4316_v55 = vpack.c.bf16 %v2792_v12, %v2792_v12  ;;  %v2647_v40 = vadd.f32 %v2646_v6, %v2190_v33  ;;  %v2673_v50 = vpop.f32.mrf.mxu1 }
 0x285   : > { %v2192_v36 = vpop.f32.mrf.mxu0 }
 0x286   : > { %3323 = vst.msk [vmem:[%s5152_s12 + $0x16c] sm:$0xf] %vm3231_vm1, %v4316_v55  ;;  %v2793_v56 = vmax.f32 %v2647_v40, 0.0  ;;  %v2193_v44 = vadd.f32 %v5713_v37, %v2192_v36  ;;  %v2675_v54 = vpop.f32.mrf.mxu1 }
 0x287   : > { %v2194_v60 = vpop.f32.mrf.mxu0 }
 0x288   : > { %v4317_v61 = vpack.c.bf16 %v2793_v56, %v2793_v56  ;;  %v2650_v0 = vadd.f32 %v2649_v63, %v2193_v44  ;;  %v2678_v9 = vpop.f32.mrf.mxu1 }
 0x289   : > { %v2197_v23 = vpop.f32.mrf.mxu0 }
 0x28a   : > { %3324 = vst.msk [vmem:[%s5152_s12 + $0x170] sm:$0xf] %vm3231_vm1, %v4317_v61  ;;  %v2794_v1 = vmax.f32 %v2650_v0, 0.0  ;;  %v2198_v4 = vadd.f32 %v5713_v37, %v2197_v23  ;;  %v2680_v14 = vpop.f32.mrf.mxu1 }
 0x28b   : > { %v2199_v46 = vpop.f32.mrf.mxu0 }
 0x28c   : > { %v4318_v31 = vpack.c.bf16 %v2794_v1, %v2794_v1  ;;  %v2655_v6 = vadd.f32 %v2654_v8, %v2198_v4  ;;  %v2681_v10 = vpop.f32.mrf.mxu1 }
 0x28d   : > { %v2200_v59 = vpop.f32.mrf.mxu0 }
 0x28e   : > { %3325 = vst.msk [vmem:[%s5152_s12 + $0x174] sm:$0xf] %vm3231_vm1, %v4318_v31  ;;  %v2795_v57 = vmax.f32 %v2655_v6, 0.0  ;;  %v2201_v11 = vadd.f32 %v5713_v37, %v2200_v59  ;;  %v2683_v20 = vpop.f32.mrf.mxu1 }
 0x28f   : > { %v2202_v7 = vpop.f32.mrf.mxu0 }
 0x290   : > { %v4319_v62 = vpack.c.bf16 %v2795_v57, %v2795_v57  ;;  %v2658_v63 = vadd.f32 %v2657_v53, %v2201_v11  ;;  %v2686_v45 = vpop.f32.mrf.mxu1 }
 0x291   : > { %v2205_v19 = vpop.f32.mrf.mxu0 }
 0x292   : > { %3326 = vst.msk [vmem:[%s5152_s12 + $0x178] sm:$0xf] %vm3231_vm1, %v4319_v62  ;;  %v2796_v3 = vmax.f32 %v2658_v63, 0.0  ;;  %v2206_v2 = vadd.f32 %v5713_v37, %v2205_v19  ;;  %v2688_v16 = vpop.f32.mrf.mxu1 }
 0x293   : > { %v2207_v25 = vpop.f32.mrf.mxu0 }
 0x294   : > { %v4320_v58 = vpack.c.bf16 %v2796_v3, %v2796_v3  ;;  %v2663_v8 = vadd.f32 %v2662_v27, %v2206_v2  ;;  %v2689_v17 = vpop.f32.mrf.mxu1 }
 0x295   : > { %v2208_v26 = vpop.f32.mrf.mxu0 }
 0x296   : > { %3327 = vst.msk [vmem:[%s5152_s12 + $0x17c] sm:$0xf] %vm3231_vm1, %v4320_v58  ;;  %v2797_v29 = vmax.f32 %v2663_v8, 0.0  ;;  %v2209_v13 = vadd.f32 %v5713_v37, %v2208_v26  ;;  %v2691_v21 = vpop.f32.mrf.mxu1 }
 0x297   : > { %v2210_v30 = vpop.f32.mrf.mxu0 }
 0x298   : > { %v4321_v34 = vpack.c.bf16 %v2797_v29, %v2797_v29  ;;  %v2666_v53 = vadd.f32 %v2665_v48, %v2209_v13  ;;  %v2694_v42 = vpop.f32.mrf.mxu1 }
 0x299   : > { %v2213_v18 = vpop.f32.mrf.mxu0 }
 0x29a   : > { %3328 = vst.msk [vmem:[%s5152_s12 + $0x180] sm:$0xf] %vm3231_vm1, %v4321_v34  ;;  %v2798_v35 = vmax.f32 %v2666_v53, 0.0  ;;  %v2214_v38 = vadd.f32 %v5713_v37, %v2213_v18  ;;  %v2696_v47 = vpop.f32.mrf.mxu1 }
 0x29b   : > { %v2215_v24 = vpop.f32.mrf.mxu0 }
 0x29c   : > { %v4322_v39 = vpack.c.bf16 %v2798_v35, %v2798_v35  ;;  %v2671_v27 = vadd.f32 %v2670_v41, %v2214_v38  ;;  %v2697_v51 = vpop.f32.mrf.mxu1 }
 0x29d   : > { %v2216_v28 = vpop.f32.mrf.mxu0 }
 0x29e   : > { %3329 = vst.msk [vmem:[%s5152_s12 + $0x184] sm:$0xf] %vm3231_vm1, %v4322_v39  ;;  %v2799_v15 = vmax.f32 %v2671_v27, 0.0  ;;  %v2217_v43 = vadd.f32 %v5713_v37, %v2216_v28  ;;  %v2699_v52 = vpop.f32.mrf.mxu1 }
 0x29f   : > { %v2218_v32 = vpop.f32.mrf.mxu0 }
 0x2a0   : > { %v4323_v5 = vpack.c.bf16 %v2799_v15, %v2799_v15  ;;  %v2674_v48 = vadd.f32 %v2673_v50, %v2217_v43 }
 0x2a1   : > { %v2221_v12 = vpop.f32.mrf.mxu0 }
 0x2a2   : > { %3330 = vst.msk [vmem:[%s5152_s12 + $0x188] sm:$0xf] %vm3231_vm1, %v4323_v5  ;;  %v2800_v33 = vmax.f32 %v2674_v48, 0.0  ;;  %v2222_v22 = vadd.f32 %v5713_v37, %v2221_v12 }
 0x2a3   : > { %v2223_v55 = vpop.f32.mrf.mxu0 }
 0x2a4   : > { %v4324_v40 = vpack.c.bf16 %v2800_v33, %v2800_v33  ;;  %v2679_v41 = vadd.f32 %v2678_v9, %v2222_v22 }
 0x2a5   : > { %v2224_v36 = vpop.f32.mrf.mxu0 }
 0x2a6   : > { %3331 = vst.msk [vmem:[%s5152_s12 + $0x18c] sm:$0xf] %vm3231_vm1, %v4324_v40  ;;  %v2801_v56 = vmax.f32 %v2679_v41, 0.0  ;;  %v2225_v44 = vadd.f32 %v5713_v37, %v2224_v36 }
 0x2a7   : > { %v2226_v49 = vpop.f32.mrf.mxu0 }
 0x2a8   : > { %v4325_v60 = vpack.c.bf16 %v2801_v56, %v2801_v56  ;;  %v2682_v61 = vadd.f32 %v2681_v10, %v2225_v44 }
 0x2a9   : > { %v2229_v0 = vpop.f32.mrf.mxu0 }
 0x2aa   : > { %3332 = vst.msk [vmem:[%s5152_s12 + $0x190] sm:$0xf] %vm3231_vm1, %v4325_v60  ;;  %v2802_v50 = vmax.f32 %v2682_v61, 0.0  ;;  %v2230_v23 = vadd.f32 %v5713_v37, %v2229_v0 }
 0x2ab   : > { %v2231_v1 = vpop.f32.mrf.mxu0 }
 0x2ac   : > { %v4326_v4 = vpack.c.bf16 %v2802_v50, %v2802_v50  ;;  %v2687_v54 = vadd.f32 %v2686_v45, %v2230_v23 }
 0x2ad   : > { %v2232_v46 = vpop.f32.mrf.mxu0 }
 0x2ae   : > { %3333 = vst.msk [vmem:[%s5152_s12 + $0x194] sm:$0xf] %vm3231_vm1, %v4326_v4  ;;  %v2803_v31 = vmax.f32 %v2687_v54, 0.0  ;;  %v2233_v6 = vadd.f32 %v5713_v37, %v2232_v46 }
 0x2af   : > { %v2234_v9 = vpop.f32.mrf.mxu0 }
 0x2b0   : > { %v4327_v59 = vpack.c.bf16 %v2803_v31, %v2803_v31  ;;  %v2690_v57 = vadd.f32 %v2689_v17, %v2233_v6 }
 0x2b1   : > { %v2237_v11 = vpop.f32.mrf.mxu0 }
 0x2b2   : > { %3334 = vst.msk [vmem:[%s5152_s12 + $0x198] sm:$0xf] %vm3231_vm1, %v4327_v59  ;;  %v2804_v14 = vmax.f32 %v2690_v57, 0.0  ;;  %v2238_v7 = vadd.f32 %v5713_v37, %v2237_v11 }
 0x2b3   : > { %v2239_v62 = vpop.f32.mrf.mxu0 }
 0x2b4   : > { %v4328_v63 = vpack.c.bf16 %v2804_v14, %v2804_v14  ;;  %v2695_v10 = vadd.f32 %v2694_v42, %v2238_v7 }
 0x2b5   : > { %v2240_v19 = vpop.f32.mrf.mxu0 }
 0x2b6   : > { %3335 = vst.msk [vmem:[%s5152_s12 + $0x19c] sm:$0xf] %vm3231_vm1, %v4328_v63  ;;  %v2805_v3 = vmax.f32 %v2695_v10, 0.0  ;;  %v2241_v2 = vadd.f32 %v5713_v37, %v2240_v19 }
 0x2b7   : > { %v2242_v20 = vpop.f32.mrf.mxu0 }
 0x2b8   : > { %v4329_v25 = vpack.c.bf16 %v2805_v3, %v2805_v3  ;;  %v2698_v58 = vadd.f32 %v2697_v51, %v2241_v2 }
 0x2ba   : > { %3336 = vst.msk [vmem:[%s5152_s12 + $0x1a0] sm:$0xf] %vm3231_vm1, %v4329_v25  ;;  %v2806_v8 = vmax.f32 %v2698_v58, 0.0  ;;  %3344 = sbr.rel (!%p4871_p4) target bundleno = 784 (0x310), region = 36 }
 0x2bc   : > { %v4330_v45 = vpack.c.bf16 %v2806_v8, %v2806_v8 }
 0x2be   : > { %3337 = vst.msk [vmem:[%s5152_s12 + $0x1a4] sm:$0xf] %vm3231_vm1, %v4330_v45 }
 0x2bf   : > { %s5994_s24 = smov (!%p3347_p8, %s3346_s24), 106 }
 0x2c0   : > { %s4209_s4 = sshll.u32 %s5994_s24, 6 }
 0x2c1   : > { %p4212_p9 = scmp.eq.s32.totalorder %s4209_s4, 0 }
 0x2c2   : > { %s5796_s5 = sshrl.u32 (!%p4212_p9), %s5994_s24, 6 }
 0x2c3   : > { %3355 = sbr.rel (%p4212_p9) target bundleno = 784 (0x310), region = 40  ;;  %p4213_p10 = scmp.le.s32.totalorder (!%p4212_p9), %s5796_s5, 0 }
 0x2c8   : > { %3762 = sbr.rel (%p4213_p10) target bundleno = 767 (0x2ff), region = 112  ;;  %s5987_s15 = smov (!%p4213_p10), %s5790_s28 }
 0x2c9   : > { %s5988_s20 = smov (!%p4213_p10), %s5152_s12  ;;  %s5805_s29 = smov (!%p4213_p10), 0  }
 0x2ca   : > { %s5807_s6 = smov (!%p4213_p10), 0  }
 0x2cd LB: >> { %v3372_v37 = vld [vmem:[%s4799_s20] sm:$0xf]  ;;  %v3374_v26 = vld [vmem:[%s4799_s20 + $0x4] sm:$0xf]  ;;  %v3376_v29 = vld [vmem:[%s4799_s20 + $0x8] sm:$0xf]  ;;  %s4807_s6 = sphi %s5807_s6, %s3366_s6   ;;  %s4803_s29 = sphi %s5805_s29, %s5989_s29   ;;  %s4799_s20 = sphi %s5988_s20, %s3505_s20   ;;  %s4795_s15 = sphi %s5987_s15, %s3506_s15  }
 0x2ce   : >> { %3373 = vst [vmem:[%s4795_s15] sm:$0xf] %v3372_v37  ;;  %3375 = vst [vmem:[%s4795_s15 + $0x4] sm:$0xf] %v3374_v26  ;;  %v3378_v13 = vld [vmem:[%s4799_s20 + $0xc] sm:$0xf]  ;;  %s3500_s7 = sadd.s32 1, %s4803_s29 }
 0x2cf   : >> { %3377 = vst [vmem:[%s4795_s15 + $0x8] sm:$0xf] %v3376_v29  ;;  %v3380_v16 = vld [vmem:[%s4799_s20 + $0x10] sm:$0xf]  ;;  %v3382_v30 = vld [vmem:[%s4799_s20 + $0x14] sm:$0xf]  ;;  %p3501_p11 = scmp.ge.s32.totalorder %s3500_s7, %s5796_s5 }
 0x2d0   : >> { %3379 = vst [vmem:[%s4795_s15 + $0xc] sm:$0xf] %v3378_v13  ;;  %3381 = vst [vmem:[%s4795_s15 + $0x10] sm:$0xf] %v3380_v16  ;;  %v3384_v34 = vld [vmem:[%s4799_s20 + $0x18] sm:$0xf] }
 0x2d1   : >> { %3383 = vst [vmem:[%s4795_s15 + $0x14] sm:$0xf] %v3382_v30  ;;  %v3386_v53 = vld [vmem:[%s4799_s20 + $0x1c] sm:$0xf]  ;;  %v3388_v17 = vld [vmem:[%s4799_s20 + $0x20] sm:$0xf] }
 0x2d2   : >> { %3385 = vst [vmem:[%s4795_s15 + $0x18] sm:$0xf] %v3384_v34  ;;  %3387 = vst [vmem:[%s4795_s15 + $0x1c] sm:$0xf] %v3386_v53  ;;  %v3390_v18 = vld [vmem:[%s4799_s20 + $0x24] sm:$0xf] }
 0x2d3   : >> { %3389 = vst [vmem:[%s4795_s15 + $0x20] sm:$0xf] %v3388_v17  ;;  %v3392_v35 = vld [vmem:[%s4799_s20 + $0x28] sm:$0xf]  ;;  %v3394_v38 = vld [vmem:[%s4799_s20 + $0x2c] sm:$0xf] }
 0x2d4   : >> { %3391 = vst [vmem:[%s4795_s15 + $0x24] sm:$0xf] %v3390_v18  ;;  %3393 = vst [vmem:[%s4795_s15 + $0x28] sm:$0xf] %v3392_v35  ;;  %v3396_v21 = vld [vmem:[%s4799_s20 + $0x30] sm:$0xf] }
 0x2d5   : >> { %3395 = vst [vmem:[%s4795_s15 + $0x2c] sm:$0xf] %v3394_v38  ;;  %v3398_v24 = vld [vmem:[%s4799_s20 + $0x34] sm:$0xf]  ;;  %v3400_v39 = vld [vmem:[%s4799_s20 + $0x38] sm:$0xf] }
 0x2d6   : >> { %3397 = vst [vmem:[%s4795_s15 + $0x30] sm:$0xf] %v3396_v21  ;;  %3399 = vst [vmem:[%s4795_s15 + $0x34] sm:$0xf] %v3398_v24  ;;  %v3402_v27 = vld [vmem:[%s4799_s20 + $0x3c] sm:$0xf] }
 0x2d7   : >> { %3401 = vst [vmem:[%s4795_s15 + $0x38] sm:$0xf] %v3400_v39  ;;  %v3404_v42 = vld [vmem:[%s4799_s20 + $0x40] sm:$0xf]  ;;  %v3406_v28 = vld [vmem:[%s4799_s20 + $0x44] sm:$0xf] }
 0x2d8   : >> { %3403 = vst [vmem:[%s4795_s15 + $0x3c] sm:$0xf] %v3402_v27  ;;  %3405 = vst [vmem:[%s4795_s15 + $0x40] sm:$0xf] %v3404_v42  ;;  %v3408_v15 = vld [vmem:[%s4799_s20 + $0x48] sm:$0xf] }
 0x2d9   : >> { %3407 = vst [vmem:[%s4795_s15 + $0x44] sm:$0xf] %v3406_v28  ;;  %v3410_v43 = vld [vmem:[%s4799_s20 + $0x4c] sm:$0xf]  ;;  %v3412_v47 = vld [vmem:[%s4799_s20 + $0x50] sm:$0xf] }
 0x2da   : >> { %3409 = vst [vmem:[%s4795_s15 + $0x48] sm:$0xf] %v3408_v15  ;;  %3411 = vst [vmem:[%s4795_s15 + $0x4c] sm:$0xf] %v3410_v43  ;;  %v3414_v32 = vld [vmem:[%s4799_s20 + $0x54] sm:$0xf] }
 0x2db   : >> { %3413 = vst [vmem:[%s4795_s15 + $0x50] sm:$0xf] %v3412_v47  ;;  %v3416_v5 = vld [vmem:[%s4799_s20 + $0x58] sm:$0xf]  ;;  %v3418_v48 = vld [vmem:[%s4799_s20 + $0x5c] sm:$0xf] }
 0x2dc   : >> { %3415 = vst [vmem:[%s4795_s15 + $0x54] sm:$0xf] %v3414_v32  ;;  %3417 = vst [vmem:[%s4795_s15 + $0x58] sm:$0xf] %v3416_v5  ;;  %v3420_v51 = vld [vmem:[%s4799_s20 + $0x60] sm:$0xf] }
 0x2dd   : >> { %3419 = vst [vmem:[%s4795_s15 + $0x5c] sm:$0xf] %v3418_v48  ;;  %v3422_v12 = vld [vmem:[%s4799_s20 + $0x64] sm:$0xf]  ;;  %v3424_v33 = vld [vmem:[%s4799_s20 + $0x68] sm:$0xf] }
 0x2de   : >> { %3421 = vst [vmem:[%s4795_s15 + $0x60] sm:$0xf] %v3420_v51  ;;  %3423 = vst [vmem:[%s4795_s15 + $0x64] sm:$0xf] %v3422_v12  ;;  %v3426_v22 = vld [vmem:[%s4799_s20 + $0x6c] sm:$0xf] }
 0x2df   : >> { %3425 = vst [vmem:[%s4795_s15 + $0x68] sm:$0xf] %v3424_v33  ;;  %v3428_v52 = vld [vmem:[%s4799_s20 + $0x70] sm:$0xf]  ;;  %v3430_v55 = vld [vmem:[%s4799_s20 + $0x74] sm:$0xf] }
 0x2e0   : >> { %3427 = vst [vmem:[%s4795_s15 + $0x6c] sm:$0xf] %v3426_v22  ;;  %3429 = vst [vmem:[%s4795_s15 + $0x70] sm:$0xf] %v3428_v52  ;;  %v3432_v40 = vld [vmem:[%s4799_s20 + $0x78] sm:$0xf] }
 0x2e1   : >> { %3431 = vst [vmem:[%s4795_s15 + $0x74] sm:$0xf] %v3430_v55  ;;  %v3434_v41 = vld [vmem:[%s4799_s20 + $0x7c] sm:$0xf]  ;;  %v3436_v36 = vld [vmem:[%s4799_s20 + $0x80] sm:$0xf] }
 0x2e2   : >> { %3433 = vst [vmem:[%s4795_s15 + $0x78] sm:$0xf] %v3432_v40  ;;  %3435 = vst [vmem:[%s4795_s15 + $0x7c] sm:$0xf] %v3434_v41  ;;  %v3438_v56 = vld [vmem:[%s4799_s20 + $0x84] sm:$0xf] }
 0x2e3   : >> { %3437 = vst [vmem:[%s4795_s15 + $0x80] sm:$0xf] %v3436_v36  ;;  %v3440_v44 = vld [vmem:[%s4799_s20 + $0x88] sm:$0xf]  ;;  %v3442_v49 = vld [vmem:[%s4799_s20 + $0x8c] sm:$0xf] }
 0x2e4   : >> { %3439 = vst [vmem:[%s4795_s15 + $0x84] sm:$0xf] %v3438_v56  ;;  %3441 = vst [vmem:[%s4795_s15 + $0x88] sm:$0xf] %v3440_v44  ;;  %v3444_v60 = vld [vmem:[%s4799_s20 + $0x90] sm:$0xf] }
 0x2e5   : >> { %3443 = vst [vmem:[%s4795_s15 + $0x8c] sm:$0xf] %v3442_v49  ;;  %v3446_v61 = vld [vmem:[%s4799_s20 + $0x94] sm:$0xf]  ;;  %v3448_v0 = vld [vmem:[%s4799_s20 + $0x98] sm:$0xf] }
 0x2e6   : >> { %3445 = vst [vmem:[%s4795_s15 + $0x90] sm:$0xf] %v3444_v60  ;;  %3447 = vst [vmem:[%s4795_s15 + $0x94] sm:$0xf] %v3446_v61  ;;  %v3450_v50 = vld [vmem:[%s4799_s20 + $0x9c] sm:$0xf] }
 0x2e7   : >> { %3449 = vst [vmem:[%s4795_s15 + $0x98] sm:$0xf] %v3448_v0  ;;  %v3452_v23 = vld [vmem:[%s4799_s20 + $0xa0] sm:$0xf]  ;;  %v3454_v1 = vld [vmem:[%s4799_s20 + $0xa4] sm:$0xf] }
 0x2e8   : >> { %3451 = vst [vmem:[%s4795_s15 + $0x9c] sm:$0xf] %v3450_v50  ;;  %3453 = vst [vmem:[%s4795_s15 + $0xa0] sm:$0xf] %v3452_v23  ;;  %v3456_v4 = vld [vmem:[%s4799_s20 + $0xa8] sm:$0xf] }
 0x2e9   : >> { %3455 = vst [vmem:[%s4795_s15 + $0xa4] sm:$0xf] %v3454_v1  ;;  %v3458_v54 = vld [vmem:[%s4799_s20 + $0xac] sm:$0xf]  ;;  %v3460_v46 = vld [vmem:[%s4799_s20 + $0xb0] sm:$0xf] }
 0x2ea   : >> { %3457 = vst [vmem:[%s4795_s15 + $0xa8] sm:$0xf] %v3456_v4  ;;  %3459 = vst [vmem:[%s4795_s15 + $0xac] sm:$0xf] %v3458_v54  ;;  %v3462_v31 = vld [vmem:[%s4799_s20 + $0xb4] sm:$0xf] }
 0x2eb   : >> { %3461 = vst [vmem:[%s4795_s15 + $0xb0] sm:$0xf] %v3460_v46  ;;  %v3464_v6 = vld [vmem:[%s4799_s20 + $0xb8] sm:$0xf]  ;;  %v3466_v9 = vld [vmem:[%s4799_s20 + $0xbc] sm:$0xf] }
 0x2ec   : >> { %3463 = vst [vmem:[%s4795_s15 + $0xb4] sm:$0xf] %v3462_v31  ;;  %3465 = vst [vmem:[%s4795_s15 + $0xb8] sm:$0xf] %v3464_v6  ;;  %v3468_v59 = vld [vmem:[%s4799_s20 + $0xc0] sm:$0xf] }
 0x2ed   : >> { %3467 = vst [vmem:[%s4795_s15 + $0xbc] sm:$0xf] %v3466_v9  ;;  %v3470_v57 = vld [vmem:[%s4799_s20 + $0xc4] sm:$0xf]  ;;  %v3472_v11 = vld [vmem:[%s4799_s20 + $0xc8] sm:$0xf] }
 0x2ee   : >> { %3469 = vst [vmem:[%s4795_s15 + $0xc0] sm:$0xf] %v3468_v59  ;;  %3471 = vst [vmem:[%s4795_s15 + $0xc4] sm:$0xf] %v3470_v57  ;;  %v3474_v14 = vld [vmem:[%s4799_s20 + $0xcc] sm:$0xf] }
 0x2ef   : >> { %3473 = vst [vmem:[%s4795_s15 + $0xc8] sm:$0xf] %v3472_v11  ;;  %v3476_v7 = vld [vmem:[%s4799_s20 + $0xd0] sm:$0xf]  ;;  %v3478_v62 = vld [vmem:[%s4799_s20 + $0xd4] sm:$0xf] }
 0x2f0   : >> { %3475 = vst [vmem:[%s4795_s15 + $0xcc] sm:$0xf] %v3474_v14  ;;  %3477 = vst [vmem:[%s4795_s15 + $0xd0] sm:$0xf] %v3476_v7  ;;  %v3480_v63 = vld [vmem:[%s4799_s20 + $0xd8] sm:$0xf] }
 0x2f1   : >> { %3479 = vst [vmem:[%s4795_s15 + $0xd4] sm:$0xf] %v3478_v62  ;;  %v3482_v10 = vld [vmem:[%s4799_s20 + $0xdc] sm:$0xf]  ;;  %v3484_v19 = vld [vmem:[%s4799_s20 + $0xe0] sm:$0xf] }
 0x2f2   : >> { %3481 = vst [vmem:[%s4795_s15 + $0xd8] sm:$0xf] %v3480_v63  ;;  %3483 = vst [vmem:[%s4795_s15 + $0xdc] sm:$0xf] %v3482_v10  ;;  %v3486_v3 = vld [vmem:[%s4799_s20 + $0xe4] sm:$0xf] }
 0x2f3   : >> { %3485 = vst [vmem:[%s4795_s15 + $0xe0] sm:$0xf] %v3484_v19  ;;  %v3488_v2 = vld [vmem:[%s4799_s20 + $0xe8] sm:$0xf]  ;;  %v3490_v20 = vld [vmem:[%s4799_s20 + $0xec] sm:$0xf] }
 0x2f4   : >> { %3487 = vst [vmem:[%s4795_s15 + $0xe4] sm:$0xf] %v3486_v3  ;;  %3489 = vst [vmem:[%s4795_s15 + $0xe8] sm:$0xf] %v3488_v2  ;;  %v3492_v25 = vld [vmem:[%s4799_s20 + $0xf0] sm:$0xf] }
 0x2f5   : >> { %3491 = vst [vmem:[%s4795_s15 + $0xec] sm:$0xf] %v3490_v20  ;;  %v3494_v58 = vld [vmem:[%s4799_s20 + $0xf4] sm:$0xf]  ;;  %v3496_v8 = vld [vmem:[%s4799_s20 + $0xf8] sm:$0xf] }
 0x2f6   : >> { %3493 = vst [vmem:[%s4795_s15 + $0xf0] sm:$0xf] %v3492_v25  ;;  %3495 = vst [vmem:[%s4795_s15 + $0xf4] sm:$0xf] %v3494_v58  ;;  %v3498_v45 = vld [vmem:[%s4799_s20 + $0xfc] sm:$0xf] }
 0x2f7   : >> { %3497 = vst [vmem:[%s4795_s15 + $0xf8] sm:$0xf] %v3496_v8  ;;  %3499 = vst [vmem:[%s4795_s15 + $0xfc] sm:$0xf] %v3498_v45  ;;  %s5996_s7 = smov (%p3501_p11, %s3500_s7), 0  ;;  %s3366_s6 = sadd.s32 1, %s4807_s6  }
 0x2f8   : >> { %s4214_s8 = sshll.u32 %s5996_s7, 8  ;;  %p3365_p12 = scmp.ge.s32.totalorder %s3366_s6, %s5796_s5 }
 0x2f9   : >> { %s3505_s20 = scalar_lea.vmem %s5152_s12, %s4214_s8 [#allocation2]   ;;  %s3506_s15 = scalar_lea.vmem %s5790_s28, %s4214_s8  }
 0x2fa   : >> { %s5989_s29 = smov %s5996_s7  ;;  %3368 = sbr.rel (!%p3365_p12) target bundleno = 717 (0x2cd), region = 118 }
 0x2ff PF: > { %s5964_s9 = sand.u32 63, %s5994_s24   ;;  %s4332_s10 = sshll.u32 %s5796_s5, 8 }
 0x300   : > { %s3511_s11 = scalar_lea.vmem %s5152_s12, %s4332_s10 [#allocation2]   ;;  %s3513_s14 = scalar_lea.vmem %s5790_s28, %s4332_s10  }
 0x301   : > { %p4219_p13 = scmp.le.s32.totalorder %s5964_s9, 0 }
 0x302   : > { %s4809_s17 = smov (!%p4219_p13), %s3513_s14   ;;  %s4813_s18 = smov (!%p4219_p13), %s3511_s11  }
 0x303   : > { %3776 = sbr.rel (%p4219_p13) target bundleno = 784 (0x310), region = 123  ;;  %s4817_s21 = smov (!%p4219_p13), 0  }
 0x304   : > { %s4821_s22 = smov (!%p4219_p13), 0  }
 0x308 LB: >> { %v3523_v37 = vld [vmem:[%s4815_s18] sm:$0xf]  ;;  %s3525_s30 = sadd.s32 1, %s4819_s21  ;;  %s3517_s22 = sadd.s32 1, %s4823_s22   ;;  %s4823_s22 = sphi %s4821_s22, %s3517_s22   ;;  %s4819_s21 = sphi %s4817_s21, %s4818_s21   ;;  %s4815_s18 = sphi %s4813_s18, %s3530_s18   ;;  %s4811_s17 = sphi %s4809_s17, %s3531_s17  }
 0x309   : >> { %3524 = vst [vmem:[%s4811_s17] sm:$0xf] %v3523_v37  ;;  %p3526_p0 = scmp.ge.s32.totalorder %s3525_s30, %s5964_s9  ;;  %p3516_p1 = scmp.ge.s32.totalorder %s3517_s22, %s5964_s9 }
 0x30b   : >> { %s5998_s30 = smov (%p3526_p0, %s3525_s30), 0  ;;  %3519 = sbr.rel (!%p3516_p1) target bundleno = 776 (0x308), region = 129 }
 0x30c   : >> { %s4220_s12 = sshll.u32 %s5998_s30, 2  ;;  %s4818_s21 = smov %s5998_s30  }
 0x30d   : >> { %s3530_s18 = scalar_lea.vmem %s3511_s11, %s4220_s12 [#allocation2]   ;;  %s3531_s17 = scalar_lea.vmem %s3513_s14, %s4220_s12  }
 0x310 PF: > { %p10_p2 = scmp.ge.s32.totalorder %s4861_s16, 4   ;;  %s5990_s12 = smov %s4787_s13 }
 0x311   : > { %s5991_s13 = smov %s4869_s19  ;;  %s5992_s14 = smov %s4861_s16 }
 0x312   :  { %12 = sbr.rel (!%p10_p2) target bundleno = 2 (0x2), region = 140 }

// kernel: _lambda_.7
= control target key start
LH: loop header
LB: loop body
LE: loop exit
PB: predicated region body
PF: predicated region fallthrough
CT: control target
= control target key end

     0   :  { %s2909_s12 = smov 0   ;;  %s2911_s13 = smov 0   ;;  %s3460_s0 = inlined_call_operand.vmem [shape: bf16[338,800], index: 0, kind: input, shape index: {}]   ;;  %s3461_s1 = inlined_call_operand.vmem [shape: bf16[800,16], index: 1, kind: input, shape index: {}]   ;;  %s3462_s2 = inlined_call_operand.vmem [shape: f32[1,16], index: 2, kind: input, shape index: {}]   ;;  %s3463_s3 = inlined_call_operand.vmem [shape: bf16[338,16], index: 3, kind: output, shape index: {}]  }
   0x1   :  { %s2913_s14 = smov 0  }
   0x2 LB: > { %s2922_s15 = sadd.s32 4294967295, %s2853_s14   ;;  %s2924_s16 = sadd.s32 1, %s2853_s14   ;;  %s2853_s14 = sphi %s2913_s14, %s3470_s14   ;;  %s2849_s13 = sphi %s2911_s13, %s3469_s13   ;;  %s2845_s12 = sphi %s2909_s12, %s3468_s12  }
   0x3   : > { %s85_s17 = ssub.s32 %s2853_s14, %s2924_s16  ;;  %s88_s18 = sadd.s32 1, %s2849_s13 }
   0x4   : > { %p86_p0 = scmp.eq.s32.totalorder %s85_s17, 0  ;;  %p98_p1 = scmp.ne.s32.totalorder %s2849_s13, %s2845_s12 }
   0x5   : > { %p99_p2 = scmp.eq.s32.totalorder %s2922_s15, 1  ;;  %p2037_p3 = scmp.ge.s32.totalorder %s2853_s14, 1 }
   0x6   : > { %s2932_s19 = scalar_select %p86_p0, %s2849_s13, %s88_s18  }
   0x7   : > { %p2934_p4 = por %p99_p2, %p98_p1  ;;  %p149_p5 = scmp.lt.s32.totalorder %s2853_s14, 3 }
   0x9   : > { %p150_p6 = pnand %p2037_p3, %p149_p5 }
   0xa   : > { %s2981_s28 = smul.u32 (!%p150_p6), 22, %s2922_s15 }
   0xb   : > { %153 = sbr.rel (%p150_p6) target bundleno = 495 (0x1ef), region = 32 }
   0xc   : > { %p184_p7 = scmp.lt.s32.totalorder (!%p150_p6), %s2981_s28, 42 }
  0x10   : > { %v2635_v0 = vld [vmem:[%s3461_s1 + $0x78] sm:$0xff]   ;;  %v2639_v4 = vld [vmem:[%s3461_s1 + $0x70] sm:$0xff]   ;;  %v2643_v8 = vld [vmem:[%s3461_s1 + $0x68] sm:$0xff]   ;;  %s185_s24 = scalar_select %p184_p7, %s2981_s28, 42  ;;  %v2887_v36 = vmov 0.0   ;;  %vm2888_vm0 = vmmov 0  }
  0x11   : > { %v2636_v1 = vld [vmem:[%s3461_s1 + $0x38] sm:$0xff]   ;;  %2235 = vmatprep.subr.bf16.mxu0 %v2635_v0  ;;  %v2640_v5 = vld [vmem:[%s3461_s1 + $0x30] sm:$0xff]   ;;  %v2644_v9 = vld [vmem:[%s3461_s1 + $0x28] sm:$0xff]   ;;  %vm1081_vm1 = vcmask 261120   ;;  %vm1709_vm2 = vcmask 125952   ;;  %s1740_s4 = ssub.s32 (%p2934_p4), 43, %s2981_s28 }
  0x12   : > { %v2637_v2 = vld [vmem:[%s3461_s1 + $0xf8] sm:$0xff]   ;;  %2236 = vmatpush3.bf16.msra.mxu0 %v2636_v1  ;;  %v2641_v6 = vld [vmem:[%s3461_s1 + $0xf0] sm:$0xff]   ;;  %v2645_v10 = vld [vmem:[%s3461_s1 + $0xe8] sm:$0xff]   ;;  %s2543_s7 = smul.u32 28, %s185_s24  ;;  %p1741_p8 = scmp.lt.s32.totalorder (%p2934_p4), %s1740_s4, 22 }
  0x13   : > { %v2638_v3 = vld [vmem:[%s3461_s1 + $0xb8] sm:$0xff]   ;;  %2317 = vmatprep.subr.bf16.mxu1 %v2637_v2  ;;  %2237 = vmatprep.subr.bf16.mxu0 %v2639_v4  ;;  %v2642_v7 = vld [vmem:[%s3461_s1 + $0xb0] sm:$0xff]   ;;  %v2646_v11 = vld [vmem:[%s3461_s1 + $0xa8] sm:$0xff]   ;;  %s2234_s5 = smul.u32 (%p2934_p4), 88, %s2922_s15 }
  0x14   : > { %2318 = vmatpush3.bf16.msra.mxu1 %v2638_v3  ;;  %v2647_v12 = vld [vmem:[%s3461_s1 + $0x60] sm:$0xff]   ;;  %v2651_v16 = vld [vmem:[%s3461_s1 + $0x58] sm:$0xff]   ;;  %v2655_v20 = vld [vmem:[%s3461_s1 + $0x50] sm:$0xff]   ;;  %s3036_s24 = scalar_lea.vmem %s3460_s0, %s2543_s7 }
  0x15   : > { %2319 = vmatprep.subr.bf16.mxu1 %v2641_v6  ;;  %v2648_v13 = vld [vmem:[%s3461_s1 + $0x20] sm:$0xff]   ;;  %v2652_v17 = vld [vmem:[%s3461_s1 + $0x18] sm:$0xff]   ;;  %v2656_v21 = vld [vmem:[%s3461_s1 + $0x10] sm:$0xff]   ;;  %s3357_s8 = scalar_lea.vmem (%p2934_p4), %s3463_s3, %s2234_s5  }
  0x16   : > { %2238 = vmatpush3.bf16.msra.mxu0 %v2640_v5  ;;  %v2649_v14 = vld [vmem:[%s3461_s1 + $0xe0] sm:$0xff]   ;;  %v2653_v18 = vld [vmem:[%s3461_s1 + $0xd8] sm:$0xff]   ;;  %v2657_v22 = vld [vmem:[%s3461_s1 + $0xd0] sm:$0xff]  }
  0x17   : > { %2239 = vmatprep.subr.bf16.mxu0 %v2643_v8  ;;  %v2650_v15 = vld [vmem:[%s3461_s1 + $0xa0] sm:$0xff]   ;;  %v2654_v19 = vld [vmem:[%s3461_s1 + $0x98] sm:$0xff]   ;;  %v2658_v23 = vld [vmem:[%s3461_s1 + $0x90] sm:$0xff]  }
  0x18   : > { %2320 = vmatpush3.bf16.msra.mxu1 %v2642_v7  ;;  %v2659_v24 = vld [vmem:[%s3461_s1 + $0x48] sm:$0xff]   ;;  %v2663_v28 = vld [vmem:[%s3461_s1 + $0x40] sm:$0xff]   ;;  %v2673_v37 = vld [vmem:[%s3461_s1 + $0x178] sm:$0xff]  }
  0x19   : > { %2321 = vmatprep.subr.bf16.mxu1 %v2645_v10  ;;  %v2660_v25 = vld [vmem:[%s3461_s1 + $0x8] sm:$0xff]   ;;  %v2664_v29 = vld [vmem:[%s3461_s1] sm:$0xff]   ;;  %v2674_v38 = vld [vmem:[%s3461_s1 + $0x138] sm:$0xff]  }
  0x1a   : > { %2240 = vmatpush3.bf16.msra.mxu0 %v2644_v9  ;;  %v2661_v26 = vld [vmem:[%s3461_s1 + $0xc8] sm:$0xff]   ;;  %v2665_v30 = vld [vmem:[%s3461_s1 + $0xc0] sm:$0xff]   ;;  %v2675_v39 = vld [vmem:[%s3036_s24 + $0x3c] ss:$28 sps:$4 sm:$0xff]  }
  0x1b   : > { %2241 = vmatprep.subr.bf16.mxu0 %v2647_v12  ;;  %v2662_v27 = vld [vmem:[%s3461_s1 + $0x88] sm:$0xff]   ;;  %v2666_v31 = vld [vmem:[%s3461_s1 + $0x80] sm:$0xff]   ;;  %v2678_v41 = vld [vmem:[%s3036_s24 + $0x38] ss:$28 sps:$4 sm:$0xff]  }
  0x1c   : > { %2322 = vmatpush3.bf16.msra.mxu1 %v2646_v11  ;;  %v2667_v32 = vld [vmem:[%s3036_s24] ss:$28 sps:$4 sm:$0xff]   ;;  %v2670_v34 = vld [vmem:[%s3036_s24 + $0x8] ss:$28 sps:$4 sm:$0xff]   ;;  %v2682_v44 = vld [vmem:[%s3461_s1 + $0x170] sm:$0xff]  }
  0x1d   : > { %2323 = vmatprep.subr.bf16.mxu1 %v2649_v14  ;;  %v2669_v33 = vld [vmem:[%s3036_s24 + $0x4] ss:$28 sps:$4 sm:$0xff]   ;;  %v2672_v35 = vld [vmem:[%s3036_s24 + $0xc] ss:$28 sps:$4 sm:$0xff]   ;;  %v2683_v45 = vld [vmem:[%s3461_s1 + $0x130] sm:$0xff]  }
  0x1e   : > { %2242 = vmatpush3.bf16.msra.mxu0 %v2648_v13  ;;  %1147 = vmatprep.mubr.bf16.mxu0 %v2669_v33  ;;  %v2677_v40 = vld [vmem:[%s3461_s1 + $0x188] sm:$0xff]   ;;  %v2679_v42 = vld [vmem:[%s3036_s24 + $0x44] ss:$28 sps:$4 sm:$0xff]   ;;  %v2684_v46 = vld [vmem:[%s3036_s24 + $0x74] ss:$28 sps:$4 sm:$0xff]  }
  0x1f   : > { %2243 = vmatprep.subr.bf16.mxu0 %v2651_v16  ;;  %1268 = vmatprep.mubr.bf16.mxu1 %v2672_v35  ;;  %v2681_v43 = vld [vmem:[%s3036_s24 + $0x40] ss:$28 sps:$4 sm:$0xff]   ;;  %v2690_v48 = vld [vmem:[%s3461_s1 + $0x168] sm:$0xff]   ;;  %v2689_v51 = vld [vmem:[%s3036_s24 + $0x78] ss:$28 sps:$4 sm:$0xff]  }
  0x20   : > { %2324 = vmatpush3.bf16.msra.mxu1 %v2650_v15  ;;  %v2687_v47 = vld [vmem:[%s3036_s24 + $0x7c] ss:$28 sps:$4 sm:$0xff]   ;;  %v2693_v49 = vld [vmem:[%s3461_s1 + $0x128] sm:$0xff]   ;;  %v2695_v53 = vld [vmem:[%s3036_s24 + $0xb4] ss:$28 sps:$4 sm:$0xff]  }
  0x21   : > { %2325 = vmatprep.subr.bf16.mxu1 %v2653_v18  ;;  %v2686_v50 = vld [vmem:[%s3036_s24 + $0x70] ss:$28 sps:$4 sm:$0xff]   ;;  %v2704_v54 = vld [vmem:[%s3461_s1 + $0x160] sm:$0xff]   ;;  %v2712_v60 = vld [vmem:[%s3461_s1 + $0x158] sm:$0xff]  }
  0x22   : > { %2244 = vmatpush3.bf16.msra.mxu0 %v2652_v17  ;;  %v2691_v52 = vld [vmem:[%s3036_s24 + $0xac] ss:$28 sps:$4 sm:$0xff]   ;;  %v2705_v55 = vld [vmem:[%s3461_s1 + $0x120] sm:$0xff]   ;;  %v2713_v61 = vld [vmem:[%s3461_s1 + $0x118] sm:$0xff]  }
  0x23   : > { %2245 = vmatprep.subr.bf16.mxu0 %v2655_v20  ;;  %v2694_v56 = vld [vmem:[%s3036_s24 + $0xa8] ss:$28 sps:$4 sm:$0xff]   ;;  %v2697_v57 = vld [vmem:[%s3036_s24 + $0xb0] ss:$28 sps:$4 sm:$0xff]   ;;  %v2700_v62 = vld [vmem:[%s3036_s24 + $0xe0] ss:$28 sps:$4 sm:$0xff]  }
  0x24   : > { %2326 = vmatpush3.bf16.msra.mxu1 %v2654_v19  ;;  %v2698_v58 = vld [vmem:[%s3036_s24 + $0xe4] ss:$28 sps:$4 sm:$0xff]   ;;  %v2701_v59 = vld [vmem:[%s3036_s24 + $0xec] ss:$28 sps:$4 sm:$0xff]   ;;  %v2706_v1 = vld [vmem:[%s3036_s24 + $0x11c] ss:$28 sps:$4 sm:$0xff]  }
  0x25   : > { %2327 = vmatprep.subr.bf16.mxu1 %v2657_v22  ;;  %v2720_v63 = vld [vmem:[%s3461_s1 + $0x180] sm:$0xff]   ;;  %v2723_v2 = vld [vmem:[%s3461_s1 + $0x150] sm:$0xff]   ;;  %v2735_v6 = vld [vmem:[%s3461_s1 + $0x148] sm:$0xff]  }
  0x26   : > { %2246 = vmatpush3.bf16.msra.mxu0 %v2656_v21  ;;  %v2703_v0 = vld [vmem:[%s3036_s24 + $0xe8] ss:$28 sps:$4 sm:$0xff]   ;;  %v2727_v4 = vld [vmem:[%s3461_s1 + $0x110] sm:$0xff]   ;;  %v2711_v8 = vld [vmem:[%s3036_s24 + $0x120] ss:$28 sps:$4 sm:$0xff]  }
  0x27   : > { %2247 = vmatprep.subr.bf16.mxu0 %v2659_v24  ;;  %v2709_v3 = vld [vmem:[%s3036_s24 + $0x124] ss:$28 sps:$4 sm:$0xff]   ;;  %v2708_v5 = vld [vmem:[%s3036_s24 + $0x118] ss:$28 sps:$4 sm:$0xff]   ;;  %v2736_v7 = vld [vmem:[%s3461_s1 + $0x108] sm:$0xff]  }
  0x28   : > { %2328 = vmatpush3.bf16.msra.mxu1 %v2658_v23  ;;  %v2714_v9 = vld [vmem:[%s3036_s24 + $0x154] ss:$28 sps:$4 sm:$0xff]   ;;  %v2717_v10 = vld [vmem:[%s3036_s24 + $0x15c] ss:$28 sps:$4 sm:$0xff]   ;;  %v2743_v11 = vld [vmem:[%s3461_s1 + $0x140] sm:$0xff]  }
  0x29   : > { %2329 = vmatprep.subr.bf16.mxu1 %v2661_v26  ;;  %v2744_v12 = vld [vmem:[%s3461_s1 + $0x100] sm:$0xff]   ;;  %v2716_v13 = vld [vmem:[%s3036_s24 + $0x150] ss:$28 sps:$4 sm:$0xff]   ;;  %v2719_v14 = vld [vmem:[%s3036_s24 + $0x158] ss:$28 sps:$4 sm:$0xff]  }
  0x2a   : > { %2248 = vmatpush3.bf16.msra.mxu0 %v2660_v25  ;;  %v2721_v15 = vld [vmem:[%s3036_s24 + $0x18c] ss:$28 sps:$4 sm:$0xff]   ;;  %v2725_v16 = vld [vmem:[%s3036_s24 + $0x194] ss:$28 sps:$4 sm:$0xff]   ;;  %v2729_v19 = vld [vmem:[%s3036_s24 + $0x1c4] ss:$28 sps:$4 sm:$0xff]  }
  0x2b   : > { %2249 = vmatprep.subr.bf16.mxu0 %v2663_v28  ;;  %v2724_v17 = vld [vmem:[%s3036_s24 + $0x188] ss:$28 sps:$4 sm:$0xff]   ;;  %v2728_v18 = vld [vmem:[%s3036_s24 + $0x190] ss:$28 sps:$4 sm:$0xff]   ;;  %v2731_v21 = vld [vmem:[%s3036_s24 + $0x1c0] ss:$28 sps:$4 sm:$0xff]  }
  0x2c   : > { %2330 = vmatpush3.bf16.msra.mxu1 %v2662_v27  ;;  %v2732_v20 = vld [vmem:[%s3036_s24 + $0x1cc] ss:$28 sps:$4 sm:$0xff]   ;;  %v2737_v23 = vld [vmem:[%s3036_s24 + $0x1fc] ss:$28 sps:$4 sm:$0xff]   ;;  %v2740_v24 = vld [vmem:[%s3036_s24 + $0x204] ss:$28 sps:$4 sm:$0xff]  }
  0x2d   : > { %2331 = vmatprep.subr.bf16.mxu1 %v2665_v30  ;;  %v2734_v22 = vld [vmem:[%s3036_s24 + $0x1c8] ss:$28 sps:$4 sm:$0xff]   ;;  %v2739_v25 = vld [vmem:[%s3036_s24 + $0x1f8] ss:$28 sps:$4 sm:$0xff]   ;;  %v2742_v26 = vld [vmem:[%s3036_s24 + $0x200] ss:$28 sps:$4 sm:$0xff]  }
  0x2e   : > { %2250 = vmatpush3.bf16.msra.mxu0 %v2664_v29  ;;  %v2745_v27 = vld [vmem:[%s3036_s24 + $0x234] ss:$28 sps:$4 sm:$0xff]   ;;  %v2748_v28 = vld [vmem:[%s3036_s24 + $0x23c] ss:$28 sps:$4 sm:$0xff]   ;;  %v2757_v35 = vld [vmem:[%s3036_s24 + $0x48] ss:$28 sps:$4 sm:$0xff]  }
  0x2f   : > { %2399 = vmatprep.subr.bf16.mxu0 %v2673_v37  ;;  %v2747_v29 = vld [vmem:[%s3036_s24 + $0x230] ss:$28 sps:$4 sm:$0xff]   ;;  %v2750_v30 = vld [vmem:[%s3036_s24 + $0x238] ss:$28 sps:$4 sm:$0xff]  }
  0x30   : > { %2332 = vmatpush3.bf16.msra.mxu1 %v2666_v31  ;;  %v2753_v31 = vld [vmem:[%s3036_s24 + $0x14] ss:$28 sps:$4 sm:$0xff]  }
  0x31   : > { %2494 = vmatprep.subr.bf16.mxu1 %v2887_v36  ;;  %1148 = vmatmul.mubr.bf16.vlgmr.msra.gmra.mxu0 %v2667_v32  ;;  %v2751_v32 = vld [vmem:[%s3036_s24 + $0x10] ss:$28 sps:$4 sm:$0xff]   ;;  %v2754_v33 = vld [vmem:[%s3036_s24 + $0x18] ss:$28 sps:$4 sm:$0xff]  }
  0x32   : > { %2400 = vmatpush3.bf16.msra.mxu0 %v2674_v38  ;;  %1155 = vmatprep.mubr.bf16.mxu0 %v2675_v39  ;;  %v2758_v37 = vld [vmem:[%s3036_s24 + $0x50] ss:$28 sps:$4 sm:$0xff]   ;;  %v2759_v38 = vld [vmem:[%s3036_s24 + $0x84] ss:$28 sps:$4 sm:$0xff]  }
  0x33   : > { %1269 = vmatmul.mubr.bf16.vlgmr.msra.gmra.mxu1 %v2670_v34  ;;  %2401 = vmatprep.subr.bf16.mxu0 %v2682_v44  ;;  %v2755_v34 = vld [vmem:[%s3036_s24 + $0x4c] ss:$28 sps:$4 sm:$0xff]   ;;  %v2761_v39 = vld [vmem:[%s3036_s24 + $0x80] ss:$28 sps:$4 sm:$0xff]   ;;  %v2767_v44 = vld [vmem:[%s3036_s24 + $0xf4] ss:$28 sps:$4 sm:$0xff]  }
  0x34   : > { %2495 = vmatpush3.bf16.msra.mxu1 %v2677_v40  ;;  %1276 = vmatprep.mubr.bf16.mxu1 %v2679_v42  ;;  %v2762_v40 = vld [vmem:[%s3036_s24 + $0x88] ss:$28 sps:$4 sm:$0xff]   ;;  %v2765_v42 = vld [vmem:[%s3036_s24 + $0xb8] ss:$28 sps:$4 sm:$0xff]  }
  0x35   : > { %2496 = vmatprep.subr.bf16.mxu1 %v2887_v36 }
  0x36   : > { %2402 = vmatpush3.bf16.msra.mxu0 %v2683_v45  ;;  %v2769_v45 = vld [vmem:[%s3036_s24 + $0xf0] ss:$28 sps:$4 sm:$0xff]  }
  0x37   : > { %2403 = vmatprep.subr.bf16.mxu0 %v2690_v48  ;;  %v2773_v48 = vld [vmem:[%s3036_s24 + $0x128] ss:$28 sps:$4 sm:$0xff]  }
  0x38   : > { %2497 = vmatpush3.bf16.msra.mxu1 %v2720_v63  ;;  %v2793_v63 = vld [vmem:[%s3036_s24 + $0x240] ss:$28 sps:$4 sm:$0xff]  }
  0x39   : > { %1156 = vmatmul.mubr.bf16.gmra.mxu0 %v2678_v41  ;;  %v2763_v41 = vld [vmem:[%s3036_s24 + $0xbc] ss:$28 sps:$4 sm:$0xff]  }
  0x3a   : > { %1163 = vmatprep.mubr.bf16.mxu0 %v2684_v46  ;;  %2404 = vmatpush3.bf16.msra.mxu0 %v2693_v49  ;;  %v2770_v46 = vld [vmem:[%s3036_s24 + $0xf8] ss:$28 sps:$4 sm:$0xff]   ;;  %v2774_v49 = vld [vmem:[%s3036_s24 + $0x130] ss:$28 sps:$4 sm:$0xff]  }
  0x3b   : > { %1277 = vmatmul.mubr.bf16.gmra.mxu1 %v2681_v43  ;;  %2405 = vmatprep.subr.bf16.mxu0 %v2704_v54  ;;  %v2766_v43 = vld [vmem:[%s3036_s24 + $0xc0] ss:$28 sps:$4 sm:$0xff]   ;;  %v2781_v54 = vld [vmem:[%s3036_s24 + $0x198] ss:$28 sps:$4 sm:$0xff]  }
  0x3c   : > { %1284 = vmatprep.mubr.bf16.mxu1 %v2687_v47  ;;  %v2771_v47 = vld [vmem:[%s3036_s24 + $0x12c] ss:$28 sps:$4 sm:$0xff]  }
  0x3e   : > { %2406 = vmatpush3.bf16.msra.mxu0 %v2705_v55  ;;  %v2782_v55 = vld [vmem:[%s3036_s24 + $0x1a0] ss:$28 sps:$4 sm:$0xff]  }
  0x3f   : > { %2407 = vmatprep.subr.bf16.mxu0 %v2712_v60  ;;  %v2789_v60 = vld [vmem:[%s3036_s24 + $0x208] ss:$28 sps:$4 sm:$0xff]  }
  0x41   : > { %1164 = vmatmul.mubr.bf16.gmra.mxu0 %v2686_v50  ;;  %v2775_v50 = vld [vmem:[%s3036_s24 + $0x164] ss:$28 sps:$4 sm:$0xff]  }
  0x42   : > { %1171 = vmatprep.mubr.bf16.mxu0 %v2691_v52  ;;  %2408 = vmatpush3.bf16.msra.mxu0 %v2713_v61  ;;  %v2778_v52 = vld [vmem:[%s3036_s24 + $0x168] ss:$28 sps:$4 sm:$0xff]   ;;  %v2790_v61 = vld [vmem:[%s3036_s24 + $0x210] ss:$28 sps:$4 sm:$0xff]  }
  0x43   : > { %1285 = vmatmul.mubr.bf16.gmra.mxu1 %v2689_v51  ;;  %2409 = vmatprep.subr.bf16.mxu0 %v2723_v2  ;;  %v2777_v51 = vld [vmem:[%s3036_s24 + $0x160] ss:$28 sps:$4 sm:$0xff]  }
  0x44   : > { %1292 = vmatprep.mubr.bf16.mxu1 %v2695_v53  ;;  %v2779_v53 = vld [vmem:[%s3036_s24 + $0x19c] ss:$28 sps:$4 sm:$0xff]  }
  0x46   : > { %2410 = vmatpush3.bf16.msra.mxu0 %v2727_v4 }
  0x47   : > { %2411 = vmatprep.subr.bf16.mxu0 %v2735_v6 }
  0x49   : > { %1172 = vmatmul.mubr.bf16.gmra.mxu0 %v2694_v56  ;;  %v2783_v56 = vld [vmem:[%s3036_s24 + $0x1d4] ss:$28 sps:$4 sm:$0xff]  }
  0x4a   : > { %1179 = vmatprep.mubr.bf16.mxu0 %v2698_v58  ;;  %2412 = vmatpush3.bf16.msra.mxu0 %v2736_v7  ;;  %v2786_v58 = vld [vmem:[%s3036_s24 + $0x1d8] ss:$28 sps:$4 sm:$0xff]  }
  0x4b   : > { %1293 = vmatmul.mubr.bf16.gmra.mxu1 %v2697_v57  ;;  %2413 = vmatprep.subr.bf16.mxu0 %v2743_v11  ;;  %v2785_v57 = vld [vmem:[%s3036_s24 + $0x1d0] ss:$28 sps:$4 sm:$0xff]  }
  0x4c   : > { %1300 = vmatprep.mubr.bf16.mxu1 %v2701_v59  ;;  %v2787_v59 = vld [vmem:[%s3036_s24 + $0x20c] ss:$28 sps:$4 sm:$0xff]  }
  0x4e   : > { %2414 = vmatpush3.bf16.msra.mxu0 %v2744_v12 }
  0x51   : > { %1180 = vmatmul.mubr.bf16.gmra.mxu0 %v2700_v62  ;;  %v2791_v62 = vld [vmem:[%s3036_s24 + $0x244] ss:$28 sps:$4 sm:$0xff]  }
  0x52   : > { %1187 = vmatprep.mubr.bf16.mxu0 %v2706_v1 }
  0x53   : > { %1301 = vmatmul.mubr.bf16.gmra.mxu1 %v2703_v0  ;;  %v2794_v0 = vld [vmem:[%s3036_s24 + $0x248] ss:$28 sps:$4 sm:$0xff]   ;;  %s175_s24 = sand.u32 1, %s2845_s12  }
  0x54   : > { %1308 = vmatprep.mubr.bf16.mxu1 %v2709_v3  ;;  %v3213_v3 = vld [vmem:[%s3462_s2] ss:$0 sm:$0xff]  ;;  %s2542_s30 = smul.u32 88, %s175_s24 }
  0x56   : > { %s3284_s12 = scalar_lea.vmem [#allocation2], %s2542_s30  }
  0x59   : > { %1188 = vmatmul.mubr.bf16.gmra.mxu0 %v2708_v5 }
  0x5a   : > { %1195 = vmatprep.mubr.bf16.mxu0 %v2714_v9 }
  0x5b   : > { %1309 = vmatmul.mubr.bf16.gmra.mxu1 %v2711_v8 }
  0x5c   : > { %1316 = vmatprep.mubr.bf16.mxu1 %v2717_v10 }
  0x61   : > { %1196 = vmatmul.mubr.bf16.gmra.mxu0 %v2716_v13 }
  0x62   : > { %1203 = vmatprep.mubr.bf16.mxu0 %v2721_v15 }
  0x63   : > { %1317 = vmatmul.mubr.bf16.gmra.mxu1 %v2719_v14 }
  0x64   : > { %1324 = vmatprep.mubr.bf16.mxu1 %v2725_v16 }
  0x69   : > { %1204 = vmatmul.mubr.bf16.gmra.mxu0 %v2724_v17 }
  0x6a   : > { %1211 = vmatprep.mubr.bf16.mxu0 %v2729_v19 }
  0x6b   : > { %1325 = vmatmul.mubr.bf16.gmra.mxu1 %v2728_v18 }
  0x6c   : > { %1332 = vmatprep.mubr.bf16.mxu1 %v2732_v20 }
  0x71   : > { %1212 = vmatmul.mubr.bf16.gmra.mxu0 %v2731_v21 }
  0x72   : > { %1219 = vmatprep.mubr.bf16.mxu0 %v2737_v23 }
  0x73   : > { %1333 = vmatmul.mubr.bf16.gmra.mxu1 %v2734_v22 }
  0x74   : > { %1340 = vmatprep.mubr.bf16.mxu1 %v2740_v24 }
  0x79   : > { %1220 = vmatmul.mubr.bf16.gmra.mxu0 %v2739_v25 }
  0x7a   : > { %1227 = vmatprep.mubr.bf16.mxu0 %v2745_v27 }
  0x7b   : > { %1341 = vmatmul.mubr.bf16.gmra.mxu1 %v2742_v26 }
  0x7c   : > { %1348 = vmatprep.mubr.bf16.mxu1 %v2748_v28 }
  0x81   : > { %1228 = vmatmul.mubr.bf16.gmra.mxu0 %v2747_v29 }
  0x82   : > { %1389 = vmatprep.mubr.bf16.mxu0 %v2753_v31 }
  0x83   : > { %1349 = vmatmul.mubr.bf16.gmra.mxu1 %v2750_v30 }
  0x84   : > { %2498 = vmatprep.mubr.msk.bf16.mxu1 %vm2888_vm0, %v2887_v36 }
  0x89   : > { %1390 = vmatmul.mubr.bf16.vlgmr.msra.gmra.mxu0 %v2751_v32 }
  0x8a   : > { %1397 = vmatprep.mubr.bf16.mxu0 %v2755_v34 }
  0x8b   : > { %2499 = vmatmul.mubr.msk.bf16.vlgmr.msra.gmra.mxu1 %vm1081_vm1, %v2754_v33 }
  0x8c   : > { %2502 = vmatprep.mubr.msk.bf16.mxu1 %vm2888_vm0, %v2887_v36 }
  0x91   : > { %1398 = vmatmul.mubr.bf16.gmra.mxu0 %v2757_v35 }
  0x92   : > { %1405 = vmatprep.mubr.bf16.mxu0 %v2759_v38 }
  0x93   : > { %2503 = vmatmul.mubr.msk.bf16.gmra.mxu1 %vm1081_vm1, %v2758_v37 }
  0x94   : > { %2506 = vmatprep.mubr.msk.bf16.mxu1 %vm2888_vm0, %v2887_v36 }
  0x99   : > { %1406 = vmatmul.mubr.bf16.gmra.mxu0 %v2761_v39 }
  0x9a   : > { %1413 = vmatprep.mubr.bf16.mxu0 %v2763_v41 }
  0x9b   : > { %2507 = vmatmul.mubr.msk.bf16.gmra.mxu1 %vm1081_vm1, %v2762_v40 }
  0x9c   : > { %2510 = vmatprep.mubr.msk.bf16.mxu1 %vm2888_vm0, %v2887_v36 }
  0xa1   : > { %1414 = vmatmul.mubr.bf16.gmra.mxu0 %v2765_v42 }
  0xa2   : > { %1421 = vmatprep.mubr.bf16.mxu0 %v2767_v44 }
  0xa3   : > { %2511 = vmatmul.mubr.msk.bf16.gmra.mxu1 %vm1081_vm1, %v2766_v43 }
  0xa4   : > { %2514 = vmatprep.mubr.msk.bf16.mxu1 %vm2888_vm0, %v2887_v36 }
  0xa9   : > { %1422 = vmatmul.mubr.bf16.gmra.mxu0 %v2769_v45 }
  0xaa   : > { %1429 = vmatprep.mubr.bf16.mxu0 %v2771_v47 }
  0xab   : > { %2515 = vmatmul.mubr.msk.bf16.gmra.mxu1 %vm1081_vm1, %v2770_v46 }
  0xac   : > { %2518 = vmatprep.mubr.msk.bf16.mxu1 %vm2888_vm0, %v2887_v36 }
  0xb1   : > { %1430 = vmatmul.mubr.bf16.gmra.mxu0 %v2773_v48 }
  0xb2   : > { %1437 = vmatprep.mubr.bf16.mxu0 %v2775_v50 }
  0xb3   : > { %2519 = vmatmul.mubr.msk.bf16.gmra.mxu1 %vm1081_vm1, %v2774_v49 }
  0xb4   : > { %2522 = vmatprep.mubr.msk.bf16.mxu1 %vm2888_vm0, %v2887_v36 }
  0xb9   : > { %1438 = vmatmul.mubr.bf16.gmra.mxu0 %v2777_v51 }
  0xba   : > { %1445 = vmatprep.mubr.bf16.mxu0 %v2779_v53 }
  0xbb   : > { %2523 = vmatmul.mubr.msk.bf16.gmra.mxu1 %vm1081_vm1, %v2778_v52 }
  0xbc   : > { %2526 = vmatprep.mubr.msk.bf16.mxu1 %vm2888_vm0, %v2887_v36 }
  0xc1   : > { %1446 = vmatmul.mubr.bf16.gmra.mxu0 %v2781_v54 }
  0xc2   : > { %1453 = vmatprep.mubr.bf16.mxu0 %v2783_v56 }
  0xc3   : > { %2527 = vmatmul.mubr.msk.bf16.gmra.mxu1 %vm1081_vm1, %v2782_v55 }
  0xc4   : > { %2530 = vmatprep.mubr.msk.bf16.mxu1 %vm2888_vm0, %v2887_v36 }
  0xc9   : > { %1454 = vmatmul.mubr.bf16.gmra.mxu0 %v2785_v57 }
  0xca   : > { %1461 = vmatprep.mubr.bf16.mxu0 %v2787_v59 }
  0xcb   : > { %2531 = vmatmul.mubr.msk.bf16.gmra.mxu1 %vm1081_vm1, %v2786_v58 }
  0xcc   : > { %2534 = vmatprep.mubr.msk.bf16.mxu1 %vm2888_vm0, %v2887_v36 }
  0xd1   : > { %1462 = vmatmul.mubr.bf16.gmra.mxu0 %v2789_v60 }
  0xd2   : > { %1469 = vmatprep.mubr.bf16.mxu0 %v2791_v62 }
  0xd3   : > { %2535 = vmatmul.mubr.msk.bf16.gmra.mxu1 %vm1081_vm1, %v2790_v61 }
  0xd4   : > { %2538 = vmatprep.mubr.msk.bf16.mxu1 %vm2888_vm0, %v2887_v36 }
  0xd9   : > { %1470 = vmatmul.mubr.bf16.gmra.mxu0 %v2793_v63 }
  0xdb   : > { %2539 = vmatmul.mubr.msk.bf16.gmra.mxu1 %vm1081_vm1, %v2794_v0 }
  0xf1   : > { %v2251_v1 = vpop.f32.mrf.mxu0 }
  0xf3   : > { %v2333_v2 = vpop.f32.mrf.mxu1  ;;  %v2252_v4 = vpop.f32.mrf.mxu0 }
  0xf4   : > { %v2253_v5 = vadd.f32 %v2252_v4, %v2251_v1 }
  0xf5   : > { %v2334_v6 = vpop.f32.mrf.mxu1  ;;  %v2254_v8 = vpop.f32.mrf.mxu0 }
  0xf6   : > { %v2335_v7 = vadd.f32 %v2334_v6, %v2333_v2  ;;  %v1150_v9 = vadd.f32 %v2253_v5, %v3213_v3 }
  0xf7   : > { %v2336_v36 = vpop.f32.mrf.mxu1  ;;  %v2255_v10 = vpop.f32.mrf.mxu0 }
  0xf8   : > { %v3216_v11 = vadd.f32 %v2335_v7, %v1150_v9  ;;  %v2256_v12 = vadd.f32 %v2255_v10, %v2254_v8 }
  0xf9   : > { %v2337_v13 = vpop.f32.mrf.mxu1  ;;  %v2257_v15 = vpop.f32.mrf.mxu0 }
  0xfa   : > { %v2338_v14 = vadd.f32 %v2337_v13, %v2336_v36  ;;  %v1153_v16 = vadd.f32 %v2256_v12, %v3213_v3 }
  0xfb   : > { %v2339_v17 = vpop.f32.mrf.mxu1  ;;  %v2258_v18 = vpop.f32.mrf.mxu0 }
  0xfc   : > { %v3219_v19 = vadd.f32 %v2338_v14, %v1153_v16  ;;  %v2259_v20 = vadd.f32 %v2258_v18, %v2257_v15 }
  0xfd   : > { %v2340_v21 = vpop.f32.mrf.mxu1  ;;  %v2260_v23 = vpop.f32.mrf.mxu0 }
  0xfe   : > { %v2341_v22 = vadd.f32 %v2340_v21, %v2339_v17  ;;  %v1158_v24 = vadd.f32 %v2259_v20, %v3213_v3 }
  0xff   : > { %v2342_v25 = vpop.f32.mrf.mxu1  ;;  %v2261_v26 = vpop.f32.mrf.mxu0 }
 0x100   : > { %v3222_v27 = vadd.f32 %v2341_v22, %v1158_v24  ;;  %v2262_v28 = vadd.f32 %v2261_v26, %v2260_v23 }
 0x101   : > { %v2343_v29 = vpop.f32.mrf.mxu1  ;;  %v2263_v31 = vpop.f32.mrf.mxu0 }
 0x102   : > { %v2344_v30 = vadd.f32 %v2343_v29, %v2342_v25  ;;  %v1161_v32 = vadd.f32 %v2262_v28, %v3213_v3 }
 0x103   : > { %v2345_v33 = vpop.f32.mrf.mxu1  ;;  %v2264_v34 = vpop.f32.mrf.mxu0 }
 0x104   : > { %v3225_v35 = vadd.f32 %v2344_v30, %v1161_v32  ;;  %v2265_v37 = vadd.f32 %v2264_v34, %v2263_v31 }
 0x105   : > { %v2346_v38 = vpop.f32.mrf.mxu1  ;;  %v2266_v40 = vpop.f32.mrf.mxu0 }
 0x106   : > { %v2347_v39 = vadd.f32 %v2346_v38, %v2345_v33  ;;  %v1166_v41 = vadd.f32 %v2265_v37, %v3213_v3 }
 0x107   : > { %v2348_v42 = vpop.f32.mrf.mxu1  ;;  %v2267_v43 = vpop.f32.mrf.mxu0 }
 0x108   : > { %v3228_v44 = vadd.f32 %v2347_v39, %v1166_v41  ;;  %v2268_v45 = vadd.f32 %v2267_v43, %v2266_v40 }
 0x109   : > { %v2349_v46 = vpop.f32.mrf.mxu1  ;;  %v2269_v48 = vpop.f32.mrf.mxu0 }
 0x10a   : > { %v2350_v47 = vadd.f32 %v2349_v46, %v2348_v42  ;;  %v1169_v49 = vadd.f32 %v2268_v45, %v3213_v3 }
 0x10b   : > { %v2351_v50 = vpop.f32.mrf.mxu1  ;;  %v2270_v51 = vpop.f32.mrf.mxu0 }
 0x10c   : > { %v3231_v52 = vadd.f32 %v2350_v47, %v1169_v49  ;;  %v2271_v53 = vadd.f32 %v2270_v51, %v2269_v48 }
 0x10d   : > { %v2352_v54 = vpop.f32.mrf.mxu1  ;;  %v2272_v56 = vpop.f32.mrf.mxu0 }
 0x10e   : > { %v2353_v55 = vadd.f32 %v2352_v54, %v2351_v50  ;;  %v1174_v57 = vadd.f32 %v2271_v53, %v3213_v3 }
 0x10f   : > { %v2354_v58 = vpop.f32.mrf.mxu1  ;;  %v2273_v59 = vpop.f32.mrf.mxu0 }
 0x110   : > { %v3234_v60 = vadd.f32 %v2353_v55, %v1174_v57  ;;  %v2274_v61 = vadd.f32 %v2273_v59, %v2272_v56 }
 0x111   : > { %v2355_v62 = vpop.f32.mrf.mxu1  ;;  %v2275_v0 = vpop.f32.mrf.mxu0 }
 0x112   : > { %v2356_v63 = vadd.f32 %v2355_v62, %v2354_v58  ;;  %v1177_v1 = vadd.f32 %v2274_v61, %v3213_v3 }
 0x113   : > { %v2357_v2 = vpop.f32.mrf.mxu1  ;;  %v2276_v4 = vpop.f32.mrf.mxu0 }
 0x114   : > { %v3237_v5 = vadd.f32 %v2356_v63, %v1177_v1  ;;  %v2277_v6 = vadd.f32 %v2276_v4, %v2275_v0 }
 0x115   : > { %v2358_v7 = vpop.f32.mrf.mxu1  ;;  %v2278_v9 = vpop.f32.mrf.mxu0 }
 0x116   : > { %v2359_v8 = vadd.f32 %v2358_v7, %v2357_v2  ;;  %v1182_v36 = vadd.f32 %v2277_v6, %v3213_v3 }
 0x117   : > { %v2360_v10 = vpop.f32.mrf.mxu1  ;;  %v2279_v12 = vpop.f32.mrf.mxu0 }
 0x118   : > { %v3240_v13 = vadd.f32 %v2359_v8, %v1182_v36  ;;  %v2280_v14 = vadd.f32 %v2279_v12, %v2278_v9 }
 0x119   : > { %v2361_v15 = vpop.f32.mrf.mxu1  ;;  %v2281_v17 = vpop.f32.mrf.mxu0 }
 0x11a   : > { %v2362_v16 = vadd.f32 %v2361_v15, %v2360_v10  ;;  %v1185_v18 = vadd.f32 %v2280_v14, %v3213_v3 }
 0x11b   : > { %v2363_v20 = vpop.f32.mrf.mxu1  ;;  %v2282_v21 = vpop.f32.mrf.mxu0 }
 0x11c   : > { %v3243_v22 = vadd.f32 %v2362_v16, %v1185_v18  ;;  %v2283_v23 = vadd.f32 %v2282_v21, %v2281_v17 }
 0x11d   : > { %v2364_v24 = vpop.f32.mrf.mxu1  ;;  %v2284_v26 = vpop.f32.mrf.mxu0 }
 0x11e   : > { %v2365_v25 = vadd.f32 %v2364_v24, %v2363_v20  ;;  %v1190_v28 = vadd.f32 %v2283_v23, %v3213_v3 }
 0x11f   : > { %v2366_v29 = vpop.f32.mrf.mxu1  ;;  %v2285_v30 = vpop.f32.mrf.mxu0 }
 0x120   : > { %v3246_v31 = vadd.f32 %v2365_v25, %v1190_v28  ;;  %v2286_v32 = vadd.f32 %v2285_v30, %v2284_v26 }
 0x121   : > { %v2367_v33 = vpop.f32.mrf.mxu1  ;;  %v2287_v37 = vpop.f32.mrf.mxu0 }
 0x122   : > { %v2368_v34 = vadd.f32 %v2367_v33, %v2366_v29  ;;  %v1193_v38 = vadd.f32 %v2286_v32, %v3213_v3 }
 0x123   : > { %v2369_v39 = vpop.f32.mrf.mxu1  ;;  %v2288_v40 = vpop.f32.mrf.mxu0 }
 0x124   : > { %v3249_v41 = vadd.f32 %v2368_v34, %v1193_v38  ;;  %v2289_v42 = vadd.f32 %v2288_v40, %v2287_v37 }
 0x125   : > { %v2370_v43 = vpop.f32.mrf.mxu1  ;;  %v2290_v46 = vpop.f32.mrf.mxu0 }
 0x126   : > { %v2371_v45 = vadd.f32 %v2370_v43, %v2369_v39  ;;  %v1198_v47 = vadd.f32 %v2289_v42, %v3213_v3 }
 0x127   : > { %v2372_v48 = vpop.f32.mrf.mxu1  ;;  %v2291_v49 = vpop.f32.mrf.mxu0 }
 0x128   : > { %v3252_v50 = vadd.f32 %v2371_v45, %v1198_v47  ;;  %v2292_v51 = vadd.f32 %v2291_v49, %v2290_v46 }
 0x129   : > { %v2373_v53 = vpop.f32.mrf.mxu1  ;;  %v2293_v55 = vpop.f32.mrf.mxu0 }
 0x12a   : > { %v2374_v54 = vadd.f32 %v2373_v53, %v2372_v48  ;;  %v1201_v56 = vadd.f32 %v2292_v51, %v3213_v3 }
 0x12b   : > { %v2375_v57 = vpop.f32.mrf.mxu1  ;;  %v2294_v58 = vpop.f32.mrf.mxu0 }
 0x12c   : > { %v3255_v59 = vadd.f32 %v2374_v54, %v1201_v56  ;;  %v2295_v61 = vadd.f32 %v2294_v58, %v2293_v55 }
 0x12d   : > { %v2376_v62 = vpop.f32.mrf.mxu1  ;;  %v2296_v0 = vpop.f32.mrf.mxu0 }
 0x12e   : > { %v2377_v63 = vadd.f32 %v2376_v62, %v2375_v57  ;;  %v1206_v1 = vadd.f32 %v2295_v61, %v3213_v3 }
 0x12f   : > { %v2378_v2 = vpop.f32.mrf.mxu1  ;;  %v2297_v4 = vpop.f32.mrf.mxu0 }
 0x130   : > { %v3258_v6 = vadd.f32 %v2377_v63, %v1206_v1  ;;  %v2298_v7 = vadd.f32 %v2297_v4, %v2296_v0 }
 0x131   : > { %v2379_v8 = vpop.f32.mrf.mxu1  ;;  %v2299_v36 = vpop.f32.mrf.mxu0 }
 0x132   : > { %v2380_v9 = vadd.f32 %v2379_v8, %v2378_v2  ;;  %v1209_v10 = vadd.f32 %v2298_v7, %v3213_v3 }
 0x133   : > { %v2381_v12 = vpop.f32.mrf.mxu1  ;;  %v2300_v14 = vpop.f32.mrf.mxu0 }
 0x134   : > { %v3261_v15 = vadd.f32 %v2380_v9, %v1209_v10  ;;  %v2301_v16 = vadd.f32 %v2300_v14, %v2299_v36 }
 0x135   : > { %v2382_v17 = vpop.f32.mrf.mxu1  ;;  %v2302_v20 = vpop.f32.mrf.mxu0 }
 0x136   : > { %v2383_v18 = vadd.f32 %v2382_v17, %v2381_v12  ;;  %v1214_v21 = vadd.f32 %v2301_v16, %v3213_v3 }
 0x137   : > { %v2384_v23 = vpop.f32.mrf.mxu1  ;;  %v2303_v24 = vpop.f32.mrf.mxu0 }
 0x138   : > { %v3264_v25 = vadd.f32 %v2383_v18, %v1214_v21  ;;  %v2304_v26 = vadd.f32 %v2303_v24, %v2302_v20 }
 0x139   : > { %v2385_v28 = vpop.f32.mrf.mxu1  ;;  %v2305_v30 = vpop.f32.mrf.mxu0 }
 0x13a   : > { %v2386_v29 = vadd.f32 %v2385_v28, %v2384_v23  ;;  %v1217_v32 = vadd.f32 %v2304_v26, %v3213_v3 }
 0x13b   : > { %v2387_v33 = vpop.f32.mrf.mxu1  ;;  %v2306_v34 = vpop.f32.mrf.mxu0 }
 0x13c   : > { %v3267_v37 = vadd.f32 %v2386_v29, %v1217_v32  ;;  %v2307_v38 = vadd.f32 %v2306_v34, %v2305_v30 }
 0x13d   : > { %v2388_v39 = vpop.f32.mrf.mxu1  ;;  %v2308_v42 = vpop.f32.mrf.mxu0 }
 0x13e   : > { %v2389_v40 = vadd.f32 %v2388_v39, %v2387_v33  ;;  %v1222_v43 = vadd.f32 %v2307_v38, %v3213_v3 }
 0x13f   : > { %v2390_v45 = vpop.f32.mrf.mxu1  ;;  %v2309_v46 = vpop.f32.mrf.mxu0 }
 0x140   : > { %v3270_v47 = vadd.f32 %v2389_v40, %v1222_v43  ;;  %v2310_v48 = vadd.f32 %v2309_v46, %v2308_v42 }
 0x141   : > { %v2391_v49 = vpop.f32.mrf.mxu1  ;;  %v2311_v53 = vpop.f32.mrf.mxu0 }
 0x142   : > { %v2392_v51 = vadd.f32 %v2391_v49, %v2390_v45  ;;  %v1225_v54 = vadd.f32 %v2310_v48, %v3213_v3 }
 0x143   : > { %v2393_v55 = vpop.f32.mrf.mxu1  ;;  %v2312_v56 = vpop.f32.mrf.mxu0 }
 0x144   : > { %v3273_v57 = vadd.f32 %v2392_v51, %v1225_v54  ;;  %v2313_v58 = vadd.f32 %v2312_v56, %v2311_v53 }
 0x145   : > { %v2394_v61 = vpop.f32.mrf.mxu1  ;;  %v2314_v63 = vpop.f32.mrf.mxu0 }
 0x146   : > { %v2395_v62 = vadd.f32 %v2394_v61, %v2393_v55  ;;  %v1230_v0 = vadd.f32 %v2313_v58, %v3213_v3 }
 0x147   : > { %v2396_v1 = vpop.f32.mrf.mxu1  ;;  %v2315_v2 = vpop.f32.mrf.mxu0 }
 0x148   : > { %v3276_v4 = vadd.f32 %v2395_v62, %v1230_v0  ;;  %v2316_v7 = vadd.f32 %v2315_v2, %v2314_v63 }
 0x149   : > { %v2397_v8 = vpop.f32.mrf.mxu1  ;;  %v2415_v36 = vpop.f32.mrf.mxu0 }
 0x14a   : > { %v2398_v9 = vadd.f32 %v2397_v8, %v2396_v1  ;;  %v1233_v10 = vadd.f32 %v2316_v7, %v3213_v3 }
 0x14b   : > { %v1512_v12 = vpop.f32.mrf.mxu1  ;;  %v2416_v14 = vpop.f32.mrf.mxu0 }
 0x14c   : > { %v3279_v16 = vadd.f32 %v2398_v9, %v1233_v10  ;;  %v2417_v17 = vadd.f32 %v2416_v14, %v2415_v36 }
 0x14d   : > { %v2500_v18 = vpop.f32.mrf.mxu1  ;;  %v2418_v20 = vpop.f32.mrf.mxu0 }
 0x14e   : > { %v1392_v21 = vadd.f32 %v2417_v17, %v3216_v11 }
 0x14f   : > { %v1515_v23 = vpop.f32.mrf.mxu1  ;;  %v2419_v24 = vpop.f32.mrf.mxu0 }
 0x150   : > { %v1513_v26 = vadd.f32 %v1512_v12, %v1392_v21  ;;  %v2420_v28 = vadd.f32 %v2419_v24, %v2418_v20 }
 0x151   : > { %v2501_v29 = vpop.f32.mrf.mxu1  ;;  %v2421_v30 = vpop.f32.mrf.mxu0 }
 0x152   : > { %v1599_v32 = vmax.f32 %v1513_v26, 0.0  ;;  %v1395_v3 = vadd.f32 %v2420_v28, %v3219_v19 }
 0x153   : > { %v1520_v33 = vpop.f32.mrf.mxu1  ;;  %v2422_v34 = vpop.f32.mrf.mxu0 }
 0x154   : > { %v2212_v38 = vpack.c.bf16 %v1599_v32, %v1599_v32  ;;  %v1516_v39 = vadd.f32 %v1515_v23, %v1395_v3  ;;  %v2423_v40 = vadd.f32 %v2422_v34, %v2421_v30 }
 0x155   : > { %v2504_v42 = vpop.f32.mrf.mxu1  ;;  %v2424_v43 = vpop.f32.mrf.mxu0 }
 0x156   : > { %1710 = vst.msk [vmem:[%s3284_s12] sm:$0xf] %vm1709_vm2, %v2212_v38  ;;  %v1600_v11 = vmax.f32 %v1516_v39, 0.0  ;;  %v1400_v45 = vadd.f32 %v2423_v40, %v3222_v27 }
 0x157   : > { %v1523_v46 = vpop.f32.mrf.mxu1  ;;  %v2425_v48 = vpop.f32.mrf.mxu0 }
 0x158   : > { %v2213_v19 = vpack.c.bf16 %v1600_v11, %v1600_v11  ;;  %v1521_v49 = vadd.f32 %v1520_v33, %v1400_v45  ;;  %v2426_v51 = vadd.f32 %v2425_v48, %v2424_v43 }
 0x159   : > { %v2505_v53 = vpop.f32.mrf.mxu1  ;;  %v2427_v54 = vpop.f32.mrf.mxu0 }
 0x15a   : > { %1711 = vst.msk [vmem:[%s3284_s12 + $0x4] sm:$0xf] %vm1709_vm2, %v2213_v19  ;;  %v1601_v55 = vmax.f32 %v1521_v49, 0.0  ;;  %v1403_v56 = vadd.f32 %v2426_v51, %v3225_v35 }
 0x15b   : > { %v1528_v58 = vpop.f32.mrf.mxu1  ;;  %v2428_v61 = vpop.f32.mrf.mxu0 }
 0x15c   : > { %v2214_v62 = vpack.c.bf16 %v1601_v55, %v1601_v55  ;;  %v1524_v63 = vadd.f32 %v1523_v46, %v1403_v56  ;;  %v2429_v0 = vadd.f32 %v2428_v61, %v2427_v54 }
 0x15d   : > { %v2508_v27 = vpop.f32.mrf.mxu1  ;;  %v2430_v1 = vpop.f32.mrf.mxu0 }
 0x15e   : > { %1712 = vst.msk [vmem:[%s3284_s12 + $0x8] sm:$0xf] %vm1709_vm2, %v2214_v62  ;;  %v1602_v2 = vmax.f32 %v1524_v63, 0.0  ;;  %v1408_v7 = vadd.f32 %v2429_v0, %v3228_v44 }
 0x15f   : > { %v1531_v8 = vpop.f32.mrf.mxu1  ;;  %v2431_v9 = vpop.f32.mrf.mxu0 }
 0x160   : > { %v2215_v36 = vpack.c.bf16 %v1602_v2, %v1602_v2  ;;  %v1529_v10 = vadd.f32 %v1528_v58, %v1408_v7  ;;  %v2432_v12 = vadd.f32 %v2431_v9, %v2430_v1 }
 0x161   : > { %v2509_v35 = vpop.f32.mrf.mxu1  ;;  %v2433_v14 = vpop.f32.mrf.mxu0 }
 0x162   : > { %1713 = vst.msk [vmem:[%s3284_s12 + $0xc] sm:$0xf] %vm1709_vm2, %v2215_v36  ;;  %v1603_v17 = vmax.f32 %v1529_v10, 0.0  ;;  %v1411_v18 = vadd.f32 %v2432_v12, %v3231_v52 }
 0x163   : > { %v1536_v20 = vpop.f32.mrf.mxu1  ;;  %v2434_v21 = vpop.f32.mrf.mxu0 }
 0x164   : > { %v2216_v23 = vpack.c.bf16 %v1603_v17, %v1603_v17  ;;  %v1532_v24 = vadd.f32 %v1531_v8, %v1411_v18  ;;  %v2435_v26 = vadd.f32 %v2434_v21, %v2433_v14 }
 0x165   : > { %v2512_v44 = vpop.f32.mrf.mxu1  ;;  %v2436_v28 = vpop.f32.mrf.mxu0 }
 0x166   : > { %1714 = vst.msk [vmem:[%s3284_s12 + $0x10] sm:$0xf] %vm1709_vm2, %v2216_v23  ;;  %v1604_v29 = vmax.f32 %v1532_v24, 0.0  ;;  %v1416_v30 = vadd.f32 %v2435_v26, %v3234_v60 }
 0x167   : > { %v1539_v32 = vpop.f32.mrf.mxu1  ;;  %v2437_v3 = vpop.f32.mrf.mxu0 }
 0x168   : > { %v2217_v33 = vpack.c.bf16 %v1604_v29, %v1604_v29  ;;  %v1537_v34 = vadd.f32 %v1536_v20, %v1416_v30  ;;  %v2438_v38 = vadd.f32 %v2437_v3, %v2436_v28 }
 0x169   : > { %v2513_v52 = vpop.f32.mrf.mxu1  ;;  %v2439_v39 = vpop.f32.mrf.mxu0 }
 0x16a   : > { %1715 = vst.msk [vmem:[%s3284_s12 + $0x14] sm:$0xf] %vm1709_vm2, %v2217_v33  ;;  %v1605_v40 = vmax.f32 %v1537_v34, 0.0  ;;  %v1419_v42 = vadd.f32 %v2438_v38, %v3237_v5 }
 0x16b   : > { %v1544_v43 = vpop.f32.mrf.mxu1  ;;  %v2440_v11 = vpop.f32.mrf.mxu0 }
 0x16c   : > { %v2218_v45 = vpack.c.bf16 %v1605_v40, %v1605_v40  ;;  %v1540_v46 = vadd.f32 %v1539_v32, %v1419_v42  ;;  %v2441_v48 = vadd.f32 %v2440_v11, %v2439_v39 }
 0x16d   : > { %v2516_v60 = vpop.f32.mrf.mxu1  ;;  %v2442_v19 = vpop.f32.mrf.mxu0 }
 0x16e   : > { %1716 = vst.msk [vmem:[%s3284_s12 + $0x18] sm:$0xf] %vm1709_vm2, %v2218_v45  ;;  %v1606_v49 = vmax.f32 %v1540_v46, 0.0  ;;  %v1424_v51 = vadd.f32 %v2441_v48, %v3240_v13 }
 0x16f   : > { %v1547_v53 = vpop.f32.mrf.mxu1  ;;  %v2443_v54 = vpop.f32.mrf.mxu0 }
 0x170   : > { %v2219_v55 = vpack.c.bf16 %v1606_v49, %v1606_v49  ;;  %v1545_v56 = vadd.f32 %v1544_v43, %v1424_v51  ;;  %v2444_v58 = vadd.f32 %v2443_v54, %v2442_v19 }
 0x171   : > { %v2517_v5 = vpop.f32.mrf.mxu1  ;;  %v2445_v61 = vpop.f32.mrf.mxu0 }
 0x172   : > { %1717 = vst.msk [vmem:[%s3284_s12 + $0x1c] sm:$0xf] %vm1709_vm2, %v2219_v55  ;;  %v1607_v62 = vmax.f32 %v1545_v56, 0.0  ;;  %v1427_v63 = vadd.f32 %v2444_v58, %v3243_v22 }
 0x173   : > { %v1552_v0 = vpop.f32.mrf.mxu1  ;;  %v2446_v27 = vpop.f32.mrf.mxu0 }
 0x174   : > { %v2220_v1 = vpack.c.bf16 %v1607_v62, %v1607_v62  ;;  %v1548_v2 = vadd.f32 %v1547_v53, %v1427_v63  ;;  %v2447_v7 = vadd.f32 %v2446_v27, %v2445_v61 }
 0x175   : > { %v2520_v13 = vpop.f32.mrf.mxu1  ;;  %v2448_v8 = vpop.f32.mrf.mxu0 }
 0x176   : > { %1718 = vst.msk [vmem:[%s3284_s12 + $0x20] sm:$0xf] %vm1709_vm2, %v2220_v1  ;;  %v1608_v9 = vmax.f32 %v1548_v2, 0.0  ;;  %v1432_v36 = vadd.f32 %v2447_v7, %v3246_v31 }
 0x177   : > { %v1555_v10 = vpop.f32.mrf.mxu1  ;;  %v2449_v12 = vpop.f32.mrf.mxu0 }
 0x178   : > { %v2221_v35 = vpack.c.bf16 %v1608_v9, %v1608_v9  ;;  %v1553_v14 = vadd.f32 %v1552_v0, %v1432_v36  ;;  %v2450_v17 = vadd.f32 %v2449_v12, %v2448_v8 }
 0x179   : > { %v2521_v22 = vpop.f32.mrf.mxu1  ;;  %v2451_v18 = vpop.f32.mrf.mxu0 }
 0x17a   : > { %1719 = vst.msk [vmem:[%s3284_s12 + $0x24] sm:$0xf] %vm1709_vm2, %v2221_v35  ;;  %v1609_v20 = vmax.f32 %v1553_v14, 0.0  ;;  %v1435_v21 = vadd.f32 %v2450_v17, %v3249_v41 }
 0x17b   : > { %v1560_v23 = vpop.f32.mrf.mxu1  ;;  %v2452_v24 = vpop.f32.mrf.mxu0 }
 0x17c   : > { %v2222_v26 = vpack.c.bf16 %v1609_v20, %v1609_v20  ;;  %v1556_v44 = vadd.f32 %v1555_v10, %v1435_v21  ;;  %v2453_v28 = vadd.f32 %v2452_v24, %v2451_v18 }
 0x17d   : > { %v2524_v31 = vpop.f32.mrf.mxu1  ;;  %v2454_v29 = vpop.f32.mrf.mxu0 }
 0x17e   : > { %1720 = vst.msk [vmem:[%s3284_s12 + $0x28] sm:$0xf] %vm1709_vm2, %v2222_v26  ;;  %v1610_v30 = vmax.f32 %v1556_v44, 0.0  ;;  %v1440_v32 = vadd.f32 %v2453_v28, %v3252_v50 }
 0x17f   : > { %v1563_v3 = vpop.f32.mrf.mxu1  ;;  %v2455_v33 = vpop.f32.mrf.mxu0 }
 0x180   : > { %v2223_v34 = vpack.c.bf16 %v1610_v30, %v1610_v30  ;;  %v1561_v38 = vadd.f32 %v1560_v23, %v1440_v32  ;;  %v2456_v52 = vadd.f32 %v2455_v33, %v2454_v29 }
 0x181   : > { %v2525_v41 = vpop.f32.mrf.mxu1  ;;  %v2457_v39 = vpop.f32.mrf.mxu0 }
 0x182   : > { %1721 = vst.msk [vmem:[%s3284_s12 + $0x2c] sm:$0xf] %vm1709_vm2, %v2223_v34  ;;  %v1611_v40 = vmax.f32 %v1561_v38, 0.0  ;;  %v1443_v42 = vadd.f32 %v2456_v52, %v3255_v59 }
 0x183   : > { %v1568_v43 = vpop.f32.mrf.mxu1  ;;  %v2458_v11 = vpop.f32.mrf.mxu0 }
 0x184   : > { %v2224_v45 = vpack.c.bf16 %v1611_v40, %v1611_v40  ;;  %v1564_v46 = vadd.f32 %v1563_v3, %v1443_v42  ;;  %v2459_v48 = vadd.f32 %v2458_v11, %v2457_v39 }
 0x185   : > { %v2528_v50 = vpop.f32.mrf.mxu1  ;;  %v2460_v60 = vpop.f32.mrf.mxu0 }
 0x186   : > { %1722 = vst.msk [vmem:[%s3284_s12 + $0x30] sm:$0xf] %vm1709_vm2, %v2224_v45  ;;  %v1612_v19 = vmax.f32 %v1564_v46, 0.0  ;;  %v1448_v49 = vadd.f32 %v2459_v48, %v3258_v6 }
 0x187   : > { %v1571_v51 = vpop.f32.mrf.mxu1  ;;  %v2461_v53 = vpop.f32.mrf.mxu0 }
 0x188   : > { %v2225_v54 = vpack.c.bf16 %v1612_v19, %v1612_v19  ;;  %v1569_v55 = vadd.f32 %v1568_v43, %v1448_v49  ;;  %v2462_v56 = vadd.f32 %v2461_v53, %v2460_v60 }
 0x189   : > { %v2529_v59 = vpop.f32.mrf.mxu1  ;;  %v2463_v58 = vpop.f32.mrf.mxu0 }
 0x18a   : > { %1723 = vst.msk [vmem:[%s3284_s12 + $0x34] sm:$0xf] %vm1709_vm2, %v2225_v54  ;;  %v1613_v5 = vmax.f32 %v1569_v55, 0.0  ;;  %v1451_v61 = vadd.f32 %v2462_v56, %v3261_v15 }
 0x18b   : > { %v1576_v62 = vpop.f32.mrf.mxu1  ;;  %v2464_v63 = vpop.f32.mrf.mxu0 }
 0x18c   : > { %v2226_v0 = vpack.c.bf16 %v1613_v5, %v1613_v5  ;;  %v1572_v27 = vadd.f32 %v1571_v51, %v1451_v61  ;;  %v2465_v1 = vadd.f32 %v2464_v63, %v2463_v58 }
 0x18d   : > { %v2532_v6 = vpop.f32.mrf.mxu1  ;;  %v2466_v2 = vpop.f32.mrf.mxu0 }
 0x18e   : > { %1724 = vst.msk [vmem:[%s3284_s12 + $0x38] sm:$0xf] %vm1709_vm2, %v2226_v0  ;;  %v1614_v7 = vmax.f32 %v1572_v27, 0.0  ;;  %v1456_v13 = vadd.f32 %v2465_v1, %v3264_v25 }
 0x18f   : > { %v1579_v8 = vpop.f32.mrf.mxu1  ;;  %v2467_v9 = vpop.f32.mrf.mxu0 }
 0x190   : > { %v2227_v36 = vpack.c.bf16 %v1614_v7, %v1614_v7  ;;  %v1577_v10 = vadd.f32 %v1576_v62, %v1456_v13  ;;  %v2468_v12 = vadd.f32 %v2467_v9, %v2466_v2 }
 0x191   : > { %v2533_v15 = vpop.f32.mrf.mxu1  ;;  %v2469_v35 = vpop.f32.mrf.mxu0 }
 0x192   : > { %1725 = vst.msk [vmem:[%s3284_s12 + $0x3c] sm:$0xf] %vm1709_vm2, %v2227_v36  ;;  %v1615_v14 = vmax.f32 %v1577_v10, 0.0  ;;  %v1459_v17 = vadd.f32 %v2468_v12, %v3267_v37 }
 0x193   : > { %v1584_v22 = vpop.f32.mrf.mxu1  ;;  %v2470_v18 = vpop.f32.mrf.mxu0 }
 0x194   : > { %v2228_v20 = vpack.c.bf16 %v1615_v14, %v1615_v14  ;;  %v1580_v21 = vadd.f32 %v1579_v8, %v1459_v17  ;;  %v2471_v23 = vadd.f32 %v2470_v18, %v2469_v35 }
 0x195   : > { %v2536_v25 = vpop.f32.mrf.mxu1  ;;  %v2472_v24 = vpop.f32.mrf.mxu0 }
 0x196   : > { %1726 = vst.msk [vmem:[%s3284_s12 + $0x40] sm:$0xf] %vm1709_vm2, %v2228_v20  ;;  %v1616_v26 = vmax.f32 %v1580_v21, 0.0  ;;  %v1464_v44 = vadd.f32 %v2471_v23, %v3270_v47 }
 0x197   : > { %v1587_v28 = vpop.f32.mrf.mxu1  ;;  %v2473_v31 = vpop.f32.mrf.mxu0 }
 0x198   : > { %v2229_v29 = vpack.c.bf16 %v1616_v26, %v1616_v26  ;;  %v1585_v30 = vadd.f32 %v1584_v22, %v1464_v44  ;;  %v2474_v32 = vadd.f32 %v2473_v31, %v2472_v24 }
 0x199   : > { %v2537_v37 = vpop.f32.mrf.mxu1  ;;  %v2475_v3 = vpop.f32.mrf.mxu0 }
 0x19a   : > { %1727 = vst.msk [vmem:[%s3284_s12 + $0x44] sm:$0xf] %vm1709_vm2, %v2229_v29  ;;  %v1617_v33 = vmax.f32 %v1585_v30, 0.0  ;;  %v1467_v34 = vadd.f32 %v2474_v32, %v3273_v57 }
 0x19b   : > { %v1592_v38 = vpop.f32.mrf.mxu1  ;;  %v2476_v52 = vpop.f32.mrf.mxu0 }
 0x19c   : > { %v2230_v41 = vpack.c.bf16 %v1617_v33, %v1617_v33  ;;  %v1588_v39 = vadd.f32 %v1587_v28, %v1467_v34  ;;  %v2477_v40 = vadd.f32 %v2476_v52, %v2475_v3 }
 0x19d   : > { %v2540_v47 = vpop.f32.mrf.mxu1  ;;  %v2478_v42 = vpop.f32.mrf.mxu0 }
 0x19e   : > { %1728 = vst.msk [vmem:[%s3284_s12 + $0x48] sm:$0xf] %vm1709_vm2, %v2230_v41  ;;  %v1618_v43 = vmax.f32 %v1588_v39, 0.0  ;;  %v1472_v11 = vadd.f32 %v2477_v40, %v3276_v4 }
 0x19f   : > { %v1595_v45 = vpop.f32.mrf.mxu1  ;;  %v2479_v46 = vpop.f32.mrf.mxu0 }
 0x1a0   : > { %v2231_v48 = vpack.c.bf16 %v1618_v43, %v1618_v43  ;;  %v1593_v50 = vadd.f32 %v1592_v38, %v1472_v11  ;;  %v2480_v57 = vadd.f32 %v2479_v46, %v2478_v42 }
 0x1a1   : > { %v2541_v60 = vpop.f32.mrf.mxu1 }
 0x1a2   : > { %1729 = vst.msk [vmem:[%s3284_s12 + $0x4c] sm:$0xf] %vm1709_vm2, %v2231_v48  ;;  %v1619_v19 = vmax.f32 %v1593_v50, 0.0  ;;  %v1475_v49 = vadd.f32 %v2480_v57, %v3279_v16 }
 0x1a4   : > { %v2232_v51 = vpack.c.bf16 %v1619_v19, %v1619_v19  ;;  %v1596_v53 = vadd.f32 %v1595_v45, %v1475_v49 }
 0x1a6   : > { %1730 = vst.msk [vmem:[%s3284_s12 + $0x50] sm:$0xf] %vm1709_vm2, %v2232_v51  ;;  %v1620_v54 = vmax.f32 %v1596_v53, 0.0  ;;  %1738 = sbr.rel (!%p2934_p4) target bundleno = 495 (0x1ef), region = 36 }
 0x1a8   : > { %v2233_v55 = vpack.c.bf16 %v1620_v54, %v1620_v54 }
 0x1aa   : > { %1731 = vst.msk [vmem:[%s3284_s12 + $0x54] sm:$0xf] %vm1709_vm2, %v2233_v55 }
 0x1ab   : > { %s3472_s4 = smov (!%p1741_p8, %s1740_s4), 22 }
 0x1ac   : > { %s2200_s9 = sshll.u32 %s3472_s4, 6 }
 0x1ad   : > { %p2203_p9 = scmp.eq.s32.totalorder %s2200_s9, 0 }
 0x1ae   : > { %2795 = sdivrem.u32 (!%p2203_p9), %s3472_s4, 22 }
 0x1af   : > { %1749 = sbr.rel (%p2203_p9) target bundleno = 495 (0x1ef), region = 40 }
 0x1b7   : > { %s3363_s20 = spop.drf %2795 }
 0x1b8   : > { %p2204_p10 = scmp.le.s32.totalorder %s3363_s20, 0 }
 0x1b9   : > { %s3465_s15 = smov (!%p2204_p10), %s3357_s8  ;;  %s3466_s28 = smov (!%p2204_p10), %s3284_s12 }
 0x1ba   : > { %1990 = sbr.rel (%p2204_p10) target bundleno = 470 (0x1d6), region = 112  ;;  %s3372_s10 = smov (!%p2204_p10), 0  }
 0x1bb   : > { %s3374_s11 = smov (!%p2204_p10), 0  }
 0x1bf LB: >> { %v1767_v4 = vld [vmem:[%s2861_s28] sm:$0xf]  ;;  %v1769_v16 = vld [vmem:[%s2861_s28 + $0x4] sm:$0xf]  ;;  %v1771_v56 = vld [vmem:[%s2861_s28 + $0x8] sm:$0xf]  ;;  %s2869_s11 = sphi %s3374_s11, %s1761_s11   ;;  %s2865_s10 = sphi %s3372_s10, %s3467_s10   ;;  %s2861_s28 = sphi %s3466_s28, %s1816_s28   ;;  %s2857_s15 = sphi %s3465_s15, %s1817_s15  }
 0x1c0   : >> { %1768 = vst [vmem:[%s2857_s15] sm:$0xf] %v1767_v4  ;;  %1770 = vst [vmem:[%s2857_s15 + $0x4] sm:$0xf] %v1769_v16  ;;  %v1773_v59 = vld [vmem:[%s2861_s28 + $0xc] sm:$0xf]  ;;  %s1811_s14 = sadd.s32 1, %s2865_s10 }
 0x1c1   : >> { %1772 = vst [vmem:[%s2857_s15 + $0x8] sm:$0xf] %v1771_v56  ;;  %v1775_v58 = vld [vmem:[%s2861_s28 + $0x10] sm:$0xf]  ;;  %v1777_v5 = vld [vmem:[%s2861_s28 + $0x14] sm:$0xf]  ;;  %p1812_p11 = scmp.ge.s32.totalorder %s1811_s14, %s3363_s20 }
 0x1c2   : >> { %1774 = vst [vmem:[%s2857_s15 + $0xc] sm:$0xf] %v1773_v59  ;;  %1776 = vst [vmem:[%s2857_s15 + $0x10] sm:$0xf] %v1775_v58  ;;  %v1779_v61 = vld [vmem:[%s2861_s28 + $0x18] sm:$0xf] }
 0x1c3   : >> { %1778 = vst [vmem:[%s2857_s15 + $0x14] sm:$0xf] %v1777_v5  ;;  %v1781_v62 = vld [vmem:[%s2861_s28 + $0x1c] sm:$0xf]  ;;  %v1783_v63 = vld [vmem:[%s2861_s28 + $0x20] sm:$0xf] }
 0x1c4   : >> { %1780 = vst [vmem:[%s2857_s15 + $0x18] sm:$0xf] %v1779_v61  ;;  %1782 = vst [vmem:[%s2857_s15 + $0x1c] sm:$0xf] %v1781_v62  ;;  %v1785_v0 = vld [vmem:[%s2861_s28 + $0x24] sm:$0xf] }
 0x1c5   : >> { %1784 = vst [vmem:[%s2857_s15 + $0x20] sm:$0xf] %v1783_v63  ;;  %v1787_v27 = vld [vmem:[%s2861_s28 + $0x28] sm:$0xf]  ;;  %v1789_v1 = vld [vmem:[%s2861_s28 + $0x2c] sm:$0xf] }
 0x1c6   : >> { %1786 = vst [vmem:[%s2857_s15 + $0x24] sm:$0xf] %v1785_v0  ;;  %1788 = vst [vmem:[%s2857_s15 + $0x28] sm:$0xf] %v1787_v27  ;;  %v1791_v6 = vld [vmem:[%s2861_s28 + $0x30] sm:$0xf] }
 0x1c7   : >> { %1790 = vst [vmem:[%s2857_s15 + $0x2c] sm:$0xf] %v1789_v1  ;;  %v1793_v2 = vld [vmem:[%s2861_s28 + $0x34] sm:$0xf]  ;;  %v1795_v7 = vld [vmem:[%s2861_s28 + $0x38] sm:$0xf] }
 0x1c8   : >> { %1792 = vst [vmem:[%s2857_s15 + $0x30] sm:$0xf] %v1791_v6  ;;  %1794 = vst [vmem:[%s2857_s15 + $0x34] sm:$0xf] %v1793_v2  ;;  %v1797_v13 = vld [vmem:[%s2861_s28 + $0x3c] sm:$0xf] }
 0x1c9   : >> { %1796 = vst [vmem:[%s2857_s15 + $0x38] sm:$0xf] %v1795_v7  ;;  %v1799_v8 = vld [vmem:[%s2861_s28 + $0x40] sm:$0xf]  ;;  %v1801_v9 = vld [vmem:[%s2861_s28 + $0x44] sm:$0xf] }
 0x1ca   : >> { %1798 = vst [vmem:[%s2857_s15 + $0x3c] sm:$0xf] %v1797_v13  ;;  %1800 = vst [vmem:[%s2857_s15 + $0x40] sm:$0xf] %v1799_v8  ;;  %v1803_v36 = vld [vmem:[%s2861_s28 + $0x48] sm:$0xf] }
 0x1cb   : >> { %1802 = vst [vmem:[%s2857_s15 + $0x44] sm:$0xf] %v1801_v9  ;;  %v1805_v10 = vld [vmem:[%s2861_s28 + $0x4c] sm:$0xf]  ;;  %v1807_v12 = vld [vmem:[%s2861_s28 + $0x50] sm:$0xf] }
 0x1cc   : >> { %1804 = vst [vmem:[%s2857_s15 + $0x48] sm:$0xf] %v1803_v36  ;;  %1806 = vst [vmem:[%s2857_s15 + $0x4c] sm:$0xf] %v1805_v10  ;;  %v1809_v15 = vld [vmem:[%s2861_s28 + $0x54] sm:$0xf] }
 0x1cd   : >> { %1808 = vst [vmem:[%s2857_s15 + $0x50] sm:$0xf] %v1807_v12  ;;  %1810 = vst [vmem:[%s2857_s15 + $0x54] sm:$0xf] %v1809_v15  ;;  %s3474_s14 = smov (%p1812_p11, %s1811_s14), 0  ;;  %s1761_s11 = sadd.s32 1, %s2869_s11  }
 0x1ce   : >> { %s1814_s17 = smul.u32 88, %s3474_s14  ;;  %p1760_p12 = scmp.ge.s32.totalorder %s1761_s11, %s3363_s20 }
 0x1cf   : >> { %s3467_s10 = smov %s3474_s14 }
 0x1d0   : >> { %s1816_s28 = scalar_lea.vmem %s3284_s12, %s1814_s17 [#allocation2]   ;;  %s1817_s15 = scalar_lea.vmem %s3357_s8, %s1814_s17  }
 0x1d1   : > { %1763 = sbr.rel (!%p1760_p12) target bundleno = 447 (0x1bf), region = 118 }
 0x1d6 PF: > { %2797 = sdivrem.u32 %s3472_s4, 22 }
 0x1d7   : > { %s2205_s18 = smul.u32 88, %s3363_s20 }
 0x1d9   : > { %s1822_s21 = scalar_lea.vmem %s3284_s12, %s2205_s18 [#allocation2]   ;;  %s1824_s22 = scalar_lea.vmem %s3357_s8, %s2205_s18  }
 0x1df   : > { %s2798_s23 = spop.drf %2797 }
 0x1e0   : > { %p2207_p13 = scmp.le.s32.totalorder %s2798_s23, 0 }
 0x1e1   : > { %s2871_s25 = smov (!%p2207_p13), %s1824_s22   ;;  %s2875_s26 = smov (!%p2207_p13), %s1822_s21  }
 0x1e2   : > { %2004 = sbr.rel (%p2207_p13) target bundleno = 495 (0x1ef), region = 123  ;;  %s2879_s27 = smov (!%p2207_p13), 0  }
 0x1e3   : > { %s2883_s29 = smov (!%p2207_p13), 0  }
 0x1e7 LB: >> { %v1834_v35 = vld [vmem:[%s2877_s26] sm:$0xf]  ;;  %s1836_s24 = sadd.s32 1, %s2881_s27  ;;  %s1828_s29 = sadd.s32 1, %s2885_s29   ;;  %s2885_s29 = sphi %s2883_s29, %s1828_s29   ;;  %s2881_s27 = sphi %s2879_s27, %s2880_s27   ;;  %s2877_s26 = sphi %s2875_s26, %s1841_s26   ;;  %s2873_s25 = sphi %s2871_s25, %s1842_s25  }
 0x1e8   : >> { %1835 = vst [vmem:[%s2873_s25] sm:$0xf] %v1834_v35  ;;  %p1837_p0 = scmp.ge.s32.totalorder %s1836_s24, %s2798_s23  ;;  %p1827_p1 = scmp.ge.s32.totalorder %s1828_s29, %s2798_s23 }
 0x1ea   : >> { %s3476_s24 = smov (%p1837_p0, %s1836_s24), 0  ;;  %1830 = sbr.rel (!%p1827_p1) target bundleno = 487 (0x1e7), region = 129 }
 0x1eb   : >> { %s2208_s30 = sshll.u32 %s3476_s24, 2  ;;  %s2880_s27 = smov %s3476_s24  }
 0x1ec   : >> { %s1841_s26 = scalar_lea.vmem %s1822_s21, %s2208_s30 [#allocation2]   ;;  %s1842_s25 = scalar_lea.vmem %s1824_s22, %s2208_s30  }
 0x1ef PF: > { %p10_p2 = scmp.ge.s32.totalorder %s2924_s16, 4   ;;  %s3468_s12 = smov %s2849_s13 }
 0x1f0   : > { %s3469_s13 = smov %s2932_s19  ;;  %s3470_s14 = smov %s2924_s16 }
 0x1f1   :  { %12 = sbr.rel (!%p10_p2) target bundleno = 2 (0x2), region = 140 }

// kernel: _lambda_.8
= control target key start
LH: loop header
LB: loop body
LE: loop exit
PB: predicated region body
PF: predicated region fallthrough
CT: control target
= control target key end

     0   :  { %v378_v0 = vmov 0   ;;  %vm145_vm0 = vcmask 130048   ;;  %vm279_vm1 = vcmask 60416   ;;  %s497_s1 = inlined_call_operand.vmem [shape: bf16[144,8], index: 1, kind: input, shape index: {}]   ;;  %s498_s0 = inlined_call_operand.vmem [shape: bf16[72,144], index: 0, kind: input, shape index: {}]   ;;  %s499_s2 = inlined_call_operand.vmem [shape: f32[1,8], index: 2, kind: input, shape index: {}]   ;;  %s500_s3 = inlined_call_operand.vmem [shape: bf16[72,8], index: 3, kind: output, shape index: {}]  }
   0x1   :  { %161 = vmatprep.subr.bf16.mxu0 %v378_v0  ;;  %v355_v1 = vld [vmem:[%s497_s1 + $0x38] sm:$0xff]   ;;  %336 = vmatprep.subr.bf16.mxu1 %v378_v0  ;;  %v356_v2 = vld [vmem:[%s497_s1 + $0x30] sm:$0xff]   ;;  %v357_v3 = vld [vmem:[%s497_s1 + $0x28] sm:$0xff]  }
   0x2   :  { %162 = vmatpush1.bf16.msra.mxu0 %v355_v1  ;;  %345 = vmatpush1.bf16.msra.mxu1 %v355_v1  ;;  %v358_v4 = vld [vmem:[%s497_s1 + $0x20] sm:$0xff]   ;;  %v369_v6 = vld [vmem:[%s498_s0 + $0x34] ss:$8 sps:$4 sm:$0xff]   ;;  %v361_v9 = vld [vmem:[%s497_s1 + $0x8] sm:$0xff]  }
   0x3   :  { %163 = vmatprep.subr.bf16.mxu0 %v378_v0  ;;  %337 = vmatprep.subr.bf16.mxu1 %v378_v0  ;;  %v366_v5 = vld [vmem:[%s498_s0 + $0x4] ss:$8 sps:$4 sm:$0xff]   ;;  %v359_v7 = vld [vmem:[%s497_s1 + $0x18] sm:$0xff]   ;;  %v360_v8 = vld [vmem:[%s497_s1 + $0x10] sm:$0xff]  }
   0x4   :  { %313 = vmatprep.mubr.msk.bf16.mxu0 %vm145_vm0, %v366_v5  ;;  %316 = vmatprep.mubr.msk.bf16.mxu1 %vm145_vm0, %v369_v6  ;;  %v362_v10 = vld [vmem:[%s497_s1] sm:$0xff]   ;;  %v367_v14 = vld [vmem:[%s498_s0 + $0x30] ss:$8 sps:$4 sm:$0xff]   ;;  %v370_v15 = vld [vmem:[%s498_s0 + $0x14] ss:$8 sps:$4 sm:$0xff]  }
   0x5   :  { %v363_v11 = vld [vmem:[%s497_s1 + $0x40] sm:$0xff]   ;;  %v372_v17 = vld [vmem:[%s498_s0 + $0x10] ss:$8 sps:$4 sm:$0xff]  }
   0x6   :  { %164 = vmatpush1.bf16.msra.mxu0 %v356_v2  ;;  %346 = vmatpush1.bf16.msra.mxu1 %v356_v2  ;;  %v23_v12 = vld [vmem:[%s498_s0 + $0x40] sm:$0xff] }
   0x7   :  { %165 = vmatprep.subr.bf16.mxu0 %v378_v0  ;;  %338 = vmatprep.subr.bf16.mxu1 %v378_v0  ;;  %v364_v13 = vld [vmem:[%s498_s0] ss:$8 sps:$4 sm:$0xff]   ;;  %v303_v16 = vcombine.high %v23_v12, %v23_v12  ;;  %v302_v18 = vcombine.low %v23_v12, %v23_v12  ;;  %v375_v19 = vld [vmem:[%s498_s0 + $0x24] ss:$8 sps:$4 sm:$0xff]  }
   0x8   :  { %v377_v20 = vld [vmem:[%s498_s0 + $0x20] ss:$8 sps:$4 sm:$0xff]  }
   0x9   :  { %v293_v21 = vld [vmem:[%s499_s2] ss:$0 sm:$0xff] }
   0xa   :  { %166 = vmatpush1.bf16.msra.mxu0 %v357_v3  ;;  %347 = vmatpush1.bf16.msra.mxu1 %v357_v3 }
   0xb   :  { %167 = vmatprep.subr.bf16.mxu0 %v378_v0  ;;  %339 = vmatprep.subr.bf16.mxu1 %v378_v0 }
   0xe   :  { %168 = vmatpush1.bf16.msra.mxu0 %v358_v4  ;;  %348 = vmatpush1.bf16.msra.mxu1 %v358_v4 }
   0xf   :  { %169 = vmatprep.subr.bf16.mxu0 %v378_v0  ;;  %340 = vmatprep.subr.bf16.mxu1 %v378_v0 }
  0x12   :  { %170 = vmatpush1.bf16.msra.mxu0 %v359_v7  ;;  %349 = vmatpush1.bf16.msra.mxu1 %v359_v7 }
  0x13   :  { %171 = vmatprep.subr.bf16.mxu0 %v378_v0  ;;  %341 = vmatprep.subr.bf16.mxu1 %v378_v0 }
  0x16   :  { %172 = vmatpush1.bf16.msra.mxu0 %v360_v8  ;;  %350 = vmatpush1.bf16.msra.mxu1 %v360_v8 }
  0x17   :  { %173 = vmatprep.subr.bf16.mxu0 %v378_v0  ;;  %342 = vmatprep.subr.bf16.mxu1 %v378_v0 }
  0x1a   :  { %174 = vmatpush1.bf16.msra.mxu0 %v361_v9  ;;  %351 = vmatpush1.bf16.msra.mxu1 %v361_v9 }
  0x1b   :  { %175 = vmatprep.subr.bf16.mxu0 %v378_v0  ;;  %343 = vmatprep.subr.bf16.mxu1 %v378_v0 }
  0x1e   :  { %176 = vmatpush1.bf16.msra.mxu0 %v362_v10  ;;  %352 = vmatpush1.bf16.msra.mxu1 %v362_v10 }
  0x1f   :  { %191 = vmatprep.subr.bf16.mxu0 %v378_v0  ;;  %344 = vmatprep.subr.bf16.mxu1 %v378_v0 }
  0x22   :  { %192 = vmatpush2.bf16.msra.mxu0 %v363_v11  ;;  %353 = vmatpush2.bf16.msra.mxu1 %v363_v11 }
  0x25   :  { %194 = vmatmul.mubr.bf16.vlgmr.msra.gmra.mxu0 %v364_v13  ;;  %218 = vmatmul.mubr.bf16.vlgmr.msra.gmra.mxu1 %v367_v14 }
  0x26   :  { %314 = vmatprep.mubr.msk.bf16.mxu0 %vm145_vm0, %v370_v15  ;;  %317 = vmatprep.mubr.msk.bf16.mxu1 %vm145_vm0, %v303_v16 }
  0x2d   :  { %202 = vmatmul.mubr.bf16.gmra.mxu0 %v372_v17  ;;  %226 = vmatmul.mubr.bf16.gmra.mxu1 %v302_v18 }
  0x2e   :  { %315 = vmatprep.mubr.msk.bf16.mxu0 %vm145_vm0, %v375_v19 }
  0x35   :  { %210 = vmatmul.mubr.bf16.gmra.mxu0 %v377_v20 }
  0xe5   :  { %v195_v22 = vpop.f32.mrf.mxu0  ;;  %v219_v23 = vpop.f32.mrf.mxu1 }
  0xe6   :  { %v196_v24 = vadd.f32 %v293_v21, %v195_v22  ;;  %v220_v25 = vadd.f32 %v293_v21, %v219_v23 }
  0xe7   :  { %v197_v26 = vpop.f32.mrf.mxu0  ;;  %v221_v27 = vpop.f32.mrf.mxu1 }
  0xe8   :  { %v233_v28 = vmax.f32 %v196_v24, 0.0  ;;  %v239_v29 = vmax.f32 %v220_v25, 0.0 }
  0xe9   :  { %v198_v30 = vpop.f32.mrf.mxu0  ;;  %v222_v31 = vpop.f32.mrf.mxu1 }
  0xea   :  { %v327_v32 = vpack.c.bf16 %v233_v28, %v233_v28  ;;  %v199_v33 = vadd.f32 %v293_v21, %v198_v30  ;;  %v333_v34 = vpack.c.bf16 %v239_v29, %v239_v29  ;;  %v223_v35 = vadd.f32 %v293_v21, %v222_v31 }
  0xeb   :  { %v200_v36 = vpop.f32.mrf.mxu0  ;;  %v224_v37 = vpop.f32.mrf.mxu1 }
  0xec   :  { %280 = vst.msk [vmem:[%s500_s3] sm:$0xf] %vm279_vm1, %v327_v32  ;;  %v234_v38 = vmax.f32 %v199_v33, 0.0  ;;  %286 = vst.msk [vmem:[%s500_s3 + $0x18] sm:$0xf] %vm279_vm1, %v333_v34  ;;  %v240_v39 = vmax.f32 %v223_v35, 0.0 }
  0xed   :  { %v203_v40 = vpop.f32.mrf.mxu0  ;;  %v227_v41 = vpop.f32.mrf.mxu1 }
  0xee   :  { %v328_v42 = vpack.c.bf16 %v234_v38, %v234_v38  ;;  %v204_v43 = vadd.f32 %v293_v21, %v203_v40  ;;  %v334_v44 = vpack.c.bf16 %v240_v39, %v240_v39  ;;  %v228_v45 = vadd.f32 %v293_v21, %v227_v41 }
  0xef   :  { %v205_v46 = vpop.f32.mrf.mxu0  ;;  %v229_v47 = vpop.f32.mrf.mxu1 }
  0xf0   :  { %281 = vst.msk [vmem:[%s500_s3 + $0x4] sm:$0xf] %vm279_vm1, %v328_v42  ;;  %v235_v48 = vmax.f32 %v204_v43, 0.0  ;;  %287 = vst.msk [vmem:[%s500_s3 + $0x1c] sm:$0xf] %vm279_vm1, %v334_v44  ;;  %v241_v49 = vmax.f32 %v228_v45, 0.0 }
  0xf1   :  { %v206_v50 = vpop.f32.mrf.mxu0  ;;  %v230_v51 = vpop.f32.mrf.mxu1 }
  0xf2   :  { %v329_v52 = vpack.c.bf16 %v235_v48, %v235_v48  ;;  %v207_v53 = vadd.f32 %v293_v21, %v206_v50  ;;  %v335_v54 = vpack.c.bf16 %v241_v49, %v241_v49 }
  0xf3   :  { %v208_v55 = vpop.f32.mrf.mxu0  ;;  %v231_v56 = vpop.f32.mrf.mxu1 }
  0xf4   :  { %282 = vst.msk [vmem:[%s500_s3 + $0x8] sm:$0xf] %vm279_vm1, %v329_v52  ;;  %v236_v57 = vmax.f32 %v207_v53, 0.0  ;;  %288 = vst.msk [vmem:[%s500_s3 + $0x20] sm:$0xf] %vm279_vm1, %v335_v54 }
  0xf5   :  { %v211_v58 = vpop.f32.mrf.mxu0 }
  0xf6   :  { %v330_v59 = vpack.c.bf16 %v236_v57, %v236_v57  ;;  %v212_v60 = vadd.f32 %v293_v21, %v211_v58 }
  0xf7   :  { %v213_v61 = vpop.f32.mrf.mxu0 }
  0xf8   :  { %283 = vst.msk [vmem:[%s500_s3 + $0xc] sm:$0xf] %vm279_vm1, %v330_v59  ;;  %v237_v62 = vmax.f32 %v212_v60, 0.0 }
  0xf9   :  { %v214_v63 = vpop.f32.mrf.mxu0 }
  0xfa   :  { %v331_v0 = vpack.c.bf16 %v237_v62, %v237_v62  ;;  %v215_v1 = vadd.f32 %v293_v21, %v214_v63 }
  0xfb   :  { %v216_v2 = vpop.f32.mrf.mxu0 }
  0xfc   :  { %284 = vst.msk [vmem:[%s500_s3 + $0x10] sm:$0xf] %vm279_vm1, %v331_v0  ;;  %v238_v3 = vmax.f32 %v215_v1, 0.0 }
  0xfe   :  { %v332_v4 = vpack.c.bf16 %v238_v3, %v238_v3 }
 0x100   :  { %285 = vst.msk [vmem:[%s500_s3 + $0x14] sm:$0xf] %vm279_vm1, %v332_v4 }

// kernel: _lambda_.9
= control target key start
LH: loop header
LB: loop body
LE: loop exit
PB: predicated region body
PF: predicated region fallthrough
CT: control target
= control target key end

     0   :  { %v100_v0 = vlaneseq  ;;  %vm520_vm0 = vcmask 1041408   ;;  %v1363_v2 = vmov 0   ;;  %v1364_v3 = vmov 1966171168   ;;  %s1751_s1 = inlined_call_operand.vmem [shape: bf16[292,500], index: 1, kind: input, shape index: {}]   ;;  %s1752_s0 = inlined_call_operand.vmem [shape: bf16[2,292], index: 0, kind: input, shape index: {}]   ;;  %s1753_s3 = inlined_call_operand.vmem [shape: bf16[500,1], index: 3, kind: input, shape index: {}]   ;;  %s1754_s2 = inlined_call_operand.vmem [shape: f32[1,500], index: 2, kind: input, shape index: {}]   ;;  %s1755_s4 = inlined_call_operand.<no memory space> [shape: f32[1,1], index: 4, kind: input, shape index: {}]   ;;  %s1756_s5 = inlined_call_operand.vmem [shape: f32[2,1], index: 5, kind: output, shape index: {}]  }
   0x1   :  { %v1219_v1 = vld [vmem:[%s1751_s1 + $0xe4] ss:$16 sps:$4 sm:$0xff]   ;;  %606 = vmatprep.mubr.bf16.mxu1 %v1363_v2  ;;  %v130_v4 = vunpack.c.l.s4 %v1364_v3  ;;  %v1222_v6 = vld [vmem:[%s1751_s1 + $0xe0] ss:$16 sps:$4 sm:$0xff]   ;;  %v1240_v25 = vld [vmem:[%s1751_s1 + $0xec] ss:$16 sps:$4 sm:$0xff]  }
   0x2   :  { %v96_v5 = vld [vmem:[%s1751_s1 + $0x240] sm:$0x33]  ;;  %v1405_v7 = vshrl.u32 %v100_v0, 7  ;;  %533 = vmatprep.subr.bf16.mxu0 %v1219_v1  ;;  %vm516_vm1 = vcmask 293888   ;;  %v1238_v30 = vld [vmem:[%s1751_s1 + $0xe8] ss:$16 sps:$4 sm:$0xff]  }
   0x3   :  { %v1131_v8 = vcombine.high %v96_v5, %v96_v5  ;;  %v1130_v9 = vcombine.low %v96_v5, %v96_v5  ;;  %v1224_v10 = vld [vmem:[%s1751_s1 + $0xc4] ss:$16 sps:$4 sm:$0xff]   ;;  %v131_v11 = vunpack.c.0.s8 %v130_v4  ;;  %534 = vmatpush1.bf16.msra.mxu0 %v1222_v6  ;;  %v1228_v13 = vld [vmem:[%s1751_s1 + $0xc0] ss:$16 sps:$4 sm:$0xff]   ;;  %v1246_v31 = vld [vmem:[%s1751_s1 + $0xcc] ss:$16 sps:$4 sm:$0xff]  }
   0x4   :  { %v1226_v12 = vld [vmem:[%s1751_s1 + $0x224] ss:$16 sps:$4 sm:$0xff]   ;;  %535 = vmatprep.subr.bf16.mxu0 %v1224_v10  ;;  %v1229_v15 = vld [vmem:[%s1751_s1 + $0x220] ss:$16 sps:$4 sm:$0xff]   ;;  %v1244_v34 = vld [vmem:[%s1751_s1 + $0xc8] ss:$16 sps:$4 sm:$0xff]  }
   0x5   :  { %1134 = vmatprep.subr.msk.bf16.mxu1 %vm520_vm0, %v1131_v8  ;;  %v522_v14 = vsel %vm520_vm0, %v1130_v9, 0  ;;  %v1230_v16 = vld [vmem:[%s1751_s1 + $0xa4] ss:$16 sps:$4 sm:$0xff]   ;;  %v134_v17 = vsub.s32 %v131_v11, %v1405_v7  ;;  %v1234_v19 = vld [vmem:[%s1751_s1 + $0xa0] ss:$16 sps:$4 sm:$0xff]   ;;  %vm964_vm2 = vcmask 949248  }
   0x6   :  { %585 = vmatpush1.bf16.msra.mxu1 %v522_v14  ;;  %v1232_v18 = vld [vmem:[%s1751_s1 + $0x204] ss:$16 sps:$4 sm:$0xff]   ;;  %v1057_v21 = vld.sshfl [vmem:[%s1752_s0] sm:$0x13 pattern:$0x75316420] }
   0x7   :  { %586 = vmatprep.subr.bf16.mxu1 %v1226_v12  ;;  %536 = vmatpush1.bf16.msra.mxu0 %v1228_v13  ;;  %v1236_v20 = vld [vmem:[%s1751_s1 + $0x84] ss:$16 sps:$4 sm:$0xff]   ;;  %v1235_v22 = vld [vmem:[%s1751_s1 + $0x200] ss:$16 sps:$4 sm:$0xff]   ;;  %v1440_v23 = vrot.slane %v1057_v21, %v134_v17  ;;  %v128_v24 = vcombine.high %v1057_v21, %v1057_v21  ;;  %v1252_v35 = vld [vmem:[%s1751_s1 + $0xac] ss:$16 sps:$4 sm:$0xff]  }
   0x8   :  { %537 = vmatprep.subr.bf16.mxu0 %v1230_v16  ;;  %v1241_v26 = vld [vmem:[%s1751_s1 + $0x80] ss:$16 sps:$4 sm:$0xff]   ;;  %v1242_v29 = vld [vmem:[%s1751_s1 + $0x64] ss:$16 sps:$4 sm:$0xff]   ;;  %v1250_v38 = vld [vmem:[%s1751_s1 + $0xa8] ss:$16 sps:$4 sm:$0xff]  }
   0x9   :  { %v142_v27 = vrot.slane %v128_v24, %v134_v17  ;;  %v1450_v28 = vcombine.high %v1440_v23, %v1440_v23  ;;  %v1247_v32 = vld [vmem:[%s1751_s1 + $0x60] ss:$16 sps:$4 sm:$0xff]   ;;  %v1248_v33 = vld [vmem:[%s1751_s1 + $0x44] ss:$16 sps:$4 sm:$0xff]   ;;  %v1258_v39 = vld [vmem:[%s1751_s1 + $0x8c] ss:$16 sps:$4 sm:$0xff]  }
   0xa   :  { %587 = vmatpush1.bf16.msra.mxu1 %v1229_v15  ;;  %v1253_v36 = vld [vmem:[%s1751_s1 + $0x40] ss:$16 sps:$4 sm:$0xff]   ;;  %v1254_v37 = vld [vmem:[%s1751_s1 + $0x24] ss:$16 sps:$4 sm:$0xff]   ;;  %v1256_v42 = vld [vmem:[%s1751_s1 + $0x88] ss:$16 sps:$4 sm:$0xff]  }
   0xb   :  { %588 = vmatprep.subr.bf16.mxu1 %v1232_v18  ;;  %538 = vmatpush1.bf16.msra.mxu0 %v1234_v19  ;;  %v1259_v40 = vld [vmem:[%s1751_s1 + $0x20] ss:$16 sps:$4 sm:$0xff]   ;;  %v1260_v41 = vld [vmem:[%s1751_s1 + $0x4] ss:$16 sps:$4 sm:$0xff]   ;;  %v1264_v43 = vld [vmem:[%s1751_s1 + $0x6c] ss:$16 sps:$4 sm:$0xff]  }
   0xc   :  { %539 = vmatprep.subr.bf16.mxu0 %v1236_v20  ;;  %565 = vmatprep.mubr.bf16.mxu0 %v142_v27  ;;  %v1265_v44 = vld [vmem:[%s1751_s1] ss:$16 sps:$4 sm:$0xff]   ;;  %v1266_v45 = vld [vmem:[%s1751_s1 + $0x1e4] ss:$16 sps:$4 sm:$0xff]   ;;  %v1262_v46 = vld [vmem:[%s1751_s1 + $0x68] ss:$16 sps:$4 sm:$0xff]  }
   0xd   :  { %v1270_v47 = vld [vmem:[%s1751_s1 + $0x4c] ss:$16 sps:$4 sm:$0xff]   ;;  %v1271_v48 = vld [vmem:[%s1751_s1 + $0x1e0] ss:$16 sps:$4 sm:$0xff]   ;;  %v1272_v49 = vld [vmem:[%s1751_s1 + $0x1c4] ss:$16 sps:$4 sm:$0xff]  }
   0xe   :  { %589 = vmatpush1.bf16.msra.mxu1 %v1235_v22  ;;  %v1268_v50 = vld [vmem:[%s1751_s1 + $0x48] ss:$16 sps:$4 sm:$0xff]   ;;  %v1276_v51 = vld [vmem:[%s1751_s1 + $0x2c] ss:$16 sps:$4 sm:$0xff]   ;;  %v1277_v52 = vld [vmem:[%s1751_s1 + $0x1c0] ss:$16 sps:$4 sm:$0xff]  }
   0xf   :  { %615 = vmatprep.subr.bf16.mxu1 %v1240_v25  ;;  %540 = vmatpush1.bf16.msra.mxu0 %v1241_v26  ;;  %v1278_v53 = vld [vmem:[%s1751_s1 + $0x1a4] ss:$16 sps:$4 sm:$0xff]   ;;  %v1274_v54 = vld [vmem:[%s1751_s1 + $0x28] ss:$16 sps:$4 sm:$0xff]   ;;  %v1282_v55 = vld [vmem:[%s1751_s1 + $0xc] ss:$16 sps:$4 sm:$0xff]  }
  0x10   :  { %541 = vmatprep.subr.bf16.mxu0 %v1242_v29  ;;  %v1283_v56 = vld [vmem:[%s1751_s1 + $0x1a0] ss:$16 sps:$4 sm:$0xff]   ;;  %v1284_v57 = vld [vmem:[%s1751_s1 + $0x184] ss:$16 sps:$4 sm:$0xff]   ;;  %v1280_v58 = vld [vmem:[%s1751_s1 + $0x8] ss:$16 sps:$4 sm:$0xff]  }
  0x11   :  { %1135 = vmatmul.mubr.msk.bf16.vlgmr.msra.gmra.mxu1 %vm516_vm1, %v1450_v28  ;;  %v1288_v59 = vld [vmem:[%s1751_s1 + $0x1ec] ss:$16 sps:$4 sm:$0xff]   ;;  %v1289_v60 = vld [vmem:[%s1751_s1 + $0x180] ss:$16 sps:$4 sm:$0xff]   ;;  %v1290_v61 = vld [vmem:[%s1751_s1 + $0x164] ss:$16 sps:$4 sm:$0xff]  }
  0x12   :  { %616 = vmatpush1.bf16.msra.mxu1 %v1238_v30  ;;  %647 = vmatprep.mubr.bf16.mxu1 %v142_v27  ;;  %v1286_v62 = vld [vmem:[%s1751_s1 + $0x1e8] ss:$16 sps:$4 sm:$0xff]   ;;  %v1294_v63 = vld [vmem:[%s1751_s1 + $0x1cc] ss:$16 sps:$4 sm:$0xff]   ;;  %v1295_v0 = vld [vmem:[%s1751_s1 + $0x160] ss:$16 sps:$4 sm:$0xff]  }
  0x13   :  { %617 = vmatprep.subr.bf16.mxu1 %v1246_v31  ;;  %542 = vmatpush1.bf16.msra.mxu0 %v1247_v32  ;;  %v1296_v1 = vld [vmem:[%s1751_s1 + $0x144] ss:$16 sps:$4 sm:$0xff]   ;;  %v1292_v3 = vld [vmem:[%s1751_s1 + $0x1c8] ss:$16 sps:$4 sm:$0xff]   ;;  %v1300_v4 = vld [vmem:[%s1751_s1 + $0x1ac] ss:$16 sps:$4 sm:$0xff]  }
  0x14   :  { %543 = vmatprep.subr.bf16.mxu0 %v1248_v33  ;;  %v1301_v5 = vld [vmem:[%s1751_s1 + $0x140] ss:$16 sps:$4 sm:$0xff]   ;;  %v1302_v6 = vld [vmem:[%s1751_s1 + $0x124] ss:$16 sps:$4 sm:$0xff]   ;;  %v1298_v8 = vld [vmem:[%s1751_s1 + $0x1a8] ss:$16 sps:$4 sm:$0xff]  }
  0x15   :  { %v1306_v9 = vld [vmem:[%s1751_s1 + $0x18c] ss:$16 sps:$4 sm:$0xff]   ;;  %v1307_v10 = vld [vmem:[%s1751_s1 + $0x120] ss:$16 sps:$4 sm:$0xff]   ;;  %v1308_v11 = vld [vmem:[%s1751_s1 + $0x104] ss:$16 sps:$4 sm:$0xff]  }
  0x16   :  { %618 = vmatpush1.bf16.msra.mxu1 %v1244_v34  ;;  %v1304_v12 = vld [vmem:[%s1751_s1 + $0x188] ss:$16 sps:$4 sm:$0xff]   ;;  %v1312_v14 = vld [vmem:[%s1751_s1 + $0x16c] ss:$16 sps:$4 sm:$0xff]   ;;  %v1313_v15 = vld [vmem:[%s1751_s1 + $0x100] ss:$16 sps:$4 sm:$0xff]  }
  0x17   :  { %619 = vmatprep.subr.bf16.mxu1 %v1252_v35  ;;  %544 = vmatpush1.bf16.msra.mxu0 %v1253_v36  ;;  %v97_v13 = vld [vmem:[%s1751_s1 + $0x248] sm:$0x33]  ;;  %v1331_v31 = vld [vmem:[%s1753_s3 + $0x78] sm:$0xff]   ;;  %v1333_v33 = vld [vmem:[%s1753_s3 + $0x70] sm:$0xff]   ;;  %vm1051_vm3 = vcmask 1024  }
  0x18   :  { %545 = vmatprep.subr.bf16.mxu0 %v1254_v37  ;;  %v1133_v16 = vcombine.high %v97_v13, %v97_v13  ;;  %v1132_v17 = vcombine.low %v97_v13, %v97_v13  ;;  %v1310_v18 = vld [vmem:[%s1751_s1 + $0x168] ss:$16 sps:$4 sm:$0xff]   ;;  %v1316_v19 = vld [vmem:[%s1751_s1 + $0x14c] ss:$16 sps:$4 sm:$0xff]   ;;  %v1337_v35 = vld [vmem:[%s1753_s3 + $0x60] sm:$0xff]  }
  0x19   :  { %v1324_v21 = vld [vmem:[%s1751_s1 + $0x22c] ss:$16 sps:$4 sm:$0xff]   ;;  %v1314_v22 = vld [vmem:[%s1751_s1 + $0x148] ss:$16 sps:$4 sm:$0xff]  }
  0x1a   :  { %620 = vmatpush1.bf16.msra.mxu1 %v1250_v38  ;;  %v528_v20 = vsel %vm520_vm0, %v1132_v17, 0  ;;  %v1321_v24 = vld [vmem:[%s1751_s1 + $0x12c] ss:$16 sps:$4 sm:$0xff]   ;;  %v1322_v25 = vld [vmem:[%s1751_s1 + $0x228] ss:$16 sps:$4 sm:$0xff]   ;;  %v1339_v38 = vld [vmem:[%s1753_s3 + $0x20] sm:$0xff]  }
  0x1b   :  { %621 = vmatprep.subr.bf16.mxu1 %v1258_v39  ;;  %546 = vmatpush1.bf16.msra.mxu0 %v1259_v40  ;;  %v1330_v26 = vld [vmem:[%s1751_s1 + $0x20c] ss:$16 sps:$4 sm:$0xff]   ;;  %v1319_v27 = vld [vmem:[%s1751_s1 + $0x128] ss:$16 sps:$4 sm:$0xff]   ;;  %v1342_v39 = vld [vmem:[%s1753_s3 + $0xf0] sm:$0xff]  }
  0x1c   :  { %547 = vmatprep.subr.bf16.mxu0 %v1260_v41  ;;  %v1327_v29 = vld [vmem:[%s1751_s1 + $0x10c] ss:$16 sps:$4 sm:$0xff]   ;;  %v1325_v30 = vld [vmem:[%s1751_s1 + $0x108] ss:$16 sps:$4 sm:$0xff]  }
  0x1d   :  { %v1332_v32 = vld [vmem:[%s1753_s3 + $0x38] sm:$0xff]   ;;  %v1336_v34 = vld [vmem:[%s1753_s3 + $0x28] sm:$0xff]  }
  0x1e   :  { %622 = vmatpush1.bf16.msra.mxu1 %v1256_v42  ;;  %v1338_v36 = vld [vmem:[%s1753_s3 + $0xf8] ss:$0 sps:$4 sm:$0x33]   ;;  %v1344_v42 = vld [vmem:[%s1753_s3 + $0xb0] sm:$0xff]  }
  0x1f   :  { %623 = vmatprep.subr.bf16.mxu1 %v1264_v43  ;;  %548 = vmatpush1.bf16.msra.mxu0 %v1265_v44  ;;  %v1340_v37 = vld [vmem:[%s1753_s3 + $0xb8] sm:$0xff]   ;;  %v1345_v43 = vld [vmem:[%s1753_s3 + $0x50] sm:$0xff]   ;;  %v1346_v44 = vld [vmem:[%s1753_s3 + $0xe8] sm:$0xff]  }
  0x20   :  { %549 = vmatprep.subr.bf16.mxu0 %v1266_v45  ;;  %v1341_v40 = vld [vmem:[%s1753_s3 + $0x58] sm:$0xff]   ;;  %v1347_v45 = vld [vmem:[%s1753_s3 + $0x10] sm:$0xff]  }
  0x21   :  { %v1343_v41 = vld [vmem:[%s1753_s3 + $0x18] sm:$0xff]  }
  0x22   :  { %624 = vmatpush1.bf16.msra.mxu1 %v1262_v46  ;;  %v1348_v46 = vld [vmem:[%s1753_s3 + $0xa8] sm:$0xff]  }
  0x23   :  { %625 = vmatprep.subr.bf16.mxu1 %v1270_v47  ;;  %550 = vmatpush2.bf16.msra.mxu0 %v1271_v48  ;;  %v1349_v47 = vld [vmem:[%s1753_s3 + $0x48] sm:$0xff]   ;;  %v1350_v48 = vld [vmem:[%s1753_s3 + $0xe0] sm:$0xff]  }
  0x24   :  { %551 = vmatprep.subr.bf16.mxu0 %v1272_v49  ;;  %v1351_v49 = vld [vmem:[%s1753_s3 + $0x8] sm:$0xff]  }
  0x26   :  { %626 = vmatpush1.bf16.msra.mxu1 %v1268_v50  ;;  %v1352_v50 = vld [vmem:[%s1753_s3 + $0xa0] sm:$0xff]  }
  0x27   :  { %627 = vmatprep.subr.bf16.mxu1 %v1276_v51  ;;  %552 = vmatpush2.bf16.msra.mxu0 %v1277_v52  ;;  %v1353_v51 = vld [vmem:[%s1753_s3 + $0x40] sm:$0xff]   ;;  %v1354_v52 = vld [vmem:[%s1753_s3 + $0xd8] sm:$0xff]  }
  0x28   :  { %553 = vmatprep.subr.bf16.mxu0 %v1278_v53  ;;  %v1355_v53 = vld [vmem:[%s1753_s3] sm:$0xff]  }
  0x2a   :  { %628 = vmatpush1.bf16.msra.mxu1 %v1274_v54  ;;  %v1356_v54 = vld [vmem:[%s1753_s3 + $0x98] sm:$0xff]  }
  0x2b   :  { %629 = vmatprep.subr.bf16.mxu1 %v1282_v55  ;;  %554 = vmatpush2.bf16.msra.mxu0 %v1283_v56  ;;  %v1357_v55 = vld [vmem:[%s1753_s3 + $0xd0] sm:$0xff]  }
  0x2c   :  { %555 = vmatprep.subr.bf16.mxu0 %v1284_v57  ;;  %v1358_v56 = vld [vmem:[%s1753_s3 + $0x90] sm:$0xff]   ;;  %v1359_v57 = vld [vmem:[%s1753_s3 + $0xc8] sm:$0xff]  }
  0x2e   :  { %630 = vmatpush1.bf16.msra.mxu1 %v1280_v58  ;;  %v1360_v58 = vld [vmem:[%s1753_s3 + $0x88] sm:$0xff]  }
  0x2f   :  { %631 = vmatprep.subr.bf16.mxu1 %v1288_v59  ;;  %556 = vmatpush2.bf16.msra.mxu0 %v1289_v60  ;;  %v1361_v59 = vld [vmem:[%s1753_s3 + $0xc0] sm:$0xff]  }
  0x30   :  { %557 = vmatprep.subr.bf16.mxu0 %v1290_v61  ;;  %v1362_v60 = vld [vmem:[%s1753_s3 + $0x80] sm:$0xff]  }
  0x32   :  { %632 = vmatpush2.bf16.msra.mxu1 %v1286_v62 }
  0x33   :  { %633 = vmatprep.subr.bf16.mxu1 %v1294_v63  ;;  %558 = vmatpush2.bf16.msra.mxu0 %v1295_v0 }
  0x34   :  { %559 = vmatprep.subr.bf16.mxu0 %v1296_v1  ;;  %v102_v1 = vsub.s32 0, %v1405_v7 }
  0x36   :  { %634 = vmatpush2.bf16.msra.mxu1 %v1292_v3  ;;  %v98_v3 = vld [vmem:[%s1754_s2] sm:$0xf] }
  0x37   :  { %635 = vmatprep.subr.bf16.mxu1 %v1300_v4  ;;  %560 = vmatpush2.bf16.msra.mxu0 %v1301_v5  ;;  %v106_v4 = vsub.s32 1, %v1405_v7  ;;  %v103_v5 = vrot.slane %v98_v3, %v102_v1 }
  0x38   :  { %561 = vmatprep.subr.bf16.mxu0 %v1302_v6 }
  0x39   :  { %v107_v6 = vrot.slane %v98_v3, %v106_v4 }
  0x3a   :  { %636 = vmatpush2.bf16.msra.mxu1 %v1298_v8 }
  0x3b   :  { %637 = vmatprep.subr.bf16.mxu1 %v1306_v9  ;;  %562 = vmatpush2.bf16.msra.mxu0 %v1307_v10 }
  0x3c   :  { %563 = vmatprep.subr.bf16.mxu0 %v1308_v11 }
  0x3e   :  { %638 = vmatpush2.bf16.msra.mxu1 %v1304_v12 }
  0x3f   :  { %639 = vmatprep.subr.bf16.mxu1 %v1312_v14  ;;  %564 = vmatpush2.bf16.msra.mxu0 %v1313_v15 }
  0x40   :  { %1136 = vmatprep.subr.msk.bf16.mxu0 %vm520_vm0, %v1133_v16 }
  0x42   :  { %640 = vmatpush2.bf16.msra.mxu1 %v1310_v18  ;;  %566 = vmatmul.mubr.bf16.vlgmr.msra.gmra.mxu0 %v1440_v23  ;;  %v110_v18 = vsub.s32 2, %v1405_v7 }
  0x43   :  { %641 = vmatprep.subr.bf16.mxu1 %v1316_v19  ;;  %667 = vmatpush1.bf16.msra.mxu0 %v528_v20  ;;  %v114_v20 = vsub.s32 3, %v1405_v7 }
  0x44   :  { %688 = vmatprep.mubr.bf16.mxu0 %v1363_v2  ;;  %668 = vmatprep.subr.bf16.mxu0 %v1324_v21  ;;  %v1328_v2 = vld [vmem:[%s1751_s1 + $0x208] ss:$16 sps:$4 sm:$0xff]  }
  0x46   :  { %642 = vmatpush2.bf16.msra.mxu1 %v1314_v22  ;;  %v111_v22 = vrot.slane %v98_v3, %v110_v18 }
  0x47   :  { %643 = vmatprep.subr.bf16.mxu1 %v1321_v24  ;;  %669 = vmatpush1.bf16.msra.mxu0 %v1322_v25  ;;  %v115_v25 = vrot.slane %v98_v3, %v114_v20 }
  0x48   :  { %670 = vmatprep.subr.bf16.mxu0 %v1330_v26 }
  0x4a   :  { %644 = vmatpush2.bf16.msra.mxu1 %v1319_v27 }
  0x4b   :  { %645 = vmatprep.subr.bf16.mxu1 %v1327_v29  ;;  %671 = vmatpush1.bf16.msra.mxu0 %v1328_v2 }
  0x4c   :  { %1172 = vmatprep.subr.bf16.mxu0 %v1331_v31 }
  0x4e   :  { %646 = vmatpush2.bf16.msra.mxu1 %v1325_v30  ;;  %1137 = vmatmul.mubr.msk.bf16.vlgmr.msra.gmra.mxu0 %vm516_vm1, %v1450_v28  ;;  %v1334_v28 = vld [vmem:[%s1753_s3 + $0x30] sm:$0xff]  }
  0x4f   :  { %1173 = vmatpush3.bf16.msra.mxu0 %v1332_v32  ;;  %1216 = vmatprep.subr.msk.bf16.mxu1 %vm520_vm0, %v1338_v36 }
  0x50   :  { %1174 = vmatprep.subr.bf16.mxu0 %v1333_v33 }
  0x51   :  { %648 = vmatmul.mubr.bf16.vlgmr.msra.gmra.mxu1 %v1440_v23  ;;  %v1335_v23 = vld [vmem:[%s1753_s3 + $0x68] sm:$0xff]  }
  0x52   :  { %1195 = vmatpush3.bf16.msra.mxu1 %v1340_v37 }
  0x53   :  { %1175 = vmatpush3.bf16.msra.mxu0 %v1334_v28  ;;  %1196 = vmatprep.subr.bf16.mxu1 %v1342_v39 }
  0x54   :  { %1176 = vmatprep.subr.bf16.mxu0 %v1335_v23 }
  0x56   :  { %1197 = vmatpush3.bf16.msra.mxu1 %v1344_v42 }
  0x57   :  { %1177 = vmatpush3.bf16.msra.mxu0 %v1336_v34  ;;  %1198 = vmatprep.subr.bf16.mxu1 %v1346_v44 }
  0x58   :  { %1178 = vmatprep.subr.bf16.mxu0 %v1337_v35 }
  0x5a   :  { %1199 = vmatpush3.bf16.msra.mxu1 %v1348_v46 }
  0x5b   :  { %1179 = vmatpush3.bf16.msra.mxu0 %v1339_v38  ;;  %1200 = vmatprep.subr.bf16.mxu1 %v1350_v48  ;;  %v10_v38 = vstv %s1755_s4 }
  0x5c   :  { %1180 = vmatprep.subr.bf16.mxu0 %v1341_v40  ;;  %11 = vst [vmem:[#allocation2] sm:$0x1] %v10_v38 }
  0x5e   :  { %1201 = vmatpush3.bf16.msra.mxu1 %v1352_v50 }
  0x5f   :  { %1181 = vmatpush3.bf16.msra.mxu0 %v1343_v41  ;;  %1202 = vmatprep.subr.bf16.mxu1 %v1354_v52 }
  0x60   :  { %1182 = vmatprep.subr.bf16.mxu0 %v1345_v43 }
  0x62   :  { %1203 = vmatpush3.bf16.msra.mxu1 %v1356_v54 }
  0x63   :  { %1183 = vmatpush3.bf16.msra.mxu0 %v1347_v45  ;;  %1204 = vmatprep.subr.bf16.mxu1 %v1357_v55  ;;  %v1138_v44 = vld [vmem:[#allocation2] ss:$0 sm:$0xff] }
  0x64   :  { %1184 = vmatprep.subr.bf16.mxu0 %v1349_v47 }
  0x66   :  { %1205 = vmatpush3.bf16.msra.mxu1 %v1358_v56 }
  0x67   :  { %1185 = vmatpush3.bf16.msra.mxu0 %v1351_v49  ;;  %1206 = vmatprep.subr.bf16.mxu1 %v1359_v57 }
  0x68   :  { %1186 = vmatprep.subr.bf16.mxu0 %v1353_v51 }
  0x6a   :  { %1207 = vmatpush3.bf16.msra.mxu1 %v1360_v58 }
  0x6b   :  { %1187 = vmatpush3.bf16.msra.mxu0 %v1355_v53  ;;  %1208 = vmatprep.subr.bf16.mxu1 %v1361_v59 }
  0x6e   :  { %1209 = vmatpush3.bf16.msra.mxu1 %v1362_v60 }
  0xd1   :  { %v608_v61 = vpop.f32.mrf.mxu1 }
  0xd3   :  { %v610_v62 = vpop.f32.mrf.mxu1 }
  0xd5   :  { %v612_v63 = vpop.f32.mrf.mxu1 }
  0xd7   :  { %v613_v0 = vpop.f32.mrf.mxu1 }
 0x102   :  { %v567_v8 = vpop.f32.mrf.mxu0 }
 0x103   :  { %v568_v9 = vadd.f32 %v567_v8, %v103_v5 }
 0x104   :  { %v569_v10 = vpop.f32.mrf.mxu0 }
 0x105   :  { %v609_v11 = vadd.f32 %v608_v61, %v568_v9  ;;  %v570_v12 = vadd.f32 %v569_v10, %v107_v6 }
 0x106   :  { %v571_v13 = vpop.f32.mrf.mxu0 }
 0x107   :  { %v611_v14 = vadd.f32 %v610_v62, %v570_v12  ;;  %v697_v15 = vmax.f32 %v609_v11, 0.0 }
 0x108   :  { %v572_v16 = vpop.f32.mrf.mxu0 }
 0x109   :  { %v698_v17 = vmax.f32 %v611_v14, 0.0  ;;  %v701_v21 = vpack.c.bf16 %v697_v15, %v697_v15 }
 0x10b   :  { %v702_v19 = vpack.c.bf16 %v698_v17, %v698_v17 }
 0x10d   :  { %1003 = vmatprep.mubr.bf16.mxu0 %v702_v19 }
 0x10e   :  { %v690_v24 = vpop.f32.mrf.mxu0  ;;  %1004 = vmatmul.mubr.bf16.vlgmr.msra.gmra.mxu0 %v701_v21 }
 0x110   :  { %v692_v27 = vpop.f32.mrf.mxu0 }
 0x111   :  { %v649_v26 = vpop.f32.mrf.mxu1 }
 0x112   :  { %v650_v29 = vadd.f32 %v649_v26, %v111_v22  ;;  %v694_v30 = vpop.f32.mrf.mxu0 }
 0x113   :  { %v651_v2 = vpop.f32.mrf.mxu1 }
 0x114   :  { %v691_v31 = vadd.f32 %v690_v24, %v650_v29  ;;  %v652_v32 = vadd.f32 %v651_v2, %v115_v25  ;;  %v695_v28 = vpop.f32.mrf.mxu0 }
 0x115   :  { %v653_v33 = vpop.f32.mrf.mxu1 }
 0x116   :  { %v693_v23 = vadd.f32 %v692_v27, %v652_v32  ;;  %v699_v34 = vmax.f32 %v691_v31, 0.0 }
 0x117   :  { %v654_v35 = vpop.f32.mrf.mxu1 }
 0x118   :  { %v700_v36 = vmax.f32 %v693_v23, 0.0  ;;  %v703_v37 = vpack.c.bf16 %v699_v34, %v699_v34 }
 0x11a   :  { %v704_v7 = vpack.c.bf16 %v700_v36, %v700_v36 }
 0x11c   :  { %1171 = vmatprep.mubr.msk.bf16.mxu1 %vm964_vm2, %v704_v7 }
 0x11d   :  { %1044 = vmatmul.mubr.bf16.vlgmr.msra.gmra.mxu1 %v703_v37 }
 0x1ce   :  { %v1188_v39 = vpop.f32.mrf.mxu0 }
 0x1d0   :  { %v1189_v40 = vpop.f32.mrf.mxu0 }
 0x1d1   :  { %v1190_v43 = vadd.f32 %v1189_v40, %v1188_v39 }
 0x1d2   :  { %v1191_v41 = vpop.f32.mrf.mxu0 }
 0x1d3   :  { %v1006_v47 = vadd.f32 %v1190_v43, %v1138_v44 }
 0x1d4   :  { %v1192_v42 = vpop.f32.mrf.mxu0 }
 0x1dd   :  { %v1210_v45 = vpop.f32.mrf.mxu1 }
 0x1df   :  { %v1211_v46 = vpop.f32.mrf.mxu1 }
 0x1e0   :  { %v1212_v48 = vadd.f32 %v1211_v46, %v1210_v45 }
 0x1e1   :  { %v1213_v49 = vpop.f32.mrf.mxu1 }
 0x1e2   :  { %v1046_v50 = vadd.f32 %v1212_v48, %v1006_v47 }
 0x1e3   :  { %v1214_v51 = vpop.f32.mrf.mxu1 }
 0x1e4   :  { %1052 = vst.msk [vmem:[%s1756_s5] sm:$0x3] %vm1051_vm3, %v1046_v50 }

</bundles_post_ra>
